<compile_context>
chip_gen: v6e
topology: v6e:2x2x1
jax: 0.10.0
libtpu: 0.0.40
codegen_flags: <defaults>
</compile_context>

<pallas_src>
import functools
import math

import jax
import jax.numpy as jnp
from jax.experimental import pallas as pl
from jax.experimental.pallas import tpu as pltpu

NUM_HEADS = 4      # MambaAttnBlock uses Attention(dim, num_heads=4)
LN_EPS = 1e-5
VMEM_LIMIT = 48 * 1024 * 1024   # safe on v5e/v6e (128 MiB) and v7x (64 MiB per TC)


# ----------------------------------------------------------------------------
# in-kernel helpers (pure jnp, traced inside the Pallas kernels)
# ----------------------------------------------------------------------------
def _layer_norm(x, g, b):
    mu = jnp.mean(x, axis=-1, keepdims=True)
    xc = x - mu
    var = jnp.mean(xc * xc, axis=-1, keepdims=True)
    return xc * jax.lax.rsqrt(var + LN_EPS) * g + b


def _softplus(v):
    # numerically-stable softplus in f32 (exp/log only -> EUP friendly)
    return jnp.maximum(v, 0.0) + jnp.log(1.0 + jnp.exp(-jnp.abs(v)))


def _mlp_tail(y, g2, b2, w1, b1, w2, b2m):
    # y + Mlp(LayerNorm2(y))        (gamma_2 == 1, drop_path == identity)
    h = _layer_norm(y, g2, b2)
    h = jnp.dot(h.astype(jnp.bfloat16), w1,
                preferred_element_type=jnp.float32) + b1
    # TODO(synk): PyTorch nn.GELU defaults to exact erf; tanh approximation is
    # used here for a TPU-safe (EUP tanh) lowering.
    h = jax.nn.gelu(h, approximate=True)
    out = jnp.dot(h.astype(jnp.bfloat16), w2,
                  preferred_element_type=jnp.float32) + b2m
    return y + out


def _dwconv3_silu(v, w):
    # depthwise conv1d, kernel 3, 'same' zero padding, no bias (the reference
    # builds Conv1d with bias=conv_bias // 2 == 0), followed by SiLU.
    # v: (bb, L, D), w: (3, D)
    L = v.shape[1]
    zrow = jnp.zeros((v.shape[0], 1, v.shape[2]), v.dtype)
    vm1 = jnp.concatenate([zrow, v[:, :L - 1, :]], axis=1)     # v[l-1]
    vp1 = jnp.concatenate([v[:, 1:, :], zrow], axis=1)         # v[l+1]
    y = vm1 * w[0:1, :] + v * w[1:2, :] + vp1 * w[2:3, :]
    return y * jax.nn.sigmoid(y)


# ----------------------------------------------------------------------------
# Pallas kernels
# ----------------------------------------------------------------------------
def _mamba_block_kernel(x_ref, g1_ref, b1_ref, w_in_ref, wcx_ref, wcz_ref,
                        w_xp_ref, w_dt_ref, b_dt_ref, A_ref, Dp_ref,
                        w_oy_ref, w_oz_ref,
                        g2_ref, b2_ref, w1_ref, mb1_ref, w2_ref, mb2_ref,
                        o_ref,
                        dlt_scr, du_scr, b_scr, c_scr, y_scr):
    # Full MambaAttnBlock (mamba variant) for a block of bb batch elements:
    #   y  = x + mixer(LayerNorm1(x))
    #   out = y + Mlp(LayerNorm2(y))     (gamma_1 == gamma_2 == 1, no drop_path)
    bb, L, D = x_ref.shape
    n = A_ref.shape[0]
    r = w_dt_ref.shape[0]
    M = bb * L

    x3 = x_ref[...]                                            # (bb, L, D) f32
    x2 = x3.reshape(M, D)
    h = _layer_norm(x2, g1_ref[...], b1_ref[...])              # norm1

    # in_proj (bf16 operands, f32 accumulation) then chunk into x / z halves
    xz = jnp.dot(h.astype(jnp.bfloat16), w_in_ref[...],
                 preferred_element_type=jnp.float32)           # (M, 2D)
    xh = xz[:, :D].reshape(bb, L, D)
    zh = xz[:, D:].reshape(bb, L, D)

    xc3 = _dwconv3_silu(xh, wcx_ref[...])                      # (bb, L, D)
    zc3 = _dwconv3_silu(zh, wcz_ref[...])
    xc = xc3.reshape(M, D)
    zc = zc3.reshape(M, D)

    # x_proj -> (dt_r | B | C) and dt_proj (+ bias)
    x_dbl = jnp.dot(xc.astype(jnp.bfloat16), w_xp_ref[...],
                    preferred_element_type=jnp.float32)        # (M, r + 2n)
    dt = jnp.dot(x_dbl[:, :r].astype(jnp.bfloat16), w_dt_ref[...],
                 preferred_element_type=jnp.float32) + b_dt_ref[...]
    # NOTE: the reference applies dt_proj's bias in the Linear *and* passes it
    # again as delta_bias to selective_scan_fn, so it is added twice on purpose.
    delta = _softplus(dt + b_dt_ref[...])                      # (M, D)

    dlt_scr[...] = delta.reshape(bb, L, D)
    du_scr[...] = (delta * xc).reshape(bb, L, D)               # delta * u
    b_scr[...] = x_dbl[:, r:r + n].reshape(bb, L, n)
    c_scr[...] = x_dbl[:, r + n:].reshape(bb, L, n)

    A2 = A_ref[...]                                            # (n, D), negative

    # Chunked selective scan: Tc timesteps / iteration on (bb, Tc, n, D) tiles.
    # Within a chunk the recurrence h <- dA*h + dB*u is composed with a
    # Hillis-Steele doubling scan (log2(Tc) steps of dense vreg work); the
    # serial chain is only across chunks.  dA / dBu are built per chunk with
    # single broadcasts, so no (L, n, D) scratch is ever materialized.
    Tc = 8 if L % 8 == 0 else (4 if L % 4 == 0 else (2 if L % 2 == 0 else 1))
    nchunks = L // Tc
    shape4 = (bb, Tc, n, D)

    def chunk_body(lc, hcar):                                  # hcar: (bb, n, D)
        off = lc * Tc
        if Tc == 8:
            off = pl.multiple_of(off, 8)
        d_ch = dlt_scr[:, pl.ds(off, Tc), :]                   # (bb, Tc, D)
        u_ch = du_scr[:, pl.ds(off, Tc), :]
        b_ch = b_scr[:, pl.ds(off, Tc), :]                     # (bb, Tc, n)
        c_ch = c_scr[:, pl.ds(off, Tc), :]

        d_bc = jax.lax.broadcast_in_dim(d_ch, shape4, (0, 1, 3))
        u_bc = jax.lax.broadcast_in_dim(u_ch, shape4, (0, 1, 3))
        b_bc = jax.lax.broadcast_in_dim(b_ch, shape4, (0, 1, 2))
        c_bc = jax.lax.broadcast_in_dim(c_ch, shape4, (0, 1, 2))
        a_bc = jax.lax.broadcast_in_dim(A2, shape4, (2, 3))

        a = jnp.exp(d_bc * a_bc)                               # dA  (bb,Tc,n,D)
        bu = u_bc * b_bc                                       # dB*u

        s = 1
        while s < Tc:                                          # doubling steps
            a_prev = jnp.concatenate(
                [jnp.ones((bb, s, n, D), jnp.float32), a[:, :Tc - s]], axis=1)
            bu_prev = jnp.concatenate(
                [jnp.zeros((bb, s, n, D), jnp.float32), bu[:, :Tc - s]], axis=1)
            bu = bu + a * bu_prev
            a = a * a_prev
            s *= 2

        hloc = a * jax.lax.broadcast_in_dim(hcar, shape4, (0, 2, 3)) + bu
        # y[b,t,:] = sum_j C[b,t,j] * h[b,t,j,:]  (broadcast mul + sublane sum)
        y_ch = jnp.sum(c_bc * hloc, axis=2)                    # (bb, Tc, D)
        y_scr[:, pl.ds(off, Tc), :] = y_ch
        return hloc[:, Tc - 1]                                 # new carry

    jax.lax.fori_loop(0, nchunks, chunk_body,
                      jnp.zeros((bb, n, D), jnp.float32))

    y = y_scr[...].reshape(M, D) + xc * Dp_ref[...]            # + u * D skip
    # out_proj over concat([y, z]) as two half matmuls (no in-kernel concat)
    out = (jnp.dot(y.astype(jnp.bfloat16), w_oy_ref[...],
                   preferred_element_type=jnp.float32)
           + jnp.dot(zc.astype(jnp.bfloat16), w_oz_ref[...],
                     preferred_element_type=jnp.float32))
    res = x2 + out                                             # residual (gamma_1 == 1)
    res = _mlp_tail(res, g2_ref[...], b2_ref[...], w1_ref[...], mb1_ref[...],
                    w2_ref[...], mb2_ref[...])                 # fused LN2 -> MLP -> +res
    o_ref[...] = res.reshape(bb, L, D)


def _win_attn_kernel(x_ref, wqkv_ref, wp_ref, bp_ref,
                     g2_ref, b2_ref, w1_ref, mb1_ref, w2_ref, mb2_ref,
                     o_ref, *, scale, num_heads):
    # A block of sb window-row stripes: fused qkv projection + per-window
    # softmax attention + fused output projection + residual + LN2/MLP tail,
    # written straight back into the (B, N, C) token layout.
    # NOTE: the reference's non-temporal attention path does NOT apply norm1
    # and uses qkv_bias=False.
    sb, ws_i, nww, ws_j, C = x_ref.shape
    T = ws_i * ws_j
    nw = sb * nww
    M = nw * T
    hd = C // num_heads

    x5 = x_ref[...]                                            # f32
    xrows = x5.reshape(M, C)                                   # token/stripe order
    # window-major copy in bf16 (half the transposed bytes of the old f32 path)
    xw = jnp.transpose(x5.astype(jnp.bfloat16),
                       (0, 2, 1, 3, 4)).reshape(M, C)
    qkv = jnp.dot(xw, wqkv_ref[...],
                  preferred_element_type=jnp.float32)          # (M, 3C) fused qkv

    heads = []
    for hh in range(num_heads):                                # static unroll
        q = qkv[:, hh * hd:(hh + 1) * hd].reshape(nw, T, hd).astype(jnp.bfloat16)
        k = qkv[:, C + hh * hd:C + (hh + 1) * hd].reshape(nw, T, hd).astype(jnp.bfloat16)
        v = qkv[:, 2 * C + hh * hd:2 * C + (hh + 1) * hd].reshape(nw, T, hd).astype(jnp.bfloat16)
        s = jnp.einsum('wtd,wsd->wts', q, k,
                       preferred_element_type=jnp.float32) * scale
        s = s - jnp.max(s, axis=-1, keepdims=True)
        p = jnp.exp(s)
        p = p * pl.reciprocal(jnp.sum(p, axis=-1, keepdims=True), approx=True)
        oh = jnp.einsum('wts,wsd->wtd', p.astype(jnp.bfloat16), v,
                        preferred_element_type=jnp.float32)
        heads.append(oh.reshape(M, hd))
    ow = jnp.concatenate(heads, axis=-1).astype(jnp.bfloat16)  # (M, C) window-major

    # permute head outputs back to token order (bf16), then fused (C, C) proj
    orows = jnp.transpose(ow.reshape(sb, nww, ws_i, ws_j, C),
                          (0, 2, 1, 3, 4)).reshape(M, C)
    attn = jnp.dot(orows, wp_ref[...],
                   preferred_element_type=jnp.float32) + bp_ref[...]
    y = xrows + attn                                           # residual (gamma_1 == 1)
    y = _mlp_tail(y, g2_ref[...], b2_ref[...], w1_ref[...], mb1_ref[...],
                  w2_ref[...], mb2_ref[...])                   # fused LN2 -> MLP -> +res
    o_ref[...] = y.reshape(sb, ws_i, nww, ws_j, C)


# ----------------------------------------------------------------------------
# pallas_call wrappers
# ----------------------------------------------------------------------------
def _pick_block(total, unit_rows, target_rows=256, max_rows=4096):
    """Largest/most useful divisor of `total` so each grid step sees
    roughly >= target_rows matmul rows without blowing up VMEM."""
    best = 1
    for d in range(1, total + 1):
        if total % d:
            continue
        if d * unit_rows <= max_rows:
            best = d
        if d * unit_rows >= target_rows:
            break
    return best


def _mamba_block(x, blk):
    B, L, D = x.shape
    m = blk['mamba']
    mlp = blk['mlp']
    n = m['A'].shape[0]
    r = m['w_dt'].shape[0]
    H4 = mlp['w1'].shape[1]
    bb = _pick_block(B, L)                       # batch elements per grid step
    bmap = lambda i: (i, 0, 0)
    wmap = lambda i: (0, 0)
    return pl.pallas_call(
        _mamba_block_kernel,
        grid=(B // bb,),
        in_specs=[pl.BlockSpec((bb, L, D), bmap),
                  pl.BlockSpec((1, D), wmap), pl.BlockSpec((1, D), wmap),
                  pl.BlockSpec((D, 2 * D), wmap),
                  pl.BlockSpec((3, D), wmap), pl.BlockSpec((3, D), wmap),
                  pl.BlockSpec((D, r + 2 * n), wmap),
                  pl.BlockSpec((r, D), wmap), pl.BlockSpec((1, D), wmap),
                  pl.BlockSpec((n, D), wmap), pl.BlockSpec((1, D), wmap),
                  pl.BlockSpec((D, D), wmap), pl.BlockSpec((D, D), wmap),
                  pl.BlockSpec((1, D), wmap), pl.BlockSpec((1, D), wmap),
                  pl.BlockSpec((D, H4), wmap), pl.BlockSpec((1, H4), wmap),
                  pl.BlockSpec((H4, D), wmap), pl.BlockSpec((1, D), wmap)],
        out_specs=pl.BlockSpec((bb, L, D), bmap),
        out_shape=jax.ShapeDtypeStruct((B, L, D), jnp.float32),
        scratch_shapes=[pltpu.VMEM((bb, L, D), jnp.float32),   # delta
                        pltpu.VMEM((bb, L, D), jnp.float32),   # delta * u
                        pltpu.VMEM((bb, L, n), jnp.float32),   # B
                        pltpu.VMEM((bb, L, n), jnp.float32),   # C
                        pltpu.VMEM((bb, L, D), jnp.float32)],  # scan output y
        compiler_params=pltpu.CompilerParams(
            dimension_semantics=("parallel",),
            vmem_limit_bytes=VMEM_LIMIT),
    )(x, blk['ln1_g'], blk['ln1_b'], m['w_in'], m['conv_x'], m['conv_z'],
      m['w_xp'], m['w_dt'], m['b_dt'], m['A'], m['Dp'], m['w_oy'], m['w_oz'],
      blk['ln2_g'], blk['ln2_b'], mlp['w1'], mlp['b1'], mlp['w2'], mlp['b2'])


def _attn_block(x, blk, window_size):
    B, N, C = x.shape
    Hh = int(round(N ** 0.5))
    ws = window_size
    nwh, nww = Hh // ws, Hh // ws
    hd = C // NUM_HEADS
    mlp = blk['mlp']
    H4 = mlp['w1'].shape[1]
    nstripes = B * nwh
    stripe_rows = ws * nww * ws
    sb = _pick_block(nstripes, stripe_rows)      # stripes per grid step
    # free (metadata-only) reshape: (B, N, C) -> (B*H/ws, ws, W/ws, ws, C)
    x5 = x.reshape(nstripes, ws, nww, ws, C)
    xmap = lambda i: (i, 0, 0, 0, 0)
    wmap = lambda i: (0, 0)
    y5 = pl.pallas_call(
        functools.partial(_win_attn_kernel, scale=hd ** -0.5,
                          num_heads=NUM_HEADS),
        grid=(nstripes // sb,),
        in_specs=[pl.BlockSpec((sb, ws, nww, ws, C), xmap),
                  pl.BlockSpec((C, 3 * C), wmap),
                  pl.BlockSpec((C, C), wmap),
                  pl.BlockSpec((1, C), wmap),
                  pl.BlockSpec((1, C), wmap), pl.BlockSpec((1, C), wmap),
                  pl.BlockSpec((C, H4), wmap), pl.BlockSpec((1, H4), wmap),
                  pl.BlockSpec((H4, C), wmap), pl.BlockSpec((1, C), wmap)],
        out_specs=pl.BlockSpec((sb, ws, nww, ws, C), xmap),
        out_shape=jax.ShapeDtypeStruct(x5.shape, jnp.float32),
        compiler_params=pltpu.CompilerParams(
            dimension_semantics=("parallel",),
            vmem_limit_bytes=VMEM_LIMIT),
    )(x5, blk['wqkv'], blk['wp'], blk['proj_b'],
      blk['ln2_g'], blk['ln2_b'], mlp['w1'], mlp['b1'], mlp['w2'], mlp['b2'])
    return y5.reshape(B, N, C)


# ----------------------------------------------------------------------------
# Module forward
# ----------------------------------------------------------------------------
def stage_block(x, blocks, window_size):
    for blk in blocks:
        if blk['kind'] == 'mamba':
            x = _mamba_block(x, blk)
        else:
            x = _attn_block(x, blk, window_size)
    return x


# ----------------------------------------------------------------------------
# Deterministic synthetic parameters, stored in kernel-ready layouts
# (pre-transposed, matmul weights in bf16) -- shapes follow the PyTorch __init__.
# ----------------------------------------------------------------------------
def init_params(key, num_layers, dim, d_state=16, d_conv=3, expand=2):
    d_inner = expand * dim
    dh = d_inner // 2                                        # == dim for expand=2
    dt_rank = math.ceil(dim / 16)
    ks = iter(jax.random.split(key, 256))

    def nrm(shape, scale=0.02):
        return scale * jax.random.normal(next(ks), shape, dtype=jnp.float32)

    def mlp_p():
        return dict(w1=jnp.transpose(nrm((4 * dim, dim))).astype(jnp.bfloat16),
                    b1=jnp.zeros((1, 4 * dim), jnp.float32),
                    w2=jnp.transpose(nrm((dim, 4 * dim))).astype(jnp.bfloat16),
                    b2=jnp.zeros((1, dim), jnp.float32))

    blocks = []
    for _ in range(num_layers):                              # Mamba blocks
        dt_init_std = dt_rank ** -0.5
        dt = jnp.exp(jax.random.uniform(next(ks), (dh,), dtype=jnp.float32)
                     * (math.log(0.1) - math.log(0.001)) + math.log(0.001))
        dt = jnp.maximum(dt, 1e-4)
        inv_dt = dt + jnp.log(-jnp.expm1(-dt))
        A_log = jnp.broadcast_to(
            jnp.log(jnp.arange(1, d_state + 1, dtype=jnp.float32)), (dh, d_state))
        in_proj_w = nrm((d_inner, dim))
        x_proj_w = nrm((dt_rank + 2 * d_state, dh))
        dt_proj_w = jax.random.uniform(next(ks), (dh, dt_rank), jnp.float32,
                                       minval=-dt_init_std, maxval=dt_init_std)
        out_t = jnp.transpose(nrm((dim, d_inner)))           # (d_inner, dim)
        mamba = dict(
            w_in=jnp.transpose(in_proj_w).astype(jnp.bfloat16),          # (dim, 2*dim)
            conv_x=jnp.transpose(nrm((dh, 1, d_conv), 0.3)[:, 0, :]),    # (3, dh), no bias
            conv_z=jnp.transpose(nrm((dh, 1, d_conv), 0.3)[:, 0, :]),
            w_xp=jnp.transpose(x_proj_w).astype(jnp.bfloat16),           # (dh, r+2n)
            w_dt=jnp.transpose(dt_proj_w).astype(jnp.bfloat16),          # (r, dh)
            b_dt=inv_dt[None, :].astype(jnp.float32),
            A=jnp.transpose(-jnp.exp(A_log)),                            # (n, dh)
            Dp=jnp.ones((1, dh), jnp.float32),
            w_oy=out_t[:dh, :].astype(jnp.bfloat16),                     # (dh, dim)
            w_oz=out_t[dh:, :].astype(jnp.bfloat16),
        )
        blocks.append(dict(kind='mamba',
                           ln1_g=jnp.ones((1, dim), jnp.float32),
                           ln1_b=jnp.zeros((1, dim), jnp.float32),
                           ln2_g=jnp.ones((1, dim), jnp.float32),
                           ln2_b=jnp.zeros((1, dim), jnp.float32),
                           mamba=mamba, mlp=mlp_p()))

    for _ in range(num_layers):                              # Attention blocks
        qkv_w = nrm((3 * dim, dim))                          # no qkv bias
        proj_w = nrm((dim, dim))
        blocks.append(dict(kind='attn',
                           ln2_g=jnp.ones((1, dim), jnp.float32),
                           ln2_b=jnp.zeros((1, dim), jnp.float32),
                           wqkv=jnp.transpose(qkv_w).astype(jnp.bfloat16),  # (C, 3C)
                           wp=jnp.transpose(proj_w).astype(jnp.bfloat16),   # (C, C)
                           proj_b=jnp.zeros((1, dim), jnp.float32),
                           mlp=mlp_p()))
    return blocks


# ----------------------------------------------------------------------------
if __name__ == "__main__":
    key = jax.random.PRNGKey(0)
    pkey, xkey = jax.random.split(key)

    num_layers, dim, window_size = 1, 32, 4
    B, H, W = 2, 8, 8
    N = H * W                                                # x: (B, L=N, D=dim)

    params = init_params(pkey, num_layers, dim)
    x = jax.random.normal(xkey, (B, N, dim), dtype=jnp.float32)

    fwd = jax.jit(lambda inp: stage_block(inp, params, window_size))
    y = jax.block_until_ready(fwd(x))

    assert y.shape == (B, N, dim) and y.dtype == jnp.float32
    assert bool(jnp.all(jnp.isfinite(y)))
    print("KERNEL_OK")
</pallas_src>

<mosaic_0001>
module attributes {stable_mosaic.version = 11 : i64} {
  func.func @_mamba_block_kernel(%arg0: i32, %arg1: memref<2x64x32xf32, #tpu.memory_space<vmem>>, %arg2: memref<1x32xf32, #tpu.memory_space<vmem>>, %arg3: memref<1x32xf32, #tpu.memory_space<vmem>>, %arg4: memref<32x64xbf16, #tpu.memory_space<vmem>>, %arg5: memref<3x32xf32, #tpu.memory_space<vmem>>, %arg6: memref<3x32xf32, #tpu.memory_space<vmem>>, %arg7: memref<32x34xbf16, #tpu.memory_space<vmem>>, %arg8: memref<2x32xbf16, #tpu.memory_space<vmem>>, %arg9: memref<1x32xf32, #tpu.memory_space<vmem>>, %arg10: memref<16x32xf32, #tpu.memory_space<vmem>>, %arg11: memref<1x32xf32, #tpu.memory_space<vmem>>, %arg12: memref<32x32xbf16, #tpu.memory_space<vmem>>, %arg13: memref<32x32xbf16, #tpu.memory_space<vmem>>, %arg14: memref<1x32xf32, #tpu.memory_space<vmem>>, %arg15: memref<1x32xf32, #tpu.memory_space<vmem>>, %arg16: memref<32x128xbf16, #tpu.memory_space<vmem>>, %arg17: memref<1x128xf32, #tpu.memory_space<vmem>>, %arg18: memref<128x32xbf16, #tpu.memory_space<vmem>>, %arg19: memref<1x32xf32, #tpu.memory_space<vmem>>, %arg20: memref<2x64x32xf32, #tpu.memory_space<vmem>>, %arg21: memref<2x64x32xf32, #tpu.memory_space<vmem>>, %arg22: memref<2x64x32xf32, #tpu.memory_space<vmem>>, %arg23: memref<2x64x16xf32, #tpu.memory_space<vmem>>, %arg24: memref<2x64x16xf32, #tpu.memory_space<vmem>>, %arg25: memref<2x64x32xf32, #tpu.memory_space<vmem>>) attributes {dimension_semantics = [#tpu.dimension_semantics<parallel>], iteration_bounds = array<i64: 1>, scalar_prefetch = 0 : i64, scratch_operands = 5 : i64, tpu.core_type = #tpu.core_type<tc>, window_params = [{transform_indices = @transform_0, window_bounds = array<i64: 2, 64, 32>}, {pipeline_mode = #tpu.pipeline_mode<synchronous>, transform_indices = @transform_1, window_bounds = array<i64: 1, 32>}, {pipeline_mode = #tpu.pipeline_mode<synchronous>, transform_indices = @transform_2, window_bounds = array<i64: 1, 32>}, {pipeline_mode = #tpu.pipeline_mode<synchronous>, transform_indices = @transform_3, window_bounds = array<i64: 32, 64>}, {pipeline_mode = #tpu.pipeline_mode<synchronous>, transform_indices = @transform_4, window_bounds = array<i64: 3, 32>}, {pipeline_mode = #tpu.pipeline_mode<synchronous>, transform_indices = @transform_5, window_bounds = array<i64: 3, 32>}, {pipeline_mode = #tpu.pipeline_mode<synchronous>, transform_indices = @transform_6, window_bounds = array<i64: 32, 34>}, {pipeline_mode = #tpu.pipeline_mode<synchronous>, transform_indices = @transform_7, window_bounds = array<i64: 2, 32>}, {pipeline_mode = #tpu.pipeline_mode<synchronous>, transform_indices = @transform_8, window_bounds = array<i64: 1, 32>}, {pipeline_mode = #tpu.pipeline_mode<synchronous>, transform_indices = @transform_9, window_bounds = array<i64: 16, 32>}, {pipeline_mode = #tpu.pipeline_mode<synchronous>, transform_indices = @transform_10, window_bounds = array<i64: 1, 32>}, {pipeline_mode = #tpu.pipeline_mode<synchronous>, transform_indices = @transform_11, window_bounds = array<i64: 32, 32>}, {pipeline_mode = #tpu.pipeline_mode<synchronous>, transform_indices = @transform_12, window_bounds = array<i64: 32, 32>}, {pipeline_mode = #tpu.pipeline_mode<synchronous>, transform_indices = @transform_13, window_bounds = array<i64: 1, 32>}, {pipeline_mode = #tpu.pipeline_mode<synchronous>, transform_indices = @transform_14, window_bounds = array<i64: 1, 32>}, {pipeline_mode = #tpu.pipeline_mode<synchronous>, transform_indices = @transform_15, window_bounds = array<i64: 32, 128>}, {pipeline_mode = #tpu.pipeline_mode<synchronous>, transform_indices = @transform_16, window_bounds = array<i64: 1, 128>}, {pipeline_mode = #tpu.pipeline_mode<synchronous>, transform_indices = @transform_17, window_bounds = array<i64: 128, 32>}, {pipeline_mode = #tpu.pipeline_mode<synchronous>, transform_indices = @transform_18, window_bounds = array<i64: 1, 32>}, {transform_indices = @transform_19, window_bounds = array<i64: 2, 64, 32>}]} {
    %c0 = arith.constant 0 : index
    %c0_0 = arith.constant 0 : index
    %c0_1 = arith.constant 0 : index
    %0 = vector.load %arg1[%c0, %c0_0, %c0_1] : memref<2x64x32xf32, #tpu.memory_space<vmem>>, vector<2x64x32xf32>
    %1 = vector.shape_cast %0 : vector<2x64x32xf32> to vector<128x32xf32>
    %c0_2 = arith.constant 0 : index
    %c0_3 = arith.constant 0 : index
    %2 = vector.load %arg2[%c0_2, %c0_3] : memref<1x32xf32, #tpu.memory_space<vmem>>, vector<1x32xf32>
    %c0_4 = arith.constant 0 : index
    %c0_5 = arith.constant 0 : index
    %3 = vector.load %arg3[%c0_4, %c0_5] : memref<1x32xf32, #tpu.memory_space<vmem>>, vector<1x32xf32>
    %cst = arith.constant dense<0.000000e+00> : vector<128xf32>
    %4 = vector.multi_reduction <add>, %1, %cst [1] : vector<128x32xf32> to vector<128xf32>
    %5 = vector.shape_cast %4 : vector<128xf32> to vector<128x1xf32>
    %cst_6 = arith.constant 3.200000e+01 : f32
    %6 = vector.broadcast %cst_6 : f32 to vector<128x1xf32>
    %7 = arith.divf %5, %6 : vector<128x1xf32>
    %8 = vector.broadcast %7 : vector<128x1xf32> to vector<128x32xf32>
    %9 = arith.subf %1, %8 : vector<128x32xf32>
    %10 = arith.mulf %9, %9 : vector<128x32xf32>
    %cst_7 = arith.constant dense<0.000000e+00> : vector<128xf32>
    %11 = vector.multi_reduction <add>, %10, %cst_7 [1] : vector<128x32xf32> to vector<128xf32>
    %12 = vector.shape_cast %11 : vector<128xf32> to vector<128x1xf32>
    %cst_8 = arith.constant 3.200000e+01 : f32
    %13 = vector.broadcast %cst_8 : f32 to vector<128x1xf32>
    %14 = arith.divf %12, %13 : vector<128x1xf32>
    %cst_9 = arith.constant 9.99999974E-6 : f32
    %15 = vector.broadcast %cst_9 : f32 to vector<128x1xf32>
    %16 = arith.addf %14, %15 : vector<128x1xf32>
    %17 = math.rsqrt %16 : vector<128x1xf32>
    %18 = vector.broadcast %17 : vector<128x1xf32> to vector<128x32xf32>
    %19 = arith.mulf %9, %18 : vector<128x32xf32>
    %20 = vector.broadcast %2 : vector<1x32xf32> to vector<128x32xf32>
    %21 = arith.mulf %19, %20 : vector<128x32xf32>
    %22 = vector.broadcast %3 : vector<1x32xf32> to vector<128x32xf32>
    %23 = arith.addf %21, %22 : vector<128x32xf32>
    %24 = arith.truncf %23 : vector<128x32xf32> to vector<128x32xbf16>
    %c0_10 = arith.constant 0 : index
    %c0_11 = arith.constant 0 : index
    %25 = vector.load %arg4[%c0_10, %c0_11] : memref<32x64xbf16, #tpu.memory_space<vmem>>, vector<32x64xbf16>
    %cst_12 = arith.constant dense<0.000000e+00> : vector<128x64xf32>
    %26 = tpu.matmul %24, %25, %cst_12 {dimension_numbers = #tpu.dot_dimension_numbers<[1], [0], [0], [1], [0, 0, 1, 1], [], []>} : vector<128x32xbf16>, vector<32x64xbf16>, vector<128x64xf32> -> vector<128x64xf32>
    %27 = vector.extract_strided_slice %26 {offsets = [0, 0], sizes = [128, 32], strides = [1, 1]} : vector<128x64xf32> to vector<128x32xf32>
    %28 = vector.shape_cast %27 : vector<128x32xf32> to vector<2x64x32xf32>
    %29 = vector.extract_strided_slice %26 {offsets = [0, 32], sizes = [128, 32], strides = [1, 1]} : vector<128x64xf32> to vector<128x32xf32>
    %30 = vector.shape_cast %29 : vector<128x32xf32> to vector<2x64x32xf32>
    %c0_13 = arith.constant 0 : index
    %c0_14 = arith.constant 0 : index
    %31 = vector.load %arg5[%c0_13, %c0_14] : memref<3x32xf32, #tpu.memory_space<vmem>>, vector<3x32xf32>
    %cst_15 = arith.constant 0.000000e+00 : f32
    %32 = vector.broadcast %cst_15 : f32 to vector<2x1x32xf32>
    %33 = vector.extract_strided_slice %28 {offsets = [0, 0, 0], sizes = [2, 63, 32], strides = [1, 1, 1]} : vector<2x64x32xf32> to vector<2x63x32xf32>
    %34 = tpu.concatenate %32, %33 in 1 : vector<2x1x32xf32>, vector<2x63x32xf32> -> vector<2x64x32xf32>
    %35 = vector.extract_strided_slice %28 {offsets = [0, 1, 0], sizes = [2, 63, 32], strides = [1, 1, 1]} : vector<2x64x32xf32> to vector<2x63x32xf32>
    %36 = tpu.concatenate %35, %32 in 1 : vector<2x63x32xf32>, vector<2x1x32xf32> -> vector<2x64x32xf32>
    %37 = vector.extract_strided_slice %31 {offsets = [0, 0], sizes = [1, 32], strides = [1, 1]} : vector<3x32xf32> to vector<1x32xf32>
    %38 = vector.shape_cast %37 : vector<1x32xf32> to vector<1x1x32xf32>
    %39 = vector.broadcast %38 : vector<1x1x32xf32> to vector<2x64x32xf32>
    %40 = arith.mulf %34, %39 : vector<2x64x32xf32>
    %41 = vector.extract_strided_slice %31 {offsets = [1, 0], sizes = [1, 32], strides = [1, 1]} : vector<3x32xf32> to vector<1x32xf32>
    %42 = vector.shape_cast %41 : vector<1x32xf32> to vector<1x1x32xf32>
    %43 = vector.broadcast %42 : vector<1x1x32xf32> to vector<2x64x32xf32>
    %44 = arith.mulf %28, %43 : vector<2x64x32xf32>
    %45 = arith.addf %40, %44 : vector<2x64x32xf32>
    %46 = vector.extract_strided_slice %31 {offsets = [2, 0], sizes = [1, 32], strides = [1, 1]} : vector<3x32xf32> to vector<1x32xf32>
    %47 = vector.shape_cast %46 : vector<1x32xf32> to vector<1x1x32xf32>
    %48 = vector.broadcast %47 : vector<1x1x32xf32> to vector<2x64x32xf32>
    %49 = arith.mulf %36, %48 : vector<2x64x32xf32>
    %50 = arith.addf %45, %49 : vector<2x64x32xf32>
    %51 = arith.negf %50 : vector<2x64x32xf32>
    %52 = math.exp %51 : vector<2x64x32xf32>
    %cst_16 = arith.constant 1.000000e+00 : f32
    %53 = vector.broadcast %cst_16 : f32 to vector<2x64x32xf32>
    %54 = arith.addf %53, %52 : vector<2x64x32xf32>
    %55 = arith.divf %53, %54 : vector<2x64x32xf32>
    %56 = arith.mulf %50, %55 : vector<2x64x32xf32>
    %c0_17 = arith.constant 0 : index
    %c0_18 = arith.constant 0 : index
    %57 = vector.load %arg6[%c0_17, %c0_18] : memref<3x32xf32, #tpu.memory_space<vmem>>, vector<3x32xf32>
    %cst_19 = arith.constant 0.000000e+00 : f32
    %58 = vector.broadcast %cst_19 : f32 to vector<2x1x32xf32>
    %59 = vector.extract_strided_slice %30 {offsets = [0, 0, 0], sizes = [2, 63, 32], strides = [1, 1, 1]} : vector<2x64x32xf32> to vector<2x63x32xf32>
    %60 = tpu.concatenate %58, %59 in 1 : vector<2x1x32xf32>, vector<2x63x32xf32> -> vector<2x64x32xf32>
    %61 = vector.extract_strided_slice %30 {offsets = [0, 1, 0], sizes = [2, 63, 32], strides = [1, 1, 1]} : vector<2x64x32xf32> to vector<2x63x32xf32>
    %62 = tpu.concatenate %61, %58 in 1 : vector<2x63x32xf32>, vector<2x1x32xf32> -> vector<2x64x32xf32>
    %63 = vector.extract_strided_slice %57 {offsets = [0, 0], sizes = [1, 32], strides = [1, 1]} : vector<3x32xf32> to vector<1x32xf32>
    %64 = vector.shape_cast %63 : vector<1x32xf32> to vector<1x1x32xf32>
    %65 = vector.broadcast %64 : vector<1x1x32xf32> to vector<2x64x32xf32>
    %66 = arith.mulf %60, %65 : vector<2x64x32xf32>
    %67 = vector.extract_strided_slice %57 {offsets = [1, 0], sizes = [1, 32], strides = [1, 1]} : vector<3x32xf32> to vector<1x32xf32>
    %68 = vector.shape_cast %67 : vector<1x32xf32> to vector<1x1x32xf32>
    %69 = vector.broadcast %68 : vector<1x1x32xf32> to vector<2x64x32xf32>
    %70 = arith.mulf %30, %69 : vector<2x64x32xf32>
    %71 = arith.addf %66, %70 : vector<2x64x32xf32>
    %72 = vector.extract_strided_slice %57 {offsets = [2, 0], sizes = [1, 32], strides = [1, 1]} : vector<3x32xf32> to vector<1x32xf32>
    %73 = vector.shape_cast %72 : vector<1x32xf32> to vector<1x1x32xf32>
    %74 = vector.broadcast %73 : vector<1x1x32xf32> to vector<2x64x32xf32>
    %75 = arith.mulf %62, %74 : vector<2x64x32xf32>
    %76 = arith.addf %71, %75 : vector<2x64x32xf32>
    %77 = arith.negf %76 : vector<2x64x32xf32>
    %78 = math.exp %77 : vector<2x64x32xf32>
    %cst_20 = arith.constant 1.000000e+00 : f32
    %79 = vector.broadcast %cst_20 : f32 to vector<2x64x32xf32>
    %80 = arith.addf %79, %78 : vector<2x64x32xf32>
    %81 = arith.divf %79, %80 : vector<2x64x32xf32>
    %82 = arith.mulf %76, %81 : vector<2x64x32xf32>
    %83 = vector.shape_cast %56 : vector<2x64x32xf32> to vector<128x32xf32>
    %84 = vector.shape_cast %82 : vector<2x64x32xf32> to vector<128x32xf32>
    %85 = arith.truncf %83 : vector<128x32xf32> to vector<128x32xbf16>
    %c0_21 = arith.constant 0 : index
    %c0_22 = arith.constant 0 : index
    %86 = vector.load %arg7[%c0_21, %c0_22] : memref<32x34xbf16, #tpu.memory_space<vmem>>, vector<32x34xbf16>
    %cst_23 = arith.constant dense<0.000000e+00> : vector<128x34xf32>
    %87 = tpu.matmul %85, %86, %cst_23 {dimension_numbers = #tpu.dot_dimension_numbers<[1], [0], [0], [1], [0, 0, 1, 1], [], []>} : vector<128x32xbf16>, vector<32x34xbf16>, vector<128x34xf32> -> vector<128x34xf32>
    %88 = vector.extract_strided_slice %87 {offsets = [0, 0], sizes = [128, 2], strides = [1, 1]} : vector<128x34xf32> to vector<128x2xf32>
    %89 = arith.truncf %88 : vector<128x2xf32> to vector<128x2xbf16>
    %c0_24 = arith.constant 0 : index
    %c0_25 = arith.constant 0 : index
    %90 = vector.load %arg8[%c0_24, %c0_25] : memref<2x32xbf16, #tpu.memory_space<vmem>>, vector<2x32xbf16>
    %cst_26 = arith.constant dense<0.000000e+00> : vector<128x32xf32>
    %91 = tpu.matmul %89, %90, %cst_26 {dimension_numbers = #tpu.dot_dimension_numbers<[1], [0], [0], [1], [0, 0, 1, 1], [], []>} : vector<128x2xbf16>, vector<2x32xbf16>, vector<128x32xf32> -> vector<128x32xf32>
    %c0_27 = arith.constant 0 : index
    %c0_28 = arith.constant 0 : index
    %92 = vector.load %arg9[%c0_27, %c0_28] : memref<1x32xf32, #tpu.memory_space<vmem>>, vector<1x32xf32>
    %93 = vector.broadcast %92 : vector<1x32xf32> to vector<128x32xf32>
    %94 = arith.addf %91, %93 : vector<128x32xf32>
    %c0_29 = arith.constant 0 : index
    %c0_30 = arith.constant 0 : index
    %95 = vector.load %arg9[%c0_29, %c0_30] : memref<1x32xf32, #tpu.memory_space<vmem>>, vector<1x32xf32>
    %96 = vector.broadcast %95 : vector<1x32xf32> to vector<128x32xf32>
    %97 = arith.addf %94, %96 : vector<128x32xf32>
    %cst_31 = arith.constant 0.000000e+00 : f32
    %98 = vector.broadcast %cst_31 : f32 to vector<128x32xf32>
    %99 = arith.maximumf %97, %98 : vector<128x32xf32>
    %100 = math.absf %97 : vector<128x32xf32>
    %cst_32 = arith.constant 0.000000e+00 : f32
    %101 = vector.broadcast %cst_32 : f32 to vector<128x32xf32>
    %102 = arith.subf %101, %100 : vector<128x32xf32>
    %103 = math.exp %102 : vector<128x32xf32>
    %cst_33 = arith.constant 1.000000e+00 : f32
    %104 = vector.broadcast %cst_33 : f32 to vector<128x32xf32>
    %105 = arith.addf %104, %103 : vector<128x32xf32>
    %106 = math.log %105 : vector<128x32xf32>
    %107 = arith.addf %99, %106 : vector<128x32xf32>
    %108 = vector.shape_cast %107 : vector<128x32xf32> to vector<2x64x32xf32>
    %c0_34 = arith.constant 0 : index
    %c0_35 = arith.constant 0 : index
    %c0_36 = arith.constant 0 : index
    %109 = vector.load %arg21[%c0_34, %c0_35, %c0_36] : memref<2x64x32xf32, #tpu.memory_space<vmem>>, vector<2x64x32xf32>
    tpu.vector_store %arg21[%c0_34, %c0_35, %c0_36], %108 {strides = array<i32>} : memref<2x64x32xf32, #tpu.memory_space<vmem>>, vector<2x64x32xf32>,
    %110 = arith.mulf %107, %83 : vector<128x32xf32>
    %111 = vector.shape_cast %110 : vector<128x32xf32> to vector<2x64x32xf32>
    %c0_37 = arith.constant 0 : index
    %c0_38 = arith.constant 0 : index
    %c0_39 = arith.constant 0 : index
    %112 = vector.load %arg22[%c0_37, %c0_38, %c0_39] : memref<2x64x32xf32, #tpu.memory_space<vmem>>, vector<2x64x32xf32>
    tpu.vector_store %arg22[%c0_37, %c0_38, %c0_39], %111 {strides = array<i32>} : memref<2x64x32xf32, #tpu.memory_space<vmem>>, vector<2x64x32xf32>,
    %113 = vector.extract_strided_slice %87 {offsets = [0, 2], sizes = [128, 16], strides = [1, 1]} : vector<128x34xf32> to vector<128x16xf32>
    %114 = vector.shape_cast %113 : vector<128x16xf32> to vector<2x64x16xf32>
    %c0_40 = arith.constant 0 : index
    %c0_41 = arith.constant 0 : index
    %c0_42 = arith.constant 0 : index
    %115 = vector.load %arg23[%c0_40, %c0_41, %c0_42] : memref<2x64x16xf32, #tpu.memory_space<vmem>>, vector<2x64x16xf32>
    tpu.vector_store %arg23[%c0_40, %c0_41, %c0_42], %114 {strides = array<i32>} : memref<2x64x16xf32, #tpu.memory_space<vmem>>, vector<2x64x16xf32>,
    %116 = vector.extract_strided_slice %87 {offsets = [0, 18], sizes = [128, 16], strides = [1, 1]} : vector<128x34xf32> to vector<128x16xf32>
    %117 = vector.shape_cast %116 : vector<128x16xf32> to vector<2x64x16xf32>
    %c0_43 = arith.constant 0 : index
    %c0_44 = arith.constant 0 : index
    %c0_45 = arith.constant 0 : index
    %118 = vector.load %arg24[%c0_43, %c0_44, %c0_45] : memref<2x64x16xf32, #tpu.memory_space<vmem>>, vector<2x64x16xf32>
    tpu.vector_store %arg24[%c0_43, %c0_44, %c0_45], %117 {strides = array<i32>} : memref<2x64x16xf32, #tpu.memory_space<vmem>>, vector<2x64x16xf32>,
    %c0_46 = arith.constant 0 : index
    %c0_47 = arith.constant 0 : index
    %119 = vector.load %arg10[%c0_46, %c0_47] : memref<16x32xf32, #tpu.memory_space<vmem>>, vector<16x32xf32>
    %cst_48 = arith.constant 0.000000e+00 : f32
    %120 = vector.broadcast %cst_48 : f32 to vector<2x16x32xf32>
    %c0_i32 = arith.constant 0 : i32
    %c8_i32 = arith.constant 8 : i32
    %121 = arith.addi %c0_i32, %c8_i32 : i32
    %c1_i32 = arith.constant 1 : i32
    %122 = scf.for %arg26 = %c0_i32 to %121 step %c1_i32 iter_args(%arg27 = %120) -> (vector<2x16x32xf32>)  : i32 {
      %c8_i32_87 = arith.constant 8 : i32
      %187 = arith.muli %arg26, %c8_i32_87 : i32
      %188 = tpu.assume_multiple %187, 8 : i32
      %c0_88 = arith.constant 0 : index
      %189 = arith.index_cast %188 : i32 to index
      %c0_89 = arith.constant 0 : index
      %190 = vector.load %arg21[%c0_88, %189, %c0_89] : memref<2x64x32xf32, #tpu.memory_space<vmem>>, vector<2x8x32xf32>
      %c0_90 = arith.constant 0 : index
      %191 = arith.index_cast %188 : i32 to index
      %c0_91 = arith.constant 0 : index
      %192 = vector.load %arg22[%c0_90, %191, %c0_91] : memref<2x64x32xf32, #tpu.memory_space<vmem>>, vector<2x8x32xf32>
      %c0_92 = arith.constant 0 : index
      %193 = arith.index_cast %188 : i32 to index
      %c0_93 = arith.constant 0 : index
      %194 = vector.load %arg23[%c0_92, %193, %c0_93] : memref<2x64x16xf32, #tpu.memory_space<vmem>>, vector<2x8x16xf32>
      %c0_94 = arith.constant 0 : index
      %195 = arith.index_cast %188 : i32 to index
      %c0_95 = arith.constant 0 : index
      %196 = vector.load %arg24[%c0_94, %195, %c0_95] : memref<2x64x16xf32, #tpu.memory_space<vmem>>, vector<2x8x16xf32>
      %197 = vector.shape_cast %190 : vector<2x8x32xf32> to vector<2x8x1x32xf32>
      %198 = vector.broadcast %197 : vector<2x8x1x32xf32> to vector<2x8x16x32xf32>
      %199 = vector.shape_cast %192 : vector<2x8x32xf32> to vector<2x8x1x32xf32>
      %200 = vector.broadcast %199 : vector<2x8x1x32xf32> to vector<2x8x16x32xf32>
      %201 = vector.shape_cast %194 : vector<2x8x16xf32> to vector<2x8x16x1xf32>
      %202 = vector.broadcast %201 : vector<2x8x16x1xf32> to vector<2x8x16x32xf32>
      %203 = vector.shape_cast %196 : vector<2x8x16xf32> to vector<2x8x16x1xf32>
      %204 = vector.broadcast %203 : vector<2x8x16x1xf32> to vector<2x8x16x32xf32>
      %205 = vector.shape_cast %119 : vector<16x32xf32> to vector<1x1x16x32xf32>
      %206 = vector.broadcast %205 : vector<1x1x16x32xf32> to vector<2x8x16x32xf32>
      %207 = arith.mulf %198, %206 : vector<2x8x16x32xf32>
      %208 = math.exp %207 : vector<2x8x16x32xf32>
      %209 = arith.mulf %200, %202 : vector<2x8x16x32xf32>
      %cst_96 = arith.constant 1.000000e+00 : f32
      %210 = vector.broadcast %cst_96 : f32 to vector<2x1x16x32xf32>
      %211 = vector.extract_strided_slice %208 {offsets = [0, 0, 0, 0], sizes = [2, 7, 16, 32], strides = [1, 1, 1, 1]} : vector<2x8x16x32xf32> to vector<2x7x16x32xf32>
      %212 = tpu.concatenate %210, %211 in 1 : vector<2x1x16x32xf32>, vector<2x7x16x32xf32> -> vector<2x8x16x32xf32>
      %cst_97 = arith.constant 0.000000e+00 : f32
      %213 = vector.broadcast %cst_97 : f32 to vector<2x1x16x32xf32>
      %214 = vector.extract_strided_slice %209 {offsets = [0, 0, 0, 0], sizes = [2, 7, 16, 32], strides = [1, 1, 1, 1]} : vector<2x8x16x32xf32> to vector<2x7x16x32xf32>
      %215 = tpu.concatenate %213, %214 in 1 : vector<2x1x16x32xf32>, vector<2x7x16x32xf32> -> vector<2x8x16x32xf32>
      %216 = arith.mulf %208, %215 : vector<2x8x16x32xf32>
      %217 = arith.addf %209, %216 : vector<2x8x16x32xf32>
      %218 = arith.mulf %208, %212 : vector<2x8x16x32xf32>
      %cst_98 = arith.constant 1.000000e+00 : f32
      %219 = vector.broadcast %cst_98 : f32 to vector<2x2x16x32xf32>
      %220 = vector.extract_strided_slice %218 {offsets = [0, 0, 0, 0], sizes = [2, 6, 16, 32], strides = [1, 1, 1, 1]} : vector<2x8x16x32xf32> to vector<2x6x16x32xf32>
      %221 = tpu.concatenate %219, %220 in 1 : vector<2x2x16x32xf32>, vector<2x6x16x32xf32> -> vector<2x8x16x32xf32>
      %cst_99 = arith.constant 0.000000e+00 : f32
      %222 = vector.broadcast %cst_99 : f32 to vector<2x2x16x32xf32>
      %223 = vector.extract_strided_slice %217 {offsets = [0, 0, 0, 0], sizes = [2, 6, 16, 32], strides = [1, 1, 1, 1]} : vector<2x8x16x32xf32> to vector<2x6x16x32xf32>
      %224 = tpu.concatenate %222, %223 in 1 : vector<2x2x16x32xf32>, vector<2x6x16x32xf32> -> vector<2x8x16x32xf32>
      %225 = arith.mulf %218, %224 : vector<2x8x16x32xf32>
      %226 = arith.addf %217, %225 : vector<2x8x16x32xf32>
      %227 = arith.mulf %218, %221 : vector<2x8x16x32xf32>
      %cst_100 = arith.constant 1.000000e+00 : f32
      %228 = vector.broadcast %cst_100 : f32 to vector<2x4x16x32xf32>
      %229 = vector.extract_strided_slice %227 {offsets = [0, 0, 0, 0], sizes = [2, 4, 16, 32], strides = [1, 1, 1, 1]} : vector<2x8x16x32xf32> to vector<2x4x16x32xf32>
      %230 = tpu.concatenate %228, %229 in 1 : vector<2x4x16x32xf32>, vector<2x4x16x32xf32> -> vector<2x8x16x32xf32>
      %cst_101 = arith.constant 0.000000e+00 : f32
      %231 = vector.broadcast %cst_101 : f32 to vector<2x4x16x32xf32>
      %232 = vector.extract_strided_slice %226 {offsets = [0, 0, 0, 0], sizes = [2, 4, 16, 32], strides = [1, 1, 1, 1]} : vector<2x8x16x32xf32> to vector<2x4x16x32xf32>
      %233 = tpu.concatenate %231, %232 in 1 : vector<2x4x16x32xf32>, vector<2x4x16x32xf32> -> vector<2x8x16x32xf32>
      %234 = arith.mulf %227, %233 : vector<2x8x16x32xf32>
      %235 = arith.addf %226, %234 : vector<2x8x16x32xf32>
      %236 = arith.mulf %227, %230 : vector<2x8x16x32xf32>
      %237 = vector.shape_cast %arg27 : vector<2x16x32xf32> to vector<2x1x16x32xf32>
      %238 = vector.broadcast %237 : vector<2x1x16x32xf32> to vector<2x8x16x32xf32>
      %239 = arith.mulf %236, %238 : vector<2x8x16x32xf32>
      %240 = arith.addf %239, %235 : vector<2x8x16x32xf32>
      %241 = arith.mulf %204, %240 : vector<2x8x16x32xf32>
      %cst_102 = arith.constant dense<0.000000e+00> : vector<2x8x32xf32>
      %242 = vector.multi_reduction <add>, %241, %cst_102 [2] : vector<2x8x16x32xf32> to vector<2x8x32xf32>
      %c0_103 = arith.constant 0 : index
      %243 = arith.index_cast %188 : i32 to index
      %c0_104 = arith.constant 0 : index
      %244 = vector.load %arg25[%c0_103, %243, %c0_104] : memref<2x64x32xf32, #tpu.memory_space<vmem>>, vector<2x8x32xf32>
      tpu.vector_store %arg25[%c0_103, %243, %c0_104], %242 {strides = array<i32>} : memref<2x64x32xf32, #tpu.memory_space<vmem>>, vector<2x8x32xf32>,
      %245 = vector.extract_strided_slice %240 {offsets = [0, 7, 0, 0], sizes = [2, 1, 16, 32], strides = [1, 1, 1, 1]} : vector<2x8x16x32xf32> to vector<2x1x16x32xf32>
      %246 = vector.shape_cast %245 : vector<2x1x16x32xf32> to vector<2x16x32xf32>
      scf.yield %246 : vector<2x16x32xf32>
    }
    %c8_i32_49 = arith.constant 8 : i32
    %c0_50 = arith.constant 0 : index
    %c0_51 = arith.constant 0 : index
    %c0_52 = arith.constant 0 : index
    %123 = vector.load %arg25[%c0_50, %c0_51, %c0_52] : memref<2x64x32xf32, #tpu.memory_space<vmem>>, vector<2x64x32xf32>
    %124 = vector.shape_cast %123 : vector<2x64x32xf32> to vector<128x32xf32>
    %c0_53 = arith.constant 0 : index
    %c0_54 = arith.constant 0 : index
    %125 = vector.load %arg11[%c0_53, %c0_54] : memref<1x32xf32, #tpu.memory_space<vmem>>, vector<1x32xf32>
    %126 = vector.broadcast %125 : vector<1x32xf32> to vector<128x32xf32>
    %127 = arith.mulf %83, %126 : vector<128x32xf32>
    %128 = arith.addf %124, %127 : vector<128x32xf32>
    %129 = arith.truncf %128 : vector<128x32xf32> to vector<128x32xbf16>
    %c0_55 = arith.constant 0 : index
    %c0_56 = arith.constant 0 : index
    %130 = vector.load %arg12[%c0_55, %c0_56] : memref<32x32xbf16, #tpu.memory_space<vmem>>, vector<32x32xbf16>
    %cst_57 = arith.constant dense<0.000000e+00> : vector<128x32xf32>
    %131 = tpu.matmul %129, %130, %cst_57 {dimension_numbers = #tpu.dot_dimension_numbers<[1], [0], [0], [1], [0, 0, 1, 1], [], []>} : vector<128x32xbf16>, vector<32x32xbf16>, vector<128x32xf32> -> vector<128x32xf32>
    %132 = arith.truncf %84 : vector<128x32xf32> to vector<128x32xbf16>
    %c0_58 = arith.constant 0 : index
    %c0_59 = arith.constant 0 : index
    %133 = vector.load %arg13[%c0_58, %c0_59] : memref<32x32xbf16, #tpu.memory_space<vmem>>, vector<32x32xbf16>
    %cst_60 = arith.constant dense<0.000000e+00> : vector<128x32xf32>
    %134 = tpu.matmul %132, %133, %cst_60 {dimension_numbers = #tpu.dot_dimension_numbers<[1], [0], [0], [1], [0, 0, 1, 1], [], []>} : vector<128x32xbf16>, vector<32x32xbf16>, vector<128x32xf32> -> vector<128x32xf32>
    %135 = arith.addf %131, %134 : vector<128x32xf32>
    %136 = arith.addf %1, %135 : vector<128x32xf32>
    %c0_61 = arith.constant 0 : index
    %c0_62 = arith.constant 0 : index
    %137 = vector.load %arg14[%c0_61, %c0_62] : memref<1x32xf32, #tpu.memory_space<vmem>>, vector<1x32xf32>
    %c0_63 = arith.constant 0 : index
    %c0_64 = arith.constant 0 : index
    %138 = vector.load %arg15[%c0_63, %c0_64] : memref<1x32xf32, #tpu.memory_space<vmem>>, vector<1x32xf32>
    %c0_65 = arith.constant 0 : index
    %c0_66 = arith.constant 0 : index
    %139 = vector.load %arg16[%c0_65, %c0_66] : memref<32x128xbf16, #tpu.memory_space<vmem>>, vector<32x128xbf16>
    %c0_67 = arith.constant 0 : index
    %c0_68 = arith.constant 0 : index
    %140 = vector.load %arg17[%c0_67, %c0_68] : memref<1x128xf32, #tpu.memory_space<vmem>>, vector<1x128xf32>
    %c0_69 = arith.constant 0 : index
    %c0_70 = arith.constant 0 : index
    %141 = vector.load %arg18[%c0_69, %c0_70] : memref<128x32xbf16, #tpu.memory_space<vmem>>, vector<128x32xbf16>
    %c0_71 = arith.constant 0 : index
    %c0_72 = arith.constant 0 : index
    %142 = vector.load %arg19[%c0_71, %c0_72] : memref<1x32xf32, #tpu.memory_space<vmem>>, vector<1x32xf32>
    %cst_73 = arith.constant dense<0.000000e+00> : vector<128xf32>
    %143 = vector.multi_reduction <add>, %136, %cst_73 [1] : vector<128x32xf32> to vector<128xf32>
    %144 = vector.shape_cast %143 : vector<128xf32> to vector<128x1xf32>
    %cst_74 = arith.constant 3.200000e+01 : f32
    %145 = vector.broadcast %cst_74 : f32 to vector<128x1xf32>
    %146 = arith.divf %144, %145 : vector<128x1xf32>
    %147 = vector.broadcast %146 : vector<128x1xf32> to vector<128x32xf32>
    %148 = arith.subf %136, %147 : vector<128x32xf32>
    %149 = arith.mulf %148, %148 : vector<128x32xf32>
    %cst_75 = arith.constant dense<0.000000e+00> : vector<128xf32>
    %150 = vector.multi_reduction <add>, %149, %cst_75 [1] : vector<128x32xf32> to vector<128xf32>
    %151 = vector.shape_cast %150 : vector<128xf32> to vector<128x1xf32>
    %cst_76 = arith.constant 3.200000e+01 : f32
    %152 = vector.broadcast %cst_76 : f32 to vector<128x1xf32>
    %153 = arith.divf %151, %152 : vector<128x1xf32>
    %cst_77 = arith.constant 9.99999974E-6 : f32
    %154 = vector.broadcast %cst_77 : f32 to vector<128x1xf32>
    %155 = arith.addf %153, %154 : vector<128x1xf32>
    %156 = math.rsqrt %155 : vector<128x1xf32>
    %157 = vector.broadcast %156 : vector<128x1xf32> to vector<128x32xf32>
    %158 = arith.mulf %148, %157 : vector<128x32xf32>
    %159 = vector.broadcast %137 : vector<1x32xf32> to vector<128x32xf32>
    %160 = arith.mulf %158, %159 : vector<128x32xf32>
    %161 = vector.broadcast %138 : vector<1x32xf32> to vector<128x32xf32>
    %162 = arith.addf %160, %161 : vector<128x32xf32>
    %163 = arith.truncf %162 : vector<128x32xf32> to vector<128x32xbf16>
    %cst_78 = arith.constant dense<0.000000e+00> : vector<128x128xf32>
    %164 = tpu.matmul %163, %139, %cst_78 {dimension_numbers = #tpu.dot_dimension_numbers<[1], [0], [0], [1], [0, 0, 1, 1], [], []>} : vector<128x32xbf16>, vector<32x128xbf16>, vector<128x128xf32> -> vector<128x128xf32>
    %165 = vector.broadcast %140 : vector<1x128xf32> to vector<128x128xf32>
    %166 = arith.addf %164, %165 : vector<128x128xf32>
    %167 = arith.mulf %166, %166 : vector<128x128xf32>
    %168 = arith.mulf %166, %167 : vector<128x128xf32>
    %cst_79 = arith.constant 4.471500e-02 : f32
    %169 = vector.broadcast %cst_79 : f32 to vector<128x128xf32>
    %170 = arith.mulf %169, %168 : vector<128x128xf32>
    %171 = arith.addf %166, %170 : vector<128x128xf32>
    %cst_80 = arith.constant 0.797884583 : f32
    %172 = vector.broadcast %cst_80 : f32 to vector<128x128xf32>
    %173 = arith.mulf %172, %171 : vector<128x128xf32>
    %174 = math.tanh %173 : vector<128x128xf32>
    %cst_81 = arith.constant 1.000000e+00 : f32
    %175 = vector.broadcast %cst_81 : f32 to vector<128x128xf32>
    %176 = arith.addf %175, %174 : vector<128x128xf32>
    %cst_82 = arith.constant 5.000000e-01 : f32
    %177 = vector.broadcast %cst_82 : f32 to vector<128x128xf32>
    %178 = arith.mulf %177, %176 : vector<128x128xf32>
    %179 = arith.mulf %166, %178 : vector<128x128xf32>
    %180 = arith.truncf %179 : vector<128x128xf32> to vector<128x128xbf16>
    %cst_83 = arith.constant dense<0.000000e+00> : vector<128x32xf32>
    %181 = tpu.matmul %180, %141, %cst_83 {dimension_numbers = #tpu.dot_dimension_numbers<[1], [0], [0], [1], [0, 0, 1, 1], [], []>} : vector<128x128xbf16>, vector<128x32xbf16>, vector<128x32xf32> -> vector<128x32xf32>
    %182 = vector.broadcast %142 : vector<1x32xf32> to vector<128x32xf32>
    %183 = arith.addf %181, %182 : vector<128x32xf32>
    %184 = arith.addf %136, %183 : vector<128x32xf32>
    %185 = vector.shape_cast %184 : vector<128x32xf32> to vector<2x64x32xf32>
    %c0_84 = arith.constant 0 : index
    %c0_85 = arith.constant 0 : index
    %c0_86 = arith.constant 0 : index
    %186 = vector.load %arg20[%c0_84, %c0_85, %c0_86] : memref<2x64x32xf32, #tpu.memory_space<vmem>>, vector<2x64x32xf32>
    tpu.vector_store %arg20[%c0_84, %c0_85, %c0_86], %185 {strides = array<i32>} : memref<2x64x32xf32, #tpu.memory_space<vmem>>, vector<2x64x32xf32>,
    return
  }
  func.func @transform_0(%arg0: i32) -> (i32, i32, i32) {
    %c0_i32 = arith.constant 0 : i32
    %c0_i32_0 = arith.constant 0 : i32
    %c0_i32_1 = arith.constant 0 : i32
    return %arg0, %c0_i32, %c0_i32_0 : i32, i32, i32
  }
  func.func @transform_1(%arg0: i32) -> (i32, i32) {
    %c0_i32 = arith.constant 0 : i32
    %c0_i32_0 = arith.constant 0 : i32
    %c0_i32_1 = arith.constant 0 : i32
    return %c0_i32, %c0_i32_0 : i32, i32
  }
  func.func @transform_2(%arg0: i32) -> (i32, i32) {
    %c0_i32 = arith.constant 0 : i32
    %c0_i32_0 = arith.constant 0 : i32
    %c0_i32_1 = arith.constant 0 : i32
    return %c0_i32, %c0_i32_0 : i32, i32
  }
  func.func @transform_3(%arg0: i32) -> (i32, i32) {
    %c0_i32 = arith.constant 0 : i32
    %c0_i32_0 = arith.constant 0 : i32
    %c0_i32_1 = arith.constant 0 : i32
    return %c0_i32, %c0_i32_0 : i32, i32
  }
  func.func @transform_4(%arg0: i32) -> (i32, i32) {
    %c0_i32 = arith.constant 0 : i32
    %c0_i32_0 = arith.constant 0 : i32
    %c0_i32_1 = arith.constant 0 : i32
    return %c0_i32, %c0_i32_0 : i32, i32
  }
  func.func @transform_5(%arg0: i32) -> (i32, i32) {
    %c0_i32 = arith.constant 0 : i32
    %c0_i32_0 = arith.constant 0 : i32
    %c0_i32_1 = arith.constant 0 : i32
    return %c0_i32, %c0_i32_0 : i32, i32
  }
  func.func @transform_6(%arg0: i32) -> (i32, i32) {
    %c0_i32 = arith.constant 0 : i32
    %c0_i32_0 = arith.constant 0 : i32
    %c0_i32_1 = arith.constant 0 : i32
    return %c0_i32, %c0_i32_0 : i32, i32
  }
  func.func @transform_7(%arg0: i32) -> (i32, i32) {
    %c0_i32 = arith.constant 0 : i32
    %c0_i32_0 = arith.constant 0 : i32
    %c0_i32_1 = arith.constant 0 : i32
    return %c0_i32, %c0_i32_0 : i32, i32
  }
  func.func @transform_8(%arg0: i32) -> (i32, i32) {
    %c0_i32 = arith.constant 0 : i32
    %c0_i32_0 = arith.constant 0 : i32
    %c0_i32_1 = arith.constant 0 : i32
    return %c0_i32, %c0_i32_0 : i32, i32
  }
  func.func @transform_9(%arg0: i32) -> (i32, i32) {
    %c0_i32 = arith.constant 0 : i32
    %c0_i32_0 = arith.constant 0 : i32
    %c0_i32_1 = arith.constant 0 : i32
    return %c0_i32, %c0_i32_0 : i32, i32
  }
  func.func @transform_10(%arg0: i32) -> (i32, i32) {
    %c0_i32 = arith.constant 0 : i32
    %c0_i32_0 = arith.constant 0 : i32
    %c0_i32_1 = arith.constant 0 : i32
    return %c0_i32, %c0_i32_0 : i32, i32
  }
  func.func @transform_11(%arg0: i32) -> (i32, i32) {
    %c0_i32 = arith.constant 0 : i32
    %c0_i32_0 = arith.constant 0 : i32
    %c0_i32_1 = arith.constant 0 : i32
    return %c0_i32, %c0_i32_0 : i32, i32
  }
  func.func @transform_12(%arg0: i32) -> (i32, i32) {
    %c0_i32 = arith.constant 0 : i32
    %c0_i32_0 = arith.constant 0 : i32
    %c0_i32_1 = arith.constant 0 : i32
    return %c0_i32, %c0_i32_0 : i32, i32
  }
  func.func @transform_13(%arg0: i32) -> (i32, i32) {
    %c0_i32 = arith.constant 0 : i32
    %c0_i32_0 = arith.constant 0 : i32
    %c0_i32_1 = arith.constant 0 : i32
    return %c0_i32, %c0_i32_0 : i32, i32
  }
  func.func @transform_14(%arg0: i32) -> (i32, i32) {
    %c0_i32 = arith.constant 0 : i32
    %c0_i32_0 = arith.constant 0 : i32
    %c0_i32_1 = arith.constant 0 : i32
    return %c0_i32, %c0_i32_0 : i32, i32
  }
  func.func @transform_15(%arg0: i32) -> (i32, i32) {
    %c0_i32 = arith.constant 0 : i32
    %c0_i32_0 = arith.constant 0 : i32
    %c0_i32_1 = arith.constant 0 : i32
    return %c0_i32, %c0_i32_0 : i32, i32
  }
  func.func @transform_16(%arg0: i32) -> (i32, i32) {
    %c0_i32 = arith.constant 0 : i32
    %c0_i32_0 = arith.constant 0 : i32
    %c0_i32_1 = arith.constant 0 : i32
    return %c0_i32, %c0_i32_0 : i32, i32
  }
  func.func @transform_17(%arg0: i32) -> (i32, i32) {
    %c0_i32 = arith.constant 0 : i32
    %c0_i32_0 = arith.constant 0 : i32
    %c0_i32_1 = arith.constant 0 : i32
    return %c0_i32, %c0_i32_0 : i32, i32
  }
  func.func @transform_18(%arg0: i32) -> (i32, i32) {
    %c0_i32 = arith.constant 0 : i32
    %c0_i32_0 = arith.constant 0 : i32
    %c0_i32_1 = arith.constant 0 : i32
    return %c0_i32, %c0_i32_0 : i32, i32
  }
  func.func @transform_19(%arg0: i32) -> (i32, i32, i32) {
    %c0_i32 = arith.constant 0 : i32
    %c0_i32_0 = arith.constant 0 : i32
    %c0_i32_1 = arith.constant 0 : i32
    return %arg0, %c0_i32, %c0_i32_0 : i32, i32, i32
  }
}

module attributes {stable_mosaic.version = 11 : i64} {
  func.func @_win_attn_kernel(%arg0: i32, %arg1: memref<4x4x2x4x32xf32, #tpu.memory_space<vmem>>, %arg2: memref<32x96xbf16, #tpu.memory_space<vmem>>, %arg3: memref<32x32xbf16, #tpu.memory_space<vmem>>, %arg4: memref<1x32xf32, #tpu.memory_space<vmem>>, %arg5: memref<1x32xf32, #tpu.memory_space<vmem>>, %arg6: memref<1x32xf32, #tpu.memory_space<vmem>>, %arg7: memref<32x128xbf16, #tpu.memory_space<vmem>>, %arg8: memref<1x128xf32, #tpu.memory_space<vmem>>, %arg9: memref<128x32xbf16, #tpu.memory_space<vmem>>, %arg10: memref<1x32xf32, #tpu.memory_space<vmem>>, %arg11: memref<4x4x2x4x32xf32, #tpu.memory_space<vmem>>) attributes {dimension_semantics = [#tpu.dimension_semantics<parallel>], iteration_bounds = array<i64: 1>, scalar_prefetch = 0 : i64, scratch_operands = 0 : i64, tpu.core_type = #tpu.core_type<tc>, window_params = [{transform_indices = @transform_0, window_bounds = array<i64: 4, 4, 2, 4, 32>}, {pipeline_mode = #tpu.pipeline_mode<synchronous>, transform_indices = @transform_1, window_bounds = array<i64: 32, 96>}, {pipeline_mode = #tpu.pipeline_mode<synchronous>, transform_indices = @transform_2, window_bounds = array<i64: 32, 32>}, {pipeline_mode = #tpu.pipeline_mode<synchronous>, transform_indices = @transform_3, window_bounds = array<i64: 1, 32>}, {pipeline_mode = #tpu.pipeline_mode<synchronous>, transform_indices = @transform_4, window_bounds = array<i64: 1, 32>}, {pipeline_mode = #tpu.pipeline_mode<synchronous>, transform_indices = @transform_5, window_bounds = array<i64: 1, 32>}, {pipeline_mode = #tpu.pipeline_mode<synchronous>, transform_indices = @transform_6, window_bounds = array<i64: 32, 128>}, {pipeline_mode = #tpu.pipeline_mode<synchronous>, transform_indices = @transform_7, window_bounds = array<i64: 1, 128>}, {pipeline_mode = #tpu.pipeline_mode<synchronous>, transform_indices = @transform_8, window_bounds = array<i64: 128, 32>}, {pipeline_mode = #tpu.pipeline_mode<synchronous>, transform_indices = @transform_9, window_bounds = array<i64: 1, 32>}, {transform_indices = @transform_10, window_bounds = array<i64: 4, 4, 2, 4, 32>}]} {
    %c0 = arith.constant 0 : index
    %c0_0 = arith.constant 0 : index
    %c0_1 = arith.constant 0 : index
    %c0_2 = arith.constant 0 : index
    %c0_3 = arith.constant 0 : index
    %0 = vector.load %arg1[%c0, %c0_0, %c0_1, %c0_2, %c0_3] : memref<4x4x2x4x32xf32, #tpu.memory_space<vmem>>, vector<4x4x2x4x32xf32>
    %1 = vector.shape_cast %0 : vector<4x4x2x4x32xf32> to vector<128x32xf32>
    %2 = arith.truncf %0 : vector<4x4x2x4x32xf32> to vector<4x4x2x4x32xbf16>
    %3 = tpu.transpose %2, [0, 2, 1, 3, 4] : vector<4x4x2x4x32xbf16> -> vector<4x2x4x4x32xbf16>
    %4 = vector.shape_cast %3 : vector<4x2x4x4x32xbf16> to vector<128x32xbf16>
    %c0_4 = arith.constant 0 : index
    %c0_5 = arith.constant 0 : index
    %5 = vector.load %arg2[%c0_4, %c0_5] : memref<32x96xbf16, #tpu.memory_space<vmem>>, vector<32x96xbf16>
    %cst = arith.constant dense<0.000000e+00> : vector<128x96xf32>
    %6 = tpu.matmul %4, %5, %cst {dimension_numbers = #tpu.dot_dimension_numbers<[1], [0], [0], [1], [0, 0, 1, 1], [], []>} : vector<128x32xbf16>, vector<32x96xbf16>, vector<128x96xf32> -> vector<128x96xf32>
    %7 = vector.extract_strided_slice %6 {offsets = [0, 0], sizes = [128, 8], strides = [1, 1]} : vector<128x96xf32> to vector<128x8xf32>
    %8 = vector.shape_cast %7 : vector<128x8xf32> to vector<8x16x8xf32>
    %9 = arith.truncf %8 : vector<8x16x8xf32> to vector<8x16x8xbf16>
    %10 = vector.extract_strided_slice %6 {offsets = [0, 32], sizes = [128, 8], strides = [1, 1]} : vector<128x96xf32> to vector<128x8xf32>
    %11 = vector.shape_cast %10 : vector<128x8xf32> to vector<8x16x8xf32>
    %12 = arith.truncf %11 : vector<8x16x8xf32> to vector<8x16x8xbf16>
    %13 = vector.extract_strided_slice %6 {offsets = [0, 64], sizes = [128, 8], strides = [1, 1]} : vector<128x96xf32> to vector<128x8xf32>
    %14 = vector.shape_cast %13 : vector<128x8xf32> to vector<8x16x8xf32>
    %15 = arith.truncf %14 : vector<8x16x8xf32> to vector<8x16x8xbf16>
    "tpu.trace_start"() <{level = 10 : i32, message = "wtd,wsd->wts"}> : () -> ()
    %cst_6 = arith.constant dense<0.000000e+00> : vector<8x16x16xf32>
    %16 = tpu.matmul %9, %12, %cst_6 {dimension_numbers = #tpu.dot_dimension_numbers<[2], [2], [1], [1], [0, 0, 0, 1, 1, 1], [0], [0]>} : vector<8x16x8xbf16>, vector<8x16x8xbf16>, vector<8x16x16xf32> -> vector<8x16x16xf32>
    "tpu.trace_stop"() : () -> ()
    %cst_7 = arith.constant 0.353553385 : f32
    %17 = vector.broadcast %cst_7 : f32 to vector<8x16x16xf32>
    %18 = arith.mulf %16, %17 : vector<8x16x16xf32>
    %cst_8 = arith.constant dense<0xFF800000> : vector<8x16xf32>
    %19 = vector.multi_reduction <maximumf>, %18, %cst_8 [2] : vector<8x16x16xf32> to vector<8x16xf32>
    %20 = vector.shape_cast %19 : vector<8x16xf32> to vector<8x16x1xf32>
    %21 = vector.broadcast %20 : vector<8x16x1xf32> to vector<8x16x16xf32>
    %22 = arith.subf %18, %21 : vector<8x16x16xf32>
    %23 = math.exp %22 : vector<8x16x16xf32>
    %cst_9 = arith.constant dense<0.000000e+00> : vector<8x16xf32>
    %24 = vector.multi_reduction <add>, %23, %cst_9 [2] : vector<8x16x16xf32> to vector<8x16xf32>
    %25 = vector.shape_cast %24 : vector<8x16xf32> to vector<8x16x1xf32>
    %26 = tpu.reciprocal %25 {approx = true} : vector<8x16x1xf32> -> vector<8x16x1xf32>
    %27 = vector.broadcast %26 : vector<8x16x1xf32> to vector<8x16x16xf32>
    %28 = arith.mulf %23, %27 : vector<8x16x16xf32>
    %29 = arith.truncf %28 : vector<8x16x16xf32> to vector<8x16x16xbf16>
    "tpu.trace_start"() <{level = 10 : i32, message = "wts,wsd->wtd"}> : () -> ()
    %cst_10 = arith.constant dense<0.000000e+00> : vector<8x16x8xf32>
    %30 = tpu.matmul %29, %15, %cst_10 {dimension_numbers = #tpu.dot_dimension_numbers<[2], [1], [1], [2], [0, 0, 0, 1, 1, 2], [0], [0]>} : vector<8x16x16xbf16>, vector<8x16x8xbf16>, vector<8x16x8xf32> -> vector<8x16x8xf32>
    "tpu.trace_stop"() : () -> ()
    %31 = vector.shape_cast %30 : vector<8x16x8xf32> to vector<128x8xf32>
    %32 = vector.extract_strided_slice %6 {offsets = [0, 8], sizes = [128, 8], strides = [1, 1]} : vector<128x96xf32> to vector<128x8xf32>
    %33 = vector.shape_cast %32 : vector<128x8xf32> to vector<8x16x8xf32>
    %34 = arith.truncf %33 : vector<8x16x8xf32> to vector<8x16x8xbf16>
    %35 = vector.extract_strided_slice %6 {offsets = [0, 40], sizes = [128, 8], strides = [1, 1]} : vector<128x96xf32> to vector<128x8xf32>
    %36 = vector.shape_cast %35 : vector<128x8xf32> to vector<8x16x8xf32>
    %37 = arith.truncf %36 : vector<8x16x8xf32> to vector<8x16x8xbf16>
    %38 = vector.extract_strided_slice %6 {offsets = [0, 72], sizes = [128, 8], strides = [1, 1]} : vector<128x96xf32> to vector<128x8xf32>
    %39 = vector.shape_cast %38 : vector<128x8xf32> to vector<8x16x8xf32>
    %40 = arith.truncf %39 : vector<8x16x8xf32> to vector<8x16x8xbf16>
    "tpu.trace_start"() <{level = 10 : i32, message = "wtd,wsd->wts"}> : () -> ()
    %cst_11 = arith.constant dense<0.000000e+00> : vector<8x16x16xf32>
    %41 = tpu.matmul %34, %37, %cst_11 {dimension_numbers = #tpu.dot_dimension_numbers<[2], [2], [1], [1], [0, 0, 0, 1, 1, 1], [0], [0]>} : vector<8x16x8xbf16>, vector<8x16x8xbf16>, vector<8x16x16xf32> -> vector<8x16x16xf32>
    "tpu.trace_stop"() : () -> ()
    %cst_12 = arith.constant 0.353553385 : f32
    %42 = vector.broadcast %cst_12 : f32 to vector<8x16x16xf32>
    %43 = arith.mulf %41, %42 : vector<8x16x16xf32>
    %cst_13 = arith.constant dense<0xFF800000> : vector<8x16xf32>
    %44 = vector.multi_reduction <maximumf>, %43, %cst_13 [2] : vector<8x16x16xf32> to vector<8x16xf32>
    %45 = vector.shape_cast %44 : vector<8x16xf32> to vector<8x16x1xf32>
    %46 = vector.broadcast %45 : vector<8x16x1xf32> to vector<8x16x16xf32>
    %47 = arith.subf %43, %46 : vector<8x16x16xf32>
    %48 = math.exp %47 : vector<8x16x16xf32>
    %cst_14 = arith.constant dense<0.000000e+00> : vector<8x16xf32>
    %49 = vector.multi_reduction <add>, %48, %cst_14 [2] : vector<8x16x16xf32> to vector<8x16xf32>
    %50 = vector.shape_cast %49 : vector<8x16xf32> to vector<8x16x1xf32>
    %51 = tpu.reciprocal %50 {approx = true} : vector<8x16x1xf32> -> vector<8x16x1xf32>
    %52 = vector.broadcast %51 : vector<8x16x1xf32> to vector<8x16x16xf32>
    %53 = arith.mulf %48, %52 : vector<8x16x16xf32>
    %54 = arith.truncf %53 : vector<8x16x16xf32> to vector<8x16x16xbf16>
    "tpu.trace_start"() <{level = 10 : i32, message = "wts,wsd->wtd"}> : () -> ()
    %cst_15 = arith.constant dense<0.000000e+00> : vector<8x16x8xf32>
    %55 = tpu.matmul %54, %40, %cst_15 {dimension_numbers = #tpu.dot_dimension_numbers<[2], [1], [1], [2], [0, 0, 0, 1, 1, 2], [0], [0]>} : vector<8x16x16xbf16>, vector<8x16x8xbf16>, vector<8x16x8xf32> -> vector<8x16x8xf32>
    "tpu.trace_stop"() : () -> ()
    %56 = vector.shape_cast %55 : vector<8x16x8xf32> to vector<128x8xf32>
    %57 = vector.extract_strided_slice %6 {offsets = [0, 16], sizes = [128, 8], strides = [1, 1]} : vector<128x96xf32> to vector<128x8xf32>
    %58 = vector.shape_cast %57 : vector<128x8xf32> to vector<8x16x8xf32>
    %59 = arith.truncf %58 : vector<8x16x8xf32> to vector<8x16x8xbf16>
    %60 = vector.extract_strided_slice %6 {offsets = [0, 48], sizes = [128, 8], strides = [1, 1]} : vector<128x96xf32> to vector<128x8xf32>
    %61 = vector.shape_cast %60 : vector<128x8xf32> to vector<8x16x8xf32>
    %62 = arith.truncf %61 : vector<8x16x8xf32> to vector<8x16x8xbf16>
    %63 = vector.extract_strided_slice %6 {offsets = [0, 80], sizes = [128, 8], strides = [1, 1]} : vector<128x96xf32> to vector<128x8xf32>
    %64 = vector.shape_cast %63 : vector<128x8xf32> to vector<8x16x8xf32>
    %65 = arith.truncf %64 : vector<8x16x8xf32> to vector<8x16x8xbf16>
    "tpu.trace_start"() <{level = 10 : i32, message = "wtd,wsd->wts"}> : () -> ()
    %cst_16 = arith.constant dense<0.000000e+00> : vector<8x16x16xf32>
    %66 = tpu.matmul %59, %62, %cst_16 {dimension_numbers = #tpu.dot_dimension_numbers<[2], [2], [1], [1], [0, 0, 0, 1, 1, 1], [0], [0]>} : vector<8x16x8xbf16>, vector<8x16x8xbf16>, vector<8x16x16xf32> -> vector<8x16x16xf32>
    "tpu.trace_stop"() : () -> ()
    %cst_17 = arith.constant 0.353553385 : f32
    %67 = vector.broadcast %cst_17 : f32 to vector<8x16x16xf32>
    %68 = arith.mulf %66, %67 : vector<8x16x16xf32>
    %cst_18 = arith.constant dense<0xFF800000> : vector<8x16xf32>
    %69 = vector.multi_reduction <maximumf>, %68, %cst_18 [2] : vector<8x16x16xf32> to vector<8x16xf32>
    %70 = vector.shape_cast %69 : vector<8x16xf32> to vector<8x16x1xf32>
    %71 = vector.broadcast %70 : vector<8x16x1xf32> to vector<8x16x16xf32>
    %72 = arith.subf %68, %71 : vector<8x16x16xf32>
    %73 = math.exp %72 : vector<8x16x16xf32>
    %cst_19 = arith.constant dense<0.000000e+00> : vector<8x16xf32>
    %74 = vector.multi_reduction <add>, %73, %cst_19 [2] : vector<8x16x16xf32> to vector<8x16xf32>
    %75 = vector.shape_cast %74 : vector<8x16xf32> to vector<8x16x1xf32>
    %76 = tpu.reciprocal %75 {approx = true} : vector<8x16x1xf32> -> vector<8x16x1xf32>
    %77 = vector.broadcast %76 : vector<8x16x1xf32> to vector<8x16x16xf32>
    %78 = arith.mulf %73, %77 : vector<8x16x16xf32>
    %79 = arith.truncf %78 : vector<8x16x16xf32> to vector<8x16x16xbf16>
    "tpu.trace_start"() <{level = 10 : i32, message = "wts,wsd->wtd"}> : () -> ()
    %cst_20 = arith.constant dense<0.000000e+00> : vector<8x16x8xf32>
    %80 = tpu.matmul %79, %65, %cst_20 {dimension_numbers = #tpu.dot_dimension_numbers<[2], [1], [1], [2], [0, 0, 0, 1, 1, 2], [0], [0]>} : vector<8x16x16xbf16>, vector<8x16x8xbf16>, vector<8x16x8xf32> -> vector<8x16x8xf32>
    "tpu.trace_stop"() : () -> ()
    %81 = vector.shape_cast %80 : vector<8x16x8xf32> to vector<128x8xf32>
    %82 = vector.extract_strided_slice %6 {offsets = [0, 24], sizes = [128, 8], strides = [1, 1]} : vector<128x96xf32> to vector<128x8xf32>
    %83 = vector.shape_cast %82 : vector<128x8xf32> to vector<8x16x8xf32>
    %84 = arith.truncf %83 : vector<8x16x8xf32> to vector<8x16x8xbf16>
    %85 = vector.extract_strided_slice %6 {offsets = [0, 56], sizes = [128, 8], strides = [1, 1]} : vector<128x96xf32> to vector<128x8xf32>
    %86 = vector.shape_cast %85 : vector<128x8xf32> to vector<8x16x8xf32>
    %87 = arith.truncf %86 : vector<8x16x8xf32> to vector<8x16x8xbf16>
    %88 = vector.extract_strided_slice %6 {offsets = [0, 88], sizes = [128, 8], strides = [1, 1]} : vector<128x96xf32> to vector<128x8xf32>
    %89 = vector.shape_cast %88 : vector<128x8xf32> to vector<8x16x8xf32>
    %90 = arith.truncf %89 : vector<8x16x8xf32> to vector<8x16x8xbf16>
    "tpu.trace_start"() <{level = 10 : i32, message = "wtd,wsd->wts"}> : () -> ()
    %cst_21 = arith.constant dense<0.000000e+00> : vector<8x16x16xf32>
    %91 = tpu.matmul %84, %87, %cst_21 {dimension_numbers = #tpu.dot_dimension_numbers<[2], [2], [1], [1], [0, 0, 0, 1, 1, 1], [0], [0]>} : vector<8x16x8xbf16>, vector<8x16x8xbf16>, vector<8x16x16xf32> -> vector<8x16x16xf32>
    "tpu.trace_stop"() : () -> ()
    %cst_22 = arith.constant 0.353553385 : f32
    %92 = vector.broadcast %cst_22 : f32 to vector<8x16x16xf32>
    %93 = arith.mulf %91, %92 : vector<8x16x16xf32>
    %cst_23 = arith.constant dense<0xFF800000> : vector<8x16xf32>
    %94 = vector.multi_reduction <maximumf>, %93, %cst_23 [2] : vector<8x16x16xf32> to vector<8x16xf32>
    %95 = vector.shape_cast %94 : vector<8x16xf32> to vector<8x16x1xf32>
    %96 = vector.broadcast %95 : vector<8x16x1xf32> to vector<8x16x16xf32>
    %97 = arith.subf %93, %96 : vector<8x16x16xf32>
    %98 = math.exp %97 : vector<8x16x16xf32>
    %cst_24 = arith.constant dense<0.000000e+00> : vector<8x16xf32>
    %99 = vector.multi_reduction <add>, %98, %cst_24 [2] : vector<8x16x16xf32> to vector<8x16xf32>
    %100 = vector.shape_cast %99 : vector<8x16xf32> to vector<8x16x1xf32>
    %101 = tpu.reciprocal %100 {approx = true} : vector<8x16x1xf32> -> vector<8x16x1xf32>
    %102 = vector.broadcast %101 : vector<8x16x1xf32> to vector<8x16x16xf32>
    %103 = arith.mulf %98, %102 : vector<8x16x16xf32>
    %104 = arith.truncf %103 : vector<8x16x16xf32> to vector<8x16x16xbf16>
    "tpu.trace_start"() <{level = 10 : i32, message = "wts,wsd->wtd"}> : () -> ()
    %cst_25 = arith.constant dense<0.000000e+00> : vector<8x16x8xf32>
    %105 = tpu.matmul %104, %90, %cst_25 {dimension_numbers = #tpu.dot_dimension_numbers<[2], [1], [1], [2], [0, 0, 0, 1, 1, 2], [0], [0]>} : vector<8x16x16xbf16>, vector<8x16x8xbf16>, vector<8x16x8xf32> -> vector<8x16x8xf32>
    "tpu.trace_stop"() : () -> ()
    %106 = vector.shape_cast %105 : vector<8x16x8xf32> to vector<128x8xf32>
    %107 = tpu.concatenate %31, %56, %81, %106 in 1 : vector<128x8xf32>, vector<128x8xf32>, vector<128x8xf32>, vector<128x8xf32> -> vector<128x32xf32>
    %108 = arith.truncf %107 : vector<128x32xf32> to vector<128x32xbf16>
    %109 = vector.shape_cast %108 : vector<128x32xbf16> to vector<4x2x4x4x32xbf16>
    %110 = tpu.transpose %109, [0, 2, 1, 3, 4] : vector<4x2x4x4x32xbf16> -> vector<4x4x2x4x32xbf16>
    %111 = vector.shape_cast %110 : vector<4x4x2x4x32xbf16> to vector<128x32xbf16>
    %c0_26 = arith.constant 0 : index
    %c0_27 = arith.constant 0 : index
    %112 = vector.load %arg3[%c0_26, %c0_27] : memref<32x32xbf16, #tpu.memory_space<vmem>>, vector<32x32xbf16>
    %cst_28 = arith.constant dense<0.000000e+00> : vector<128x32xf32>
    %113 = tpu.matmul %111, %112, %cst_28 {dimension_numbers = #tpu.dot_dimension_numbers<[1], [0], [0], [1], [0, 0, 1, 1], [], []>} : vector<128x32xbf16>, vector<32x32xbf16>, vector<128x32xf32> -> vector<128x32xf32>
    %c0_29 = arith.constant 0 : index
    %c0_30 = arith.constant 0 : index
    %114 = vector.load %arg4[%c0_29, %c0_30] : memref<1x32xf32, #tpu.memory_space<vmem>>, vector<1x32xf32>
    %115 = vector.broadcast %114 : vector<1x32xf32> to vector<128x32xf32>
    %116 = arith.addf %113, %115 : vector<128x32xf32>
    %117 = arith.addf %1, %116 : vector<128x32xf32>
    %c0_31 = arith.constant 0 : index
    %c0_32 = arith.constant 0 : index
    %118 = vector.load %arg5[%c0_31, %c0_32] : memref<1x32xf32, #tpu.memory_space<vmem>>, vector<1x32xf32>
    %c0_33 = arith.constant 0 : index
    %c0_34 = arith.constant 0 : index
    %119 = vector.load %arg6[%c0_33, %c0_34] : memref<1x32xf32, #tpu.memory_space<vmem>>, vector<1x32xf32>
    %c0_35 = arith.constant 0 : index
    %c0_36 = arith.constant 0 : index
    %120 = vector.load %arg7[%c0_35, %c0_36] : memref<32x128xbf16, #tpu.memory_space<vmem>>, vector<32x128xbf16>
    %c0_37 = arith.constant 0 : index
    %c0_38 = arith.constant 0 : index
    %121 = vector.load %arg8[%c0_37, %c0_38] : memref<1x128xf32, #tpu.memory_space<vmem>>, vector<1x128xf32>
    %c0_39 = arith.constant 0 : index
    %c0_40 = arith.constant 0 : index
    %122 = vector.load %arg9[%c0_39, %c0_40] : memref<128x32xbf16, #tpu.memory_space<vmem>>, vector<128x32xbf16>
    %c0_41 = arith.constant 0 : index
    %c0_42 = arith.constant 0 : index
    %123 = vector.load %arg10[%c0_41, %c0_42] : memref<1x32xf32, #tpu.memory_space<vmem>>, vector<1x32xf32>
    %cst_43 = arith.constant dense<0.000000e+00> : vector<128xf32>
    %124 = vector.multi_reduction <add>, %117, %cst_43 [1] : vector<128x32xf32> to vector<128xf32>
    %125 = vector.shape_cast %124 : vector<128xf32> to vector<128x1xf32>
    %cst_44 = arith.constant 3.200000e+01 : f32
    %126 = vector.broadcast %cst_44 : f32 to vector<128x1xf32>
    %127 = arith.divf %125, %126 : vector<128x1xf32>
    %128 = vector.broadcast %127 : vector<128x1xf32> to vector<128x32xf32>
    %129 = arith.subf %117, %128 : vector<128x32xf32>
    %130 = arith.mulf %129, %129 : vector<128x32xf32>
    %cst_45 = arith.constant dense<0.000000e+00> : vector<128xf32>
    %131 = vector.multi_reduction <add>, %130, %cst_45 [1] : vector<128x32xf32> to vector<128xf32>
    %132 = vector.shape_cast %131 : vector<128xf32> to vector<128x1xf32>
    %cst_46 = arith.constant 3.200000e+01 : f32
    %133 = vector.broadcast %cst_46 : f32 to vector<128x1xf32>
    %134 = arith.divf %132, %133 : vector<128x1xf32>
    %cst_47 = arith.constant 9.99999974E-6 : f32
    %135 = vector.broadcast %cst_47 : f32 to vector<128x1xf32>
    %136 = arith.addf %134, %135 : vector<128x1xf32>
    %137 = math.rsqrt %136 : vector<128x1xf32>
    %138 = vector.broadcast %137 : vector<128x1xf32> to vector<128x32xf32>
    %139 = arith.mulf %129, %138 : vector<128x32xf32>
    %140 = vector.broadcast %118 : vector<1x32xf32> to vector<128x32xf32>
    %141 = arith.mulf %139, %140 : vector<128x32xf32>
    %142 = vector.broadcast %119 : vector<1x32xf32> to vector<128x32xf32>
    %143 = arith.addf %141, %142 : vector<128x32xf32>
    %144 = arith.truncf %143 : vector<128x32xf32> to vector<128x32xbf16>
    %cst_48 = arith.constant dense<0.000000e+00> : vector<128x128xf32>
    %145 = tpu.matmul %144, %120, %cst_48 {dimension_numbers = #tpu.dot_dimension_numbers<[1], [0], [0], [1], [0, 0, 1, 1], [], []>} : vector<128x32xbf16>, vector<32x128xbf16>, vector<128x128xf32> -> vector<128x128xf32>
    %146 = vector.broadcast %121 : vector<1x128xf32> to vector<128x128xf32>
    %147 = arith.addf %145, %146 : vector<128x128xf32>
    %148 = arith.mulf %147, %147 : vector<128x128xf32>
    %149 = arith.mulf %147, %148 : vector<128x128xf32>
    %cst_49 = arith.constant 4.471500e-02 : f32
    %150 = vector.broadcast %cst_49 : f32 to vector<128x128xf32>
    %151 = arith.mulf %150, %149 : vector<128x128xf32>
    %152 = arith.addf %147, %151 : vector<128x128xf32>
    %cst_50 = arith.constant 0.797884583 : f32
    %153 = vector.broadcast %cst_50 : f32 to vector<128x128xf32>
    %154 = arith.mulf %153, %152 : vector<128x128xf32>
    %155 = math.tanh %154 : vector<128x128xf32>
    %cst_51 = arith.constant 1.000000e+00 : f32
    %156 = vector.broadcast %cst_51 : f32 to vector<128x128xf32>
    %157 = arith.addf %156, %155 : vector<128x128xf32>
    %cst_52 = arith.constant 5.000000e-01 : f32
    %158 = vector.broadcast %cst_52 : f32 to vector<128x128xf32>
    %159 = arith.mulf %158, %157 : vector<128x128xf32>
    %160 = arith.mulf %147, %159 : vector<128x128xf32>
    %161 = arith.truncf %160 : vector<128x128xf32> to vector<128x128xbf16>
    %cst_53 = arith.constant dense<0.000000e+00> : vector<128x32xf32>
    %162 = tpu.matmul %161, %122, %cst_53 {dimension_numbers = #tpu.dot_dimension_numbers<[1], [0], [0], [1], [0, 0, 1, 1], [], []>} : vector<128x128xbf16>, vector<128x32xbf16>, vector<128x32xf32> -> vector<128x32xf32>
    %163 = vector.broadcast %123 : vector<1x32xf32> to vector<128x32xf32>
    %164 = arith.addf %162, %163 : vector<128x32xf32>
    %165 = arith.addf %117, %164 : vector<128x32xf32>
    %166 = vector.shape_cast %165 : vector<128x32xf32> to vector<4x4x2x4x32xf32>
    %c0_54 = arith.constant 0 : index
    %c0_55 = arith.constant 0 : index
    %c0_56 = arith.constant 0 : index
    %c0_57 = arith.constant 0 : index
    %c0_58 = arith.constant 0 : index
    %167 = vector.load %arg11[%c0_54, %c0_55, %c0_56, %c0_57, %c0_58] : memref<4x4x2x4x32xf32, #tpu.memory_space<vmem>>, vector<4x4x2x4x32xf32>
    tpu.vector_store %arg11[%c0_54, %c0_55, %c0_56, %c0_57, %c0_58], %166 {strides = array<i32>} : memref<4x4x2x4x32xf32, #tpu.memory_space<vmem>>, vector<4x4x2x4x32xf32>,
    return
  }
  func.func @transform_0(%arg0: i32) -> (i32, i32, i32, i32, i32) {
    %c0_i32 = arith.constant 0 : i32
    %c0_i32_0 = arith.constant 0 : i32
    %c0_i32_1 = arith.constant 0 : i32
    %c0_i32_2 = arith.constant 0 : i32
    %c0_i32_3 = arith.constant 0 : i32
    return %arg0, %c0_i32, %c0_i32_0, %c0_i32_1, %c0_i32_2 : i32, i32, i32, i32, i32
  }
  func.func @transform_1(%arg0: i32) -> (i32, i32) {
    %c0_i32 = arith.constant 0 : i32
    %c0_i32_0 = arith.constant 0 : i32
    %c0_i32_1 = arith.constant 0 : i32
    return %c0_i32, %c0_i32_0 : i32, i32
  }
  func.func @transform_2(%arg0: i32) -> (i32, i32) {
    %c0_i32 = arith.constant 0 : i32
    %c0_i32_0 = arith.constant 0 : i32
    %c0_i32_1 = arith.constant 0 : i32
    return %c0_i32, %c0_i32_0 : i32, i32
  }
  func.func @transform_3(%arg0: i32) -> (i32, i32) {
    %c0_i32 = arith.constant 0 : i32
    %c0_i32_0 = arith.constant 0 : i32
    %c0_i32_1 = arith.constant 0 : i32
    return %c0_i32, %c0_i32_0 : i32, i32
  }
  func.func @transform_4(%arg0: i32) -> (i32, i32) {
    %c0_i32 = arith.constant 0 : i32
    %c0_i32_0 = arith.constant 0 : i32
    %c0_i32_1 = arith.constant 0 : i32
    return %c0_i32, %c0_i32_0 : i32, i32
  }
  func.func @transform_5(%arg0: i32) -> (i32, i32) {
    %c0_i32 = arith.constant 0 : i32
    %c0_i32_0 = arith.constant 0 : i32
    %c0_i32_1 = arith.constant 0 : i32
    return %c0_i32, %c0_i32_0 : i32, i32
  }
  func.func @transform_6(%arg0: i32) -> (i32, i32) {
    %c0_i32 = arith.constant 0 : i32
    %c0_i32_0 = arith.constant 0 : i32
    %c0_i32_1 = arith.constant 0 : i32
    return %c0_i32, %c0_i32_0 : i32, i32
  }
  func.func @transform_7(%arg0: i32) -> (i32, i32) {
    %c0_i32 = arith.constant 0 : i32
    %c0_i32_0 = arith.constant 0 : i32
    %c0_i32_1 = arith.constant 0 : i32
    return %c0_i32, %c0_i32_0 : i32, i32
  }
  func.func @transform_8(%arg0: i32) -> (i32, i32) {
    %c0_i32 = arith.constant 0 : i32
    %c0_i32_0 = arith.constant 0 : i32
    %c0_i32_1 = arith.constant 0 : i32
    return %c0_i32, %c0_i32_0 : i32, i32
  }
  func.func @transform_9(%arg0: i32) -> (i32, i32) {
    %c0_i32 = arith.constant 0 : i32
    %c0_i32_0 = arith.constant 0 : i32
    %c0_i32_1 = arith.constant 0 : i32
    return %c0_i32, %c0_i32_0 : i32, i32
  }
  func.func @transform_10(%arg0: i32) -> (i32, i32, i32, i32, i32) {
    %c0_i32 = arith.constant 0 : i32
    %c0_i32_0 = arith.constant 0 : i32
    %c0_i32_1 = arith.constant 0 : i32
    %c0_i32_2 = arith.constant 0 : i32
    %c0_i32_3 = arith.constant 0 : i32
    return %arg0, %c0_i32, %c0_i32_0, %c0_i32_1, %c0_i32_2 : i32, i32, i32, i32, i32
  }
}

</mosaic_0001>

<bundles_post_ra>
// kernel: _lambda_.2
= control target key start
LH: loop header
LB: loop body
LE: loop exit
PB: predicated region body
PF: predicated region fallthrough
CT: control target
= control target key end

     0   :  { %vm81_vm0 = vcmask 261120   ;;  %s5170_s26 = smov 32   ;;  %vm497_vm1 = vcmask 1040384   ;;  %vm546_vm2 = vcmask 1046528   ;;  %s5173_s22 = smov 110   ;;  %vm1351_vm3 = vcmask 15360   ;;  %s8149_s0 = inlined_call_operand.vmem [shape: f32[2,64,32], index: 0, kind: input, shape index: {}]   ;;  %s8150_s3 = inlined_call_operand.vmem [shape: bf16[32,64], index: 3, kind: input, shape index: {}]   ;;  %s8151_s10 = inlined_call_operand.vmem [shape: f32[1,32], index: 10, kind: input, shape index: {}, may-alias: {1,10,13}]   ;;  %s8152_s11 = inlined_call_operand.vmem [shape: bf16[32,32], index: 11, kind: input, shape index: {}]   ;;  %s8153_s12 = inlined_call_operand.vmem [shape: bf16[32,32], index: 12, kind: input, shape index: {}]   ;;  %s8154_s13 = inlined_call_operand.vmem [shape: f32[1,32], index: 13, kind: input, shape index: {}, may-alias: {1,10,13}]   ;;  %s8155_s14 = inlined_call_operand.vmem [shape: f32[1,32], index: 14, kind: input, shape index: {}, may-alias: {2,14,18}]   ;;  %s8156_s15 = inlined_call_operand.vmem [shape: bf16[32,128], index: 15, kind: input, shape index: {}]   ;;  %s8157_s16 = inlined_call_operand.vmem [shape: f32[1,128], index: 16, kind: input, shape index: {}]   ;;  %s8158_s17 = inlined_call_operand.vmem [shape: bf16[128,32], index: 17, kind: input, shape index: {}]   ;;  %s8159_s18 = inlined_call_operand.vmem [shape: f32[1,32], index: 18, kind: input, shape index: {}, may-alias: {2,14,18}]   ;;  %s8160_s19 = inlined_call_operand.vmem [shape: f32[2,64,32], index: 19, kind: output, shape index: {}]   ;;  %s8161_s5 = inlined_call_operand.vmem [shape: f32[3,32], index: 5, kind: input, shape index: {}]   ;;  %s8162_s1 = inlined_call_operand.vmem [shape: f32[1,32], index: 1, kind: input, shape index: {}, may-alias: {1,10,13}]   ;;  %s8163_s2 = inlined_call_operand.vmem [shape: f32[1,32], index: 2, kind: input, shape index: {}, may-alias: {2,14,18}]   ;;  %s8164_s6 = inlined_call_operand.vmem [shape: bf16[32,34], index: 6, kind: input, shape index: {}]   ;;  %s8165_s4 = inlined_call_operand.vmem [shape: f32[3,32], index: 4, kind: input, shape index: {}]   ;;  %s8166_s7 = inlined_call_operand.vmem [shape: bf16[2,32], index: 7, kind: input, shape index: {}]   ;;  %s8167_s9 = inlined_call_operand.vmem [shape: f32[16,32], index: 9, kind: input, shape index: {}]   ;;  %s8168_s8 = inlined_call_operand.vmem [shape: f32[1,32], index: 8, kind: input, shape index: {}]  }
   0x1   :  { %8293 = sst [smem:[#allocation133_spill]] %s8149_s0  ;;  %vm1748_vm4 = vcmask 130048  }
   0x2   :  { %8294 = sst [smem:[#allocation134_spill]] %s8150_s3 }
   0x3   :  { %8295 = sst [smem:[#allocation135_spill]] %s8151_s10 }
   0x4   :  { %8296 = sst [smem:[#allocation136_spill]] %s8152_s11 }
   0x5   :  { %s8297_s20 = sld [smem:[#allocation133_spill]] }
   0x6   :  { %s8314_s10 = sld [smem:[#allocation134_spill]] }
   0xb   :  { %v5278_v0 = vld [vmem:[%s8297_s20] sm:$0xff]  ;;  %v5283_v1 = vld [vmem:[%s8297_s20 + $0x10] sm:$0xff]  ;;  %v5288_v2 = vld [vmem:[%s8297_s20 + $0x8] sm:$0xff] }
   0xc   :  { %8298 = vst [vmem:[#allocation7_spill] sm:$0xff] %v5278_v0  ;;  %8299 = vst [vmem:[#allocation8_spill] sm:$0xff] %v5283_v1  ;;  %v82_v3 = vsel %vm81_vm0, %v5278_v0, 0.0  ;;  %v88_v4 = vsel %vm81_vm0, %v5283_v1, 0.0  ;;  %v5297_v5 = vld [vmem:[%s8297_s20 + $0x18] sm:$0xff]  ;;  %v85_v6 = vsel %vm81_vm0, %v5288_v2, 0.0 }
   0xd   :  { %8300 = vst [vmem:[#allocation9_spill] sm:$0xff] %v5288_v2  ;;  %8301 = vst [vmem:[#allocation10_spill] sm:$0xff] %v5297_v5  ;;  %83 = vadd.xlane.f32.xlu0 %v82_v3  ;;  %89 = vadd.xlane.f32.xlu1 %v88_v4  ;;  %v91_v7 = vsel %vm81_vm0, %v5297_v5, 0.0  ;;  %v5306_v8 = vld [vmem:[%s8297_s20 + $0x20] sm:$0xff]  ;;  %v5311_v9 = vld [vmem:[%s8297_s20 + $0x28] sm:$0xff] }
   0xe   :  { %8302 = vst [vmem:[#allocation11_spill] sm:$0xff] %v5306_v8  ;;  %8303 = vst [vmem:[#allocation12_spill] sm:$0xff] %v5311_v9  ;;  %v94_v10 = vsel %vm81_vm0, %v5306_v8, 0.0  ;;  %v97_v11 = vsel %vm81_vm0, %v5311_v9, 0.0  ;;  %v5320_v12 = vld [vmem:[%s8297_s20 + $0x30] sm:$0xff]  ;;  %v5325_v13 = vld [vmem:[%s8297_s20 + $0x38] sm:$0xff] }
   0xf   :  { %8304 = vst [vmem:[#allocation13_spill] sm:$0xff] %v5320_v12  ;;  %8305 = vst [vmem:[#allocation14_spill] sm:$0xff] %v5325_v13  ;;  %v100_v14 = vsel %vm81_vm0, %v5320_v12, 0.0  ;;  %v103_v15 = vsel %vm81_vm0, %v5325_v13, 0.0  ;;  %v5334_v16 = vld [vmem:[%s8297_s20 + $0x40] sm:$0xff]  ;;  %v5339_v17 = vld [vmem:[%s8297_s20 + $0x48] sm:$0xff] }
  0x10   :  { %8306 = vst [vmem:[#allocation15_spill] sm:$0xff] %v5334_v16  ;;  %8307 = vst [vmem:[#allocation16_spill] sm:$0xff] %v5339_v17  ;;  %v106_v18 = vsel %vm81_vm0, %v5334_v16, 0.0  ;;  %v109_v19 = vsel %vm81_vm0, %v5339_v17, 0.0  ;;  %v5348_v20 = vld [vmem:[%s8297_s20 + $0x50] sm:$0xff]  ;;  %v5353_v21 = vld [vmem:[%s8297_s20 + $0x58] sm:$0xff] }
  0x11   :  { %86 = vadd.xlane.f32.xlu0 %v85_v6  ;;  %92 = vadd.xlane.f32.xlu1 %v91_v7  ;;  %8308 = vst [vmem:[#allocation17_spill] sm:$0xff] %v5348_v20  ;;  %8309 = vst [vmem:[#allocation18_spill] sm:$0xff] %v5353_v21  ;;  %v112_v22 = vsel %vm81_vm0, %v5348_v20, 0.0  ;;  %v115_v23 = vsel %vm81_vm0, %v5353_v21, 0.0  ;;  %v5362_v24 = vld [vmem:[%s8297_s20 + $0x60] sm:$0xff]  ;;  %v5367_v25 = vld [vmem:[%s8297_s20 + $0x68] sm:$0xff] }
  0x12   :  { %8310 = vst [vmem:[#allocation19_spill] sm:$0xff] %v5362_v24  ;;  %8311 = vst [vmem:[#allocation20_spill] sm:$0xff] %v5367_v25  ;;  %v118_v26 = vsel %vm81_vm0, %v5362_v24, 0.0  ;;  %v121_v27 = vsel %vm81_vm0, %v5367_v25, 0.0  ;;  %v5376_v28 = vld [vmem:[%s8297_s20 + $0x70] sm:$0xff]  ;;  %v5381_v29 = vld [vmem:[%s8297_s20 + $0x78] sm:$0xff] }
  0x13   :  { %8312 = vst [vmem:[#allocation21_spill] sm:$0xff] %v5376_v28  ;;  %8313 = vst [vmem:[#allocation22_spill] sm:$0xff] %v5381_v29  ;;  %v124_v30 = vsel %vm81_vm0, %v5376_v28, 0.0  ;;  %v127_v31 = vsel %vm81_vm0, %v5381_v29, 0.0  ;;  %s5171_s20 = smov 96  }
  0x15   :  { %95 = vadd.xlane.f32.xlu0 %v94_v10  ;;  %98 = vadd.xlane.f32.xlu1 %v97_v11 }
  0x19   :  { %101 = vadd.xlane.f32.xlu0 %v100_v14  ;;  %104 = vadd.xlane.f32.xlu1 %v103_v15 }
  0x1d   :  { %107 = vadd.xlane.f32.xlu0 %v106_v18  ;;  %110 = vadd.xlane.f32.xlu1 %v109_v19 }
  0x21   :  { %113 = vadd.xlane.f32.xlu0 %v112_v22  ;;  %116 = vadd.xlane.f32.xlu1 %v115_v23 }
  0x25   :  { %119 = vadd.xlane.f32.xlu0 %v118_v26  ;;  %122 = vadd.xlane.f32.xlu1 %v121_v27 }
  0x29   :  { %125 = vadd.xlane.f32.xlu0 %v124_v30  ;;  %128 = vadd.xlane.f32.xlu1 %v127_v31 }
  0x96   :  { %v84_v32 = vpop.xlane.xlu0 %83  ;;  %v90_v33 = vpop.xlane.xlu1 %89 }
  0x97   :  { %v131_v34 = vmul.f32 0.03125, %v84_v32  ;;  %v133_v35 = vmul.f32 0.03125, %v90_v33 }
  0x99   :  { %v5388_v36 = vsub.f32 %v5278_v0, %v131_v34  ;;  %v5391_v37 = vsub.f32 %v5283_v1, %v133_v35 }
  0x9a   :  { %v87_v38 = vpop.xlane.xlu0 %86  ;;  %v93_v39 = vpop.xlane.xlu1 %92 }
  0x9b   :  { %v132_v40 = vmul.f32 0.03125, %v87_v38  ;;  %v134_v41 = vmul.f32 0.03125, %v93_v39  ;;  %v163_v42 = vmul.f32 %v5388_v36, %v5388_v36  ;;  %v165_v43 = vmul.f32 %v5391_v37, %v5391_v37 }
  0x9d   :  { %v5398_v44 = vsub.f32 %v5288_v2, %v132_v40  ;;  %v5401_v45 = vsub.f32 %v5297_v5, %v134_v41  ;;  %v179_v46 = vsel %vm81_vm0, %v163_v42, 0.0  ;;  %v185_v49 = vsel %vm81_vm0, %v165_v43, 0.0 }
  0x9e   :  { %180 = vadd.xlane.f32.xlu0 %v179_v46  ;;  %v96_v47 = vpop.xlane.xlu0 %95  ;;  %v99_v48 = vpop.xlane.xlu1 %98 }
  0x9f   :  { %v135_v50 = vmul.f32 0.03125, %v96_v47  ;;  %v136_v51 = vmul.f32 0.03125, %v99_v48  ;;  %v164_v52 = vmul.f32 %v5398_v44, %v5398_v44  ;;  %v166_v53 = vmul.f32 %v5401_v45, %v5401_v45 }
  0xa1   :  { %v5410_v54 = vsub.f32 %v5306_v8, %v135_v50  ;;  %v5413_v55 = vsub.f32 %v5311_v9, %v136_v51  ;;  %v182_v56 = vsel %vm81_vm0, %v164_v52, 0.0  ;;  %v188_v59 = vsel %vm81_vm0, %v166_v53, 0.0 }
  0xa2   :  { %186 = vadd.xlane.f32.xlu0 %v185_v49  ;;  %183 = vadd.xlane.f32.xlu1 %v182_v56  ;;  %v102_v57 = vpop.xlane.xlu0 %101  ;;  %v105_v58 = vpop.xlane.xlu1 %104 }
  0xa3   :  { %v137_v60 = vmul.f32 0.03125, %v102_v57  ;;  %v138_v61 = vmul.f32 0.03125, %v105_v58  ;;  %v167_v62 = vmul.f32 %v5410_v54, %v5410_v54  ;;  %v168_v63 = vmul.f32 %v5413_v55, %v5413_v55 }
  0xa5   :  { %v5422_v3 = vsub.f32 %v5320_v12, %v137_v60  ;;  %v5425_v4 = vsub.f32 %v5325_v13, %v138_v61  ;;  %v191_v6 = vsel %vm81_vm0, %v167_v62, 0.0  ;;  %v194_v11 = vsel %vm81_vm0, %v168_v63, 0.0 }
  0xa6   :  { %189 = vadd.xlane.f32.xlu1 %v188_v59  ;;  %192 = vadd.xlane.f32.xlu0 %v191_v6  ;;  %v108_v7 = vpop.xlane.xlu0 %107  ;;  %v111_v10 = vpop.xlane.xlu1 %110 }
  0xa7   :  { %v139_v14 = vmul.f32 0.03125, %v108_v7  ;;  %v140_v15 = vmul.f32 0.03125, %v111_v10  ;;  %v169_v18 = vmul.f32 %v5422_v3, %v5422_v3  ;;  %v170_v19 = vmul.f32 %v5425_v4, %v5425_v4 }
  0xa9   :  { %v5434_v22 = vsub.f32 %v5334_v16, %v139_v14  ;;  %v5437_v23 = vsub.f32 %v5339_v17, %v140_v15  ;;  %v197_v26 = vsel %vm81_vm0, %v169_v18, 0.0  ;;  %v200_v31 = vsel %vm81_vm0, %v170_v19, 0.0  ;;  %v4756_v18 = vld [vmem:[%s8314_s10 + $0x8] sm:$0xff]   ;;  %v4757_v19 = vld [vmem:[%s8314_s10] sm:$0xff]  }
  0xaa   :  { %195 = vadd.xlane.f32.xlu1 %v194_v11  ;;  %198 = vadd.xlane.f32.xlu0 %v197_v26  ;;  %v114_v27 = vpop.xlane.xlu0 %113  ;;  %v117_v30 = vpop.xlane.xlu1 %116  ;;  %v595_v26 = vlaneseq }
  0xab   :  { %v141_v32 = vmul.f32 0.03125, %v114_v27  ;;  %v142_v33 = vmul.f32 0.03125, %v117_v30  ;;  %v171_v34 = vmul.f32 %v5434_v22, %v5434_v22  ;;  %v172_v35 = vmul.f32 %v5437_v23, %v5437_v23  ;;  %4556 = vmatprep.subr.bf16.mxu0 %v4756_v18  ;;  %4706 = vmatprep.subr.bf16.mxu1 %v4756_v18  ;;  %v799_v30 = vld [vmem:[%s8161_s5] sm:$0x7] }
  0xac   :  { %4557 = vmatpush3.bf16.msra.mxu0 %v4756_v18  ;;  %4708 = vmatpush3.bf16.msra.mxu1 %v4756_v18  ;;  %v5489_v27 = vshrl.u32 %v595_v26, 7 }
  0xad   :  { %v5446_v38 = vsub.f32 %v5348_v20, %v141_v32  ;;  %v5449_v39 = vsub.f32 %v5353_v21, %v142_v33  ;;  %v203_v40 = vsel %vm81_vm0, %v171_v34, 0.0  ;;  %v206_v43 = vsel %vm81_vm0, %v172_v35, 0.0  ;;  %4558 = vmatprep.subr.bf16.mxu0 %v4757_v19  ;;  %4707 = vmatprep.subr.bf16.mxu1 %v4757_v19 }
  0xae   :  { %201 = vadd.xlane.f32.xlu1 %v200_v31  ;;  %204 = vadd.xlane.f32.xlu0 %v203_v40  ;;  %v120_v41 = vpop.xlane.xlu0 %119  ;;  %v123_v42 = vpop.xlane.xlu1 %122  ;;  %8315 = vst [vmem:[#allocation23_spill] sm:$0xff] %v5489_v27  ;;  %v5495_v31 = vsub.s32 0, %v5489_v27  ;;  %v5498_v32 = vsub.s32 1, %v5489_v27  ;;  %v5501_v33 = vsub.s32 2, %v5489_v27 }
  0xaf   :  { %v143_v46 = vmul.f32 0.03125, %v120_v41  ;;  %v144_v47 = vmul.f32 0.03125, %v123_v42  ;;  %v173_v48 = vmul.f32 %v5446_v38, %v5446_v38  ;;  %v174_v49 = vmul.f32 %v5449_v39, %v5449_v39 }
  0xb0   :  { %4559 = vmatpush3.bf16.msra.mxu0 %v4757_v19  ;;  %4709 = vmatpush3.bf16.msra.mxu1 %v4757_v19  ;;  %8316 = vst [vmem:[#allocation24_spill] sm:$0xff] %v5495_v31  ;;  %8317 = vst [vmem:[#allocation25_spill] sm:$0xff] %v5498_v32  ;;  %v5504_v34 = vrot.slane %v799_v30, %v5495_v31  ;;  %v873_v35 = vrot.slane %v799_v30, %v5498_v32 }
  0xb1   :  { %v5458_v50 = vsub.f32 %v5362_v24, %v143_v46  ;;  %v5461_v51 = vsub.f32 %v5367_v25, %v144_v47  ;;  %v209_v52 = vsel %vm81_vm0, %v173_v48, 0.0  ;;  %v212_v57 = vsel %vm81_vm0, %v174_v49, 0.0  ;;  %8318 = vst [vmem:[#allocation26_spill] sm:$0xff] %v5501_v33 }
  0xb2   :  { %207 = vadd.xlane.f32.xlu1 %v206_v43  ;;  %210 = vadd.xlane.f32.xlu0 %v209_v52  ;;  %v126_v53 = vpop.xlane.xlu0 %125  ;;  %v129_v56 = vpop.xlane.xlu1 %128  ;;  %8319 = vst [vmem:[#allocation27_spill] sm:$0xff] %v5504_v34  ;;  %v977_v40 = vrot.slane %v799_v30, %v5501_v33 }
  0xb3   :  { %v145_v58 = vmul.f32 0.03125, %v126_v53  ;;  %v146_v59 = vmul.f32 0.03125, %v129_v56  ;;  %v175_v60 = vmul.f32 %v5458_v50, %v5458_v50  ;;  %v176_v61 = vmul.f32 %v5461_v51, %v5461_v51 }
  0xb5   :  { %v5470_v62 = vsub.f32 %v5376_v28, %v145_v58  ;;  %v5473_v63 = vsub.f32 %v5381_v29, %v146_v59  ;;  %v215_v6 = vsel %vm81_vm0, %v175_v60, 0.0  ;;  %v218_v7 = vsel %vm81_vm0, %v176_v61, 0.0 }
  0xb6   :  { %213 = vadd.xlane.f32.xlu1 %v212_v57  ;;  %216 = vadd.xlane.f32.xlu0 %v215_v6 }
  0xb7   :  { %v177_v10 = vmul.f32 %v5470_v62, %v5470_v62  ;;  %v178_v11 = vmul.f32 %v5473_v63, %v5473_v63 }
  0xb9   :  { %v221_v14 = vsel %vm81_vm0, %v177_v10, 0.0  ;;  %v224_v15 = vsel %vm81_vm0, %v178_v11, 0.0 }
  0xba   :  { %219 = vadd.xlane.f32.xlu1 %v218_v7  ;;  %222 = vadd.xlane.f32.xlu0 %v221_v14 }
  0xbe   :  { %225 = vadd.xlane.f32.xlu1 %v224_v15 }
  0xcf   :  { %875 = vrot.lane.b32.xlu1 %v873_v35, %s5170_s26 }
  0xd0   :  { %979 = vrot.lane.b32.xlu0 %v977_v40, %s5170_s26 }
 0x127   :  { %v181_v41 = vpop.xlane.xlu0 %180 }
 0x128   :  { %v227_v42 = vmul.f32 0.03125, %v181_v41 }
 0x12a   :  { %v243_v43 = vadd.f32 1e-05, %v227_v42  ;;  %v5511_v42 = vld [vmem:[%s8162_s1] ss:$0 sm:$0xff] }
 0x12b   :  { %v184_v46 = vpop.xlane.xlu1 %183  ;;  %v187_v47 = vpop.xlane.xlu0 %186 }
 0x12c   :  { %4760 = vrsqrt.f32 %v243_v43  ;;  %v228_v48 = vmul.f32 0.03125, %v184_v46  ;;  %v229_v49 = vmul.f32 0.03125, %v187_v47 }
 0x12e   :  { %v244_v52 = vadd.f32 1e-05, %v228_v48  ;;  %v245_v53 = vadd.f32 1e-05, %v229_v49 }
 0x12f   :  { %v190_v56 = vpop.xlane.xlu1 %189  ;;  %v193_v57 = vpop.xlane.xlu0 %192 }
 0x130   :  { %4762 = vrsqrt.f32 %v244_v52  ;;  %v230_v58 = vmul.f32 0.03125, %v190_v56  ;;  %v231_v59 = vmul.f32 0.03125, %v193_v57 }
 0x131   :  { %4764 = vrsqrt.f32 %v245_v53 }
 0x132   :  { %v246_v60 = vadd.f32 1e-05, %v230_v58  ;;  %v247_v61 = vadd.f32 1e-05, %v231_v59  ;;  %v5518_v59 = vld [vmem:[%s8163_s2] ss:$0 sm:$0xff] }
 0x133   :  { %v196_v6 = vpop.xlane.xlu1 %195  ;;  %v199_v7 = vpop.xlane.xlu0 %198 }
 0x134   :  { %4766 = vrsqrt.f32 %v246_v60  ;;  %v232_v10 = vmul.f32 0.03125, %v196_v6  ;;  %v233_v11 = vmul.f32 0.03125, %v199_v7 }
 0x135   :  { %4768 = vrsqrt.f32 %v247_v61 }
 0x136   :  { %v248_v14 = vadd.f32 1e-05, %v232_v10  ;;  %v249_v15 = vadd.f32 1e-05, %v233_v11 }
 0x137   :  { %v202_v18 = vpop.xlane.xlu1 %201  ;;  %v205_v19 = vpop.xlane.xlu0 %204 }
 0x138   :  { %4770 = vrsqrt.f32 %v248_v14  ;;  %v234_v26 = vmul.f32 0.03125, %v202_v18  ;;  %v235_v30 = vmul.f32 0.03125, %v205_v19 }
 0x139   :  { %v4761_v35 = vpop.eup %4760  ;;  %4772 = vrsqrt.f32 %v249_v15 }
 0x13a   :  { %v250_v40 = vadd.f32 1e-05, %v234_v26  ;;  %v251_v41 = vadd.f32 1e-05, %v235_v30  ;;  %v275_v43 = vmul.f32 %v4761_v35, %v5388_v36 }
 0x13b   :  { %v208_v46 = vpop.xlane.xlu1 %207  ;;  %v211_v47 = vpop.xlane.xlu0 %210 }
 0x13c   :  { %4774 = vrsqrt.f32 %v250_v40  ;;  %v236_v48 = vmul.f32 0.03125, %v208_v46  ;;  %v237_v49 = vmul.f32 0.03125, %v211_v47  ;;  %v297_v53 = vmul.f32 %v5511_v42, %v275_v43 }
 0x13d   :  { %v4763_v52 = vpop.eup %4762  ;;  %4776 = vrsqrt.f32 %v251_v41 }
 0x13e   :  { %v4765_v56 = vpop.eup %4764  ;;  %v252_v57 = vadd.f32 1e-05, %v236_v48  ;;  %v253_v58 = vadd.f32 1e-05, %v237_v49  ;;  %v276_v60 = vmul.f32 %v4763_v52, %v5398_v44  ;;  %v319_v15 = vadd.f32 %v5518_v59, %v297_v53 }
 0x13f   :  { %v214_v36 = vpop.xlane.xlu1 %213  ;;  %v217_v61 = vpop.xlane.xlu0 %216  ;;  %v277_v6 = vmul.f32 %v4765_v56, %v5391_v37 }
 0x140   :  { %4778 = vrsqrt.f32 %v252_v57  ;;  %v238_v7 = vmul.f32 0.03125, %v214_v36  ;;  %v239_v10 = vmul.f32 0.03125, %v217_v61  ;;  %v298_v11 = vmul.f32 %v5511_v42, %v276_v60 }
 0x141   :  { %v4767_v14 = vpop.eup %4766  ;;  %4780 = vrsqrt.f32 %v253_v58  ;;  %v299_v37 = vmul.f32 %v5511_v42, %v277_v6 }
 0x142   :  { %v4769_v18 = vpop.eup %4768  ;;  %v254_v19 = vadd.f32 1e-05, %v238_v7  ;;  %v255_v26 = vadd.f32 1e-05, %v239_v10  ;;  %v320_v30 = vadd.f32 %v5518_v59, %v298_v11  ;;  %v278_v44 = vmul.f32 %v4767_v14, %v5401_v45 }
 0x143   :  { %v220_v35 = vpop.xlane.xlu1 %219  ;;  %v223_v40 = vpop.xlane.xlu0 %222  ;;  %v279_v41 = vmul.f32 %v4769_v18, %v5410_v54  ;;  %v321_v54 = vadd.f32 %v5518_v59, %v299_v37 }
 0x144   :  { %4782 = vrsqrt.f32 %v254_v19  ;;  %v240_v43 = vmul.f32 0.03125, %v220_v35  ;;  %v241_v46 = vmul.f32 0.03125, %v223_v40  ;;  %v335_v47 = vpack.c.bf16 %v320_v30, %v319_v15 }
 0x145   :  { %v4771_v48 = vpop.eup %4770  ;;  %4784 = vrsqrt.f32 %v255_v26  ;;  %v300_v49 = vmul.f32 %v5511_v42, %v278_v44  ;;  %v301_v52 = vmul.f32 %v5511_v42, %v279_v41 }
 0x146   :  { %v4773_v53 = vpop.eup %4772  ;;  %v256_v56 = vadd.f32 1e-05, %v240_v43  ;;  %v257_v57 = vadd.f32 1e-05, %v241_v46  ;;  %4560 = vmatprep.mubr.msk.bf16.mxu0 %vm81_vm0, %v335_v47  ;;  %v280_v45 = vmul.f32 %v4771_v48, %v5413_v55 }
 0x147   :  { %v226_v58 = vpop.xlane.xlu1 %225  ;;  %v322_v60 = vadd.f32 %v5518_v59, %v300_v49  ;;  %v281_v36 = vmul.f32 %v4773_v53, %v5422_v3  ;;  %v323_v11 = vadd.f32 %v5518_v59, %v301_v52 }
 0x148   :  { %4786 = vrsqrt.f32 %v256_v56  ;;  %v242_v61 = vmul.f32 0.03125, %v226_v58  ;;  %v302_v6 = vmul.f32 %v5511_v42, %v280_v45 }
 0x149   :  { %v4775_v7 = vpop.eup %4774  ;;  %4788 = vrsqrt.f32 %v257_v57  ;;  %v336_v10 = vpack.c.bf16 %v322_v60, %v321_v54  ;;  %v303_v19 = vmul.f32 %v5511_v42, %v281_v36 }
 0x14a   :  { %v4777_v14 = vpop.eup %4776  ;;  %v258_v15 = vadd.f32 1e-05, %v242_v61  ;;  %v324_v55 = vadd.f32 %v5518_v59, %v302_v6  ;;  %v282_v18 = vmul.f32 %v4775_v7, %v5425_v4 }
 0x14b   :  { %4561 = vmatmul.mubr.msk.bf16.vlgmr.msra.gmra.mxu0 %vm81_vm0, %v336_v10  ;;  %v283_v3 = vmul.f32 %v4777_v14, %v5434_v22  ;;  %v325_v40 = vadd.f32 %v5518_v59, %v303_v19 }
 0x14c   :  { %4790 = vrsqrt.f32 %v258_v15  ;;  %v337_v26 = vpack.c.bf16 %v324_v55, %v323_v11  ;;  %v304_v30 = vmul.f32 %v5511_v42, %v282_v18 }
 0x14d   :  { %v4779_v44 = vpop.eup %4778  ;;  %v305_v41 = vmul.f32 %v5511_v42, %v283_v3  ;;  %v4758_v3 = vld [vmem:[%s8164_s6 + $0x8] sm:$0xff]  }
 0x14e   :  { %v4781_v35 = vpop.eup %4780  ;;  %4564 = vmatprep.mubr.msk.bf16.mxu0 %vm81_vm0, %v337_v26  ;;  %v326_v37 = vadd.f32 %v5518_v59, %v304_v30  ;;  %v284_v4 = vmul.f32 %v4779_v44, %v5437_v23  ;;  %4576 = vmatprep.subr.bf16.mxu1 %v4758_v3  ;;  %v480_v30 = vld [vmem:[%s8165_s4] sm:$0x7] }
 0x14f   :  { %v285_v43 = vmul.f32 %v4781_v35, %v5446_v38  ;;  %v327_v49 = vadd.f32 %v5518_v59, %v305_v41  ;;  %v5592_v35 = vrot.slane %v480_v30, %v5495_v31 }
 0x150   :  { %v338_v46 = vpack.c.bf16 %v326_v37, %v325_v40  ;;  %v306_v22 = vmul.f32 %v5511_v42, %v284_v4 }
 0x151   :  { %v4783_v47 = vpop.eup %4782  ;;  %v307_v56 = vmul.f32 %v5511_v42, %v285_v43  ;;  %v5604_v43 = vrot.slane %v480_v30, %v5498_v32 }
 0x152   :  { %v4785_v48 = vpop.eup %4784  ;;  %v328_v52 = vadd.f32 %v5518_v59, %v306_v22  ;;  %v286_v53 = vmul.f32 %v4783_v47, %v5449_v39 }
 0x153   :  { %4565 = vmatmul.mubr.msk.bf16.gmra.mxu0 %vm81_vm0, %v338_v46  ;;  %v287_v23 = vmul.f32 %v4785_v48, %v5458_v50  ;;  %v329_v54 = vadd.f32 %v5518_v59, %v307_v56 }
 0x154   :  { %v339_v57 = vpack.c.bf16 %v328_v52, %v327_v49  ;;  %v308_v38 = vmul.f32 %v5511_v42, %v286_v53 }
 0x155   :  { %v4787_v45 = vpop.eup %4786  ;;  %v309_v39 = vmul.f32 %v5511_v42, %v287_v23  ;;  %v5624_v23 = vrot.slane %v480_v30, %v5501_v33 }
 0x156   :  { %v4789_v58 = vpop.eup %4788  ;;  %4568 = vmatprep.mubr.msk.bf16.mxu1 %vm81_vm0, %v339_v57  ;;  %v330_v60 = vadd.f32 %v5518_v59, %v308_v38  ;;  %v288_v36 = vmul.f32 %v4787_v45, %v5461_v51 }
 0x157   :  { %v289_v61 = vmul.f32 %v4789_v58, %v5470_v62  ;;  %v331_v10 = vadd.f32 %v5518_v59, %v309_v39 }
 0x158   :  { %v340_v6 = vpack.c.bf16 %v330_v60, %v329_v54  ;;  %v310_v50 = vmul.f32 %v5511_v42, %v288_v36 }
 0x159   :  { %v4791_v7 = vpop.eup %4790  ;;  %v311_v15 = vmul.f32 %v5511_v42, %v289_v61 }
 0x15a   :  { %4569 = vmatmul.mubr.msk.bf16.vlgmr.msra.gmra.mxu1 %vm81_vm0, %v340_v6  ;;  %v332_v11 = vadd.f32 %v5518_v59, %v310_v50  ;;  %v290_v14 = vmul.f32 %v4791_v7, %v5473_v63  ;;  %v4759_v63 = vld [vmem:[%s8164_s6] sm:$0xff]  }
 0x15b   :  { %v333_v62 = vadd.f32 %v5518_v59, %v311_v15  ;;  %4577 = vmatpush3.bf16.msra.mxu1 %v4758_v3 }
 0x15c   :  { %v341_v55 = vpack.c.bf16 %v332_v11, %v331_v10  ;;  %v312_v51 = vmul.f32 %v5511_v42, %v290_v14  ;;  %4578 = vmatprep.subr.bf16.mxu1 %v4759_v63  ;;  %v5580_v42 = vpop.permute.xlu1 %875 }
 0x15e   :  { %4572 = vmatprep.mubr.msk.bf16.mxu1 %vm81_vm0, %v341_v55  ;;  %v334_v18 = vadd.f32 %v5518_v59, %v312_v51 }
 0x15f   :  { %4579 = vmatpush3.bf16.msra.mxu1 %v4759_v63 }
 0x160   :  { %v342_v19 = vpack.c.bf16 %v334_v18, %v333_v62 }
 0x162   :  { %4573 = vmatmul.mubr.msk.bf16.gmra.mxu1 %vm81_vm0, %v342_v19 }
 0x20b   :  { %v5582_v26 = vpop.f32.mrf.mxu0 }
 0x20c   :  { %v880_v59 = vmul.f32 %v5582_v26, %v5580_v42  ;;  %v8173_v46 = vrot.slane %v5582_v26, 7 }
 0x20d   :  { %v5589_v44 = vpop.f32.mrf.mxu0 }
 0x20e   :  { %914 = vrot.lane.b32.xlu0 %v880_v59, %s5171_s20  ;;  %v5596_v40 = vrot.slane %v5589_v44, 7  ;;  %v619_v52 = vmul.f32 %v5604_v43, %v5589_v44  ;;  %v547_v60 = vrot.slane %v5589_v44, 1 }
 0x20f   :  { %v5598_v37 = vpop.f32.mrf.mxu0 }
 0x210   :  { %v503_v4 = vrot.slane %v5598_v37, 7  ;;  %v881_v41 = vmul.f32 %v5598_v37, %v5580_v42  ;;  %v544_v47 = vsel %vm497_vm1, 0.0, %v5596_v40  ;;  %v622_v57 = vmul.f32 %v5598_v37, %v5604_v43 }
 0x211   :  { %v5607_v22 = vpop.f32.mrf.mxu0  ;;  %v599_v49 = vmul.f32 %v5592_v35, %v544_v47  ;;  %v552_v36 = vrot.slane %v5598_v37, 1 }
 0x212   :  { %v8172_v48 = vrot.slane %v5607_v22, 7  ;;  %916 = vrot.lane.b32.xlu1 %v881_v41, %s5171_s20  ;;  %v5621_v56 = vsel %vm497_vm1, %v8173_v46, %v503_v4  ;;  %v548_v61 = vrot.slane %v5607_v22, 1  ;;  %v620_v6 = vmul.f32 %v5604_v43, %v5607_v22 }
 0x213   :  { %v5616_v53 = vpop.f32.mrf.mxu0  ;;  %v5630_v45 = vadd.f32 %v619_v52, %v599_v49  ;;  %v602_v58 = vmul.f32 %v5592_v35, %v5621_v56 }
 0x214   :  { %v5638_v54 = vsel %vm497_vm1, %v5596_v40, %v8172_v48  ;;  %v509_v11 = vrot.slane %v5616_v53, 7  ;;  %v558_v51 = vrot.slane %v5616_v53, 1  ;;  %v625_v63 = vmul.f32 %v5616_v53, %v5604_v43 }
 0x215   :  { %v5628_v38 = vpop.f32.mrf.mxu0  ;;  %v5648_v7 = vadd.f32 %v622_v57, %v602_v58  ;;  %v600_v10 = vmul.f32 %v5592_v35, %v5638_v54 }
 0x216   :  { %v505_v39 = vrot.slane %v5628_v38, 7  ;;  %v623_v18 = vmul.f32 %v5604_v43, %v5628_v38  ;;  %v554_v41 = vrot.slane %v5628_v38, 1 }
 0x217   :  { %v5646_v50 = vpop.f32.mrf.mxu0  ;;  %v5665_v3 = vadd.f32 %v620_v6, %v600_v10 }
 0x218   :  { %v5654_v14 = vsel %vm497_vm1, %v503_v4, %v505_v39  ;;  %v511_v15 = vrot.slane %v5646_v50, 7  ;;  %v560_v55 = vrot.slane %v5646_v50, 1  ;;  %v626_v52 = vmul.f32 %v5646_v50, %v5604_v43 }
 0x219   :  { %v603_v62 = vmul.f32 %v5592_v35, %v5654_v14  ;;  %v5663_v19 = vpop.f32.mrf.mxu0 }
 0x21a   :  { %8320 = vst [vmem:[#allocation28_spill] sm:$0xff] %v5663_v19  ;;  %v5670_v59 = vsel %vm497_vm1, %v509_v11, %v511_v15  ;;  %v5673_v30 = vsel %vm546_vm2, %v560_v55, 0.0  ;;  %v507_v37 = vrot.slane %v5663_v19, 7  ;;  %v5676_v4 = vpop.f32.mrf.mxu1  ;;  %v556_v10 = vrot.slane %v5663_v19, 1 }
 0x21b   :  { %8321 = vst [vmem:[#allocation29_spill] sm:$0xff] %v5673_v30  ;;  %v5679_v47 = vadd.f32 %v623_v18, %v603_v62  ;;  %v606_v49 = vmul.f32 %v5592_v35, %v5670_v59  ;;  %v662_v57 = vmul.f32 %v5624_v23, %v5673_v30  ;;  %v624_v46 = vmul.f32 %v5604_v43, %v5663_v19 }
 0x21c   :  { %v5688_v58 = vsel %vm497_vm1, %v505_v39, %v507_v37  ;;  %v5691_v6 = vsel %vm497_vm1, %v507_v37, %v509_v11  ;;  %v5694_v15 = vpop.f32.mrf.mxu1  ;;  %v550_v39 = vrot.slane %v5582_v26, 1  ;;  %v5704_v29 = vsel %vm546_vm2, %v556_v10, %v558_v51 }
 0x21d   :  { %8322 = vst [vmem:[#allocation30_spill] sm:$0xff] %v5688_v58  ;;  %8323 = vst [vmem:[#allocation31_spill] sm:$0xff] %v5691_v6  ;;  %v642_v62 = vadd.f32 %v626_v52, %v606_v49  ;;  %v604_v18 = vmul.f32 %v5592_v35, %v5688_v58  ;;  %v605_v48 = vmul.f32 %v5592_v35, %v5691_v6  ;;  %v513_v13 = vrot.slane %v5694_v15, 7 }
 0x21e   :  { %8324 = vst [vmem:[#allocation32_spill] sm:$0xff] %v5704_v29  ;;  %v5706_v11 = vpop.f32.mrf.mxu1  ;;  %v5709_v37 = vsel %vm546_vm2, %v547_v60, %v548_v61  ;;  %v660_v28 = vmul.f32 %v5624_v23, %v5704_v29  ;;  %v888_v24 = vmul.f32 %v5676_v4, %v5580_v42  ;;  %v5722_v17 = vsel %vm546_vm2, %v548_v61, %v550_v39 }
 0x21f   :  { %v5711_v49 = vadd.f32 %v662_v57, %v642_v62  ;;  %v640_v52 = vadd.f32 %v624_v46, %v604_v18  ;;  %v5713_v25 = vadd.f32 %v625_v63, %v605_v48  ;;  %v5725_v20 = vsel %vm546_vm2, %v550_v39, %v552_v36 }
 0x220   :  { %v5719_v21 = vpop.f32.mrf.mxu1  ;;  %v5729_v60 = vmul.f32 %v5582_v26, %v5604_v43  ;;  %v518_v46 = vrot.slane %v5706_v11, 7  ;;  %v5733_v48 = vsel %vm546_vm2, %v552_v36, %v554_v41  ;;  %v5737_v63 = vmul.f32 %v5624_v23, %v5709_v37  ;;  %930 = vrot.lane.b32.xlu0 %v888_v24, %s5171_s20 }
 0x221   :  { %v5739_v57 = vadd.f32 %v660_v28, %v640_v52  ;;  %v878_v62 = vmul.f32 %v5580_v42, %v5589_v44  ;;  %v5748_v18 = vmul.f32 %v5580_v42, %v5607_v22  ;;  %v516_v36 = vrot.slane %v5676_v4, 7 }
 0x222   :  { %v5742_v61 = vpop.f32.mrf.mxu1  ;;  %v889_v39 = vmul.f32 %v5706_v11, %v5580_v42  ;;  %v656_v28 = vmul.f32 %v5624_v23, %v5722_v17  ;;  %v5757_v24 = vmul.f32 %v5624_v23, %v5725_v20  ;;  %v5760_v52 = vsel %vm546_vm2, %v558_v51, %v560_v55 }
 0x223   :  { %v5763_v44 = vsel %vm546_vm2, %v554_v41, %v556_v10  ;;  %v658_v9 = vmul.f32 %v5624_v23, %v5733_v48  ;;  %v629_v8 = vmul.f32 %v5676_v4, %v5604_v43  ;;  %v519_v51 = vsel %vm497_vm1, %v516_v36, %v518_v46 }
 0x224   :  { %v5765_v16 = vpop.f32.mrf.mxu1  ;;  %932 = vrot.lane.b32.xlu1 %v889_v39, %s5171_s20  ;;  %v627_v41 = vmul.f32 %v5604_v43, %v5694_v15  ;;  %800 = vrot.lane.b32.xlu0 %v5596_v40, %s5171_s20  ;;  %v545_v2 = vsel %vm497_vm1, 0.0, %v513_v13  ;;  %v567_v39 = vrot.slane %v5706_v11, 1  ;;  %v610_v27 = vmul.f32 %v5592_v35, %v519_v51 }
 0x225   :  { %v520_v55 = vrot.slane %v5765_v16, 7  ;;  %v5783_v12 = vadd.f32 %v658_v9, %v5648_v7  ;;  %v607_v1 = vmul.f32 %v5592_v35, %v545_v2  ;;  %v630_v40 = vmul.f32 %v5706_v11, %v5604_v43 }
 0x226   :  { %v5785_v5 = vpop.f32.mrf.mxu1  ;;  %v514_v10 = vrot.slane %v5719_v21, 7  ;;  %v631_v7 = vmul.f32 %v5604_v43, %v5765_v16  ;;  %v8204_v31 = vrot.slane %v5742_v61, 7  ;;  %v8205_v32 = vrot.slane %v5742_v61, 1 }
 0x227   :  { %v5789_v0 = vsel %vm497_vm1, %v518_v46, %v520_v55  ;;  %v4391_v46 = vmul.f32 -1.442695, %v5739_v57  ;;  %v5804_v2 = vadd.f32 %v627_v41, %v607_v1  ;;  %v8326_v30 = vrot.slane %v5765_v16, 1 }
 0x228   :  { %v611_v9 = vmul.f32 %v5592_v35, %v5789_v0  ;;  %v5800_v33 = vpop.f32.mrf.mxu1  ;;  %806 = vrot.lane.b32.xlu1 %v5621_v56, %s5171_s20  ;;  %816 = vrot.lane.b32.xlu0 %v513_v13, %s5171_s20  ;;  %v633_v1 = vmul.f32 %v5742_v61, %v5604_v43  ;;  %v4389_v6 = vmul.f32 -1.442695, %v5783_v12 }
 0x229   :  { %8325 = vst [vmem:[#allocation33_spill] sm:$0xff] %v5800_v33  ;;  %v522_v11 = vrot.slane %v5800_v33, 7  ;;  %v571_v29 = vrot.slane %v5800_v33, 1  ;;  %v5817_v58 = vsel %vm546_vm2, %v567_v39, %v8326_v30  ;;  %4792 = vpow2.f32 %v4391_v46 }
 0x22a   :  { %v5810_v34 = vadd.f32 %v631_v7, %v611_v9  ;;  %v646_v9 = vadd.f32 %v630_v40, %v610_v27  ;;  %v666_v40 = vmul.f32 %v5624_v23, %v5817_v58  ;;  %v517_v46 = vsel %vm497_vm1, %v514_v10, %v516_v36 }
 0x22b   :  { %v5822_v56 = vsel %vm497_vm1, %v520_v55, %v522_v11  ;;  %v5827_v41 = vsel %vm497_vm1, %v522_v11, %v8204_v31  ;;  %v5832_v7 = vsel %vm546_vm2, %v571_v29, %v8205_v32  ;;  %v632_v55 = vmul.f32 %v5604_v43, %v5800_v33 }
 0x22c   :  { %8327 = vst [vmem:[#allocation34_spill] sm:$0xff] %v5822_v56  ;;  %8328 = vst [vmem:[#allocation35_spill] sm:$0xff] %v5832_v7  ;;  %v612_v30 = vmul.f32 %v5592_v35, %v5822_v56  ;;  %v613_v19 = vmul.f32 %v5592_v35, %v5827_v41  ;;  %v668_v27 = vmul.f32 %v5624_v23, %v5832_v7  ;;  %822 = vrot.lane.b32.xlu1 %v519_v51, %s5171_s20 }
 0x22d   :  { %910 = vrot.lane.b32.xlu0 %v878_v62, %s5171_s20  ;;  %v886_v32 = vmul.f32 %v5580_v42, %v5694_v15  ;;  %v5852_v56 = vadd.f32 %v666_v40, %v646_v9  ;;  %v609_v33 = vmul.f32 %v5592_v35, %v517_v46  ;;  %v5856_v7 = vadd.f32 %v656_v28, %v5665_v3 }
 0x22e   :  { %v648_v11 = vadd.f32 %v632_v55, %v612_v30  ;;  %v5846_v31 = vadd.f32 %v633_v1, %v613_v19  ;;  %v8329_v51 = vrot.slane %v5582_v26, 7  ;;  %v8330_v30 = vrot.slane %v5607_v22, 7 }
 0x22f   :  { %v8331_v55 = vrot.slane %v5676_v4, 1  ;;  %v5870_v9 = vsel %vm497_vm1, %v513_v13, %v514_v10  ;;  %v4393_v3 = vmul.f32 -1.442695, %v5711_v49  ;;  %v659_v26 = vmul.f32 %v5624_v23, %v5763_v44 }
 0x230   :  { %v502_v19 = vsel %vm497_vm1, %v8330_v30, %v8329_v51  ;;  %v5863_v1 = vadd.f32 %v668_v27, %v648_v11  ;;  %v563_v22 = vrot.slane %v5719_v21, 1  ;;  %912 = vrot.lane.b32.xlu1 %v5748_v18, %s5171_s20  ;;  %v645_v28 = vadd.f32 %v629_v8, %v609_v33  ;;  %v5878_v27 = vpop.permute.xlu0 %979 }
 0x231   :  { %v601_v62 = vmul.f32 %v5592_v35, %v502_v19  ;;  %v568_v36 = vsel %vm546_vm2, %v8331_v55, %v567_v39  ;;  %v628_v40 = vmul.f32 %v5604_v43, %v5719_v21  ;;  %4794 = vpow2.f32 %v4389_v6  ;;  %926 = vrot.lane.b32.xlu0 %v886_v32, %s5171_s20 }
 0x232   :  { %v665_v10 = vmul.f32 %v5624_v23, %v568_v36  ;;  %v887_v39 = vmul.f32 %v5580_v42, %v5719_v21  ;;  %v4387_v11 = vmul.f32 -1.442695, %v5856_v7  ;;  %v608_v8 = vmul.f32 %v5592_v35, %v5870_v9 }
 0x233   :  { %v637_v13 = vadd.f32 %v5729_v60, %v601_v62  ;;  %v5892_v33 = vadd.f32 %v5737_v63, %v5630_v45  ;;  %v575_v6 = vrot.slane %v5785_v5, 1  ;;  %v984_v21 = vmul.f32 %v5878_v27, %v5725_v20 }
 0x234   :  { %v5898_v60 = vadd.f32 %v665_v10, %v645_v28  ;;  %928 = vrot.lane.b32.xlu1 %v887_v39, %s5171_s20  ;;  %v644_v18 = vadd.f32 %v628_v40, %v608_v8  ;;  %v661_v51 = vmul.f32 %v5624_v23, %v5760_v52  ;;  %4796 = vpow2.f32 %v4393_v3 }
 0x235   :  { %v5896_v32 = vadd.f32 %v5757_v24, %v637_v13  ;;  %v8332_v45 = vrot.slane %v5765_v16, 1  ;;  %820 = vrot.lane.b32.xlu0 %v517_v46, %s5171_s20  ;;  %4798 = vpow2.f32 %v4387_v11  ;;  %v4386_v30 = vmul.f32 -1.442695, %v5892_v33 }
 0x236   :  { %v8333_v62 = vmov %v8331_v55  ;;  %v5919_v55 = vadd.f32 %v659_v26, %v5679_v47  ;;  %v562_v3 = vrot.slane %v5694_v15, 1  ;;  %v526_v40 = vrot.slane %v5785_v5, 7  ;;  %v4793_v26 = vpop.eup %4792 }
 0x237   :  { %v5908_v63 = vsel %vm546_vm2, %v8332_v45, %v571_v29  ;;  %v4388_v24 = vmul.f32 -1.442695, %v5896_v32  ;;  %v5916_v20 = vsel %vm546_vm2, %v563_v22, %v8333_v62  ;;  %v8334_v29 = vrot.slane %v5742_v61, 1 }
 0x238   :  { %v664_v46 = vmul.f32 %v5624_v23, %v5916_v20  ;;  %v634_v4 = vmul.f32 %v5785_v5, %v5604_v43  ;;  %802 = vrot.lane.b32.xlu1 %v5638_v54, %s5171_s20  ;;  %v4390_v47 = vmul.f32 -1.442695, %v5919_v55  ;;  %v5936_v15 = vadd.f32 %v661_v51, %v5713_v25 }
 0x239   :  { %v5925_v28 = vsel %vm546_vm2, %v8334_v29, %v575_v6  ;;  %4800 = vpow2.f32 %v4388_v24  ;;  %v5939_v13 = vsel %vm546_vm2, %v575_v6, 0.0  ;;  %v667_v10 = vmul.f32 %v5624_v23, %v5908_v63  ;;  %1018 = vrot.lane.b32.xlu0 %v984_v21, %s5171_s20 }
 0x23a   :  { %v5944_v39 = vadd.f32 %v664_v46, %v644_v18  ;;  %v5947_v43 = vsel %vm546_vm2, %v562_v3, %v563_v22  ;;  %v669_v54 = vmul.f32 %v5624_v23, %v5925_v28  ;;  %4802 = vpow2.f32 %v4386_v30 }
 0x23b   :  { %v4392_v25 = vmul.f32 -1.442695, %v5936_v15  ;;  %v663_v11 = vmul.f32 %v5624_v23, %v5947_v43  ;;  %v4399_v8 = vmul.f32 -1.442695, %v5863_v1  ;;  %v992_v6 = vmul.f32 %v5878_v27, %v568_v36 }
 0x23c   :  { %v4395_v21 = vmul.f32 -1.442695, %v5944_v39  ;;  %4804 = vpow2.f32 %v4390_v47  ;;  %v4397_v18 = vmul.f32 -1.442695, %v5852_v56  ;;  %804 = vrot.lane.b32.xlu1 %v502_v19, %s5171_s20  ;;  %v8335_v51 = vrot.slane %v5742_v61, 7 }
 0x23d   :  { %4806 = vpow2.f32 %v4392_v25  ;;  %v5960_v22 = vadd.f32 %v663_v11, %v5804_v2  ;;  %1034 = vrot.lane.b32.xlu0 %v992_v6, %s5171_s20  ;;  %v5971_v24 = vadd.f32 %v667_v10, %v5810_v34  ;;  %v5974_v19 = vadd.f32 %v669_v54, %v5846_v31 }
 0x23e   :  { %v5965_v45 = vsel %vm497_vm1, %v8335_v51, %v526_v40  ;;  %4808 = vpow2.f32 %v4395_v21  ;;  %v4795_v30 = vpop.eup %4794  ;;  %v740_v2 = vadd.f32 1.0, %v4793_v26  ;;  %v884_v62 = vmul.f32 %v5616_v53, %v5580_v42 }
 0x23f   :  { %v614_v36 = vmul.f32 %v5592_v35, %v5965_v45  ;;  %v4394_v3 = vmul.f32 -1.442695, %v5960_v22  ;;  %4810 = vpow2.f32 %v4399_v8  ;;  %v4396_v29 = vmul.f32 -1.442695, %v5898_v60 }
 0x240   :  { %v670_v35 = vmul.f32 %v5624_v23, %v5939_v13  ;;  %818 = vrot.lane.b32.xlu1 %v5870_v9, %s5171_s20  ;;  %v4398_v31 = vmul.f32 -1.442695, %v5971_v24  ;;  %v738_v34 = vadd.f32 1.0, %v4795_v30  ;;  %v892_v23 = vmul.f32 %v5742_v61, %v5580_v42 }
 0x241   :  { %v650_v46 = vadd.f32 %v634_v4, %v614_v36  ;;  %4812 = vpow2.f32 %v4394_v3  ;;  %922 = vrot.lane.b32.xlu0 %v884_v62, %s5171_s20  ;;  %v4797_v40 = vpop.eup %4796  ;;  %v983_v4 = vmul.f32 %v5878_v27, %v5722_v17  ;;  %v4400_v54 = vmul.f32 -1.442695, %v5974_v19 }
 0x242   :  { %4814 = vpow2.f32 %v4397_v18  ;;  %v4799_v47 = vpop.eup %4798  ;;  %v991_v17 = vmul.f32 %v5878_v27, %v5916_v20  ;;  %v982_v61 = vmul.f32 %v5878_v27, %v5709_v37  ;;  %v885_v20 = vmul.f32 %v5646_v50, %v5580_v42 }
 0x243   :  { %v5986_v53 = vadd.f32 %v670_v35, %v650_v46  ;;  %4816 = vrcp.f32 %v740_v2  ;;  %v736_v26 = vadd.f32 1.0, %v4799_v47  ;;  %v990_v37 = vmul.f32 %v5878_v27, %v5947_v43 }
 0x244   :  { %4818 = vpow2.f32 %v4396_v29  ;;  %1016 = vrot.lane.b32.xlu1 %v983_v4, %s5171_s20  ;;  %v742_v3 = vadd.f32 1.0, %v4797_v40  ;;  %v893_v50 = vmul.f32 %v5785_v5, %v5580_v42  ;;  %v890_v5 = vmul.f32 %v5580_v42, %v5765_v16 }
 0x245   :  { %4820 = vpow2.f32 %v4398_v31  ;;  %938 = vrot.lane.b32.xlu0 %v892_v23, %s5171_s20  ;;  %v4401_v18 = vmul.f32 -1.442695, %v5986_v53  ;;  %v882_v31 = vmul.f32 %v5580_v42, %v5628_v38 }
 0x246   :  { %v4801_v9 = vpop.eup %4800  ;;  %4822 = vrcp.f32 %v738_v34 }
 0x247   :  { %v737_v10 = vadd.f32 1.0, %v4801_v9  ;;  %4824 = vrcp.f32 %v736_v26  ;;  %v4803_v25 = vpop.eup %4802 }
 0x248   :  { %v735_v8 = vadd.f32 1.0, %v4803_v25  ;;  %1032 = vrot.lane.b32.xlu1 %v991_v17, %s5171_s20 }
 0x249   :  { %4826 = vrcp.f32 %v737_v10  ;;  %v4805_v11 = vpop.eup %4804  ;;  %1014 = vrot.lane.b32.xlu0 %v982_v61, %s5171_s20 }
 0x24a   :  { %v4807_v6 = vpop.eup %4806  ;;  %v739_v21 = vadd.f32 1.0, %v4805_v11  ;;  %4828 = vpow2.f32 %v4400_v54 }
 0x24b   :  { %v4809_v51 = vpop.eup %4808  ;;  %4830 = vrcp.f32 %v735_v8  ;;  %v741_v30 = vadd.f32 1.0, %v4807_v6 }
 0x24c   :  { %v744_v36 = vadd.f32 1.0, %v4809_v51  ;;  %4832 = vrcp.f32 %v739_v21  ;;  %v4811_v2 = vpop.eup %4810  ;;  %924 = vrot.lane.b32.xlu1 %v885_v20, %s5171_s20  ;;  %v993_v51 = vmul.f32 %v5878_v27, %v5817_v58 }
 0x24d   :  { %1030 = vrot.lane.b32.xlu0 %v990_v37, %s5171_s20  ;;  %4834 = vpow2.f32 %v4401_v18  ;;  %v748_v47 = vadd.f32 1.0, %v4811_v2  ;;  %v8347_v37 = vld [vmem:[#allocation28_spill] sm:$0xff] }
 0x24e   :  { %v4813_v62 = vpop.eup %4812  ;;  %4836 = vrcp.f32 %v744_v36 }
 0x24f   :  { %v4815_v29 = vpop.eup %4814  ;;  %v743_v46 = vadd.f32 1.0, %v4813_v62  ;;  %4838 = vrcp.f32 %v741_v30  ;;  %v8346_v30 = vld [vmem:[#allocation31_spill] sm:$0xff] }
 0x250   :  { %v4817_v35 = vpop.eup %4816  ;;  %940 = vrot.lane.b32.xlu1 %v893_v50, %s5171_s20  ;;  %v746_v40 = vadd.f32 1.0, %v4815_v29 }
 0x251   :  { %v4819_v43 = vpop.eup %4818  ;;  %4840 = vrcp.f32 %v743_v46  ;;  %918 = vrot.lane.b32.xlu0 %v882_v31, %s5171_s20  ;;  %v6029_v16 = vmul.f32 %v4817_v35, %v5739_v57  ;;  %v8350_v46 = vld [vmem:[#allocation33_spill] sm:$0xff] }
 0x252   :  { %v4821_v34 = vpop.eup %4820  ;;  %4842 = vrcp.f32 %v742_v3  ;;  %v745_v9 = vadd.f32 1.0, %v4819_v43  ;;  %v891_v50 = vmul.f32 %v5580_v42, %v8350_v46  ;;  %v8353_v43 = vld [vmem:[#allocation30_spill] sm:$0xff] }
 0x253   :  { %v4823_v4 = vpop.eup %4822  ;;  %v747_v38 = vadd.f32 1.0, %v4821_v34  ;;  %4844 = vrcp.f32 %v746_v40  ;;  %8339 = vst [vmem:[#allocation39_spill] sm:$0xff] %v6029_v16  ;;  %v986_v34 = vmul.f32 %v5878_v27, %v5763_v44  ;;  %v8355_v40 = vld [vmem:[#allocation34_spill] sm:$0xff]  ;;  %v997_v44 = vmul.f32 %v5878_v27, %v5939_v13  ;;  %v1343_v13 = vld [vmem:[%s8166_s7] sm:$0x1]  ;;  %s5172_s7 = smov 126  }
 0x254   :  { %v4825_v23 = vpop.eup %4824  ;;  %814 = vrot.lane.b32.xlu1 %v5670_v59, %s5171_s20  ;;  %v6019_v10 = vmul.f32 %v4823_v4, %v5783_v12  ;;  %4846 = vrcp.f32 %v748_v47  ;;  %v8357_v4 = vld [vmem:[#allocation29_spill] sm:$0xff]  ;;  %4710 = vmatprep.subr.msk.bf16.mxu0 %vm497_vm1, %v1343_v13 }
 0x255   :  { %934 = vrot.lane.b32.xlu0 %v890_v5, %s5171_s20  ;;  %v6023_v17 = vmul.f32 %v4825_v23, %v5856_v7  ;;  %4848 = vrcp.f32 %v745_v9  ;;  %v989_v47 = vmul.f32 %v5878_v27, %v8357_v4  ;;  %v8359_v5 = vld [vmem:[#allocation35_spill] sm:$0xff] }
 0x256   :  { %v4827_v26 = vpop.eup %4826  ;;  %8336 = vst [vmem:[#allocation36_spill] sm:$0xff] %v6019_v10  ;;  %4850 = vrcp.f32 %v747_v38 }
 0x257   :  { %v4829_v54 = vpop.eup %4828  ;;  %8337 = vst [vmem:[#allocation37_spill] sm:$0xff] %v6023_v17  ;;  %v6026_v61 = vmul.f32 %v4827_v26, %v5896_v32  ;;  %v995_v26 = vmul.f32 %v5878_v27, %v8359_v5 }
 0x258   :  { %v4831_v25 = vpop.eup %4830  ;;  %830 = vrot.lane.b32.xlu1 %v5965_v45, %s5171_s20  ;;  %v749_v6 = vadd.f32 1.0, %v4829_v54 }
 0x259   :  { %8338 = vst [vmem:[#allocation38_spill] sm:$0xff] %v6026_v61  ;;  %v4833_v59 = vpop.eup %4832  ;;  %v6032_v12 = vmul.f32 %v4831_v25, %v5892_v33  ;;  %v1191_v7 = vpack.c.bf16 %v6019_v10, %v6026_v61  ;;  %808 = vrot.lane.b32.xlu0 %v5654_v14, %s5171_s20  ;;  %v985_v33 = vmul.f32 %v5878_v27, %v5733_v48 }
 0x25a   :  { %v6039_v11 = vmul.f32 %v4833_v59, %v5919_v55  ;;  %v4835_v32 = vpop.eup %4834  ;;  %4852 = vrcp.f32 %v749_v6 }
 0x25b   :  { %8340 = vst [vmem:[#allocation40_spill] sm:$0xff] %v6032_v12  ;;  %v1190_v57 = vpack.c.bf16 %v6023_v17, %v6032_v12  ;;  %v4837_v8 = vpop.eup %4836  ;;  %v750_v14 = vadd.f32 1.0, %v4835_v32 }
 0x25c   :  { %8341 = vst [vmem:[#allocation41_spill] sm:$0xff] %v6039_v11  ;;  %v1192_v45 = vpack.c.bf16 %v6029_v16, %v6039_v11  ;;  %v4839_v21 = vpop.eup %4838  ;;  %1020 = vrot.lane.b32.xlu1 %v985_v33, %s5171_s20  ;;  %v6056_v48 = vmul.f32 %v4837_v8, %v5944_v39 }
 0x25d   :  { %4580 = vmatprep.mubr.msk.bf16.mxu1 %vm81_vm0, %v1190_v57  ;;  %824 = vrot.lane.b32.xlu0 %v5789_v0, %s5171_s20  ;;  %v6061_v20 = vmul.f32 %v4839_v21, %v5936_v15  ;;  %4854 = vrcp.f32 %v750_v14  ;;  %v883_v15 = vmul.f32 %v5580_v42, %v8347_v37  ;;  %v996_v42 = vmul.f32 %v5878_v27, %v5925_v28  ;;  %v8360_v57 = vld [vmem:[#allocation27_spill] sm:$0xff] }
 0x25e   :  { %v4841_v55 = vpop.eup %4840  ;;  %4581 = vmatmul.mubr.msk.bf16.vlgmr.msra.gmra.mxu1 %vm81_vm0, %v1191_v7  ;;  %8342 = vst [vmem:[#allocation42_spill] sm:$0xff] %v6056_v48  ;;  %v1377_v7 = vsel %vm497_vm1, %v1343_v13, 0 }
 0x25f   :  { %v4843_v18 = vpop.eup %4842  ;;  %4584 = vmatprep.mubr.msk.bf16.mxu1 %vm81_vm0, %v1192_v45  ;;  %8343 = vst [vmem:[#allocation43_spill] sm:$0xff] %v6061_v20  ;;  %v6064_v36 = vmul.f32 %v4841_v55, %v5960_v22  ;;  %4597 = vmatpush3.bf16.msra.mxu0 %v1377_v7 }
 0x260   :  { %1036 = vrot.lane.b32.xlu1 %v993_v51, %s5171_s20  ;;  %v6068_v0 = vmul.f32 %v4843_v18, %v5711_v49  ;;  %v4845_v39 = vpop.eup %4844 }
 0x261   :  { %8344 = vst [vmem:[#allocation44_spill] sm:$0xff] %v6064_v36  ;;  %812 = vrot.lane.b32.xlu0 %v8346_v30, %s5171_s20  ;;  %v1194_v58 = vpack.c.bf16 %v6056_v48, %v6064_v36  ;;  %v4847_v2 = vpop.eup %4846  ;;  %v6080_v3 = vmul.f32 %v4845_v39, %v5852_v56  ;;  %v988_v56 = vmul.f32 %v5878_v27, %v5760_v52 }
 0x262   :  { %8345 = vst [vmem:[#allocation45_spill] sm:$0xff] %v6068_v0  ;;  %v1193_v22 = vpack.c.bf16 %v6068_v0, %v6061_v20  ;;  %v4849_v62 = vpop.eup %4848  ;;  %v6087_v29 = vmul.f32 %v4847_v2, %v5863_v1 }
 0x263   :  { %v4851_v49 = vpop.eup %4850  ;;  %8348 = vst [vmem:[#allocation31_spill] sm:$0xff] %v6080_v3  ;;  %v6092_v35 = vmul.f32 %v4849_v62, %v5898_v60 }
 0x264   :  { %920 = vrot.lane.b32.xlu1 %v883_v15, %s5171_s20  ;;  %8349 = vst [vmem:[#allocation28_spill] sm:$0xff] %v6087_v29  ;;  %v6097_v31 = vmul.f32 %v4851_v49, %v5971_v24 }
 0x265   :  { %828 = vrot.lane.b32.xlu0 %v5827_v41, %s5171_s20  ;;  %8351 = vst [vmem:[#allocation33_spill] sm:$0xff] %v6092_v35  ;;  %v1195_v41 = vpack.c.bf16 %v6080_v3, %v6092_v35 }
 0x266   :  { %4585 = vmatmul.mubr.msk.bf16.gmra.mxu1 %vm81_vm0, %v1193_v22  ;;  %8352 = vst [vmem:[#allocation46_spill] sm:$0xff] %v6097_v31  ;;  %v1196_v1 = vpack.c.bf16 %v6087_v29, %v6097_v31 }
 0x267   :  { %4588 = vmatprep.mubr.msk.bf16.mxu1 %vm81_vm0, %v1194_v58  ;;  %v4853_v60 = vpop.eup %4852 }
 0x268   :  { %936 = vrot.lane.b32.xlu1 %v891_v50, %s5171_s20  ;;  %v6113_v24 = vmul.f32 %v4853_v60, %v5974_v19  ;;  %v994_v19 = vmul.f32 %v5878_v27, %v5908_v63 }
 0x269   :  { %1026 = vrot.lane.b32.xlu0 %v988_v56, %s5171_s20 }
 0x26a   :  { %v4855_v52 = vpop.eup %4854  ;;  %8354 = vst [vmem:[#allocation30_spill] sm:$0xff] %v6113_v24 }
 0x26b   :  { %v6120_v28 = vmul.f32 %v4855_v52, %v5986_v53  ;;  %v8358_v53 = vld [vmem:[#allocation32_spill] sm:$0xff] }
 0x26c   :  { %810 = vrot.lane.b32.xlu1 %v8353_v43, %s5171_s20  ;;  %v987_v9 = vmul.f32 %v5878_v27, %v8358_v53 }
 0x26d   :  { %1042 = vrot.lane.b32.xlu0 %v996_v42, %s5171_s20  ;;  %8356 = vst [vmem:[#allocation34_spill] sm:$0xff] %v6120_v28  ;;  %v1197_v23 = vpack.c.bf16 %v6120_v28, %v6113_v24 }
 0x26e   :  { %4589 = vmatmul.mubr.msk.bf16.gmra.mxu1 %vm81_vm0, %v1195_v41 }
 0x26f   :  { %4592 = vmatprep.mubr.msk.bf16.mxu1 %vm81_vm0, %v1196_v1 }
 0x270   :  { %826 = vrot.lane.b32.xlu1 %v8355_v40, %s5171_s20 }
 0x271   :  { %1022 = vrot.lane.b32.xlu0 %v986_v34, %s5171_s20 }
 0x274   :  { %1028 = vrot.lane.b32.xlu1 %v989_v47, %s5171_s20 }
 0x275   :  { %1038 = vrot.lane.b32.xlu0 %v994_v19, %s5171_s20 }
 0x276   :  { %4593 = vmatmul.mubr.msk.bf16.gmra.mxu1 %vm81_vm0, %v1197_v23 }
 0x278   :  { %1044 = vrot.lane.b32.xlu1 %v997_v44, %s5171_s20 }
 0x27c   :  { %1024 = vrot.lane.b32.xlu1 %v987_v9, %s5171_s20 }
 0x280   :  { %1040 = vrot.lane.b32.xlu1 %v995_v26, %s5171_s20  ;;  %v915_v63 = vpop.permute.xlu0 %914 }
 0x284   :  { %v917_v38 = vpop.permute.xlu1 %916 }
 0x292   :  { %v931_v54 = vpop.permute.xlu0 %930 }
 0x296   :  { %v933_v25 = vpop.permute.xlu1 %932  ;;  %v801_v59 = vpop.permute.xlu0 %800 }
 0x297   :  { %v848_v32 = vsel %vm497_vm1, 0.0, %v801_v59 }
 0x298   :  { %v854_v27 = vmul.f32 %v8360_v57, %v848_v32 }
 0x29a   :  { %v807_v33 = vpop.permute.xlu1 %806  ;;  %v817_v45 = vpop.permute.xlu0 %816 }
 0x29b   :  { %v857_v8 = vmul.f32 %v8360_v57, %v807_v33  ;;  %v849_v6 = vsel %vm497_vm1, 0.0, %v817_v45 }
 0x29c   :  { %v862_v21 = vmul.f32 %v8360_v57, %v849_v6 }
 0x29d   :  { %v6151_v55 = vadd.f32 %v917_v38, %v857_v8 }
 0x29e   :  { %v823_v14 = vpop.permute.xlu1 %822 }
 0x29f   :  { %v865_v18 = vmul.f32 %v8360_v57, %v823_v14  ;;  %v911_v51 = vpop.permute.xlu0 %910 }
 0x2a0   :  { %v958_v30 = vadd.f32 %v911_v51, %v854_v27 }
 0x2a1   :  { %v6154_v39 = vadd.f32 %v933_v25, %v865_v18 }
 0x2a2   :  { %v913_v58 = vpop.permute.xlu1 %912 }
 0x2a3   :  { %v927_v37 = vpop.permute.xlu0 %926 }
 0x2a4   :  { %v966_v15 = vadd.f32 %v927_v37, %v862_v21 }
 0x2a6   :  { %v929_v2 = vpop.permute.xlu1 %928 }
 0x2a7   :  { %v821_v22 = vpop.permute.xlu0 %820 }
 0x2a8   :  { %v864_v62 = vmul.f32 %v8360_v57, %v821_v22 }
 0x2aa   :  { %v803_v49 = vpop.permute.xlu1 %802  ;;  %v968_v46 = vadd.f32 %v931_v54, %v864_v62 }
 0x2ab   :  { %v855_v50 = vmul.f32 %v8360_v57, %v803_v49  ;;  %v1019_v56 = vpop.permute.xlu0 %1018 }
 0x2ad   :  { %v959_v41 = vadd.f32 %v913_v58, %v855_v50 }
 0x2ae   :  { %v805_v1 = vpop.permute.xlu1 %804 }
 0x2af   :  { %v856_v42 = vmul.f32 %v8360_v57, %v805_v1  ;;  %v1035_v60 = vpop.permute.xlu0 %1034 }
 0x2b0   :  { %v6159_v43 = vadd.f32 %v1035_v60, %v968_v46 }
 0x2b1   :  { %v960_v52 = vadd.f32 %v915_v63, %v856_v42 }
 0x2b2   :  { %v4412_v34 = vmul.f32 -1.442695, %v6159_v43  ;;  %v819_v40 = vpop.permute.xlu1 %818 }
 0x2b3   :  { %v6162_v4 = vadd.f32 %v1019_v56, %v960_v52  ;;  %v863_v47 = vmul.f32 %v8360_v57, %v819_v40  ;;  %v6165_v23 = vpop.permute.xlu0 %922 }
 0x2b4   :  { %4856 = vpow2.f32 %v4412_v34 }
 0x2b5   :  { %v4404_v19 = vmul.f32 -1.442695, %v6162_v4  ;;  %v967_v44 = vadd.f32 %v929_v2, %v863_v47 }
 0x2b6   :  { %v1017_v53 = vpop.permute.xlu1 %1016 }
 0x2b7   :  { %4858 = vpow2.f32 %v4404_v19  ;;  %v6168_v9 = vadd.f32 %v1017_v53, %v959_v41  ;;  %v6170_v5 = vpop.permute.xlu0 %938 }
 0x2b9   :  { %v4403_v26 = vmul.f32 -1.442695, %v6168_v9 }
 0x2ba   :  { %v1033_v63 = vpop.permute.xlu1 %1032 }
 0x2bb   :  { %4860 = vpow2.f32 %v4403_v26  ;;  %v6173_v38 = vadd.f32 %v1033_v63, %v967_v44  ;;  %v1015_v54 = vpop.permute.xlu0 %1014 }
 0x2bc   :  { %v6175_v25 = vadd.f32 %v1015_v54, %v958_v30 }
 0x2bd   :  { %v4411_v13 = vmul.f32 -1.442695, %v6173_v38 }
 0x2be   :  { %v4402_v59 = vmul.f32 -1.442695, %v6175_v25  ;;  %v925_v7 = vpop.permute.xlu1 %924 }
 0x2bf   :  { %4862 = vpow2.f32 %v4411_v13  ;;  %v1031_v32 = vpop.permute.xlu0 %1030 }
 0x2c0   :  { %4864 = vpow2.f32 %v4402_v59  ;;  %v6179_v27 = vadd.f32 %v1031_v32, %v966_v15 }
 0x2c1   :  { %v4857_v33 = vpop.eup %4856 }
 0x2c2   :  { %v1136_v8 = vadd.f32 1.0, %v4857_v33  ;;  %v4410_v45 = vmul.f32 -1.442695, %v6179_v27  ;;  %v941_v6 = vpop.permute.xlu1 %940 }
 0x2c3   :  { %v919_v21 = vpop.permute.xlu0 %918 }
 0x2c4   :  { %v4859_v14 = vpop.eup %4858  ;;  %4866 = vrcp.f32 %v1136_v8 }
 0x2c5   :  { %v1128_v18 = vadd.f32 1.0, %v4859_v14  ;;  %4868 = vpow2.f32 %v4410_v45 }
 0x2c6   :  { %v815_v51 = vpop.permute.xlu1 %814 }
 0x2c7   :  { %4870 = vrcp.f32 %v1128_v18  ;;  %v861_v30 = vmul.f32 %v8360_v57, %v815_v51  ;;  %v935_v58 = vpop.permute.xlu0 %934 }
 0x2c8   :  { %v4861_v37 = vpop.eup %4860 }
 0x2c9   :  { %v1127_v2 = vadd.f32 1.0, %v4861_v37  ;;  %v6183_v22 = vadd.f32 %v925_v7, %v861_v30 }
 0x2ca   :  { %v831_v15 = vpop.permute.xlu1 %830 }
 0x2cb   :  { %4872 = vrcp.f32 %v1127_v2  ;;  %v869_v62 = vmul.f32 %v8360_v57, %v831_v15  ;;  %v809_v49 = vpop.permute.xlu0 %808 }
 0x2cc   :  { %v4863_v46 = vpop.eup %4862  ;;  %v858_v50 = vmul.f32 %v8360_v57, %v809_v49 }
 0x2cd   :  { %v4865_v56 = vpop.eup %4864  ;;  %v1135_v41 = vadd.f32 1.0, %v4863_v46  ;;  %v6187_v1 = vadd.f32 %v941_v6, %v869_v62 }
 0x2ce   :  { %v1126_v42 = vadd.f32 1.0, %v4865_v56  ;;  %v1021_v60 = vpop.permute.xlu1 %1020  ;;  %v962_v52 = vadd.f32 %v919_v21, %v858_v50 }
 0x2cf   :  { %4874 = vrcp.f32 %v1135_v41  ;;  %v6190_v34 = vadd.f32 %v1021_v60, %v6151_v55  ;;  %v825_v40 = vpop.permute.xlu0 %824 }
 0x2d0   :  { %4876 = vrcp.f32 %v1126_v42  ;;  %v866_v47 = vmul.f32 %v8360_v57, %v825_v40 }
 0x2d1   :  { %v4867_v19 = vpop.eup %4866  ;;  %v4405_v44 = vmul.f32 -1.442695, %v6190_v34 }
 0x2d2   :  { %v4869_v53 = vpop.eup %4868  ;;  %v6195_v26 = vmul.f32 %v4867_v19, %v6159_v43  ;;  %v1037_v63 = vpop.permute.xlu1 %1036  ;;  %v970_v54 = vadd.f32 %v935_v58, %v866_v47 }
 0x2d3   :  { %v1134_v13 = vadd.f32 1.0, %v4869_v53  ;;  %4878 = vpow2.f32 %v4405_v44  ;;  %v6198_v59 = vadd.f32 %v1037_v63, %v6154_v39  ;;  %v813_v55 = vpop.permute.xlu0 %812 }
 0x2d4   :  { %8361 = vst [vmem:[#allocation29_spill] sm:$0xff] %v6195_v26  ;;  %v4871_v7 = vpop.eup %4870  ;;  %v860_v32 = vmul.f32 %v8360_v57, %v813_v55 }
 0x2d5   :  { %v6202_v33 = vmul.f32 %v4871_v7, %v6162_v4  ;;  %4880 = vrcp.f32 %v1134_v13  ;;  %v4413_v8 = vmul.f32 -1.442695, %v6198_v59 }
 0x2d6   :  { %v921_v45 = vpop.permute.xlu1 %920  ;;  %v964_v43 = vadd.f32 %v6165_v23, %v860_v32 }
 0x2d7   :  { %8362 = vst [vmem:[#allocation32_spill] sm:$0xff] %v6202_v33  ;;  %4882 = vpow2.f32 %v4413_v8  ;;  %v829_v6 = vpop.permute.xlu0 %828 }
 0x2d8   :  { %v4873_v21 = vpop.eup %4872  ;;  %v868_v14 = vmul.f32 %v8360_v57, %v829_v6 }
 0x2d9   :  { %v6208_v39 = vmul.f32 %v4873_v21, %v6168_v9 }
 0x2da   :  { %v937_v18 = vpop.permute.xlu1 %936  ;;  %v972_v51 = vadd.f32 %v6170_v5, %v868_v14 }
 0x2db   :  { %8363 = vst [vmem:[#allocation35_spill] sm:$0xff] %v6208_v39  ;;  %v1027_v30 = vpop.permute.xlu0 %1026 }
 0x2dc   :  { %v4875_v4 = vpop.eup %4874  ;;  %v6211_v58 = vadd.f32 %v1027_v30, %v964_v43 }
 0x2dd   :  { %v4877_v37 = vpop.eup %4876  ;;  %v6214_v2 = vmul.f32 %v4875_v4, %v6173_v38 }
 0x2de   :  { %v6217_v23 = vmul.f32 %v4877_v37, %v6175_v25  ;;  %v4408_v15 = vmul.f32 -1.442695, %v6211_v58  ;;  %v811_v62 = vpop.permute.xlu1 %810 }
 0x2df   :  { %8364 = vst [vmem:[#allocation27_spill] sm:$0xff] %v6214_v2  ;;  %v859_v9 = vmul.f32 %v8360_v57, %v811_v62  ;;  %v1043_v49 = vpop.permute.xlu0 %1042 }
 0x2e0   :  { %8365 = vst [vmem:[#allocation47_spill] sm:$0xff] %v6217_v23  ;;  %v4879_v46 = vpop.eup %4878  ;;  %4884 = vpow2.f32 %v4408_v15  ;;  %v6221_v5 = vadd.f32 %v1043_v49, %v972_v51 }
 0x2e1   :  { %v1129_v50 = vadd.f32 1.0, %v4879_v46  ;;  %v963_v56 = vadd.f32 %v921_v45, %v859_v9 }
 0x2e2   :  { %v4881_v41 = vpop.eup %4880  ;;  %v4416_v42 = vmul.f32 -1.442695, %v6221_v5  ;;  %v827_v38 = vpop.permute.xlu1 %826 }
 0x2e3   :  { %v6225_v60 = vmul.f32 %v4881_v41, %v6179_v27  ;;  %4886 = vrcp.f32 %v1129_v50  ;;  %v867_v25 = vmul.f32 %v8360_v57, %v827_v38  ;;  %v1023_v40 = vpop.permute.xlu0 %1022 }
 0x2e4   :  { %v4883_v47 = vpop.eup %4882  ;;  %4888 = vpow2.f32 %v4416_v42  ;;  %v1066_v19 = vadd.f32 %v1023_v40, %v962_v52 }
 0x2e5   :  { %8366 = vst [vmem:[#allocation48_spill] sm:$0xff] %v6225_v60  ;;  %v1137_v44 = vadd.f32 1.0, %v4883_v47  ;;  %v971_v53 = vadd.f32 %v937_v18, %v867_v25 }
 0x2e6   :  { %v4406_v63 = vmul.f32 -1.442695, %v1066_v19  ;;  %v1029_v13 = vpop.permute.xlu1 %1028 }
 0x2e7   :  { %4890 = vrcp.f32 %v1137_v44  ;;  %v1069_v55 = vadd.f32 %v1029_v13, %v6183_v22  ;;  %v1039_v7 = vpop.permute.xlu0 %1038 }
 0x2e8   :  { %4892 = vpow2.f32 %v4406_v63  ;;  %v1074_v32 = vadd.f32 %v1039_v7, %v970_v54 }
 0x2e9   :  { %v4409_v8 = vmul.f32 -1.442695, %v1069_v55 }
 0x2ea   :  { %v4414_v27 = vmul.f32 -1.442695, %v1074_v32  ;;  %v1045_v45 = vpop.permute.xlu1 %1044 }
 0x2eb   :  { %4894 = vpow2.f32 %v4409_v8  ;;  %v1077_v57 = vadd.f32 %v1045_v45, %v6187_v1 }
 0x2ec   :  { %4896 = vpow2.f32 %v4414_v27 }
 0x2ed   :  { %v4885_v43 = vpop.eup %4884  ;;  %v4417_v6 = vmul.f32 -1.442695, %v1077_v57 }
 0x2ee   :  { %v1132_v52 = vadd.f32 1.0, %v4885_v43  ;;  %v1025_v21 = vpop.permute.xlu1 %1024 }
 0x2ef   :  { %4898 = vpow2.f32 %v4417_v6  ;;  %v1067_v14 = vadd.f32 %v1025_v21, %v963_v56 }
 0x2f0   :  { %v4887_v18 = vpop.eup %4886  ;;  %4900 = vrcp.f32 %v1132_v52 }
 0x2f1   :  { %v4889_v51 = vpop.eup %4888  ;;  %v6231_v22 = vmul.f32 %v4887_v18, %v6190_v34  ;;  %v4407_v54 = vmul.f32 -1.442695, %v1067_v14 }
 0x2f2   :  { %v1140_v30 = vadd.f32 1.0, %v4889_v51  ;;  %v1041_v4 = vpop.permute.xlu1 %1040 }
 0x2f3   :  { %8367 = vst [vmem:[#allocation49_spill] sm:$0xff] %v6231_v22  ;;  %4902 = vpow2.f32 %v4407_v54  ;;  %v1075_v37 = vadd.f32 %v1041_v4, %v971_v53 }
 0x2f4   :  { %v4891_v15 = vpop.eup %4890  ;;  %4904 = vrcp.f32 %v1140_v30 }
 0x2f5   :  { %v4893_v1 = vpop.eup %4892  ;;  %v6234_v62 = vmul.f32 %v4891_v15, %v6198_v59  ;;  %v4415_v9 = vmul.f32 -1.442695, %v1075_v37 }
 0x2f6   :  { %v1130_v49 = vadd.f32 1.0, %v4893_v1 }
 0x2f7   :  { %8368 = vst [vmem:[#allocation50_spill] sm:$0xff] %v6234_v62  ;;  %4906 = vpow2.f32 %v4415_v9 }
 0x2f8   :  { %v4895_v46 = vpop.eup %4894  ;;  %4908 = vrcp.f32 %v1130_v49 }
 0x2f9   :  { %v4897_v50 = vpop.eup %4896  ;;  %v1133_v56 = vadd.f32 1.0, %v4895_v46 }
 0x2fa   :  { %v1138_v34 = vadd.f32 1.0, %v4897_v50 }
 0x2fb   :  { %4910 = vrcp.f32 %v1133_v56 }
 0x2fc   :  { %v4899_v41 = vpop.eup %4898  ;;  %4912 = vrcp.f32 %v1138_v34 }
 0x2fd   :  { %v4901_v42 = vpop.eup %4900  ;;  %v1141_v38 = vadd.f32 1.0, %v4899_v41 }
 0x2fe   :  { %v6237_v25 = vmul.f32 %v4901_v42, %v6211_v58 }
 0x2ff   :  { %4914 = vrcp.f32 %v1141_v38 }
 0x300   :  { %8369 = vst [vmem:[#allocation51_spill] sm:$0xff] %v6237_v25  ;;  %v4903_v40 = vpop.eup %4902 }
 0x301   :  { %v4905_v59 = vpop.eup %4904  ;;  %v1131_v47 = vadd.f32 1.0, %v4903_v40 }
 0x302   :  { %v6240_v44 = vmul.f32 %v4905_v59, %v6221_v5 }
 0x303   :  { %4916 = vrcp.f32 %v1131_v47 }
 0x304   :  { %8370 = vst [vmem:[#allocation52_spill] sm:$0xff] %v6240_v44  ;;  %v4907_v53 = vpop.eup %4906 }
 0x305   :  { %v4909_v63 = vpop.eup %4908  ;;  %v1139_v13 = vadd.f32 1.0, %v4907_v53 }
 0x306   :  { %v6242_v7 = vmul.f32 %v4909_v63, %v1066_v19 }
 0x307   :  { %4918 = vrcp.f32 %v1139_v13 }
 0x308   :  { %8371 = vst [vmem:[#allocation53_spill] sm:$0xff] %v6242_v7  ;;  %v4911_v8 = vpop.eup %4910 }
 0x309   :  { %v4913_v27 = vpop.eup %4912  ;;  %v6244_v45 = vmul.f32 %v4911_v8, %v1069_v55 }
 0x30a   :  { %v6246_v58 = vmul.f32 %v4913_v27, %v1074_v32 }
 0x30b   :  { %8372 = vst [vmem:[#allocation54_spill] sm:$0xff] %v6244_v45 }
 0x30c   :  { %8373 = vst [vmem:[#allocation55_spill] sm:$0xff] %v6246_v58  ;;  %v4915_v43 = vpop.eup %4914 }
 0x30d   :  { %v6248_v6 = vmul.f32 %v4915_v43, %v1077_v57 }
 0x30f   :  { %8374 = vst [vmem:[#allocation56_spill] sm:$0xff] %v6248_v6 }
 0x310   :  { %v4917_v52 = vpop.eup %4916 }
 0x311   :  { %v6250_v21 = vmul.f32 %v4917_v52, %v1067_v14 }
 0x313   :  { %8375 = vst [vmem:[#allocation57_spill] sm:$0xff] %v6250_v21 }
 0x314   :  { %v4919_v5 = vpop.eup %4918 }
 0x315   :  { %v6252_v18 = vmul.f32 %v4919_v5, %v1075_v37 }
 0x317   :  { %8376 = vst [vmem:[#allocation58_spill] sm:$0xff] %v6252_v18 }
 0x31e   :  { %v4582_v51 = vpop.f32.mrf.mxu1 }
 0x31f   :  { %1704 = vrot.lane.b32.xlu0 %v4582_v51, %s5172_s7 }
 0x320   :  { %v1272_v19 = vpop.f32.mrf.mxu1 }
 0x322   :  { %v4583_v54 = vpop.f32.mrf.mxu1 }
 0x323   :  { %1706 = vrot.lane.b32.xlu1 %v4583_v54, %s5172_s7  ;;  %1769 = vrot.lane.b32.xlu0 %v4582_v51, %s5173_s22  ;;  %v1336_v57 = vpack.c.bf16 %v4583_v54, %v4582_v51 }
 0x324   :  { %v1275_v55 = vpop.f32.mrf.mxu1 }
 0x325   :  { %v1335_v32 = vpack.c.bf16 %v1275_v55, %v1272_v19 }
 0x326   :  { %v4586_v14 = vpop.f32.mrf.mxu1 }
 0x327   :  { %4598 = vmatprep.mubr.msk.bf16.mxu0 %vm1351_vm3, %v1335_v32  ;;  %1771 = vrot.lane.b32.xlu1 %v4583_v54, %s5173_s22 }
 0x328   :  { %1700 = vrot.lane.b32.xlu0 %v1272_v19, %s5172_s7  ;;  %v1288_v30 = vpop.f32.mrf.mxu1  ;;  %4599 = vmatmul.mubr.msk.bf16.vlgmr.msra.gmra.mxu0 %vm1351_vm3, %v1336_v57 }
 0x32a   :  { %v4587_v4 = vpop.f32.mrf.mxu1 }
 0x32b   :  { %1702 = vrot.lane.b32.xlu1 %v1275_v55, %s5172_s7  ;;  %v1338_v1 = vpack.c.bf16 %v4587_v4, %v4586_v14 }
 0x32c   :  { %1765 = vrot.lane.b32.xlu0 %v1272_v19, %s5173_s22  ;;  %v1291_v37 = vpop.f32.mrf.mxu1 }
 0x32d   :  { %v1337_v15 = vpack.c.bf16 %v1291_v37, %v1288_v30 }
 0x32e   :  { %v4590_v9 = vpop.f32.mrf.mxu1 }
 0x32f   :  { %4602 = vmatprep.mubr.msk.bf16.mxu0 %vm1351_vm3, %v1337_v15  ;;  %1767 = vrot.lane.b32.xlu1 %v1275_v55, %s5173_s22 }
 0x330   :  { %1712 = vrot.lane.b32.xlu0 %v4586_v14, %s5172_s7  ;;  %v1304_v49 = vpop.f32.mrf.mxu1  ;;  %4603 = vmatmul.mubr.msk.bf16.gmra.mxu0 %vm1351_vm3, %v1338_v1  ;;  %v6316_v1 = vld [vmem:[%s8167_s9] sm:$0xff] }
 0x331   :  { %8377 = vst [vmem:[#allocation59_spill] sm:$0xff] %v6316_v1 }
 0x332   :  { %v4591_v46 = vpop.f32.mrf.mxu1 }
 0x333   :  { %1714 = vrot.lane.b32.xlu1 %v4587_v4, %s5172_s7  ;;  %v1340_v34 = vpack.c.bf16 %v4591_v46, %v4590_v9 }
 0x334   :  { %1777 = vrot.lane.b32.xlu0 %v4586_v14, %s5173_s22  ;;  %v1307_v50 = vpop.f32.mrf.mxu1 }
 0x335   :  { %v1339_v56 = vpack.c.bf16 %v1307_v50, %v1304_v49 }
 0x336   :  { %v4594_v41 = vpop.f32.mrf.mxu1 }
 0x337   :  { %4606 = vmatprep.mubr.msk.bf16.mxu0 %vm1351_vm3, %v1339_v56  ;;  %1779 = vrot.lane.b32.xlu1 %v4587_v4, %s5173_s22 }
 0x338   :  { %1708 = vrot.lane.b32.xlu0 %v1288_v30, %s5172_s7  ;;  %v1320_v42 = vpop.f32.mrf.mxu1  ;;  %4607 = vmatmul.mubr.msk.bf16.gmra.mxu0 %vm1351_vm3, %v1340_v34 }
 0x33a   :  { %v4595_v38 = vpop.f32.mrf.mxu1 }
 0x33b   :  { %1710 = vrot.lane.b32.xlu1 %v1291_v37, %s5172_s7  ;;  %v1342_v47 = vpack.c.bf16 %v4595_v38, %v4594_v41 }
 0x33c   :  { %1773 = vrot.lane.b32.xlu0 %v1288_v30, %s5173_s22  ;;  %v1323_v40 = vpop.f32.mrf.mxu1 }
 0x33d   :  { %v1341_v59 = vpack.c.bf16 %v1323_v40, %v1320_v42 }
 0x33f   :  { %4610 = vmatprep.mubr.msk.bf16.mxu0 %vm1351_vm3, %v1341_v59  ;;  %1775 = vrot.lane.b32.xlu1 %v1291_v37, %s5173_s22 }
 0x340   :  { %1720 = vrot.lane.b32.xlu0 %v4590_v9, %s5172_s7  ;;  %4611 = vmatmul.mubr.msk.bf16.gmra.mxu0 %vm1351_vm3, %v1342_v47 }
 0x343   :  { %1722 = vrot.lane.b32.xlu1 %v4591_v46, %s5172_s7 }
 0x344   :  { %1785 = vrot.lane.b32.xlu0 %v4590_v9, %s5173_s22  ;;  %v6321_v9 = vld [vmem:[%s8167_s9 + $0x8] sm:$0xff] }
 0x345   :  { %8378 = vst [vmem:[#allocation60_spill] sm:$0xff] %v6321_v9 }
 0x347   :  { %1787 = vrot.lane.b32.xlu1 %v4591_v46, %s5173_s22 }
 0x348   :  { %1716 = vrot.lane.b32.xlu0 %v1304_v49, %s5172_s7 }
 0x34b   :  { %1718 = vrot.lane.b32.xlu1 %v1307_v50, %s5172_s7 }
 0x34c   :  { %1781 = vrot.lane.b32.xlu0 %v1304_v49, %s5173_s22 }
 0x34f   :  { %1783 = vrot.lane.b32.xlu1 %v1307_v50, %s5173_s22 }
 0x350   :  { %1728 = vrot.lane.b32.xlu0 %v4594_v41, %s5172_s7 }
 0x353   :  { %1730 = vrot.lane.b32.xlu1 %v4595_v38, %s5172_s7 }
 0x354   :  { %1724 = vrot.lane.b32.xlu0 %v1320_v42, %s5172_s7 }
 0x357   :  { %1726 = vrot.lane.b32.xlu1 %v1323_v40, %s5172_s7 }
 0x358   :  { %1789 = vrot.lane.b32.xlu0 %v1320_v42, %s5173_s22 }
 0x35b   :  { %1791 = vrot.lane.b32.xlu1 %v1323_v40, %s5173_s22 }
 0x35c   :  { %1793 = vrot.lane.b32.xlu0 %v4594_v41, %s5173_s22 }
 0x35f   :  { %1795 = vrot.lane.b32.xlu1 %v4595_v38, %s5173_s22 }
 0x391   :  { %v1705_v53 = vpop.permute.xlu0 %1704 }
 0x392   :  { %1751 = vst.msk [vmem:[#allocation4 + $0x10] sm:$0xff] %vm1748_vm4, %v1705_v53 }
 0x395   :  { %v1707_v63 = vpop.permute.xlu1 %1706  ;;  %v1770_v13 = vpop.permute.xlu0 %1769 }
 0x396   :  { %1752 = vst.msk [vmem:[#allocation4 + $0x18] sm:$0xff] %vm1748_vm4, %v1707_v63  ;;  %1815 = vst.msk [vmem:[#allocation5 + $0x10] sm:$0xff] %vm1748_vm4, %v1770_v13  ;;  %v6339_v13 = vld [vmem:[%s8168_s8] ss:$0 sm:$0xff]  ;;  %s6493_s8 = smov 0  }
 0x399   :  { %v1772_v8 = vpop.permute.xlu1 %1771 }
 0x39a   :  { %1816 = vst.msk [vmem:[#allocation5 + $0x18] sm:$0xff] %vm1748_vm4, %v1772_v8  ;;  %v1701_v27 = vpop.permute.xlu0 %1700 }
 0x39b   :  { %1749 = vst.msk [vmem:[#allocation4] sm:$0xff] %vm1748_vm4, %v1701_v27 }
 0x39d   :  { %v1703_v43 = vpop.permute.xlu1 %1702 }
 0x39e   :  { %1750 = vst.msk [vmem:[#allocation4 + $0x8] sm:$0xff] %vm1748_vm4, %v1703_v43  ;;  %v1766_v52 = vpop.permute.xlu0 %1765 }
 0x39f   :  { %1813 = vst.msk [vmem:[#allocation5] sm:$0xff] %vm1748_vm4, %v1766_v52 }
 0x3a1   :  { %v1768_v5 = vpop.permute.xlu1 %1767 }
 0x3a2   :  { %1814 = vst.msk [vmem:[#allocation5 + $0x8] sm:$0xff] %vm1748_vm4, %v1768_v5  ;;  %v1713_v51 = vpop.permute.xlu0 %1712 }
 0x3a3   :  { %1755 = vst.msk [vmem:[#allocation4 + $0x30] sm:$0xff] %vm1748_vm4, %v1713_v51 }
 0x3a5   :  { %v1715_v19 = vpop.permute.xlu1 %1714 }
 0x3a6   :  { %1756 = vst.msk [vmem:[#allocation4 + $0x38] sm:$0xff] %vm1748_vm4, %v1715_v19  ;;  %v1778_v54 = vpop.permute.xlu0 %1777 }
 0x3a7   :  { %1819 = vst.msk [vmem:[#allocation5 + $0x30] sm:$0xff] %vm1748_vm4, %v1778_v54 }
 0x3a9   :  { %v1780_v55 = vpop.permute.xlu1 %1779 }
 0x3aa   :  { %1820 = vst.msk [vmem:[#allocation5 + $0x38] sm:$0xff] %vm1748_vm4, %v1780_v55  ;;  %v1709_v32 = vpop.permute.xlu0 %1708 }
 0x3ab   :  { %1753 = vst.msk [vmem:[#allocation4 + $0x20] sm:$0xff] %vm1748_vm4, %v1709_v32 }
 0x3ad   :  { %v1711_v57 = vpop.permute.xlu1 %1710 }
 0x3ae   :  { %1754 = vst.msk [vmem:[#allocation4 + $0x28] sm:$0xff] %vm1748_vm4, %v1711_v57  ;;  %v1774_v14 = vpop.permute.xlu0 %1773 }
 0x3af   :  { %1817 = vst.msk [vmem:[#allocation5 + $0x20] sm:$0xff] %vm1748_vm4, %v1774_v14 }
 0x3b1   :  { %v1776_v30 = vpop.permute.xlu1 %1775 }
 0x3b2   :  { %1818 = vst.msk [vmem:[#allocation5 + $0x28] sm:$0xff] %vm1748_vm4, %v1776_v30  ;;  %v1721_v4 = vpop.permute.xlu0 %1720 }
 0x3b3   :  { %1759 = vst.msk [vmem:[#allocation4 + $0x50] sm:$0xff] %vm1748_vm4, %v1721_v4 }
 0x3b5   :  { %v1723_v37 = vpop.permute.xlu1 %1722 }
 0x3b6   :  { %1760 = vst.msk [vmem:[#allocation4 + $0x58] sm:$0xff] %vm1748_vm4, %v1723_v37  ;;  %v1786_v15 = vpop.permute.xlu0 %1785 }
 0x3b7   :  { %1823 = vst.msk [vmem:[#allocation5 + $0x50] sm:$0xff] %vm1748_vm4, %v1786_v15 }
 0x3b9   :  { %v1788_v49 = vpop.permute.xlu1 %1787 }
 0x3ba   :  { %1824 = vst.msk [vmem:[#allocation5 + $0x58] sm:$0xff] %vm1748_vm4, %v1788_v49  ;;  %v1717_v46 = vpop.permute.xlu0 %1716 }
 0x3bb   :  { %1757 = vst.msk [vmem:[#allocation4 + $0x40] sm:$0xff] %vm1748_vm4, %v1717_v46 }
 0x3bd   :  { %v1719_v50 = vpop.permute.xlu1 %1718 }
 0x3be   :  { %1758 = vst.msk [vmem:[#allocation4 + $0x48] sm:$0xff] %vm1748_vm4, %v1719_v50  ;;  %v1782_v56 = vpop.permute.xlu0 %1781 }
 0x3bf   :  { %1821 = vst.msk [vmem:[#allocation5 + $0x40] sm:$0xff] %vm1748_vm4, %v1782_v56 }
 0x3c1   :  { %v1784_v34 = vpop.permute.xlu1 %1783 }
 0x3c2   :  { %1822 = vst.msk [vmem:[#allocation5 + $0x48] sm:$0xff] %vm1748_vm4, %v1784_v34  ;;  %v1729_v41 = vpop.permute.xlu0 %1728 }
 0x3c3   :  { %1763 = vst.msk [vmem:[#allocation4 + $0x70] sm:$0xff] %vm1748_vm4, %v1729_v41 }
 0x3c5   :  { %v1731_v42 = vpop.permute.xlu1 %1730 }
 0x3c6   :  { %1764 = vst.msk [vmem:[#allocation4 + $0x78] sm:$0xff] %vm1748_vm4, %v1731_v42  ;;  %v1725_v38 = vpop.permute.xlu0 %1724 }
 0x3c7   :  { %1761 = vst.msk [vmem:[#allocation4 + $0x60] sm:$0xff] %vm1748_vm4, %v1725_v38 }
 0x3c9   :  { %v1727_v40 = vpop.permute.xlu1 %1726 }
 0x3ca   :  { %1762 = vst.msk [vmem:[#allocation4 + $0x68] sm:$0xff] %vm1748_vm4, %v1727_v40  ;;  %v1790_v59 = vpop.permute.xlu0 %1789 }
 0x3cb   :  { %1825 = vst.msk [vmem:[#allocation5 + $0x60] sm:$0xff] %vm1748_vm4, %v1790_v59 }
 0x3cd   :  { %v1792_v47 = vpop.permute.xlu1 %1791 }
 0x3ce   :  { %1826 = vst.msk [vmem:[#allocation5 + $0x68] sm:$0xff] %vm1748_vm4, %v1792_v47  ;;  %v1794_v53 = vpop.permute.xlu0 %1793 }
 0x3cf   :  { %1827 = vst.msk [vmem:[#allocation5 + $0x70] sm:$0xff] %vm1748_vm4, %v1794_v53 }
 0x3d1   :  { %v1796_v63 = vpop.permute.xlu1 %1795 }
 0x3d2   :  { %1828 = vst.msk [vmem:[#allocation5 + $0x78] sm:$0xff] %vm1748_vm4, %v1796_v63 }
 0x3e8   :  { %v4600_v8 = vpop.f32.mrf.mxu0 }
 0x3e9   :  { %v1422_v27 = vadd.f32 %v4600_v8, %v6339_v13 }
 0x3ea   :  { %v1413_v43 = vpop.f32.mrf.mxu0 }
 0x3eb   :  { %v6343_v52 = vadd.f32 %v6339_v13, %v1422_v27  ;;  %v1414_v5 = vadd.f32 %v6339_v13, %v1413_v43 }
 0x3ec   :  { %v4601_v51 = vpop.f32.mrf.mxu0 }
 0x3ed   :  { %v1510_v19 = vand.u32 2147483647, %v6343_v52  ;;  %v6348_v54 = vadd.f32 %v6339_v13, %v1414_v5  ;;  %v1425_v55 = vadd.f32 %v4601_v51, %v6339_v13 }
 0x3ee   :  { %v1416_v32 = vpop.f32.mrf.mxu0 }
 0x3ef   :  { %v1526_v57 = vsub.f32 0.0, %v1510_v19  ;;  %v1508_v14 = vand.u32 2147483647, %v6348_v54  ;;  %v6353_v30 = vadd.f32 %v6339_v13, %v1425_v55  ;;  %v1417_v4 = vadd.f32 %v6339_v13, %v1416_v32 }
 0x3f0   :  { %v4604_v37 = vpop.f32.mrf.mxu0 }
 0x3f1   :  { %v1544_v15 = vmul.f32 1.442695, %v1526_v57  ;;  %v1524_v49 = vsub.f32 0.0, %v1508_v14  ;;  %v1511_v46 = vand.u32 2147483647, %v6353_v30  ;;  %v6358_v50 = vadd.f32 %v6339_v13, %v1417_v4 }
 0x3f2   :  { %v1438_v56 = vadd.f32 %v4604_v37, %v6339_v13  ;;  %v1429_v34 = vpop.f32.mrf.mxu0 }
 0x3f3   :  { %4920 = vpow2.f32 %v1544_v15  ;;  %v1540_v41 = vmul.f32 1.442695, %v1524_v49  ;;  %v1527_v42 = vsub.f32 0.0, %v1511_v46  ;;  %v1430_v38 = vadd.f32 %v6339_v13, %v1429_v34 }
 0x3f4   :  { %v1509_v40 = vand.u32 2147483647, %v6358_v50  ;;  %v6364_v59 = vadd.f32 %v6339_v13, %v1438_v56  ;;  %v4605_v47 = vpop.f32.mrf.mxu0 }
 0x3f5   :  { %4922 = vpow2.f32 %v1540_v41  ;;  %v1546_v53 = vmul.f32 1.442695, %v1527_v42  ;;  %v6367_v63 = vadd.f32 %v6339_v13, %v1430_v38  ;;  %v1441_v8 = vadd.f32 %v4605_v47, %v6339_v13 }
 0x3f6   :  { %v1525_v27 = vsub.f32 0.0, %v1509_v40  ;;  %v1514_v43 = vand.u32 2147483647, %v6364_v59  ;;  %v1432_v5 = vpop.f32.mrf.mxu0 }
 0x3f7   :  { %4924 = vpow2.f32 %v1546_v53  ;;  %v1512_v51 = vand.u32 2147483647, %v6367_v63  ;;  %v6373_v19 = vadd.f32 %v6339_v13, %v1441_v8  ;;  %v1433_v57 = vadd.f32 %v6339_v13, %v1432_v5 }
 0x3f8   :  { %v1542_v55 = vmul.f32 1.442695, %v1525_v27  ;;  %v1530_v32 = vsub.f32 0.0, %v1514_v43  ;;  %v4608_v14 = vpop.f32.mrf.mxu0 }
 0x3f9   :  { %v1528_v4 = vsub.f32 0.0, %v1512_v51  ;;  %v1515_v37 = vand.u32 2147483647, %v6373_v19  ;;  %v1454_v15 = vadd.f32 %v4608_v14, %v6339_v13  ;;  %v6379_v46 = vadd.f32 %v6339_v13, %v1433_v57 }
 0x3fa   :  { %4926 = vpow2.f32 %v1542_v55  ;;  %v1552_v49 = vmul.f32 1.442695, %v1530_v32  ;;  %v1445_v56 = vpop.f32.mrf.mxu0 }
 0x3fb   :  { %v1548_v34 = vmul.f32 1.442695, %v1528_v4  ;;  %v1531_v41 = vsub.f32 0.0, %v1515_v37  ;;  %v6382_v42 = vadd.f32 %v6339_v13, %v1454_v15  ;;  %v1446_v38 = vadd.f32 %v6339_v13, %v1445_v56 }
 0x3fc   :  { %4928 = vpow2.f32 %v1552_v49  ;;  %v1513_v40 = vand.u32 2147483647, %v6379_v46  ;;  %v4609_v47 = vpop.f32.mrf.mxu0 }
 0x3fd   :  { %4930 = vpow2.f32 %v1548_v34  ;;  %v1554_v53 = vmul.f32 1.442695, %v1531_v41  ;;  %v1518_v8 = vand.u32 2147483647, %v6382_v42  ;;  %v6388_v43 = vadd.f32 %v6339_v13, %v1446_v38 }
 0x3fe   :  { %v1529_v27 = vsub.f32 0.0, %v1513_v40  ;;  %v1457_v5 = vadd.f32 %v4609_v47, %v6339_v13  ;;  %v1448_v51 = vpop.f32.mrf.mxu0 }
 0x3ff   :  { %4932 = vpow2.f32 %v1554_v53  ;;  %v1534_v55 = vsub.f32 0.0, %v1518_v8  ;;  %v1449_v32 = vadd.f32 %v6339_v13, %v1448_v51  ;;  %v1516_v4 = vand.u32 2147483647, %v6388_v43 }
 0x400   :  { %v4921_v57 = vpop.eup %4920  ;;  %v1550_v14 = vmul.f32 1.442695, %v1529_v27  ;;  %v6394_v37 = vadd.f32 %v6339_v13, %v1457_v5  ;;  %v4612_v15 = vpop.f32.mrf.mxu0 }
 0x401   :  { %v1574_v49 = vadd.f32 1.0, %v4921_v57  ;;  %v1560_v56 = vmul.f32 1.442695, %v1534_v55  ;;  %v6397_v34 = vadd.f32 %v6339_v13, %v1449_v32  ;;  %v1470_v41 = vadd.f32 %v4612_v15, %v6339_v13 }
 0x402   :  { %v4923_v38 = vpop.eup %4922  ;;  %4934 = vpow2.f32 %v1550_v14  ;;  %v1532_v40 = vsub.f32 0.0, %v1516_v4  ;;  %v1519_v47 = vand.u32 2147483647, %v6394_v37  ;;  %v1461_v53 = vpop.f32.mrf.mxu0 }
 0x403   :  { %4936 = vlog2.f32 %v1574_v49  ;;  %v1572_v8 = vadd.f32 1.0, %v4923_v38  ;;  %v1517_v27 = vand.u32 2147483647, %v6397_v34  ;;  %v6403_v55 = vadd.f32 %v6339_v13, %v1470_v41 }
 0x404   :  { %v4925_v5 = vpop.eup %4924  ;;  %4938 = vpow2.f32 %v1560_v56  ;;  %v1556_v51 = vmul.f32 1.442695, %v1532_v40  ;;  %v1535_v57 = vsub.f32 0.0, %v1519_v47  ;;  %v4613_v32 = vpop.f32.mrf.mxu0  ;;  %v1462_v14 = vadd.f32 %v6339_v13, %v1461_v53 }
 0x405   :  { %4940 = vlog2.f32 %v1572_v8  ;;  %v1575_v15 = vadd.f32 1.0, %v4925_v5  ;;  %v1533_v6 = vsub.f32 0.0, %v1517_v27  ;;  %v1522_v49 = vand.u32 2147483647, %v6403_v55 }
 0x406   :  { %4942 = vpow2.f32 %v1556_v51  ;;  %v1562_v4 = vmul.f32 1.442695, %v1535_v57  ;;  %v1464_v38 = vpop.f32.mrf.mxu0  ;;  %v6408_v56 = vadd.f32 %v6339_v13, %v1462_v14  ;;  %v1473_v41 = vadd.f32 %v4613_v32, %v6339_v13 }
 0x407   :  { %v4927_v44 = vpop.eup %4926  ;;  %4944 = vlog2.f32 %v1575_v15  ;;  %v1558_v18 = vmul.f32 1.442695, %v1533_v6  ;;  %v1538_v47 = vsub.f32 0.0, %v1522_v49  ;;  %v1465_v8 = vadd.f32 %v6339_v13, %v1464_v38 }
 0x408   :  { %v1573_v40 = vadd.f32 1.0, %v4927_v44  ;;  %4946 = vpow2.f32 %v1562_v4  ;;  %v1520_v53 = vand.u32 2147483647, %v6408_v56  ;;  %v6414_v5 = vadd.f32 %v6339_v13, %v1473_v41 }
 0x409   :  { %v4929_v27 = vpop.eup %4928  ;;  %4948 = vpow2.f32 %v1558_v18  ;;  %v1568_v57 = vmul.f32 1.442695, %v1538_v47  ;;  %v6417_v15 = vadd.f32 %v6339_v13, %v1465_v8 }
 0x40a   :  { %v4931_v51 = vpop.eup %4930  ;;  %4950 = vlog2.f32 %v1573_v40  ;;  %v1578_v6 = vadd.f32 1.0, %v4929_v27  ;;  %v1536_v44 = vsub.f32 0.0, %v1520_v53  ;;  %v1523_v14 = vand.u32 2147483647, %v6414_v5 }
 0x40b   :  { %v1576_v32 = vadd.f32 1.0, %v4931_v51  ;;  %v1521_v18 = vand.u32 2147483647, %v6417_v15  ;;  %v1494_v51 = vmax.f32 %v6343_v52, 0.0 }
 0x40c   :  { %v4933_v4 = vpop.eup %4932  ;;  %4952 = vlog2.f32 %v1578_v6  ;;  %v1564_v38 = vmul.f32 1.442695, %v1536_v44  ;;  %v1539_v41 = vsub.f32 0.0, %v1523_v14 }
 0x40d   :  { %4954 = vlog2.f32 %v1576_v32  ;;  %v1579_v49 = vadd.f32 1.0, %v4933_v4  ;;  %v1537_v58 = vsub.f32 0.0, %v1521_v18 }
 0x40e   :  { %4956 = vpow2.f32 %v1568_v57  ;;  %v1570_v47 = vmul.f32 1.442695, %v1539_v41  ;;  %v1492_v57 = vmax.f32 %v6348_v54, 0.0 }
 0x40f   :  { %v4935_v40 = vpop.eup %4934  ;;  %4958 = vlog2.f32 %v1579_v49  ;;  %v1566_v8 = vmul.f32 1.442695, %v1537_v58 }
 0x410   :  { %v4937_v27 = vpop.eup %4936  ;;  %v1577_v13 = vadd.f32 1.0, %v4935_v40  ;;  %4960 = vpow2.f32 %v1564_v38  ;;  %v1495_v38 = vmax.f32 %v6353_v30, 0.0 }
 0x411   :  { %v4939_v53 = vpop.eup %4938  ;;  %v1593_v62 = vmul.f32 0.6931472, %v4937_v27  ;;  %4962 = vpow2.f32 %v1570_v47 }
 0x412   :  { %v4941_v6 = vpop.eup %4940  ;;  %4964 = vlog2.f32 %v1577_v13  ;;  %v1582_v32 = vadd.f32 1.0, %v4939_v53  ;;  %v1493_v53 = vmax.f32 %v6358_v50, 0.0  ;;  %v1496_v50 = vmax.f32 %v6367_v63, 0.0 }
 0x413   :  { %v4943_v4 = vpop.eup %4942  ;;  %v1622_v44 = vadd.f32 %v1593_v62, %v1494_v51  ;;  %v1589_v14 = vmul.f32 0.6931472, %v4941_v6  ;;  %4966 = vpow2.f32 %v1566_v8 }
 0x414   :  { %v4945_v18 = vpop.eup %4944  ;;  %4968 = vlog2.f32 %v1582_v32  ;;  %v1580_v49 = vadd.f32 1.0, %v4943_v4 }
 0x415   :  { %v4947_v41 = vpop.eup %4946  ;;  %1638 = vst.msk [vmem:[#allocation2 + $0x10] sm:$0xff] %vm81_vm0, %v1622_v44  ;;  %v1654_v58 = vmul.f32 %v1622_v44, %v6026_v61  ;;  %v1620_v52 = vadd.f32 %v1589_v14, %v1492_v57  ;;  %v1595_v40 = vmul.f32 0.6931472, %v4945_v18  ;;  %v1498_v44 = vmax.f32 %v6364_v59, 0.0 }
 0x416   :  { %v4949_v47 = vpop.eup %4948  ;;  %4970 = vlog2.f32 %v1580_v49  ;;  %v1583_v27 = vadd.f32 1.0, %v4947_v41 }
 0x417   :  { %v4951_v62 = vpop.eup %4950  ;;  %1670 = vst.msk [vmem:[#allocation3 + $0x10] sm:$0xff] %vm81_vm0, %v1654_v58  ;;  %1636 = vst.msk [vmem:[#allocation2] sm:$0xff] %vm81_vm0, %v1620_v52  ;;  %v1652_v54 = vmul.f32 %v1620_v52, %v6032_v12  ;;  %v1623_v13 = vadd.f32 %v1595_v40, %v1495_v38  ;;  %v1581_v8 = vadd.f32 1.0, %v4949_v47  ;;  %v1499_v47 = vmax.f32 %v6373_v19, 0.0 }
 0x418   :  { %v1591_v51 = vmul.f32 0.6931472, %v4951_v62  ;;  %4972 = vlog2.f32 %v1583_v27  ;;  %v1497_v19 = vmax.f32 %v6379_v46, 0.0 }
 0x419   :  { %v4953_v6 = vpop.eup %4952  ;;  %1668 = vst.msk [vmem:[#allocation3] sm:$0xff] %vm81_vm0, %v1652_v54  ;;  %1639 = vst.msk [vmem:[#allocation2 + $0x18] sm:$0xff] %vm81_vm0, %v1623_v13  ;;  %v1655_v30 = vmul.f32 %v1623_v13, %v6019_v10  ;;  %4974 = vlog2.f32 %v1581_v8 }
 0x41a   :  { %v4955_v32 = vpop.eup %4954  ;;  %v1621_v4 = vadd.f32 %v1591_v51, %v1493_v53  ;;  %v1601_v57 = vmul.f32 0.6931472, %v4953_v6 }
 0x41b   :  { %v4957_v14 = vpop.eup %4956  ;;  %1671 = vst.msk [vmem:[#allocation3 + $0x18] sm:$0xff] %vm81_vm0, %v1655_v30  ;;  %v1597_v18 = vmul.f32 0.6931472, %v4955_v32 }
 0x41c   :  { %v4959_v49 = vpop.eup %4958  ;;  %1637 = vst.msk [vmem:[#allocation2 + $0x8] sm:$0xff] %vm81_vm0, %v1621_v4  ;;  %v1653_v41 = vmul.f32 %v1621_v4, %v6023_v17  ;;  %v1626_v58 = vadd.f32 %v1601_v57, %v1498_v44  ;;  %v1586_v52 = vadd.f32 1.0, %v4957_v14  ;;  %v1502_v57 = vmax.f32 %v6382_v42, 0.0 }
 0x41d   :  { %v4961_v38 = vpop.eup %4960  ;;  %v1624_v40 = vadd.f32 %v1597_v18, %v1496_v50  ;;  %v1603_v27 = vmul.f32 0.6931472, %v4959_v49  ;;  %v1500_v49 = vmax.f32 %v6388_v43, 0.0 }
 0x41e   :  { %v4963_v59 = vpop.eup %4962  ;;  %1669 = vst.msk [vmem:[#allocation3 + $0x8] sm:$0xff] %vm81_vm0, %v1653_v41  ;;  %1642 = vst.msk [vmem:[#allocation2 + $0x30] sm:$0xff] %vm81_vm0, %v1626_v58  ;;  %v1658_v63 = vmul.f32 %v1626_v58, %v6061_v20  ;;  %4976 = vlog2.f32 %v1586_v52  ;;  %v1584_v62 = vadd.f32 1.0, %v4961_v38 }
 0x41f   :  { %v4965_v54 = vpop.eup %4964  ;;  %1640 = vst.msk [vmem:[#allocation2 + $0x20] sm:$0xff] %vm81_vm0, %v1624_v40  ;;  %v1656_v13 = vmul.f32 %v1624_v40, %v6039_v11  ;;  %v1627_v8 = vadd.f32 %v1603_v27, %v1499_v47  ;;  %v1587_v53 = vadd.f32 1.0, %v4963_v59  ;;  %v1503_v40 = vmax.f32 %v6394_v37, 0.0 }
 0x420   :  { %v4967_v51 = vpop.eup %4966  ;;  %1674 = vst.msk [vmem:[#allocation3 + $0x30] sm:$0xff] %vm81_vm0, %v1658_v63  ;;  %v1599_v6 = vmul.f32 0.6931472, %v4965_v54  ;;  %4978 = vlog2.f32 %v1584_v62  ;;  %v1501_v27 = vmax.f32 %v6397_v34, 0.0  ;;  %v1506_v34 = vmax.f32 %v6403_v55, 0.0 }
 0x421   :  { %v4969_v30 = vpop.eup %4968  ;;  %1672 = vst.msk [vmem:[#allocation3 + $0x20] sm:$0xff] %vm81_vm0, %v1656_v13  ;;  %1643 = vst.msk [vmem:[#allocation2 + $0x38] sm:$0xff] %vm81_vm0, %v1627_v8  ;;  %v1659_v32 = vmul.f32 %v1627_v8, %v6068_v0  ;;  %4980 = vlog2.f32 %v1587_v53  ;;  %v1585_v4 = vadd.f32 1.0, %v4967_v51  ;;  %v1505_v55 = vmax.f32 %v6417_v15, 0.0 }
 0x422   :  { %v1625_v44 = vadd.f32 %v1599_v6, %v1497_v19  ;;  %v1609_v14 = vmul.f32 0.6931472, %v4969_v30  ;;  %v1504_v6 = vmax.f32 %v6408_v56, 0.0 }
 0x423   :  { %v4971_v50 = vpop.eup %4970  ;;  %1675 = vst.msk [vmem:[#allocation3 + $0x38] sm:$0xff] %vm81_vm0, %v1659_v32  ;;  %4982 = vlog2.f32 %v1585_v4  ;;  %v1507_v32 = vmax.f32 %v6414_v5, 0.0 }
 0x424   :  { %1641 = vst.msk [vmem:[#allocation2 + $0x28] sm:$0xff] %vm81_vm0, %v1625_v44  ;;  %v1657_v46 = vmul.f32 %v1625_v44, %v6029_v16  ;;  %v1630_v18 = vadd.f32 %v1609_v14, %v1502_v57  ;;  %v1605_v41 = vmul.f32 0.6931472, %v4971_v50 }
 0x425   :  { %v4973_v58 = vpop.eup %4972 }
 0x426   :  { %v4975_v52 = vpop.eup %4974  ;;  %1673 = vst.msk [vmem:[#allocation3 + $0x28] sm:$0xff] %vm81_vm0, %v1657_v46  ;;  %1646 = vst.msk [vmem:[#allocation2 + $0x50] sm:$0xff] %vm81_vm0, %v1630_v18  ;;  %v1662_v42 = vmul.f32 %v1630_v18, %v6092_v35  ;;  %v1628_v38 = vadd.f32 %v1605_v41, %v1500_v49  ;;  %v1611_v47 = vmul.f32 0.6931472, %v4973_v58  ;;  %v6485_v49 = vmov 0.0  }
 0x427   :  { %v1607_v59 = vmul.f32 0.6931472, %v4975_v52  ;;  %v6487_v41 = vmov 0.0   ;;  %v6489_v58 = vmov 0.0   ;;  %v6491_v52 = vmov 0.0  }
 0x428   :  { %1678 = vst.msk [vmem:[#allocation3 + $0x50] sm:$0xff] %vm81_vm0, %v1662_v42  ;;  %1644 = vst.msk [vmem:[#allocation2 + $0x40] sm:$0xff] %vm81_vm0, %v1628_v38  ;;  %v1660_v43 = vmul.f32 %v1628_v38, %v6064_v36  ;;  %v1631_v63 = vadd.f32 %v1611_v47, %v1503_v40 }
 0x429   :  { %v1629_v62 = vadd.f32 %v1607_v59, %v1501_v27 }
 0x42a   :  { %1676 = vst.msk [vmem:[#allocation3 + $0x40] sm:$0xff] %vm81_vm0, %v1660_v43  ;;  %1647 = vst.msk [vmem:[#allocation2 + $0x58] sm:$0xff] %vm81_vm0, %v1631_v63  ;;  %v1663_v54 = vmul.f32 %v1631_v63, %v6080_v3 }
 0x42b   :  { %v4977_v13 = vpop.eup %4976  ;;  %1645 = vst.msk [vmem:[#allocation2 + $0x48] sm:$0xff] %vm81_vm0, %v1629_v62  ;;  %v1661_v37 = vmul.f32 %v1629_v62, %v6056_v48 }
 0x42c   :  { %1679 = vst.msk [vmem:[#allocation3 + $0x58] sm:$0xff] %vm81_vm0, %v1663_v54  ;;  %v1617_v8 = vmul.f32 0.6931472, %v4977_v13 }
 0x42d   :  { %v4979_v53 = vpop.eup %4978  ;;  %1677 = vst.msk [vmem:[#allocation3 + $0x48] sm:$0xff] %vm81_vm0, %v1661_v37 }
 0x42e   :  { %v4981_v51 = vpop.eup %4980  ;;  %v1634_v19 = vadd.f32 %v1617_v8, %v1506_v34  ;;  %v1613_v30 = vmul.f32 0.6931472, %v4979_v53 }
 0x42f   :  { %v1619_v4 = vmul.f32 0.6931472, %v4981_v51 }
 0x430   :  { %v4983_v44 = vpop.eup %4982  ;;  %1650 = vst.msk [vmem:[#allocation2 + $0x70] sm:$0xff] %vm81_vm0, %v1634_v19  ;;  %v1666_v57 = vmul.f32 %v1634_v19, %v6113_v24  ;;  %v1632_v14 = vadd.f32 %v1613_v30, %v1504_v6 }
 0x431   :  { %v1635_v50 = vadd.f32 %v1619_v4, %v1507_v32  ;;  %v1615_v46 = vmul.f32 0.6931472, %v4983_v44 }
 0x432   :  { %1682 = vst.msk [vmem:[#allocation3 + $0x70] sm:$0xff] %vm81_vm0, %v1666_v57  ;;  %1648 = vst.msk [vmem:[#allocation2 + $0x60] sm:$0xff] %vm81_vm0, %v1632_v14  ;;  %v1664_v56 = vmul.f32 %v1632_v14, %v6097_v31 }
 0x433   :  { %1651 = vst.msk [vmem:[#allocation2 + $0x78] sm:$0xff] %vm81_vm0, %v1635_v50  ;;  %v1667_v5 = vmul.f32 %v1635_v50, %v6120_v28  ;;  %v1633_v18 = vadd.f32 %v1615_v46, %v1505_v55 }
 0x434   :  { %1680 = vst.msk [vmem:[#allocation3 + $0x60] sm:$0xff] %vm81_vm0, %v1664_v56 }
 0x435   :  { %1683 = vst.msk [vmem:[#allocation3 + $0x78] sm:$0xff] %vm81_vm0, %v1667_v5  ;;  %1649 = vst.msk [vmem:[#allocation2 + $0x68] sm:$0xff] %vm81_vm0, %v1633_v18  ;;  %v1665_v15 = vmul.f32 %v1633_v18, %v6087_v29 }
 0x437   :  { %1681 = vst.msk [vmem:[#allocation3 + $0x68] sm:$0xff] %vm81_vm0, %v1665_v15 }
 0x438 LB: > { %v8379_v1 = vld [vmem:[#allocation59_spill] sm:$0xff]  ;;  %v8380_v9 = vld [vmem:[#allocation60_spill] sm:$0xff]  ;;  %8381 = vst [vmem:[#allocation61_spill] sm:$0xff] %v5152_v49  ;;  %s6511_s26 = sshll.u32 %s5168_s8, 3  ;;  %v8382_v38 = vld [vmem:[#allocation25_spill] sm:$0xff]  ;;  %vm3198_vm5 = vcmask 1041409   ;;  %v5156_v41 = vphi %v6487_v41, %v3004_v41   ;;  %v5152_v49 = vphi %v6485_v49, %v3005_v49   ;;  %s5168_s8 = sphi %s6493_s8, %s1836_s8   ;;  %v5164_v52 = vphi %v6491_v52, %v7511_v52   ;;  %v5160_v58 = vphi %v6489_v58, %v7508_v58  }
 0x439   : > { %s1848_s5 = scalar_lea.vmem [#allocation4], %s6511_s26  ;;  %v8383_v47 = vld [vmem:[#allocation24_spill] sm:$0xff]  ;;  %v8384_v59 = vld [vmem:[#allocation26_spill] sm:$0xff]  ;;  %v8385_v63 = vld [vmem:[#allocation23_spill] sm:$0xff]  ;;  %v5174_v14 = vmov 1966171168  }
 0x43a   : > { %v1849_v42 = vld [vmem:[%s1848_s5] sm:$0xff]  ;;  %v6518_v62 = vsub.s32 3, %v8385_v63  ;;  %v6522_v13 = vsub.s32 4, %v8385_v63  ;;  %v6526_v34 = vsub.s32 5, %v8385_v63  ;;  %v6530_v53 = vsub.s32 6, %v8385_v63  ;;  %s1842_s27 = scalar_lea.vmem [#allocation2], %s6511_s26 }
 0x43b   : > { %v2228_v40 = vrot.slane %v1849_v42, %v8382_v38  ;;  %v2217_v27 = vrot.slane %v1849_v42, %v8383_v47  ;;  %v2239_v43 = vrot.slane %v1849_v42, %v8384_v59  ;;  %v6534_v19 = vsub.s32 7, %v8385_v63  ;;  %v1850_v30 = vld [vmem:[%s1848_s5 + $0x40] sm:$0xff]  ;;  %s1851_s28 = scalar_lea.vmem [#allocation5], %s6511_s26  ;;  %s1845_s29 = scalar_lea.vmem [#allocation3], %s6511_s26 }
 0x43c   : > { %v2250_v54 = vrot.slane %v1849_v42, %v6518_v62  ;;  %v2261_v37 = vrot.slane %v1849_v42, %v6522_v13  ;;  %v2272_v8 = vrot.slane %v1849_v42, %v6526_v34  ;;  %v2283_v51 = vrot.slane %v1849_v42, %v6530_v53  ;;  %v1843_v15 = vld [vmem:[%s1842_s27] sm:$0xff]  ;;  %s3221_s1 = scalar_lea.vmem [#allocation6], %s6511_s26  ;;  %s1836_s8 = sadd.s32 1, %s5168_s8  }
 0x43d   : > { %2230 = vbcast.lane.b32.xlu1 %v2228_v40, 256  ;;  %2219 = vbcast.lane.b32.xlu0 %v2217_v27, 256  ;;  %v2294_v6 = vrot.slane %v1849_v42, %v6534_v19  ;;  %v2305_v32 = vrot.slane %v1850_v30, %v8383_v47  ;;  %v2316_v4 = vrot.slane %v1850_v30, %v8382_v38  ;;  %v1858_v50 = vunpack.c.l.s4 %v5174_v14  ;;  %p1833_p0 = scmp.ge.s32.totalorder %s1836_s8, 8  }
 0x43e   : > { %v2327_v44 = vrot.slane %v1850_v30, %v8384_v59  ;;  %v2338_v57 = vrot.slane %v1850_v30, %v6518_v62  ;;  %v2349_v55 = vrot.slane %v1850_v30, %v6522_v13  ;;  %v2360_v56 = vrot.slane %v1850_v30, %v6526_v34  ;;  %s8581_s3 = sld [smem:[#allocation136_spill]] (%p1833_p0) }
 0x43f   : > { %v1859_v46 = vunpack.c.0.s8 %v1858_v50  ;;  %v2371_v18 = vrot.slane %v1850_v30, %v6530_v53  ;;  %vm3200_vm6 = vcmask 1042434   ;;  %vm3202_vm7 = vcmask 1043459   ;;  %s8582_s23 = sld [smem:[#allocation135_spill]] (%p1833_p0) }
 0x440   : > { %vm3204_vm8 = vcmask 1044484   ;;  %vm3206_vm9 = vcmask 1045509   ;;  %vm3208_vm10 = vcmask 1046534   ;;  %vm3210_vm11 = vcmask 1047559  }
 0x441   : > { %2234 = vbcast.lane.b32.xlu1 %v2228_v40, 264  ;;  %2223 = vbcast.lane.b32.xlu0 %v2217_v27, 264  ;;  %v6544_v5 = vsub.s32 %v1859_v46, %v8385_v63  ;;  %v2382_v40 = vrot.slane %v1850_v30, %v6534_v19  ;;  %v1852_v27 = vld [vmem:[%s1851_s28] sm:$0xff] }
 0x442   : > { %v6562_v50 = vrot.slane %v1852_v27, %v8384_v59  ;;  %v6568_v46 = vrot.slane %v1852_v27, %v6518_v62 }
 0x443   : > { %v1863_v42 = vrot.slane %v1843_v15, %v6544_v5 }
 0x445   : > { %2245 = vbcast.lane.b32.xlu1 %v2239_v43, 264  ;;  %2241 = vbcast.lane.b32.xlu0 %v2239_v43, 256  ;;  %v1879_v43 = vrot.slane %v1863_v42, %v6544_v5 }
 0x449   : > { %2256 = vbcast.lane.b32.xlu1 %v2250_v54, 264  ;;  %2252 = vbcast.lane.b32.xlu0 %v2250_v54, 256  ;;  %v1871_v54 = vcombine.high %v1863_v42, %v1863_v42 }
 0x44b   : > { %v1893_v30 = vrot.slane %v1871_v54, %v6544_v5 }
 0x44d   : > { %2267 = vbcast.lane.b32.xlu1 %v2261_v37, 264  ;;  %2263 = vbcast.lane.b32.xlu0 %v2261_v37, 256  ;;  %v1856_v37 = vcombine.high %v1843_v15, %v1843_v15  ;;  %v6575_v15 = vrot.slane %v1852_v27, %v6522_v13  ;;  %v1961_v54 = vrot.slane %v1893_v30, %v8383_v47 }
 0x44f   : > { %v2568_v26 = vmul.f32 %v1961_v54, %v8379_v1 }
 0x451   : > { %2278 = vbcast.lane.b32.xlu1 %v2272_v8, 264  ;;  %2274 = vbcast.lane.b32.xlu0 %v2272_v8, 256  ;;  %v2393_v8 = vrot.slane %v1852_v27, %v8383_v47 }
 0x455   : > { %2289 = vbcast.lane.b32.xlu1 %v2283_v51, 264  ;;  %2285 = vbcast.lane.b32.xlu0 %v2283_v51, 256  ;;  %v1853_v51 = vld [vmem:[%s1851_s28 + $0x40] sm:$0xff] }
 0x456   : > { %v2492_v14 = vrot.slane %v1853_v51, %v8382_v38  ;;  %v6578_v42 = vrot.slane %v1853_v51, %v6522_v13  ;;  %v6596_v13 = vrot.slane %v1852_v27, %v6530_v53  ;;  %v6600_v63 = vrot.slane %v1853_v51, %v6530_v53 }
 0x459   : > { %2300 = vbcast.lane.b32.xlu1 %v2294_v6, 264  ;;  %2296 = vbcast.lane.b32.xlu0 %v2294_v6, 256  ;;  %v1901_v6 = vcombine.high %v1879_v43, %v1879_v43 }
 0x45d   : > { %2311 = vbcast.lane.b32.xlu1 %v2305_v32, 264  ;;  %2307 = vbcast.lane.b32.xlu0 %v2305_v32, 256  ;;  %v2404_v32 = vrot.slane %v1852_v27, %v8382_v38  ;;  %v6593_v38 = vld [vmem:[%s1842_s27 + $0x40] sm:$0xff] }
 0x461   : > { %2322 = vbcast.lane.b32.xlu1 %v2316_v4, 264  ;;  %2318 = vbcast.lane.b32.xlu0 %v2316_v4, 256  ;;  %v1957_v4 = vrot.slane %v1879_v43, %v8383_v47  ;;  %v1846_v43 = vld [vmem:[%s1845_s29] sm:$0xff] }
 0x462   : > { %v2036_v29 = vcombine.high %v1846_v43, %v1846_v43 }
 0x465   : > { %2333 = vbcast.lane.b32.xlu1 %v2327_v44, 264  ;;  %2329 = vbcast.lane.b32.xlu0 %v2327_v44, 256  ;;  %v1870_v44 = vrot.slane %v1856_v37, %v6544_v5  ;;  %v6588_v37 = vrot.slane %v1853_v51, %v6526_v34 }
 0x467   : > { %v1886_v24 = vrot.slane %v1870_v44, %v6544_v5 }
 0x469   : > { %2344 = vbcast.lane.b32.xlu1 %v2338_v57, 264  ;;  %2340 = vbcast.lane.b32.xlu0 %v2338_v57, 256  ;;  %v2481_v57 = vrot.slane %v1853_v51, %v8383_v47  ;;  %v1902_v2 = vcombine.high %v1886_v24, %v1886_v24  ;;  %v1973_v60 = vrot.slane %v1886_v24, %v8383_v47 }
 0x46d   : > { %2355 = vbcast.lane.b32.xlu1 %v2349_v55, 264  ;;  %2351 = vbcast.lane.b32.xlu0 %v2349_v55, 256  ;;  %v6565_v55 = vrot.slane %v1853_v51, %v8384_v59  ;;  %v2567_v59 = vmul.f32 %v1957_v4, %v8380_v9 }
 0x471   : > { %2366 = vbcast.lane.b32.xlu1 %v2360_v56, 264  ;;  %2362 = vbcast.lane.b32.xlu0 %v2360_v56, 256  ;;  %v6571_v56 = vrot.slane %v1853_v51, %v6518_v62  ;;  %v2566_v62 = vmul.f32 %v1957_v4, %v8379_v1  ;;  %v1912_v4 = vrot.slane %v6593_v38, %v6544_v5 }
 0x473   : > { %v2598_v53 = vmul.f32 1.442695, %v2566_v62 }
 0x475   : > { %2377 = vbcast.lane.b32.xlu1 %v2371_v18, 264  ;;  %2373 = vbcast.lane.b32.xlu0 %v2371_v18, 256  ;;  %v1965_v18 = vrot.slane %v1901_v6, %v8383_v47  ;;  %v1872_v6 = vcombine.high %v1870_v44, %v1870_v44  ;;  %v2569_v44 = vmul.f32 %v1961_v54, %v8380_v9  ;;  %4988 = vpow2.f32 %v2598_v53 }
 0x476   : > { %v2575_v54 = vmul.f32 %v1973_v60, %v8380_v9 }
 0x477   : > { %v2570_v28 = vmul.f32 %v1965_v18, %v8379_v1  ;;  %v2571_v31 = vmul.f32 %v1965_v18, %v8380_v9  ;;  %v1900_v35 = vrot.slane %v1872_v6, %v6544_v5  ;;  %v6624_v6 = vrot.slane %v2036_v29, %v6544_v5 }
 0x478   : > { %v2574_v29 = vmul.f32 %v1973_v60, %v8379_v1 }
 0x479   : > { %2388 = vbcast.lane.b32.xlu1 %v2382_v40, 264  ;;  %2384 = vbcast.lane.b32.xlu0 %v2382_v40, 256  ;;  %v6581_v40 = vrot.slane %v1852_v27, %v6526_v34  ;;  %v2043_v34 = vrot.slane %v1846_v43, %v6544_v5  ;;  %v2606_v43 = vmul.f32 1.442695, %v2570_v28  ;;  %v1977_v45 = vrot.slane %v1900_v35, %v8383_v47 }
 0x47a   : > { %v2604_v28 = vmul.f32 1.442695, %v2569_v44 }
 0x47b   : > { %v2059_v18 = vrot.slane %v2043_v34, %v6544_v5 }
 0x47d   : > { %2399 = vbcast.lane.b32.xlu1 %v2393_v8, 264  ;;  %2395 = vbcast.lane.b32.xlu0 %v2393_v8, 256  ;;  %v1903_v8 = vcombine.high %v1893_v30, %v1893_v30  ;;  %v6605_v30 = vrot.slane %v1852_v27, %v6534_v19  ;;  %v2600_v27 = vmul.f32 1.442695, %v2567_v59  ;;  %v2608_v59 = vmul.f32 1.442695, %v2571_v31 }
 0x47e   : > { %v2577_v31 = vmul.f32 %v1977_v45, %v8380_v9 }
 0x47f   : > { %v1969_v3 = vrot.slane %v1903_v8, %v8383_v47  ;;  %v2602_v8 = vmul.f32 1.442695, %v2568_v26  ;;  %4990 = vpow2.f32 %v2600_v27  ;;  %v2616_v27 = vmul.f32 1.442695, %v2575_v54 }
 0x480   : > { %4992 = vpow2.f32 %v2606_v43 }
 0x481   : > { %2410 = vbcast.lane.b32.xlu1 %v2404_v32, 264  ;;  %2406 = vbcast.lane.b32.xlu0 %v2404_v32, 256  ;;  %v6610_v32 = vrot.slane %v1853_v51, %v6534_v19  ;;  %v2051_v51 = vcombine.high %v2043_v34, %v2043_v34  ;;  %v2573_v62 = vmul.f32 %v1969_v3, %v8380_v9  ;;  %4994 = vpow2.f32 %v2602_v8 }
 0x482   : > { %v2572_v24 = vmul.f32 %v1969_v3, %v8379_v1  ;;  %v1981_v19 = vrot.slane %v1902_v2, %v8383_v47  ;;  %v1928_v34 = vrot.slane %v1912_v4, %v6544_v5  ;;  %4996 = vpow2.f32 %v2608_v59 }
 0x483   : > { %v2612_v26 = vmul.f32 1.442695, %v2573_v62  ;;  %v2576_v3 = vmul.f32 %v1977_v45, %v8379_v1  ;;  %v6641_v2 = vrot.slane %v2059_v18, %v8383_v47  ;;  %4998 = vpow2.f32 %v2604_v28 }
 0x484   : > { %v2610_v60 = vmul.f32 1.442695, %v2572_v24  ;;  %v2579_v44 = vmul.f32 %v1981_v19, %v8380_v9  ;;  %v1950_v43 = vcombine.high %v1928_v34, %v1928_v34  ;;  %v2620_v62 = vmul.f32 1.442695, %v2577_v31 }
 0x485   : > { %2487 = vbcast.lane.b32.xlu1 %v2481_v57, 264  ;;  %2483 = vbcast.lane.b32.xlu0 %v2481_v57, 256  ;;  %v1904_v57 = vcombine.high %v1900_v35, %v1900_v35  ;;  %v1920_v35 = vcombine.high %v1912_v4, %v1912_v4  ;;  %5000 = vpow2.f32 %v2612_v26  ;;  %v2614_v4 = vmul.f32 1.442695, %v2574_v29 }
 0x486   : > { %5002 = vpow2.f32 %v2616_v27  ;;  %v2618_v59 = vmul.f32 1.442695, %v2576_v3  ;;  %v2624_v28 = vmul.f32 1.442695, %v2579_v44  ;;  %v1997_v29 = vrot.slane %v1950_v43, %v8383_v47  ;;  %v6664_v3 = vpop.eup %4988 }
 0x487   : > { %v1985_v53 = vrot.slane %v1904_v57, %v8383_v47  ;;  %v1942_v45 = vrot.slane %v1920_v35, %v6544_v5  ;;  %v1989_v57 = vrot.slane %v1928_v34, %v8383_v47  ;;  %5004 = vpow2.f32 %v2610_v60  ;;  %8386 = vst [vmem:[#allocation62_spill] sm:$0xff] %v6664_v3 }
 0x488   : > { %5006 = vpow2.f32 %v2614_v4  ;;  %v2066_v44 = vrot.slane %v6624_v6, %v6544_v5  ;;  %v6674_v4 = vld [vmem:[%s1845_s29 + $0x40] sm:$0xff] }
 0x489   : > { %2498 = vbcast.lane.b32.xlu1 %v2492_v14, 264  ;;  %2494 = vbcast.lane.b32.xlu0 %v2492_v14, 256  ;;  %v6635_v14 = vrot.slane %v2051_v51, %v6544_v5  ;;  %v2578_v51 = vmul.f32 %v1981_v19, %v8379_v1  ;;  %v2581_v8 = vmul.f32 %v1985_v53, %v8380_v9  ;;  %5008 = vpow2.f32 %v2620_v62 }
 0x48a   : > { %v2580_v54 = vmul.f32 %v1985_v53, %v8379_v1  ;;  %v1993_v24 = vrot.slane %v1942_v45, %v8383_v47  ;;  %v1952_v31 = vcombine.high %v1942_v45, %v1942_v45  ;;  %5010 = vpow2.f32 %v2618_v59 }
 0x48b   : > { %v6653_v19 = vrot.slane %v6635_v14, %v8383_v47  ;;  %v2622_v26 = vmul.f32 1.442695, %v2578_v51  ;;  %v2628_v34 = vmul.f32 1.442695, %v2581_v8  ;;  %v2583_v27 = vmul.f32 %v1989_v57, %v8380_v9 }
 0x48c   : > { %v2626_v35 = vmul.f32 1.442695, %v2580_v54  ;;  %v2083_v60 = vcombine.high %v6635_v14, %v6635_v14  ;;  %5012 = vpow2.f32 %v2624_v28  ;;  %v2585_v51 = vmul.f32 %v1993_v24, %v8380_v9  ;;  %v6677_v43 = vpop.eup %4990 }
 0x48d   : > { %2421 = vbcast.lane.b32.xlu1 %v6562_v50, 264  ;;  %2417 = vbcast.lane.b32.xlu0 %v6562_v50, 256  ;;  %v2081_v50 = vcombine.high %v2059_v18, %v2059_v18  ;;  %v2052_v18 = vcombine.high %v6624_v6, %v6624_v6  ;;  %8387 = vst [vmem:[#allocation63_spill] sm:$0xff] %v6677_v43  ;;  %5014 = vpow2.f32 %v2622_v26  ;;  %v6682_v45 = vpop.eup %4992  ;;  %v2632_v28 = vmul.f32 1.442695, %v2583_v27 }
 0x48e   : > { %v2587_v8 = vmul.f32 %v1997_v29, %v8380_v9  ;;  %5016 = vpow2.f32 %v2628_v34  ;;  %v2001_v6 = vrot.slane %v1952_v31, %v8383_v47  ;;  %v6689_v59 = vpop.eup %4994  ;;  %v2092_v54 = vrot.slane %v6674_v4, %v6544_v5 }
 0x48f   : > { %v6661_v53 = vrot.slane %v2081_v50, %v8383_v47  ;;  %v2080_v62 = vrot.slane %v2052_v18, %v6544_v5  ;;  %5018 = vpow2.f32 %v2626_v35  ;;  %v6694_v26 = vpop.eup %4996  ;;  %v6699_v18 = vrot.slane %v2083_v60, %v8383_v47 }
 0x490   : > { %v2082_v34 = vcombine.high %v2066_v44, %v2066_v44  ;;  %v6704_v31 = vpop.eup %4998  ;;  %v2640_v27 = vmul.f32 1.442695, %v2587_v8  ;;  %v2108_v36 = vrot.slane %v2092_v54, %v6544_v5  ;;  %v2588_v8 = vmul.f32 %v2001_v6, %v8379_v1 }
 0x491   : > { %2509 = vbcast.lane.b32.xlu1 %v6565_v55, 264  ;;  %2505 = vbcast.lane.b32.xlu0 %v6565_v55, 256  ;;  %v2582_v55 = vmul.f32 %v1989_v57, %v8379_v1  ;;  %v8388_v57 = vcombine.high %v6593_v38, %v6593_v38  ;;  %v6702_v38 = vrot.slane %v2066_v44, %v8383_v47 }
 0x492   : > { %v6707_v35 = vrot.slane %v2080_v62, %v8383_v47  ;;  %v6709_v25 = vpop.eup %5000  ;;  %v6741_v20 = vmul.f32 %v6689_v59, %v6682_v45  ;;  %v6744_v16 = vrot.slane %v2108_v36, %v8383_v47  ;;  %v2085_v11 = vcombine.high %v6674_v4, %v6674_v4 }
 0x493   : > { %v2630_v14 = vmul.f32 1.442695, %v2582_v55  ;;  %v1919_v50 = vrot.slane %v8388_v57, %v6544_v5  ;;  %v2636_v55 = vmul.f32 1.442695, %v2585_v51  ;;  %v2100_v51 = vcombine.high %v2092_v54, %v2092_v54  ;;  %v6714_v0 = vpop.eup %5002 }
 0x494   : > { %8389 = vst [vmem:[#allocation64_spill] sm:$0xff] %v6707_v35  ;;  %v6728_v54 = vmul.f32 0.0, %v6677_v43  ;;  %8394 = vst [vmem:[#allocation69_spill] sm:$0xff] %v6744_v16 }
 0x495   : > { %2432 = vbcast.lane.b32.xlu1 %v6568_v46, 264  ;;  %2428 = vbcast.lane.b32.xlu0 %v6568_v46, 256  ;;  %v2584_v46 = vmul.f32 %v1993_v24, %v8379_v1  ;;  %v2586_v24 = vmul.f32 %v1997_v29, %v8379_v1  ;;  %v2084_v29 = vcombine.high %v2080_v62, %v2080_v62  ;;  %5020 = vpow2.f32 %v2630_v14  ;;  %v6722_v14 = vpop.eup %5004 }
 0x496   : > { %v1935_v60 = vrot.slane %v1919_v50, %v6544_v5  ;;  %v1921_v48 = vcombine.high %v1919_v50, %v1919_v50  ;;  %5022 = vpow2.f32 %v2632_v28  ;;  %v6719_v62 = vrot.slane %v2082_v34, %v8383_v47  ;;  %8392 = vst [vmem:[#allocation67_spill] sm:$0xff] %v6728_v54 }
 0x497   : > { %v2634_v57 = vmul.f32 1.442695, %v2584_v46  ;;  %v2638_v44 = vmul.f32 1.442695, %v2586_v24  ;;  %5024 = vpow2.f32 %v2636_v55  ;;  %v6725_v50 = vmul.f32 0.0, %v6664_v3 }
 0x498   : > { %8390 = vst [vmem:[#allocation65_spill] sm:$0xff] %v6719_v62  ;;  %v1951_v46 = vcombine.high %v1935_v60, %v1935_v60  ;;  %v6731_v28 = vrot.slane %v2084_v29, %v8383_v47  ;;  %5026 = vpow2.f32 %v2640_v27  ;;  %v2005_v34 = vrot.slane %v1935_v60, %v8383_v47 }
 0x499   : > { %2520 = vbcast.lane.b32.xlu1 %v6571_v56, 264  ;;  %2516 = vbcast.lane.b32.xlu0 %v6571_v56, 256  ;;  %v2589_v56 = vmul.f32 %v2001_v6, %v8380_v9  ;;  %8391 = vst [vmem:[#allocation66_spill] sm:$0xff] %v6725_v50  ;;  %5028 = vpow2.f32 %v2634_v57  ;;  %v1949_v6 = vrot.slane %v1921_v48, %v6544_v5 }
 0x49a   : > { %8393 = vst [vmem:[#allocation68_spill] sm:$0xff] %v6731_v28  ;;  %5030 = vpow2.f32 %v2638_v44  ;;  %v2122_v29 = vrot.slane %v2100_v51, %v6544_v5  ;;  %v6753_v48 = vmul.f32 %v6704_v31, %v6694_v26  ;;  %v6757_v57 = vmul.f32 %v6709_v25, %v6694_v26 }
 0x49b   : > { %v2644_v24 = vmul.f32 1.442695, %v2589_v56  ;;  %v2642_v56 = vmul.f32 1.442695, %v2588_v8  ;;  %v2013_v60 = vrot.slane %v1951_v46, %v8383_v47  ;;  %v6764_v51 = vmul.f32 %v6714_v0, %v6709_v25 }
 0x49c   : > { %v1953_v21 = vcombine.high %v1949_v6, %v1949_v6  ;;  %v2130_v8 = vcombine.high %v2108_v36, %v2108_v36  ;;  %v2591_v46 = vmul.f32 %v2005_v34, %v8380_v9  ;;  %v2009_v22 = vrot.slane %v1949_v6, %v8383_v47 }
 0x49d   : > { %2443 = vbcast.lane.b32.xlu1 %v6575_v15, 264  ;;  %2439 = vbcast.lane.b32.xlu0 %v6575_v15, 256  ;;  %v6733_v15 = vpop.eup %5006  ;;  %5032 = vpow2.f32 %v2644_v24  ;;  %v6787_v4 = vrot.slane %v2122_v29, %v8383_v47  ;;  %v2590_v24 = vmul.f32 %v2005_v34, %v8379_v1  ;;  %v2132_v17 = vcombine.high %v2122_v29, %v2122_v29 }
 0x49e   : > { %v6737_v55 = vpop.eup %5008  ;;  %v6780_v10 = vmul.f32 %v6733_v15, %v6722_v14  ;;  %5034 = vpow2.f32 %v2642_v56  ;;  %v2595_v12 = vmul.f32 %v2013_v60, %v8380_v9  ;;  %v2099_v34 = vrot.slane %v2085_v11, %v6544_v5 }
 0x49f   : > { %v6747_v27 = vpop.eup %5010  ;;  %v6784_v61 = vmul.f32 %v6737_v55, %v6714_v0  ;;  %8397 = vst [vmem:[#allocation72_spill] sm:$0xff] %v6787_v4  ;;  %v2594_v23 = vmul.f32 %v2013_v60, %v8379_v1  ;;  %v2017_v4 = vrot.slane %v1953_v21, %v8383_v47  ;;  %v6811_v16 = vrot.slane %v2130_v8, %v8383_v47 }
 0x4a0   : > { %v6760_v44 = vpop.eup %5012  ;;  %v6796_v6 = vmul.f32 %v6747_v27, %v6733_v15  ;;  %v2648_v29 = vmul.f32 1.442695, %v2591_v46  ;;  %v2593_v56 = vmul.f32 %v2009_v22, %v8380_v9  ;;  %v2646_v21 = vmul.f32 1.442695, %v2590_v24 }
 0x4a1   : > { %2531 = vbcast.lane.b32.xlu1 %v6578_v42, 264  ;;  %2527 = vbcast.lane.b32.xlu0 %v6578_v42, 256  ;;  %v6768_v42 = vmul.f32 %v6722_v14, %v6682_v45  ;;  %v6772_v7 = vpop.eup %5014  ;;  %v6801_v39 = vmul.f32 %v6760_v44, %v6737_v55  ;;  %8399 = vst [vmem:[#allocation74_spill] sm:$0xff] %v6811_v16  ;;  %v2656_v46 = vmul.f32 1.442695, %v2595_v12 }
 0x4a2   : > { %8395 = vst [vmem:[#allocation70_spill] sm:$0xff] %v6772_v7  ;;  %v6776_v33 = vpop.eup %5016  ;;  %v2592_v60 = vmul.f32 %v2009_v22, %v8379_v1  ;;  %v6830_v8 = vrot.slane %v2132_v17, %v8383_v47  ;;  %v2101_v16 = vcombine.high %v2099_v34, %v2099_v34  ;;  %v2115_v24 = vrot.slane %v2099_v34, %v6544_v5 }
 0x4a3   : > { %8396 = vst [vmem:[#allocation71_spill] sm:$0xff] %v6776_v33  ;;  %v6790_v36 = vpop.eup %5018  ;;  %v6818_v62 = vmul.f32 %v6776_v33, %v6760_v44  ;;  %v2654_v22 = vmul.f32 1.442695, %v2594_v23  ;;  %5036 = vpow2.f32 %v2648_v29  ;;  %v2652_v17 = vmul.f32 1.442695, %v2593_v56 }
 0x4a4   : > { %8398 = vst [vmem:[#allocation73_spill] sm:$0xff] %v6790_v36  ;;  %v6814_v28 = vpop.eup %5020  ;;  %v6822_v11 = vmul.f32 %v6790_v36, %v6772_v7  ;;  %8404 = vst [vmem:[#allocation79_spill] sm:$0xff] %v6830_v8  ;;  %v2596_v12 = vmul.f32 %v2017_v4, %v8379_v1  ;;  %5038 = vpow2.f32 %v2646_v21  ;;  %v2650_v34 = vmul.f32 1.442695, %v2592_v60 }
 0x4a5   : > { %2454 = vbcast.lane.b32.xlu1 %v6581_v40, 264  ;;  %2450 = vbcast.lane.b32.xlu0 %v6581_v40, 256  ;;  %v6808_v40 = vmul.f32 %v6772_v7, %v6747_v27  ;;  %8400 = vst [vmem:[#allocation75_spill] sm:$0xff] %v6814_v28  ;;  %8401 = vst [vmem:[#allocation76_spill] sm:$0xff] %v6818_v62  ;;  %v6825_v35 = vpop.eup %5022  ;;  %v6834_v62 = vmul.f32 %v5160_v58, %v6677_v43  ;;  %5040 = vpow2.f32 %v2656_v46 }
 0x4a6   : > { %8402 = vst [vmem:[#allocation77_spill] sm:$0xff] %v6822_v11  ;;  %8403 = vst [vmem:[#allocation78_spill] sm:$0xff] %v6825_v35  ;;  %v6836_v36 = vpop.eup %5024  ;;  %v2597_v11 = vmul.f32 %v2017_v4, %v8380_v9  ;;  %v6854_v23 = vmul.f32 %v5164_v52, %v6664_v3  ;;  %v6861_v29 = vmul.f32 0.0, %v6825_v35  ;;  %v2129_v56 = vrot.slane %v2101_v16, %v6544_v5 }
 0x4a7   : > { %8405 = vst [vmem:[#allocation80_spill] sm:$0xff] %v6834_v62  ;;  %8406 = vst [vmem:[#allocation81_spill] sm:$0xff] %v6836_v36  ;;  %v6840_v33 = vpop.eup %5026  ;;  %v6850_v62 = vmul.f32 0.0, %v6814_v28  ;;  %v6869_v21 = vrot.slane %v2115_v24, %v8383_v47  ;;  %5042 = vpow2.f32 %v2654_v22  ;;  %v2131_v1 = vcombine.high %v2115_v24, %v2115_v24 }
 0x4a8   : > { %8407 = vst [vmem:[#allocation82_spill] sm:$0xff] %v6840_v33  ;;  %v6847_v8 = vpop.eup %5028  ;;  %8410 = vst [vmem:[#allocation85_spill] sm:$0xff] %v6854_v23  ;;  %v2660_v60 = vmul.f32 1.442695, %v2597_v11  ;;  %5044 = vpow2.f32 %v2652_v17  ;;  %v2658_v7 = vmul.f32 1.442695, %v2596_v12  ;;  %v2133_v11 = vcombine.high %v2129_v56, %v2129_v56 }
 0x4a9   : > { %2542 = vbcast.lane.b32.xlu1 %v6588_v37, 264  ;;  %2538 = vbcast.lane.b32.xlu0 %v6588_v37, 256  ;;  %v6844_v37 = vmul.f32 %v6836_v36, %v6825_v35  ;;  %8408 = vst [vmem:[#allocation83_spill] sm:$0xff] %v6847_v8  ;;  %8409 = vst [vmem:[#allocation84_spill] sm:$0xff] %v6850_v62  ;;  %v6856_v9 = vpop.eup %5030  ;;  %v6865_v4 = vmul.f32 %v6847_v8, %v6814_v28  ;;  %5046 = vpow2.f32 %v2650_v34 }
 0x4aa   : > { %8411 = vst [vmem:[#allocation86_spill] sm:$0xff] %v6856_v9  ;;  %8412 = vst [vmem:[#allocation87_spill] sm:$0xff] %v6861_v29  ;;  %v6878_v46 = vpop.eup %5032  ;;  %v6883_v5 = vmul.f32 %v6856_v9, %v6847_v8  ;;  %v6895_v17 = vrot.slane %v2129_v56, %v8383_v47  ;;  %5048 = vpow2.f32 %v2660_v60  ;;  %v6920_v60 = vrot.slane %v2133_v11, %v8383_v47 }
 0x4ab   : > { %8413 = vst [vmem:[#allocation88_spill] sm:$0xff] %v6869_v21  ;;  %v6876_v29 = vmul.f32 0.0, %v6844_v37  ;;  %8415 = vst [vmem:[#allocation90_spill] sm:$0xff] %v6878_v46  ;;  %v6889_v24 = vmul.f32 %v6878_v46, %v6840_v33  ;;  %v6892_v22 = vmul.f32 0.0, %v6865_v4  ;;  %v6901_v12 = vpop.eup %5034  ;;  %5050 = vpow2.f32 %v2658_v7 }
 0x4ac   : > { %8416 = vst [vmem:[#allocation91_spill] sm:$0xff] %v6883_v5  ;;  %8418 = vst [vmem:[#allocation93_spill] sm:$0xff] %v6895_v17  ;;  %v6910_v56 = vmul.f32 %v6901_v12, %v6856_v9  ;;  %v6914_v17 = vmul.f32 %v6689_v59, %v6664_v3 }
 0x4ad   : > { %2465 = vbcast.lane.b32.xlu1 %v6596_v13, 264  ;;  %2461 = vbcast.lane.b32.xlu0 %v6596_v13, 256  ;;  %v6873_v13 = vmul.f32 %v6840_v33, %v6836_v36  ;;  %8414 = vst [vmem:[#allocation89_spill] sm:$0xff] %v6876_v29  ;;  %8417 = vst [vmem:[#allocation92_spill] sm:$0xff] %v6892_v22  ;;  %v6906_v29 = vrot.slane %v2131_v1, %v8383_v47 }
 0x4ae   : > { %8419 = vst [vmem:[#allocation94_spill] sm:$0xff] %v6901_v12  ;;  %8421 = vst [vmem:[#allocation96_spill] sm:$0xff] %v6920_v60 }
 0x4af   : > { %v2231_v23 = vpop.permute.xlu1 %2230  ;;  %v2220_v62 = vpop.permute.xlu0 %2219  ;;  %8420 = vst [vmem:[#allocation95_spill] sm:$0xff] %v6906_v29 }
 0x4b0   : > { %v2662_v16 = vmul.f32 %v2220_v62, %v6641_v2  ;;  %v6899_v62 = vmul.f32 %v6704_v31, %v6677_v43  ;;  %v2664_v34 = vmul.f32 %v2231_v23, %v6653_v19  ;;  %v6955_v60 = vpop.eup %5036 }
 0x4b1   : > { %2553 = vbcast.lane.b32.xlu1 %v6600_v63, 264  ;;  %2549 = vbcast.lane.b32.xlu0 %v6600_v63, 256  ;;  %v6961_v9 = vpop.eup %5038 }
 0x4b2   : > { %v2696_v63 = vmul.f32 %v6689_v59, %v2662_v16  ;;  %v6926_v29 = vmul.f32 0.0, %v6899_v62  ;;  %v6930_v7 = vmul.f32 %v5160_v58, %v6899_v62  ;;  %v6934_v59 = vmul.f32 %v5164_v52, %v6914_v17 }
 0x4b3   : > { %v2235_v21 = vpop.permute.xlu1 %2234  ;;  %v2224_v33 = vpop.permute.xlu0 %2223 }
 0x4b4   : > { %v6916_v22 = vadd.f32 %v2696_v63, %v2664_v34  ;;  %v2665_v23 = vmul.f32 %v2235_v21, %v6653_v19  ;;  %v2663_v1 = vmul.f32 %v2224_v33, %v6641_v2  ;;  %8422 = vst [vmem:[#allocation97_spill] sm:$0xff] %v6926_v29  ;;  %8423 = vst [vmem:[#allocation98_spill] sm:$0xff] %v6930_v7 }
 0x4b5   : > { %2476 = vbcast.lane.b32.xlu1 %v6605_v30, 264  ;;  %2472 = vbcast.lane.b32.xlu0 %v6605_v30, 256  ;;  %8424 = vst [vmem:[#allocation99_spill] sm:$0xff] %v6934_v59  ;;  %v2726_v19 = vadd.f32 %v6725_v50, %v2662_v16  ;;  %v6939_v33 = vmul.f32 %v5152_v49, %v6825_v35 }
 0x4b6   : > { %v6943_v30 = vmul.f32 %v5152_v49, %v6844_v37  ;;  %v6947_v2 = vmul.f32 %v6677_v43, %v6753_v48  ;;  %v2697_v21 = vmul.f32 %v6704_v31, %v2663_v1  ;;  %v2727_v11 = vadd.f32 %v6728_v54, %v2663_v1 }
 0x4b7   : > { %8425 = vst [vmem:[#allocation100_spill] sm:$0xff] %v6939_v33  ;;  %v2246_v63 = vpop.permute.xlu1 %2245  ;;  %v2242_v47 = vpop.permute.xlu0 %2241  ;;  %v6953_v16 = vmul.f32 %v6664_v3, %v6741_v20  ;;  %v2698_v33 = vmul.f32 %v6682_v45, %v2664_v34  ;;  %v6966_v1 = vmul.f32 0.0, %v6914_v17  ;;  %v6970_v3 = vmul.f32 %v6825_v35, %v6873_v13 }
 0x4b8   : > { %8426 = vst [vmem:[#allocation101_spill] sm:$0xff] %v6943_v30  ;;  %8427 = vst [vmem:[#allocation102_spill] sm:$0xff] %v6947_v2  ;;  %v2699_v30 = vmul.f32 %v6694_v26, %v2665_v23  ;;  %v2667_v59 = vmul.f32 %v2246_v63, %v6661_v53  ;;  %v2666_v7 = vmul.f32 %v2242_v47, %v6661_v53  ;;  %v6976_v26 = vpop.eup %5040  ;;  %v6995_v8 = vmul.f32 0.0, %v6947_v2 }
 0x4b9   : > { %v2729_v31 = vadd.f32 %v2697_v21, %v2665_v23  ;;  %2564 = vbcast.lane.b32.xlu1 %v6610_v32, 264  ;;  %2560 = vbcast.lane.b32.xlu0 %v6610_v32, 256  ;;  %8428 = vst [vmem:[#allocation103_spill] sm:$0xff] %v6966_v1  ;;  %v6974_v45 = vmul.f32 %v6814_v28, %v6883_v5  ;;  %v6980_v32 = vpop.eup %5042 }
 0x4ba   : > { %v2788_v47 = vmul.f32 %v6741_v20, %v2726_v19  ;;  %v2789_v53 = vmul.f32 %v6753_v48, %v2727_v11  ;;  %v2731_v34 = vadd.f32 %v2699_v30, %v2667_v59  ;;  %v2730_v23 = vadd.f32 %v2698_v33, %v2666_v7  ;;  %8430 = vst [vmem:[#allocation105_spill] sm:$0xff] %v6980_v32  ;;  %v6997_v33 = vpop.eup %5044 }
 0x4bb   : > { %8429 = vst [vmem:[#allocation104_spill] sm:$0xff] %v6974_v45  ;;  %v2257_v21 = vpop.permute.xlu1 %2256  ;;  %v2253_v63 = vpop.permute.xlu0 %2252  ;;  %v6984_v35 = vmul.f32 %v6955_v60, %v6878_v46  ;;  %v6988_v5 = vmul.f32 %v5156_v41, %v6814_v28  ;;  %v6992_v43 = vmul.f32 %v5156_v41, %v6865_v4  ;;  %8433 = vst [vmem:[#allocation108_spill] sm:$0xff] %v6995_v8 }
 0x4bc   : > { %v6999_v30 = vadd.f32 %v2789_v53, %v2731_v34  ;;  %v7001_v32 = vadd.f32 %v2788_v47, %v2730_v23  ;;  %v7005_v46 = vmul.f32 %v6961_v9, %v6901_v12  ;;  %v7011_v28 = vpop.eup %5046  ;;  %v2700_v8 = vmul.f32 %v6722_v14, %v2666_v7 }
 0x4bd   : > { %8431 = vst [vmem:[#allocation106_spill] sm:$0xff] %v6988_v5  ;;  %8432 = vst [vmem:[#allocation107_spill] sm:$0xff] %v6992_v43  ;;  %v7009_v5 = vmul.f32 %v5160_v58, %v6947_v2  ;;  %v2701_v43 = vmul.f32 %v6709_v25, %v2667_v59  ;;  %v2669_v36 = vmul.f32 %v2257_v21, %v6699_v18  ;;  %v7030_v25 = vpop.eup %5048 }
 0x4be   : > { %8434 = vst [vmem:[#allocation109_spill] sm:$0xff] %v6999_v30  ;;  %8435 = vst [vmem:[#allocation110_spill] sm:$0xff] %v7001_v32  ;;  %v2668_v53 = vmul.f32 %v2253_v63, %v6699_v18  ;;  %v7018_v47 = vadd.f32 %v2726_v19, %v6725_v50  ;;  %v2790_v12 = vmul.f32 %v6768_v42, %v6916_v22  ;;  %v7036_v63 = vpop.eup %5050 }
 0x4bf   : > { %8436 = vst [vmem:[#allocation111_spill] sm:$0xff] %v7005_v46  ;;  %8437 = vst [vmem:[#allocation112_spill] sm:$0xff] %v7009_v5  ;;  %v7024_v2 = vmul.f32 %v6764_v51, %v6753_v48  ;;  %v7028_v5 = vmul.f32 %v6780_v10, %v6741_v20  ;;  %v7033_v14 = vadd.f32 %v2727_v11, %v6728_v54  ;;  %v2268_v19 = vpop.permute.xlu1 %2267  ;;  %v2264_v21 = vpop.permute.xlu0 %2263 }
 0x4c0   : > { %8438 = vst [vmem:[#allocation113_spill] sm:$0xff] %v7018_v47  ;;  %8440 = vst [vmem:[#allocation115_spill] sm:$0xff] %v7030_v25  ;;  %v2733_v18 = vadd.f32 %v2701_v43, %v2669_v36  ;;  %v2791_v7 = vmul.f32 %v6757_v57, %v2729_v31  ;;  %v2732_v59 = vadd.f32 %v2700_v8, %v2668_v53 }
 0x4c1   : > { %8439 = vst [vmem:[#allocation114_spill] sm:$0xff] %v7028_v5  ;;  %8441 = vst [vmem:[#allocation116_spill] sm:$0xff] %v7033_v14  ;;  %v2703_v48 = vmul.f32 %v6714_v0, %v2669_v36  ;;  %v2702_v50 = vmul.f32 %v6733_v15, %v2668_v53  ;;  %v2671_v20 = vmul.f32 %v2268_v19, %v6702_v38 }
 0x4c2   : > { %8442 = vst [vmem:[#allocation117_spill] sm:$0xff] %v7036_v63  ;;  %v2670_v46 = vmul.f32 %v2264_v21, %v6702_v38  ;;  %v7042_v25 = vadd.f32 %v2791_v7, %v2733_v18  ;;  %v7044_v11 = vadd.f32 %v2790_v12, %v2732_v59  ;;  %v7047_v43 = vadd.f32 %v6926_v29, %v2729_v31  ;;  %v8445_v29 = vld [vmem:[#allocation64_spill] sm:$0xff] }
 0x4c3   : > { %v7051_v8 = vmul.f32 %v6784_v61, %v6757_v57  ;;  %v2793_v54 = vmul.f32 %v6764_v51, %v2731_v34  ;;  %v2792_v0 = vmul.f32 %v6780_v10, %v2730_v23  ;;  %v2735_v15 = vadd.f32 %v2703_v48, %v2671_v20  ;;  %v2279_v53 = vpop.permute.xlu1 %2278  ;;  %v2275_v19 = vpop.permute.xlu0 %2274 }
 0x4c4   : > { %8443 = vst [vmem:[#allocation118_spill] sm:$0xff] %v7042_v25  ;;  %8444 = vst [vmem:[#allocation119_spill] sm:$0xff] %v7044_v11  ;;  %v2734_v36 = vadd.f32 %v2702_v50, %v2670_v46  ;;  %v7057_v38 = vadd.f32 %v6966_v1, %v6916_v22  ;;  %v7061_v12 = vmul.f32 %v6796_v6, %v6768_v42 }
 0x4c5   : > { %v7065_v31 = vmul.f32 %v6801_v39, %v6764_v51  ;;  %v7069_v34 = vmul.f32 %v6808_v40, %v6780_v10  ;;  %v2823_v23 = vadd.f32 %v2793_v54, %v2735_v15  ;;  %v2875_v7 = vmul.f32 %v7024_v2, %v7033_v14 }
 0x4c6   : > { %v2822_v50 = vadd.f32 %v2792_v0, %v2734_v36  ;;  %v2874_v22 = vmul.f32 %v7028_v5, %v7018_v47  ;;  %v2705_v21 = vmul.f32 %v6737_v55, %v2671_v20  ;;  %v2704_v48 = vmul.f32 %v6747_v27, %v2670_v46  ;;  %v8448_v46 = vld [vmem:[#allocation70_spill] sm:$0xff] }
 0x4c7   : > { %v2673_v1 = vmul.f32 %v2279_v53, %v8445_v29  ;;  %v2672_v51 = vmul.f32 %v2275_v19, %v8445_v29  ;;  %v2795_v63 = vmul.f32 %v6784_v61, %v2733_v18  ;;  %v7080_v10 = vadd.f32 %v2875_v7, %v2823_v23  ;;  %v2290_v55 = vpop.permute.xlu1 %2289  ;;  %v2286_v20 = vpop.permute.xlu0 %2285  ;;  %v8449_v53 = vld [vmem:[#allocation65_spill] sm:$0xff] }
 0x4c8   : > { %v7082_v54 = vadd.f32 %v2874_v22, %v2822_v50  ;;  %v2877_v0 = vmul.f32 %v7051_v8, %v7047_v43  ;;  %v2794_v14 = vmul.f32 %v6796_v6, %v2732_v59  ;;  %v2876_v27 = vmul.f32 %v7061_v12, %v7057_v38 }
 0x4c9   : > { %8446 = vst [vmem:[#allocation64_spill] sm:$0xff] %v7080_v10  ;;  %v2737_v47 = vadd.f32 %v2705_v21, %v2673_v1  ;;  %v2736_v5 = vadd.f32 %v2704_v48, %v2672_v51  ;;  %v2707_v29 = vmul.f32 %v6760_v44, %v2673_v1  ;;  %v2706_v18 = vmul.f32 %v8448_v46, %v2672_v51  ;;  %v8450_v1 = vld [vmem:[#allocation71_spill] sm:$0xff]  ;;  %v8451_v46 = vld [vmem:[#allocation73_spill] sm:$0xff] }
 0x4ca   : > { %8447 = vst [vmem:[#allocation120_spill] sm:$0xff] %v7082_v54  ;;  %v2675_v19 = vmul.f32 %v2290_v55, %v8449_v53  ;;  %v2674_v23 = vmul.f32 %v2286_v20, %v8449_v53  ;;  %v2797_v50 = vmul.f32 %v6801_v39, %v2735_v15  ;;  %v2796_v7 = vmul.f32 %v6808_v40, %v2734_v36 }
 0x4cb   : > { %v2825_v59 = vadd.f32 %v2795_v63, %v2737_v47  ;;  %v2824_v22 = vadd.f32 %v2794_v14, %v2736_v5  ;;  %v2879_v54 = vmul.f32 %v7065_v31, %v6999_v30  ;;  %v2878_v44 = vmul.f32 %v7069_v34, %v7001_v32  ;;  %v2301_v10 = vpop.permute.xlu1 %2300  ;;  %v2297_v20 = vpop.permute.xlu0 %2296  ;;  %v8454_v63 = vld [vmem:[#allocation68_spill] sm:$0xff]  ;;  %v8456_v30 = vld [vmem:[#allocation77_spill] sm:$0xff] }
 0x4cc   : > { %v2739_v21 = vadd.f32 %v2707_v29, %v2675_v19  ;;  %v2738_v48 = vadd.f32 %v2706_v18, %v2674_v23  ;;  %v2709_v51 = vmul.f32 %v8450_v1, %v2675_v19  ;;  %v2708_v55 = vmul.f32 %v8451_v46, %v2674_v23  ;;  %v8455_v29 = vld [vmem:[#allocation76_spill] sm:$0xff] }
 0x4cd   : > { %v7101_v53 = vadd.f32 %v2877_v0, %v2825_v59  ;;  %v7103_v39 = vadd.f32 %v2876_v27, %v2824_v22  ;;  %v2677_v15 = vmul.f32 %v2301_v10, %v8454_v63  ;;  %v2676_v36 = vmul.f32 %v2297_v20, %v8454_v63 }
 0x4ce   : > { %v2827_v40 = vadd.f32 %v2797_v50, %v2739_v21  ;;  %v2826_v14 = vadd.f32 %v2796_v7, %v2738_v48  ;;  %v2799_v18 = vmul.f32 %v8455_v29, %v2737_v47  ;;  %v2798_v32 = vmul.f32 %v8456_v30, %v2736_v5  ;;  %v8467_v48 = vld [vmem:[#allocation69_spill] sm:$0xff] }
 0x4cf   : > { %8452 = vst [vmem:[#allocation70_spill] sm:$0xff] %v7101_v53  ;;  %8453 = vst [vmem:[#allocation65_spill] sm:$0xff] %v7103_v39  ;;  %v7111_v19 = vmul.f32 %v8455_v29, %v6784_v61  ;;  %v7115_v0 = vmul.f32 %v8456_v30, %v6796_v6  ;;  %v2741_v27 = vadd.f32 %v2709_v51, %v2677_v15  ;;  %v2312_v10 = vpop.permute.xlu1 %2311  ;;  %v2308_v59 = vpop.permute.xlu0 %2307  ;;  %v7122_v47 = vmul.f32 0.0, %v6953_v16  ;;  %v8481_v39 = vld [vmem:[#allocation105_spill] sm:$0xff] }
 0x4d0   : > { %v2740_v23 = vadd.f32 %v2708_v55, %v2676_v36  ;;  %v7117_v50 = vadd.f32 %v2879_v54, %v2827_v40  ;;  %v7119_v7 = vadd.f32 %v2878_v44, %v2826_v14  ;;  %v7126_v5 = vmul.f32 %v5164_v52, %v6953_v16 }
 0x4d1   : > { %8457 = vst [vmem:[#allocation71_spill] sm:$0xff] %v7111_v19  ;;  %8458 = vst [vmem:[#allocation73_spill] sm:$0xff] %v7115_v0  ;;  %v7129_v61 = vmul.f32 0.0, %v6970_v3  ;;  %v7133_v6 = vmul.f32 %v5152_v49, %v6970_v3  ;;  %v2829_v30 = vadd.f32 %v2799_v18, %v2741_v27  ;;  %v7136_v22 = vmul.f32 0.0, %v6974_v45 }
 0x4d2   : > { %8459 = vst [vmem:[#allocation68_spill] sm:$0xff] %v7117_v50  ;;  %8460 = vst [vmem:[#allocation76_spill] sm:$0xff] %v7119_v7  ;;  %v2828_v54 = vadd.f32 %v2798_v32, %v2740_v23  ;;  %v7140_v21 = vmul.f32 %v6757_v57, %v6899_v62  ;;  %v2679_v44 = vmul.f32 %v2312_v10, %v8467_v48  ;;  %v8476_v10 = vld [vmem:[#allocation81_spill] sm:$0xff]  ;;  %v8480_v7 = vld [vmem:[#allocation84_spill] sm:$0xff] }
 0x4d3   : > { %8461 = vst [vmem:[#allocation77_spill] sm:$0xff] %v7122_v47  ;;  %8462 = vst [vmem:[#allocation121_spill] sm:$0xff] %v7126_v5  ;;  %v2678_v1 = vmul.f32 %v2308_v59, %v8467_v48  ;;  %v2881_v51 = vmul.f32 %v7111_v19, %v7042_v25  ;;  %v2880_v46 = vmul.f32 %v7115_v0, %v7044_v11  ;;  %v2323_v40 = vpop.permute.xlu1 %2322  ;;  %v2319_v14 = vpop.permute.xlu0 %2318  ;;  %v8478_v48 = vld [vmem:[#allocation72_spill] sm:$0xff]  ;;  %v8487_v25 = vld [vmem:[#allocation74_spill] sm:$0xff] }
 0x4d4   : > { %8463 = vst [vmem:[#allocation122_spill] sm:$0xff] %v7129_v61  ;;  %8464 = vst [vmem:[#allocation123_spill] sm:$0xff] %v7133_v6  ;;  %v7150_v32 = vmul.f32 %v5156_v41, %v6974_v45  ;;  %v7154_v55 = vmul.f32 %v6768_v42, %v6914_v17  ;;  %v7158_v57 = vmul.f32 %v6889_v24, %v6844_v37  ;;  %v7185_v27 = vmul.f32 0.0, %v7140_v21  ;;  %v8503_v0 = vld [vmem:[#allocation94_spill] sm:$0xff]  ;;  %v8513_v19 = vld [vmem:[#allocation67_spill] sm:$0xff] }
 0x4d5   : > { %8465 = vst [vmem:[#allocation124_spill] sm:$0xff] %v7136_v22  ;;  %8466 = vst [vmem:[#allocation125_spill] sm:$0xff] %v7140_v21  ;;  %v7162_v20 = vmul.f32 %v6910_v56, %v6865_v4  ;;  %v7166_v63 = vmul.f32 %v6997_v33, %v6955_v60  ;;  %v7170_v15 = vmul.f32 %v6984_v35, %v6873_v13  ;;  %v8515_v45 = vld [vmem:[#allocation66_spill] sm:$0xff] }
 0x4d6   : > { %8468 = vst [vmem:[#allocation69_spill] sm:$0xff] %v7150_v32  ;;  %8469 = vst [vmem:[#allocation126_spill] sm:$0xff] %v7154_v55  ;;  %v7172_v42 = vadd.f32 %v2881_v51, %v2829_v30  ;;  %v7174_v36 = vadd.f32 %v2880_v46, %v2828_v54  ;;  %v7178_v29 = vmul.f32 %v7011_v28, %v6961_v9  ;;  %v8477_v30 = vld [vmem:[#allocation83_spill] sm:$0xff]  ;;  %v7202_v32 = vmul.f32 0.0, %v7154_v55 }
 0x4d7   : > { %8470 = vst [vmem:[#allocation127_spill] sm:$0xff] %v7158_v57  ;;  %8471 = vst [vmem:[#allocation128_spill] sm:$0xff] %v7162_v20  ;;  %v7182_v18 = vmul.f32 %v6997_v33, %v6976_v26  ;;  %v7189_v23 = vmul.f32 %v5160_v58, %v7140_v21  ;;  %v2713_v59 = vmul.f32 %v8476_v10, %v2679_v44  ;;  %v2334_v10 = vpop.permute.xlu1 %2333  ;;  %v2330_v11 = vpop.permute.xlu0 %2329  ;;  %v8514_v21 = vld [vmem:[#allocation116_spill] sm:$0xff] }
 0x4d8   : > { %8472 = vst [vmem:[#allocation129_spill] sm:$0xff] %v7172_v42  ;;  %8473 = vst [vmem:[#allocation130_spill] sm:$0xff] %v7174_v36  ;;  %v2712_v54 = vmul.f32 %v8477_v30, %v2678_v1  ;;  %v2681_v51 = vmul.f32 %v2323_v40, %v8478_v48  ;;  %v2680_v46 = vmul.f32 %v2319_v14, %v8478_v48  ;;  %v8479_v36 = vld [vmem:[#allocation87_spill] sm:$0xff]  ;;  %v8485_v30 = vld [vmem:[#allocation82_spill] sm:$0xff] }
 0x4d9   : > { %8474 = vst [vmem:[#allocation131_spill] sm:$0xff] %v7185_v27  ;;  %8475 = vst [vmem:[#allocation132_spill] sm:$0xff] %v7189_v23  ;;  %v2743_v42 = vadd.f32 %v8479_v36, %v2679_v44  ;;  %v2742_v50 = vadd.f32 %v8480_v7, %v2678_v1  ;;  %v7199_v53 = vmul.f32 %v7011_v28, %v8481_v39  ;;  %v8484_v14 = vld [vmem:[#allocation63_spill] sm:$0xff]  ;;  %v8486_v48 = vld [vmem:[#allocation86_spill] sm:$0xff] }
 0x4da   : > { %8482 = vst [vmem:[#allocation81_spill] sm:$0xff] %v7202_v32  ;;  %v2745_v23 = vadd.f32 %v2713_v59, %v2681_v51  ;;  %v2744_v6 = vadd.f32 %v2712_v54, %v2680_v46  ;;  %v7206_v40 = vmul.f32 %v5164_v52, %v7154_v55  ;;  %v2927_v44 = vmul.f32 %v8484_v14, %v7024_v2  ;;  %v8490_v32 = vld [vmem:[#allocation114_spill] sm:$0xff] }
 0x4db   : > { %v2715_v1 = vmul.f32 %v8485_v30, %v2681_v51  ;;  %v2714_v27 = vmul.f32 %v8486_v48, %v2680_v46  ;;  %v2683_v22 = vmul.f32 %v2334_v10, %v8487_v25  ;;  %v2682_v61 = vmul.f32 %v2330_v11, %v8487_v25  ;;  %v8492_v2 = vld [vmem:[#allocation78_spill] sm:$0xff]  ;;  %v8493_v46 = vld [vmem:[#allocation91_spill] sm:$0xff]  ;;  %v2345_v25 = vpop.permute.xlu1 %2344  ;;  %v2341_v11 = vpop.permute.xlu0 %2340 }
 0x4dc   : > { %8483 = vst [vmem:[#allocation83_spill] sm:$0xff] %v7206_v40  ;;  %v7215_v59 = vmul.f32 0.0, %v7158_v57  ;;  %v7219_v54 = vmul.f32 %v5152_v49, %v7158_v57  ;;  %v8491_v40 = vld [vmem:[#allocation62_spill] sm:$0xff]  ;;  %v2935_v14 = vmul.f32 %v8492_v2, %v7170_v15  ;;  %v2803_v51 = vmul.f32 %v6873_v13, %v2743_v42 }
 0x4dd   : > { %v2926_v5 = vmul.f32 %v8491_v40, %v8490_v32  ;;  %v2802_v30 = vmul.f32 %v8493_v46, %v2742_v50  ;;  %v2747_v10 = vadd.f32 %v2715_v1, %v2683_v22  ;;  %v2746_v48 = vadd.f32 %v2714_v27, %v2682_v61  ;;  %v8498_v40 = vld [vmem:[#allocation111_spill] sm:$0xff]  ;;  %v8499_v1 = vld [vmem:[#allocation117_spill] sm:$0xff] }
 0x4de   : > { %8488 = vst [vmem:[#allocation72_spill] sm:$0xff] %v7215_v59  ;;  %8489 = vst [vmem:[#allocation87_spill] sm:$0xff] %v7219_v54  ;;  %v8494_v59 = vld [vmem:[#allocation115_spill] sm:$0xff]  ;;  %v7232_v54 = vmul.f32 0.0, %v7162_v20  ;;  %v7236_v32 = vmul.f32 %v5156_v41, %v7162_v20  ;;  %v7240_v13 = vmul.f32 %v8498_v40, %v8493_v46  ;;  %v7248_v57 = vmul.f32 %v8499_v1, %v8481_v39 }
 0x4df   : > { %v7229_v47 = vmul.f32 %v8494_v59, %v6976_v26  ;;  %v7242_v2 = vadd.f32 %v2803_v51, %v2747_v10  ;;  %v7244_v27 = vadd.f32 %v2802_v30, %v2746_v48  ;;  %v7251_v59 = vmul.f32 %v5160_v58, %v2927_v44 }
 0x4e0   : > { %8496 = vst [vmem:[#allocation105_spill] sm:$0xff] %v7232_v54  ;;  %8497 = vst [vmem:[#allocation63_spill] sm:$0xff] %v7236_v32  ;;  %v8502_v54 = vld [vmem:[#allocation90_spill] sm:$0xff]  ;;  %v2716_v20 = vmul.f32 %v8503_v0, %v2682_v61  ;;  %v8504_v32 = vld [vmem:[#allocation79_spill] sm:$0xff]  ;;  %v7258_v51 = vadd.f32 %v2743_v42, %v8479_v36  ;;  %v7261_v30 = vadd.f32 %v2742_v50, %v8480_v7 }
 0x4e1   : > { %8495 = vst [vmem:[#allocation84_spill] sm:$0xff] %v7229_v47  ;;  %8500 = vst [vmem:[#allocation82_spill] sm:$0xff] %v7248_v57  ;;  %v2717_v47 = vmul.f32 %v8502_v54, %v2683_v22  ;;  %v2685_v55 = vmul.f32 %v2345_v25, %v8504_v32  ;;  %v2684_v46 = vmul.f32 %v2341_v11, %v8504_v32  ;;  %v2356_v25 = vpop.permute.xlu1 %2355  ;;  %v2352_v11 = vpop.permute.xlu0 %2351  ;;  %v8507_v50 = vld [vmem:[#allocation88_spill] sm:$0xff] }
 0x4e2   : > { %8501 = vst [vmem:[#allocation86_spill] sm:$0xff] %v7251_v59  ;;  %v7264_v1 = vmul.f32 %v5164_v52, %v2926_v5  ;;  %v7267_v44 = vmul.f32 %v5152_v49, %v2935_v14  ;;  %v2805_v22 = vmul.f32 %v6889_v24, %v2745_v23  ;;  %v2804_v0 = vmul.f32 %v6910_v56, %v2744_v6  ;;  %v8516_v49 = vld [vmem:[#allocation113_spill] sm:$0xff] }
 0x4e3   : > { %v2749_v61 = vadd.f32 %v2717_v47, %v2685_v55  ;;  %v2748_v54 = vadd.f32 %v2716_v20, %v2684_v46  ;;  %v2719_v42 = vmul.f32 %v6955_v60, %v2685_v55  ;;  %v2718_v32 = vmul.f32 %v6961_v9, %v2684_v46 }
 0x4e4   : > { %8505 = vst [vmem:[#allocation74_spill] sm:$0xff] %v7264_v1  ;;  %8506 = vst [vmem:[#allocation114_spill] sm:$0xff] %v7267_v44  ;;  %v2687_v59 = vmul.f32 %v2356_v25, %v8507_v50  ;;  %v2686_v5 = vmul.f32 %v2352_v11, %v8507_v50  ;;  %v2865_v44 = vmul.f32 %v7166_v63, %v6889_v24 }
 0x4e5   : > { %v7275_v1 = vadd.f32 %v2805_v22, %v2749_v61  ;;  %v7277_v14 = vadd.f32 %v2804_v0, %v2748_v54  ;;  %v2864_v47 = vmul.f32 %v7178_v29, %v6910_v56  ;;  %v2807_v20 = vmul.f32 %v6984_v35, %v2747_v10  ;;  %v2367_v46 = vpop.permute.xlu1 %2366  ;;  %v2363_v25 = vpop.permute.xlu0 %2362  ;;  %v8510_v10 = vld [vmem:[#allocation89_spill] sm:$0xff] }
 0x4e6   : > { %v2806_v60 = vmul.f32 %v8498_v40, %v2746_v48  ;;  %v2751_v55 = vadd.f32 %v2719_v42, %v2687_v59  ;;  %v2750_v9 = vadd.f32 %v2718_v32, %v2686_v5  ;;  %v2887_v22 = vmul.f32 %v7170_v15, %v7258_v51  ;;  %v8511_v48 = vld [vmem:[#allocation92_spill] sm:$0xff] }
 0x4e7   : > { %8508 = vst [vmem:[#allocation62_spill] sm:$0xff] %v7275_v1  ;;  %8509 = vst [vmem:[#allocation78_spill] sm:$0xff] %v7277_v14  ;;  %v2886_v0 = vmul.f32 %v7240_v13, %v7261_v30  ;;  %v2867_v24 = vmul.f32 %v7182_v18, %v6984_v35  ;;  %v7293_v56 = vmul.f32 %v7199_v53, %v8498_v40  ;;  %v8512_v1 = vld [vmem:[#allocation93_spill] sm:$0xff] }
 0x4e8   : > { %v7296_v11 = vadd.f32 %v8510_v10, %v2745_v23  ;;  %v7299_v42 = vadd.f32 %v8511_v48, %v2744_v6  ;;  %v2839_v32 = vadd.f32 %v2807_v20, %v2751_v55  ;;  %v2838_v50 = vadd.f32 %v2806_v60, %v2750_v9 }
 0x4e9   : > { %v2721_v15 = vmul.f32 %v6997_v33, %v2687_v59  ;;  %v2720_v14 = vmul.f32 %v7011_v28, %v2686_v5  ;;  %v2689_v57 = vmul.f32 %v2367_v46, %v8512_v1  ;;  %v2688_v35 = vmul.f32 %v2363_v25, %v8512_v1  ;;  %v2378_v5 = vpop.permute.xlu1 %2377  ;;  %v2374_v1 = vpop.permute.xlu0 %2373 }
 0x4ea   : > { %v2895_v40 = vadd.f32 %v8514_v21, %v8513_v19  ;;  %v2894_v23 = vadd.f32 %v8516_v49, %v8515_v45  ;;  %v7309_v10 = vadd.f32 %v2887_v22, %v2839_v32  ;;  %v7311_v6 = vadd.f32 %v2886_v0, %v2838_v50  ;;  %v8517_v21 = vld [vmem:[#allocation95_spill] sm:$0xff] }
 0x4eb   : > { %v2809_v20 = vmul.f32 %v7166_v63, %v2749_v61  ;;  %v2808_v33 = vmul.f32 %v7178_v29, %v2748_v54  ;;  %v7315_v59 = vadd.f32 %v2721_v15, %v2689_v57  ;;  %v7317_v28 = vadd.f32 %v2720_v14, %v2688_v35  ;;  %v8518_v32 = vld [vmem:[#allocation75_spill] sm:$0xff] }
 0x4ec   : > { %v2723_v60 = vmul.f32 %v6976_v26, %v2689_v57  ;;  %v2722_v19 = vmul.f32 %v8481_v39, %v2688_v35  ;;  %v7322_v49 = vmul.f32 %v2378_v5, %v8517_v21  ;;  %v7325_v45 = vmul.f32 %v2374_v1, %v8517_v21  ;;  %v8520_v1 = vld [vmem:[#allocation103_spill] sm:$0xff]  ;;  %v8522_v21 = vld [vmem:[#allocation97_spill] sm:$0xff] }
 0x4ed   : > { %v2841_v61 = vadd.f32 %v2809_v20, %v7315_v59  ;;  %v2840_v54 = vadd.f32 %v2808_v33, %v7317_v28  ;;  %v2889_v46 = vmul.f32 %v2865_v44, %v7296_v11  ;;  %v2888_v14 = vmul.f32 %v2864_v47, %v7299_v42  ;;  %v7335_v22 = vpop.permute.xlu1 %2388  ;;  %v7337_v0 = vpop.permute.xlu0 %2384  ;;  %v8519_v33 = vld [vmem:[#allocation85_spill] sm:$0xff] }
 0x4ee   : > { %v2811_v25 = vmul.f32 %v7182_v18, %v2751_v55  ;;  %v2810_v26 = vmul.f32 %v7199_v53, %v2750_v9  ;;  %v2755_v39 = vadd.f32 %v2723_v60, %v7322_v49  ;;  %v2754_v57 = vadd.f32 %v2722_v19, %v7325_v45 }
 0x4ef   : > { %v2934_v50 = vmul.f32 %v8518_v32, %v7240_v13  ;;  %v2929_v15 = vmul.f32 %v7051_v8, %v6899_v62  ;;  %v7343_v35 = vadd.f32 %v2889_v46, %v2841_v61  ;;  %v7345_v20 = vadd.f32 %v2888_v14, %v2840_v54  ;;  %v8521_v8 = vld [vmem:[#allocation80_spill] sm:$0xff]  ;;  %v8525_v32 = vld [vmem:[#allocation98_spill] sm:$0xff] }
 0x4f0   : > { %v2843_v18 = vadd.f32 %v2811_v25, %v2755_v39  ;;  %v2842_v53 = vadd.f32 %v2810_v26, %v2754_v57  ;;  %v2891_v55 = vmul.f32 %v2867_v24, %v7242_v2  ;;  %v2890_v9 = vmul.f32 %v7293_v56, %v7244_v27  ;;  %v8523_v26 = vld [vmem:[#allocation102_spill] sm:$0xff] }
 0x4f1   : > { %v2974_v5 = vadd.f32 %v8519_v33, %v2894_v23  ;;  %v2896_v60 = vadd.f32 %v7057_v38, %v8520_v1  ;;  %v2928_v13 = vmul.f32 %v7061_v12, %v6914_v17  ;;  %v2937_v62 = vmul.f32 %v2865_v44, %v6844_v37  ;;  %v2400_v14 = vpop.permute.xlu1 %2399  ;;  %v2396_v25 = vpop.permute.xlu0 %2395  ;;  %v8527_v33 = vld [vmem:[#allocation104_spill] sm:$0xff] }
 0x4f2   : > { %v2975_v19 = vadd.f32 %v8521_v8, %v2895_v40  ;;  %v2897_v61 = vadd.f32 %v7047_v43, %v8522_v21  ;;  %v7359_v54 = vadd.f32 %v2891_v55, %v2843_v18  ;;  %v7361_v46 = vadd.f32 %v2890_v9, %v2842_v53  ;;  %v8531_v21 = vld [vmem:[#allocation71_spill] sm:$0xff] }
 0x4f3   : > { %v7364_v23 = vmul.f32 %v5156_v41, %v2934_v50  ;;  %v2936_v38 = vmul.f32 %v2864_v47, %v6865_v4  ;;  %v2931_v17 = vmul.f32 %v7065_v31, %v8523_v26  ;;  %v2930_v37 = vmul.f32 %v7069_v34, %v6953_v16  ;;  %v8524_v31 = vld [vmem:[#allocation61_spill] sm:$0xff] }
 0x4f4   : > { %v3007_v12 = vmul.f32 %v2975_v19, %v2400_v14  ;;  %v3006_v44 = vmul.f32 %v2974_v5, %v2396_v25  ;;  %v7372_v43 = vmul.f32 %v5160_v58, %v2929_v15  ;;  %v2939_v40 = vmul.f32 %v2867_v24, %v6970_v3  ;;  %v8526_v15 = vld [vmem:[#allocation99_spill] sm:$0xff]  ;;  %v8530_v19 = vld [vmem:[#allocation125_spill] sm:$0xff] }
 0x4f5   : > { %v2911_v39 = vadd.f32 %v7258_v51, %v8479_v36  ;;  %v2910_v57 = vadd.f32 %v7261_v30, %v8480_v7  ;;  %v7380_v4 = vmul.f32 %v5164_v52, %v2928_v13  ;;  %v7383_v47 = vmul.f32 %v8524_v31, %v2937_v62  ;;  %v2411_v18 = vpop.permute.xlu1 %2410  ;;  %v2407_v36 = vpop.permute.xlu0 %2406  ;;  %v8529_v62 = vld [vmem:[#allocation106_spill] sm:$0xff] }
 0x4f6   : > { %v3039_v16 = vsel %vm81_vm0, %v3007_v12, 0.0  ;;  %v3038_v34 = vsel %vm81_vm0, %v3006_v44, 0.0  ;;  %v2977_v50 = vadd.f32 %v8525_v32, %v2897_v61  ;;  %v2976_v3 = vadd.f32 %v8526_v15, %v2896_v60  ;;  %v8528_v60 = vld [vmem:[#allocation100_spill] sm:$0xff]  ;;  %v8536_v15 = vld [vmem:[#allocation109_spill] sm:$0xff] }
 0x4f7   : > { %v3040_v24 = vadd.f32 %v3039_v16, %v3038_v34  ;;  %v7390_v51 = vmul.f32 %v5156_v41, %v2936_v38  ;;  %v7393_v7 = vmul.f32 %v5160_v58, %v2931_v17  ;;  %v7396_v30 = vmul.f32 %v5164_v52, %v2930_v37  ;;  %v8532_v38 = vld [vmem:[#allocation89_spill] sm:$0xff]  ;;  %v8535_v16 = vld [vmem:[#allocation84_spill] sm:$0xff] }
 0x4f8   : > { %v3009_v53 = vmul.f32 %v2977_v50, %v2411_v18  ;;  %v3008_v55 = vmul.f32 %v2976_v3, %v2407_v36  ;;  %v7399_v9 = vmul.f32 %v8524_v31, %v2939_v40  ;;  %v2938_v5 = vmul.f32 %v7293_v56, %v8527_v33  ;;  %v8533_v40 = vld [vmem:[#allocation126_spill] sm:$0xff]  ;;  %v8537_v3 = vld [vmem:[#allocation108_spill] sm:$0xff] }
 0x4f9   : > { %v3041_v1 = vrot.slane %v3040_v24, 4  ;;  %v2991_v13 = vadd.f32 %v8528_v60, %v2911_v39  ;;  %v2990_v8 = vadd.f32 %v8529_v62, %v2910_v57  ;;  %v2933_v61 = vmul.f32 %v8531_v21, %v8530_v19  ;;  %v2488_v12 = vpop.permute.xlu1 %2487  ;;  %v2484_v44 = vpop.permute.xlu0 %2483  ;;  %v8534_v39 = vld [vmem:[#allocation73_spill] sm:$0xff]  ;;  %v8538_v18 = vld [vmem:[#allocation82_spill] sm:$0xff]  ;;  %v8543_v62 = vld [vmem:[#allocation107_spill] sm:$0xff] }
 0x4fa   : > { %v3048_v14 = vsel %vm81_vm0, %v3009_v53, 0.0  ;;  %v3047_v25 = vsel %vm81_vm0, %v3008_v55, 0.0  ;;  %v2913_v26 = vadd.f32 %v7296_v11, %v8532_v38  ;;  %v2912_v17 = vadd.f32 %v7299_v42, %v8511_v48  ;;  %v8540_v36 = vld [vmem:[#allocation110_spill] sm:$0xff]  ;;  %v8541_v53 = vld [vmem:[#allocation77_spill] sm:$0xff] }
 0x4fb   : > { %v3042_v37 = vadd.f32 %v3041_v1, %v3040_v24  ;;  %v3049_v56 = vadd.f32 %v3048_v14, %v3047_v25  ;;  %v7415_v57 = vmul.f32 %v8534_v39, %v8533_v40  ;;  %v7419_v34 = vmul.f32 %v8535_v16, %v7166_v63  ;;  %v8542_v60 = vld [vmem:[#allocation101_spill] sm:$0xff]  ;;  %v8545_v39 = vld [vmem:[#allocation127_spill] sm:$0xff] }
 0x4fc   : > { %v3023_v32 = vmul.f32 %v2991_v13, %v2488_v12  ;;  %v3022_v50 = vmul.f32 %v2990_v8, %v2484_v44  ;;  %v2899_v11 = vadd.f32 %v8537_v3, %v8536_v15  ;;  %v7425_v48 = vmul.f32 %v8538_v18, %v7178_v29  ;;  %v8544_v44 = vld [vmem:[#allocation112_spill] sm:$0xff] }
 0x4fd   : > { %v3043_v42 = vrot.slane %v3042_v37, 2  ;;  %v3050_v24 = vrot.slane %v3049_v56, 4  ;;  %v2898_v55 = vadd.f32 %v8541_v53, %v8540_v36  ;;  %v7430_v33 = vmul.f32 %v5156_v41, %v2938_v5  ;;  %v2499_v14 = vpop.permute.xlu1 %2498  ;;  %v2495_v25 = vpop.permute.xlu0 %2494 }
 0x4fe   : > { %8539 = vst [vmem:[#allocation91_spill] sm:$0xff] %v7425_v48  ;;  %v3111_v63 = vsel %vm81_vm0, %v3023_v32, 0.0  ;;  %v3110_v1 = vsel %vm81_vm0, %v3022_v50, 0.0  ;;  %v2993_v13 = vadd.f32 %v8542_v60, %v2913_v26  ;;  %v2992_v8 = vadd.f32 %v8543_v62, %v2912_v17  ;;  %v8546_v26 = vld [vmem:[#allocation121_spill] sm:$0xff]  ;;  %v8547_v17 = vld [vmem:[#allocation122_spill] sm:$0xff]  ;;  %v8549_v60 = vld [vmem:[#allocation128_spill] sm:$0xff] }
 0x4ff   : > { %v3044_v19 = vadd.f32 %v3043_v42, %v3042_v37  ;;  %v3051_v29 = vadd.f32 %v3050_v24, %v3049_v56  ;;  %v3112_v21 = vadd.f32 %v3111_v63, %v3110_v1  ;;  %v7437_v38 = vmul.f32 %v5160_v58, %v2933_v61  ;;  %v8548_v61 = vld [vmem:[#allocation124_spill] sm:$0xff] }
 0x500   : > { %v3025_v12 = vmul.f32 %v2993_v13, %v2499_v14  ;;  %v3024_v5 = vmul.f32 %v2992_v8, %v2495_v25  ;;  %v2979_v40 = vadd.f32 %v8544_v44, %v2899_v11  ;;  %v2941_v32 = vmul.f32 %v7419_v34, %v8545_v39  ;;  %v8550_v8 = vld [vmem:[#allocation118_spill] sm:$0xff]  ;;  %v8552_v25 = vld [vmem:[#allocation119_spill] sm:$0xff] }
 0x501   : > { %v3052_v50 = vrot.slane %v3051_v29, 2  ;;  %v3113_v15 = vrot.slane %v3112_v21, 4  ;;  %v2978_v3 = vadd.f32 %v8546_v26, %v2898_v55  ;;  %v2915_v37 = vadd.f32 %v8547_v17, %v7242_v2  ;;  %v2422_v63 = vpop.permute.xlu1 %2421  ;;  %v2418_v1 = vpop.permute.xlu0 %2417  ;;  %v8551_v2 = vld [vmem:[#allocation131_spill] sm:$0xff]  ;;  %v8555_v17 = vld [vmem:[#allocation69_spill] sm:$0xff] }
 0x502   : > { %v3045_v56 = vrot.slane %v3044_v19, 1  ;;  %v3120_v42 = vsel %vm81_vm0, %v3025_v12, 0.0  ;;  %v3119_v58 = vsel %vm81_vm0, %v3024_v5, 0.0  ;;  %v2914_v24 = vadd.f32 %v8548_v61, %v7244_v27  ;;  %v8553_v12 = vld [vmem:[#allocation81_spill] sm:$0xff]  ;;  %v8554_v27 = vld [vmem:[#allocation123_spill] sm:$0xff] }
 0x503   : > { %v3053_v36 = vadd.f32 %v3052_v50, %v3051_v29  ;;  %v3114_v11 = vadd.f32 %v3113_v15, %v3112_v21  ;;  %v3121_v53 = vadd.f32 %v3120_v42, %v3119_v58  ;;  %v2940_v13 = vmul.f32 %v7425_v48, %v8549_v60 }
 0x504   : > { %v3011_v55 = vmul.f32 %v2979_v40, %v2422_v63  ;;  %v3010_v62 = vmul.f32 %v2978_v3, %v2418_v1  ;;  %v2901_v14 = vadd.f32 %v8551_v2, %v8550_v8  ;;  %v2900_v44 = vadd.f32 %v8553_v12, %v8552_v25  ;;  %v8556_v2 = vld [vmem:[#allocation132_spill] sm:$0xff]  ;;  %v8557_v12 = vld [vmem:[#allocation83_spill] sm:$0xff] }
 0x505   : > { %v3054_v5 = vrot.slane %v3053_v36, 1  ;;  %v3115_v39 = vrot.slane %v3114_v11, 2  ;;  %v3122_v26 = vrot.slane %v3121_v53, 4  ;;  %v2995_v29 = vadd.f32 %v8554_v27, %v2915_v37  ;;  %v2510_v63 = vpop.permute.xlu1 %2509  ;;  %v2506_v1 = vpop.permute.xlu0 %2505 }
 0x506   : > { %v3046_v21 = vadd.f32 %v3045_v56, %v3044_v19  ;;  %v3057_v50 = vsel %vm81_vm0, %v3011_v55, 0.0  ;;  %v3056_v15 = vsel %vm81_vm0, %v3010_v62, 0.0  ;;  %v2994_v42 = vadd.f32 %v8555_v17, %v2914_v24  ;;  %v8558_v55 = vld [vmem:[#allocation62_spill] sm:$0xff]  ;;  %v8559_v62 = vld [vmem:[#allocation72_spill] sm:$0xff] }
 0x507   : > { %v3055_v40 = vadd.f32 %v3054_v5, %v3053_v36  ;;  %v3116_v3 = vadd.f32 %v3115_v39, %v3114_v11  ;;  %v3123_v58 = vadd.f32 %v3122_v26, %v3121_v53  ;;  %v3058_v61 = vadd.f32 %v3057_v50, %v3056_v15  ;;  %v8560_v53 = vld [vmem:[#allocation78_spill] sm:$0xff]  ;;  %v8561_v5 = vld [vmem:[#allocation105_spill] sm:$0xff] }
 0x508   : > { %v3027_v60 = vmul.f32 %v2995_v29, %v2510_v63  ;;  %v3026_v8 = vmul.f32 %v2994_v42, %v2506_v1  ;;  %v2981_v25 = vadd.f32 %v8556_v2, %v2901_v14  ;;  %v2980_v48 = vadd.f32 %v8557_v12, %v2900_v44 }
 0x509   : > { %v3199_v19 = vsel %vm3198_vm5, %v3055_v40, %v3046_v21  ;;  %v3124_v37 = vrot.slane %v3123_v58, 2  ;;  %v3059_v56 = vrot.slane %v3058_v61, 4  ;;  %v2917_v27 = vadd.f32 %v8559_v62, %v8558_v55  ;;  %v2433_v44 = vpop.permute.xlu1 %2432  ;;  %v2429_v50 = vpop.permute.xlu0 %2428  ;;  %v8564_v62 = vld [vmem:[#allocation64_spill] sm:$0xff] }
 0x50a   : > { %v3117_v24 = vrot.slane %v3116_v3, 1  ;;  %v3129_v36 = vsel %vm81_vm0, %v3027_v60, 0.0  ;;  %v3128_v11 = vsel %vm81_vm0, %v3026_v8, 0.0  ;;  %v2916_v39 = vadd.f32 %v8561_v5, %v8560_v53  ;;  %v8562_v8 = vld [vmem:[#allocation87_spill] sm:$0xff]  ;;  %v8566_v5 = vld [vmem:[#allocation120_spill] sm:$0xff] }
 0x50b   : > { %v3125_v26 = vadd.f32 %v3124_v37, %v3123_v58  ;;  %v3060_v14 = vadd.f32 %v3059_v56, %v3058_v61  ;;  %v3130_v29 = vadd.f32 %v3129_v36, %v3128_v11  ;;  %v2956_v21 = vmul.f32 %v5164_v52, %v7415_v57  ;;  %v8563_v37 = vld [vmem:[#allocation63_spill] sm:$0xff]  ;;  %v8565_v36 = vld [vmem:[#allocation86_spill] sm:$0xff] }
 0x50c   : > { %v3013_v15 = vmul.f32 %v2981_v25, %v2433_v44  ;;  %v3012_v17 = vmul.f32 %v2980_v48, %v2429_v50  ;;  %v7471_v42 = vmul.f32 %v8524_v31, %v2941_v32  ;;  %v7474_v40 = vmul.f32 %v5156_v41, %v2940_v13 }
 0x50d   : > { %v3126_v63 = vrot.slane %v3125_v26, 1  ;;  %v3061_v1 = vrot.slane %v3060_v14, 2  ;;  %v3131_v60 = vrot.slane %v3130_v29, 4  ;;  %v2997_v58 = vadd.f32 %v8562_v8, %v2917_v27  ;;  %v2521_v32 = vpop.permute.xlu1 %2520  ;;  %v2517_v56 = vpop.permute.xlu0 %2516  ;;  %v8567_v27 = vld [vmem:[#allocation74_spill] sm:$0xff] }
 0x50e   : > { %v3118_v61 = vadd.f32 %v3117_v24, %v3116_v3  ;;  %v3066_v2 = vsel %vm81_vm0, %v3013_v15, 0.0  ;;  %v3065_v12 = vsel %vm81_vm0, %v3012_v17, 0.0  ;;  %v2996_v52 = vadd.f32 %v8563_v37, %v2916_v39  ;;  %v8569_v17 = vld [vmem:[#allocation65_spill] sm:$0xff] }
 0x50f   : > { %v3127_v57 = vadd.f32 %v3126_v63, %v3125_v26  ;;  %v3062_v48 = vadd.f32 %v3061_v1, %v3060_v14  ;;  %v3132_v25 = vadd.f32 %v3131_v60, %v3130_v29  ;;  %v3067_v31 = vadd.f32 %v3066_v2, %v3065_v12  ;;  %v8568_v14 = vld [vmem:[#allocation70_spill] sm:$0xff] }
 0x510   : > { %v3029_v41 = vmul.f32 %v2997_v58, %v2521_v32  ;;  %v3028_v13 = vmul.f32 %v2996_v52, %v2517_v56  ;;  %v2983_v11 = vadd.f32 %v8565_v36, %v8564_v62  ;;  %v2982_v3 = vadd.f32 %v8567_v27, %v8566_v5  ;;  %v8570_v52 = vld [vmem:[#allocation68_spill] sm:$0xff] }
 0x511   : > { %v3212_v24 = vsel %vm3198_vm5, %v3127_v57, %v3118_v61  ;;  %v3063_v44 = vrot.slane %v3062_v48, 1  ;;  %v3133_v50 = vrot.slane %v3132_v25, 2  ;;  %v3068_v15 = vrot.slane %v3067_v31, 4  ;;  %v2444_v2 = vpop.permute.xlu1 %2443  ;;  %v2440_v61 = vpop.permute.xlu0 %2439  ;;  %v8571_v32 = vld [vmem:[#allocation76_spill] sm:$0xff] }
 0x512   : > { %v3138_v39 = vsel %vm81_vm0, %v3029_v41, 0.0  ;;  %v3137_v26 = vsel %vm81_vm0, %v3028_v13, 0.0  ;;  %v2985_v29 = vadd.f32 %v7372_v43, %v8568_v14  ;;  %v2984_v63 = vadd.f32 %v7380_v4, %v8569_v17  ;;  %v8572_v13 = vld [vmem:[#allocation114_spill] sm:$0xff]  ;;  %v8576_v17 = vld [vmem:[#allocation117_spill] sm:$0xff] }
 0x513   : > { %v3064_v1 = vadd.f32 %v3063_v44, %v3062_v48  ;;  %v3134_v60 = vadd.f32 %v3133_v50, %v3132_v25  ;;  %v3069_v8 = vadd.f32 %v3068_v15, %v3067_v31  ;;  %v3139_v58 = vadd.f32 %v3138_v39, %v3137_v26  ;;  %v8573_v50 = vld [vmem:[#allocation129_spill] sm:$0xff]  ;;  %v8574_v15 = vld [vmem:[#allocation130_spill] sm:$0xff] }
 0x514   : > { %v3015_v12 = vmul.f32 %v2983_v11, %v2444_v2  ;;  %v3014_v37 = vmul.f32 %v2982_v3, %v2440_v61  ;;  %v7493_v57 = vadd.f32 %v7393_v7, %v8570_v52  ;;  %v7497_v56 = vadd.f32 %v7396_v30, %v8571_v32 }
 0x515   : > { %v3201_v43 = vsel %vm3200_vm6, %v3064_v1, %v3199_v19  ;;  %v3135_v41 = vrot.slane %v3134_v60, 1  ;;  %v3070_v4 = vrot.slane %v3069_v8, 2  ;;  %v3140_v48 = vrot.slane %v3139_v58, 4  ;;  %v2532_v27 = vpop.permute.xlu1 %2531  ;;  %v2528_v3 = vpop.permute.xlu0 %2527 }
 0x516   : > { %v3075_v25 = vsel %vm81_vm0, %v3015_v12, 0.0  ;;  %v3074_v31 = vsel %vm81_vm0, %v3014_v37, 0.0  ;;  %v2999_v62 = vadd.f32 %v8572_v13, %v7309_v10  ;;  %v2998_v7 = vadd.f32 %v7364_v23, %v7311_v6  ;;  %v8575_v23 = vld [vmem:[#allocation115_spill] sm:$0xff]  ;;  %v8577_v37 = vld [vmem:[#allocation96_spill] sm:$0xff] }
 0x517   : > { %v3136_v36 = vadd.f32 %v3135_v41, %v3134_v60  ;;  %v3071_v11 = vadd.f32 %v3070_v4, %v3069_v8  ;;  %v3141_v5 = vadd.f32 %v3140_v48, %v3139_v58  ;;  %v3076_v30 = vadd.f32 %v3075_v25, %v3074_v31 }
 0x518   : > { %v3031_v19 = vmul.f32 %v2999_v62, %v2532_v27  ;;  %v3030_v44 = vmul.f32 %v2998_v7, %v2528_v3  ;;  %v7508_v58 = vadd.f32 %v7437_v38, %v8573_v50   ;;  %v7511_v52 = vadd.f32 %v2956_v21, %v8574_v15  }
 0x519   : > { %v3213_v10 = vsel %vm3200_vm6, %v3136_v36, %v3212_v24  ;;  %v3072_v39 = vrot.slane %v3071_v11, 1  ;;  %v3142_v26 = vrot.slane %v3141_v5, 2  ;;  %v3077_v6 = vrot.slane %v3076_v30, 4  ;;  %v2455_v12 = vpop.permute.xlu1 %2454  ;;  %v2451_v24 = vpop.permute.xlu0 %2450 }
 0x51a   : > { %v2725_v14 = vmul.f32 %v8575_v23, %v7322_v49  ;;  %v2724_v1 = vmul.f32 %v8576_v17, %v7325_v45  ;;  %v3147_v60 = vsel %vm81_vm0, %v3031_v19, 0.0  ;;  %v3146_v38 = vsel %vm81_vm0, %v3030_v44, 0.0 }
 0x51b   : > { %v3073_v8 = vadd.f32 %v3072_v39, %v3071_v11  ;;  %v3143_v2 = vadd.f32 %v3142_v26, %v3141_v5  ;;  %v3078_v21 = vadd.f32 %v3077_v6, %v3076_v30  ;;  %v3148_v61 = vadd.f32 %v3147_v60, %v3146_v38 }
 0x51c   : > { %v2693_v32 = vmul.f32 %v7335_v22, %v8577_v37  ;;  %v2692_v49 = vmul.f32 %v7337_v0, %v8577_v37  ;;  %v3017_v41 = vmul.f32 %v2985_v29, %v2455_v12  ;;  %v3016_v4 = vmul.f32 %v2984_v63, %v2451_v24 }
 0x51d   : > { %v3203_v45 = vsel %vm3202_vm7, %v3073_v8, %v3201_v43  ;;  %v3144_v48 = vrot.slane %v3143_v2, 1  ;;  %v3079_v25 = vrot.slane %v3078_v21, 2  ;;  %v3149_v31 = vrot.slane %v3148_v61, 4  ;;  %v2543_v63 = vpop.permute.xlu1 %2542  ;;  %v2539_v5 = vpop.permute.xlu0 %2538 }
 0x51e   : > { %v3084_v13 = vsel %vm81_vm0, %v3017_v41, 0.0  ;;  %v3083_v62 = vsel %vm81_vm0, %v3016_v4, 0.0  ;;  %v3001_v7 = vadd.f32 %v7383_v47, %v7343_v35  ;;  %v3000_v22 = vadd.f32 %v7390_v51, %v7345_v20 }
 0x51f   : > { %v3145_v36 = vadd.f32 %v3144_v48, %v3143_v2  ;;  %v3080_v11 = vadd.f32 %v3079_v25, %v3078_v21  ;;  %v3150_v0 = vadd.f32 %v3149_v31, %v3148_v61  ;;  %v3085_v29 = vadd.f32 %v3084_v13, %v3083_v62 }
 0x520   : > { %v2757_v43 = vadd.f32 %v2725_v14, %v2693_v32  ;;  %v2756_v30 = vadd.f32 %v2724_v1, %v2692_v49  ;;  %v3033_v27 = vmul.f32 %v3001_v7, %v2543_v63  ;;  %v3032_v3 = vmul.f32 %v3000_v22, %v2539_v5 }
 0x521   : > { %v3214_v19 = vsel %vm3202_vm7, %v3145_v36, %v3213_v10  ;;  %v3081_v44 = vrot.slane %v3080_v11, 1  ;;  %v3151_v50 = vrot.slane %v3150_v0, 2  ;;  %v3086_v15 = vrot.slane %v3085_v29, 4  ;;  %v2466_v14 = vpop.permute.xlu1 %2465  ;;  %v2462_v10 = vpop.permute.xlu0 %2461 }
 0x522   : > { %v2813_v35 = vmul.f32 %v8535_v16, %v7315_v59  ;;  %v2812_v20 = vmul.f32 %v8538_v18, %v7317_v28  ;;  %v3156_v47 = vsel %vm81_vm0, %v3033_v27, 0.0  ;;  %v3155_v51 = vsel %vm81_vm0, %v3032_v3, 0.0 }
 0x523   : > { %v3082_v39 = vadd.f32 %v3081_v44, %v3080_v11  ;;  %v3152_v26 = vadd.f32 %v3151_v50, %v3150_v0  ;;  %v3087_v6 = vadd.f32 %v3086_v15, %v3085_v29  ;;  %v3157_v23 = vadd.f32 %v3156_v47, %v3155_v51 }
 0x524   : > { %v2845_v17 = vadd.f32 %v2813_v35, %v2757_v43  ;;  %v2844_v1 = vadd.f32 %v2812_v20, %v2756_v30  ;;  %v3019_v60 = vmul.f32 %v7493_v57, %v2466_v14  ;;  %v3018_v59 = vmul.f32 %v7497_v56, %v2462_v10 }
 0x525   : > { %v3205_v16 = vsel %vm3204_vm8, %v3082_v39, %v3203_v45  ;;  %v3153_v28 = vrot.slane %v3152_v26, 1  ;;  %v3088_v18 = vrot.slane %v3087_v6, 2  ;;  %v3158_v38 = vrot.slane %v3157_v23, 4  ;;  %v2554_v56 = vpop.permute.xlu1 %2553  ;;  %v2550_v32 = vpop.permute.xlu0 %2549  ;;  %v8578_v45 = vld [vmem:[#allocation91_spill] sm:$0xff] }
 0x526   : > { %v3093_v8 = vsel %vm81_vm0, %v3019_v60, 0.0  ;;  %v3092_v2 = vsel %vm81_vm0, %v3018_v59, 0.0  ;;  %v3003_v21 = vadd.f32 %v7399_v9, %v7359_v54  ;;  %v3002_v61 = vadd.f32 %v7430_v33, %v7361_v46 }
 0x527   : > { %v3154_v12 = vadd.f32 %v3153_v28, %v3152_v26  ;;  %v3089_v24 = vadd.f32 %v3088_v18, %v3087_v6  ;;  %v3159_v57 = vadd.f32 %v3158_v38, %v3157_v23  ;;  %v3094_v37 = vadd.f32 %v3093_v8, %v3092_v2 }
 0x528   : > { %v3035_v49 = vmul.f32 %v3003_v21, %v2554_v56  ;;  %v3034_v41 = vmul.f32 %v3002_v61, %v2550_v32  ;;  %v2893_v4 = vmul.f32 %v7419_v34, %v8558_v55  ;;  %v2892_v48 = vmul.f32 %v8578_v45, %v8560_v53  ;;  %v5052_v32 = vld [vmem:[%s8153_s12 + $0x8] sm:$0xff] (%p1833_p0)   ;;  %v8580_v45 = vld [vmem:[#allocation35_spill] sm:$0xff] (%p1833_p0) }
 0x529   : > { %v3215_v25 = vsel %vm3204_vm8, %v3154_v12, %v3214_v19  ;;  %v3090_v54 = vrot.slane %v3089_v24, 1  ;;  %v3160_v9 = vrot.slane %v3159_v57, 2  ;;  %v3095_v31 = vrot.slane %v3094_v37, 4  ;;  %v2477_v0 = vpop.permute.xlu1 %2476  ;;  %v2473_v34 = vpop.permute.xlu0 %2472  ;;  %4614 = vmatprep.subr.bf16.mxu1 (%p1833_p0), %v5052_v32 }
 0x52a   : > { %v3165_v46 = vsel %vm81_vm0, %v3035_v49, 0.0  ;;  %v3164_v33 = vsel %vm81_vm0, %v3034_v41, 0.0  ;;  %v2925_v13 = vadd.f32 %v2893_v4, %v2845_v17  ;;  %v2924_v62 = vadd.f32 %v2892_v48, %v2844_v1  ;;  %v8579_v4 = vld [vmem:[#allocation47_spill] sm:$0xff] (%p1833_p0)  ;;  %4615 = vmatpush3.bf16.msra.mxu1 (%p1833_p0), %v5052_v32  ;;  %v8601_v32 = vld [vmem:[#allocation33_spill] sm:$0xff] (%p1833_p0) }
 0x52b   : > { %v3091_v7 = vadd.f32 %v3090_v54, %v3089_v24  ;;  %v3161_v22 = vadd.f32 %v3160_v9, %v3159_v57  ;;  %v3096_v36 = vadd.f32 %v3095_v31, %v3094_v37  ;;  %v3166_v11 = vadd.f32 %v3165_v46, %v3164_v33  ;;  %v5054_v54 = vld [vmem:[%s8153_s12] sm:$0xff] (%p1833_p0)   ;;  %v8583_v9 = vld [vmem:[#allocation40_spill] sm:$0xff] (%p1833_p0)  ;;  %v8584_v46 = vld [vmem:[#allocation37_spill] sm:$0xff] (%p1833_p0) }
 0x52c   : > { %v3021_v55 = vmul.f32 %v7508_v58, %v2477_v0  ;;  %v3020_v53 = vmul.f32 %v7511_v52, %v2473_v34  ;;  %v3005_v49 = vadd.f32 %v7471_v42, %v2925_v13   ;;  %v3004_v41 = vadd.f32 %v7474_v40, %v2924_v62   ;;  %v5055_v58 = vld [vmem:[%s8581_s3] sm:$0xff] (%p1833_p0)   ;;  %4616 = vmatprep.subr.bf16.mxu1 (%p1833_p0), %v5054_v54  ;;  %v8587_v34 = vld [vmem:[#allocation32_spill] sm:$0xff] (%p1833_p0) }
 0x52d   : > { %v3207_v29 = vsel %vm3206_vm9, %v3091_v7, %v3205_v16  ;;  %v3162_v63 = vrot.slane %v3161_v22, 1  ;;  %v3097_v5 = vrot.slane %v3096_v36, 2  ;;  %v3167_v43 = vrot.slane %v3166_v11, 4  ;;  %v2565_v15 = vpop.permute.xlu1 %2564  ;;  %v2561_v35 = vpop.permute.xlu0 %2560  ;;  %v8585_v7 = vld [vmem:[#allocation38_spill] sm:$0xff] (%p1833_p0) }
 0x52e   : > { %v3102_v30 = vsel %vm81_vm0, %v3021_v55, 0.0  ;;  %v3101_v27 = vsel %vm81_vm0, %v3020_v53, 0.0  ;;  %v3037_v20 = vmul.f32 %v3005_v49, %v2565_v15  ;;  %v3036_v47 = vmul.f32 %v3004_v41, %v2561_v35  ;;  %v7598_v41 = vld [vmem:[%s8582_s23] ss:$0 sm:$0xff] (%p1833_p0)  ;;  %v8588_v55 = vld [vmem:[#allocation49_spill] sm:$0xff] (%p1833_p0)  ;;  %4617 = vmatpush3.bf16.msra.mxu1 (%p1833_p0), %v5054_v54 }
 0x52f   : > { %v3163_v3 = vadd.f32 %v3162_v63, %v3161_v22  ;;  %v3098_v19 = vadd.f32 %v3097_v5, %v3096_v36  ;;  %v3168_v44 = vadd.f32 %v3167_v43, %v3166_v11  ;;  %v3103_v50 = vadd.f32 %v3102_v30, %v3101_v27  ;;  %v8586_v36 = vld [vmem:[#allocation36_spill] sm:$0xff] (%p1833_p0)  ;;  %v8590_v63 = vld [vmem:[#allocation57_spill] sm:$0xff] (%p1833_p0) }
 0x530   : > { %v3174_v23 = vsel %vm81_vm0, %v3037_v20, 0.0  ;;  %v3173_v42 = vsel %vm81_vm0, %v3036_v47, 0.0  ;;  %v3291_v48 = vpack.c.bf16 (%p1833_p0), %v8580_v45, %v8579_v4  ;;  %v3247_v31 = vmul.f32 (%p1833_p0), %v7598_v41, %v8583_v9  ;;  %v8591_v30 = vld [vmem:[#allocation41_spill] sm:$0xff] (%p1833_p0)  ;;  %v8602_v45 = vld [vmem:[#allocation31_spill] sm:$0xff] (%p1833_p0)  ;;  %v8604_v9 = vld [vmem:[#allocation28_spill] sm:$0xff] (%p1833_p0) }
 0x531   : > { %v3216_v51 = vsel %vm3206_vm9, %v3163_v3, %v3215_v25  ;;  %v3099_v39 = vrot.slane %v3098_v19, 1  ;;  %v3169_v26 = vrot.slane %v3168_v44, 2  ;;  %v3104_v6 = vrot.slane %v3103_v50, 4  ;;  %v5053_v25 = vld [vmem:[%s8581_s3 + $0x8] sm:$0xff] (%p1833_p0)   ;;  %v8592_v3 = vld [vmem:[#allocation39_spill] sm:$0xff] (%p1833_p0) }
 0x532   : > { %v3175_v17 = vadd.f32 %v3174_v23, %v3173_v42  ;;  %4618 = vmatprep.mubr.msk.bf16.mxu1 (%p1833_p0), %vm81_vm0, %v3291_v48  ;;  %4634 = vmatprep.subr.bf16.mxu0 (%p1833_p0), %v5053_v25  ;;  %v3248_v33 = vmul.f32 (%p1833_p0), %v7598_v41, %v8584_v46  ;;  %v3249_v22 = vmul.f32 (%p1833_p0), %v7598_v41, %v8585_v7  ;;  %v8594_v23 = vld [vmem:[#allocation45_spill] sm:$0xff] (%p1833_p0) }
 0x533   : > { %v3100_v14 = vadd.f32 %v3099_v39, %v3098_v19  ;;  %v3170_v40 = vadd.f32 %v3169_v26, %v3168_v44  ;;  %v3105_v10 = vadd.f32 %v3104_v6, %v3103_v50  ;;  %4635 = vmatpush3.bf16.msra.mxu0 (%p1833_p0), %v5053_v25  ;;  %v3250_v11 = vmul.f32 (%p1833_p0), %v7598_v41, %v8586_v36  ;;  %v8593_v26 = vld [vmem:[#allocation43_spill] sm:$0xff] (%p1833_p0)  ;;  %v8605_v36 = vld [vmem:[#allocation29_spill] sm:$0xff] (%p1833_p0) }
 0x534   : > { %v3176_v16 = vrot.slane %v3175_v17, 4  ;;  %4636 = vmatprep.subr.bf16.mxu0 (%p1833_p0), %v5055_v58  ;;  %v3292_v53 = vpack.c.bf16 (%p1833_p0), %v8588_v55, %v8587_v34  ;;  %v3251_v27 = vmul.f32 (%p1833_p0), %v7598_v41, %v8591_v30  ;;  %v3252_v19 = vmul.f32 (%p1833_p0), %v7598_v41, %v8592_v3  ;;  %v8607_v34 = vld [vmem:[#allocation55_spill] sm:$0xff] (%p1833_p0)  ;;  %v8608_v55 = vld [vmem:[#allocation58_spill] sm:$0xff] (%p1833_p0) }
 0x535   : > { %v3209_v1 = vsel %vm3208_vm10, %v3100_v14, %v3207_v29  ;;  %v3171_v60 = vrot.slane %v3170_v40, 1  ;;  %v3106_v59 = vrot.slane %v3105_v10, 2  ;;  %v8589_v29 = vld [vmem:[#allocation53_spill] sm:$0xff] (%p1833_p0)  ;;  %v3253_v6 = vmul.f32 (%p1833_p0), %v7598_v41, %v8593_v26 }
 0x536   : > { %v3177_v38 = vadd.f32 %v3176_v16, %v3175_v17  ;;  %v3293_v5 = vpack.c.bf16 (%p1833_p0), %v8590_v63, %v8589_v29  ;;  %v3254_v42 = vmul.f32 (%p1833_p0), %v7598_v41, %v8594_v23  ;;  %4619 = vmatmul.mubr.msk.bf16.vlgmr.msra.gmra.mxu1 (%p1833_p0), %vm81_vm0, %v3292_v53  ;;  %v3257_v4 = vmul.f32 (%p1833_p0), %v7598_v41, %v8601_v32  ;;  %v8609_v63 = vld [vmem:[#allocation30_spill] sm:$0xff] (%p1833_p0) }
 0x537   : > { %v3172_v28 = vadd.f32 %v3171_v60, %v3170_v40  ;;  %v3107_v18 = vadd.f32 %v3106_v59, %v3105_v10  ;;  %4637 = vmatpush3.bf16.msra.mxu0 (%p1833_p0), %v5055_v58  ;;  %v8596_v59 = vld [vmem:[#allocation42_spill] sm:$0xff] (%p1833_p0)  ;;  %v3258_v48 = vmul.f32 (%p1833_p0), %v7598_v41, %v8602_v45  ;;  %v3297_v53 = vpack.c.bf16 (%p1833_p0), %v8608_v55, %v8607_v34 }
 0x538   : > { %v3178_v21 = vrot.slane %v3177_v38, 2  ;;  %v3256_v16 = vmul.f32 (%p1833_p0), %v7598_v41, %v8596_v59  ;;  %4622 = vmatprep.mubr.msk.bf16.mxu1 (%p1833_p0), %vm81_vm0, %v3293_v5  ;;  %v3261_v5 = vmul.f32 (%p1833_p0), %v7598_v41, %v8609_v63 }
 0x539   : > { %v3217_v8 = vsel %vm3208_vm10, %v3172_v28, %v3216_v51  ;;  %v3108_v2 = vrot.slane %v3107_v18, 1 }
 0x53a   : > { %v3179_v12 = vadd.f32 %v3178_v21, %v3177_v38  ;;  %v8597_v21 = vld [vmem:[#allocation51_spill] sm:$0xff] (%p1833_p0) }
 0x53b   : > { %v3109_v61 = vadd.f32 %v3108_v2, %v3107_v18 }
 0x53c   : > { %v3180_v57 = vrot.slane %v3179_v12, 1 }
 0x53d   : > { %v3211_v24 = vsel %vm3210_vm11, %v3109_v61, %v3209_v1  ;;  %1835 = sbr.rel (!%p1833_p0) target bundleno = 1080 (0x438), region = 108  ;;  %v8595_v1 = vld [vmem:[#allocation44_spill] sm:$0xff] (%p1833_p0)  ;;  %v8598_v61 = vld [vmem:[#allocation54_spill] sm:$0xff] (%p1833_p0) }
 0x53e   : > { %3222 = vst.msk [vmem:[%s3221_s1] sm:$0xff] %vm81_vm0, %v3211_v24  ;;  %v3181_v37 = vadd.f32 %v3180_v57, %v3179_v12  ;;  %v3255_v60 = vmul.f32 (%p1833_p0), %v7598_v41, %v8595_v1  ;;  %v3294_v12 = vpack.c.bf16 (%p1833_p0), %v8598_v61, %v8597_v21  ;;  %v8599_v24 = vld [vmem:[#allocation48_spill] sm:$0xff] (%p1833_p0)  ;;  %v8600_v57 = vld [vmem:[#allocation27_spill] sm:$0xff] (%p1833_p0) }
 0x53f   :  { %v8614_v1 = vld [vmem:[#allocation7_spill] sm:$0xff] (%p1833_p0) }
 0x540   : > { %v3218_v56 = vsel %vm3210_vm11, %v3181_v37, %v3217_v8  ;;  %v3295_v37 = vpack.c.bf16 (%p1833_p0), %v8600_v57, %v8599_v24  ;;  %4623 = vmatmul.mubr.msk.bf16.gmra.mxu1 (%p1833_p0), %vm81_vm0, %v3294_v12  ;;  %v8616_v24 = vld [vmem:[#allocation9_spill] sm:$0xff] (%p1833_p0) }
 0x541   : > { %3223 = vst.msk [vmem:[%s3221_s1 + $0x40] sm:$0xff] %vm81_vm0, %v3218_v56 }
 0x542   :  { %4626 = vmatprep.mubr.msk.bf16.mxu1 %vm81_vm0, %v3295_v37 }
 0x548   :  { %v3224_v52 = vld [vmem:[#allocation6] sm:$0xff]  ;;  %v3225_v49 = vld [vmem:[#allocation6 + $0x8] sm:$0xff]  ;;  %v3226_v13 = vld [vmem:[#allocation6 + $0x10] sm:$0xff] }
 0x549   :  { %v3227_v62 = vld [vmem:[#allocation6 + $0x18] sm:$0xff]  ;;  %v3228_v0 = vld [vmem:[#allocation6 + $0x20] sm:$0xff]  ;;  %v3229_v43 = vld [vmem:[#allocation6 + $0x28] sm:$0xff]  ;;  %v3263_v44 = vadd.f32 %v3247_v31, %v3224_v52  ;;  %v3264_v50 = vadd.f32 %v3248_v33, %v3225_v49  ;;  %v3265_v15 = vadd.f32 %v3249_v22, %v3226_v13  ;;  %v3260_v31 = vmul.f32 %v7598_v41, %v8604_v9 }
 0x54a   :  { %v3266_v35 = vadd.f32 %v3250_v11, %v3227_v62  ;;  %v3267_v20 = vadd.f32 %v3251_v27, %v3228_v0  ;;  %v3268_v47 = vadd.f32 %v3252_v19, %v3229_v43  ;;  %v3230_v51 = vld [vmem:[#allocation6 + $0x30] sm:$0xff]  ;;  %v3231_v39 = vld [vmem:[#allocation6 + $0x38] sm:$0xff]  ;;  %v3232_v10 = vld [vmem:[#allocation6 + $0x40] sm:$0xff] }
 0x54b   :  { %v3279_v14 = vpack.c.bf16 %v3264_v50, %v3263_v44  ;;  %v3233_v17 = vld [vmem:[#allocation6 + $0x48] sm:$0xff]  ;;  %v3269_v18 = vadd.f32 %v3253_v6, %v3230_v51  ;;  %v3270_v38 = vadd.f32 %v3254_v42, %v3231_v39  ;;  %v3271_v8 = vadd.f32 %v3255_v60, %v3232_v10  ;;  %v3234_v54 = vld [vmem:[#allocation6 + $0x50] sm:$0xff]  ;;  %v3235_v58 = vld [vmem:[#allocation6 + $0x58] sm:$0xff] }
 0x54c   :  { %v3280_v40 = vpack.c.bf16 %v3266_v35, %v3265_v15  ;;  %v3281_v28 = vpack.c.bf16 %v3268_v47, %v3267_v20  ;;  %v3272_v2 = vadd.f32 %v3256_v16, %v3233_v17  ;;  %v8603_v52 = vld [vmem:[#allocation46_spill] sm:$0xff]  ;;  %v3236_v46 = vld [vmem:[#allocation6 + $0x60] sm:$0xff]  ;;  %v3237_v33 = vld [vmem:[#allocation6 + $0x68] sm:$0xff]  ;;  %v3273_v13 = vadd.f32 %v3257_v4, %v3234_v54 }
 0x54d   :  { %4638 = vmatprep.mubr.msk.bf16.mxu0 %vm81_vm0, %v3279_v14  ;;  %v3282_v56 = vpack.c.bf16 %v3270_v38, %v3269_v18  ;;  %v3259_v49 = vmul.f32 %v7598_v41, %v8603_v52  ;;  %v3274_v62 = vadd.f32 %v3258_v48, %v3235_v58  ;;  %v3276_v22 = vadd.f32 %v3260_v31, %v3237_v33  ;;  %v8606_v11 = vld [vmem:[#allocation50_spill] sm:$0xff]  ;;  %v3238_v3 = vld [vmem:[#allocation6 + $0x70] sm:$0xff]  ;;  %v8611_v15 = vld [vmem:[#allocation52_spill] sm:$0xff] }
 0x54e   :  { %4639 = vmatmul.mubr.msk.bf16.vlgmr.msra.gmra.mxu0 %vm81_vm0, %v3280_v40  ;;  %v3283_v25 = vpack.c.bf16 %v3272_v2, %v3271_v8  ;;  %v3296_v0 = vpack.c.bf16 %v8606_v11, %v8605_v36  ;;  %v8610_v43 = vld [vmem:[#allocation34_spill] sm:$0xff]  ;;  %v3277_v44 = vadd.f32 %v3261_v5, %v3238_v3  ;;  %v8612_v35 = vld [vmem:[#allocation56_spill] sm:$0xff]  ;;  %v8617_v58 = vld [vmem:[#allocation11_spill] sm:$0xff] }
 0x54f   :  { %4642 = vmatprep.mubr.msk.bf16.mxu0 %vm81_vm0, %v3281_v28  ;;  %v3275_v7 = vadd.f32 %v3259_v49, %v3236_v46  ;;  %v3284_v29 = vpack.c.bf16 %v3274_v62, %v3273_v13  ;;  %v3262_v30 = vmul.f32 %v7598_v41, %v8610_v43  ;;  %v3239_v19 = vld [vmem:[#allocation6 + $0x78] sm:$0xff]  ;;  %v3298_v20 = vpack.c.bf16 %v8612_v35, %v8611_v15  ;;  %v8613_v42 = vld [vmem:[#allocation8_spill] sm:$0xff]  ;;  %v8618_v49 = vld [vmem:[#allocation13_spill] sm:$0xff] }
 0x550   :  { %4627 = vmatmul.mubr.msk.bf16.gmra.mxu1 %vm81_vm0, %v3296_v0  ;;  %v8615_v38 = vld [vmem:[#allocation10_spill] sm:$0xff]  ;;  %v8619_v36 = vld [vmem:[#allocation12_spill] sm:$0xff]  ;;  %v8621_v3 = vld [vmem:[#allocation15_spill] sm:$0xff] }
 0x551   :  { %v3285_v27 = vpack.c.bf16 %v3276_v22, %v3275_v7  ;;  %4630 = vmatprep.mubr.msk.bf16.mxu1 %vm81_vm0, %v3297_v53  ;;  %v3278_v50 = vadd.f32 %v3262_v30, %v3239_v19  ;;  %v8620_v53 = vld [vmem:[#allocation14_spill] sm:$0xff]  ;;  %v8622_v35 = vld [vmem:[#allocation17_spill] sm:$0xff] }
 0x553   :  { %v3286_v47 = vpack.c.bf16 %v3278_v50, %v3277_v44 }
 0x556   :  { %4643 = vmatmul.mubr.msk.bf16.gmra.mxu0 %vm81_vm0, %v3282_v56 }
 0x557   :  { %4646 = vmatprep.mubr.msk.bf16.mxu0 %vm81_vm0, %v3283_v25 }
 0x558   :  { %4631 = vmatmul.mubr.msk.bf16.gmra.mxu1 %vm81_vm0, %v3298_v20 }
 0x55e   :  { %4647 = vmatmul.mubr.msk.bf16.gmra.mxu0 %vm81_vm0, %v3284_v29 }
 0x55f   :  { %4650 = vmatprep.mubr.msk.bf16.mxu0 %vm81_vm0, %v3285_v27 }
 0x566   :  { %4651 = vmatmul.mubr.msk.bf16.gmra.mxu0 %vm81_vm0, %v3286_v47 }
 0x5f6   :  { %v4620_v41 = vpop.f32.mrf.mxu1 }
 0x5f8   :  { %v3373_v39 = vpop.f32.mrf.mxu1 }
 0x5fa   :  { %v4621_v23 = vpop.f32.mrf.mxu1 }
 0x5fc   :  { %v3376_v17 = vpop.f32.mrf.mxu1 }
 0x600   :  { %v4624_v18 = vpop.f32.mrf.mxu1 }
 0x602   :  { %v3389_v12 = vpop.f32.mrf.mxu1 }
 0x604   :  { %v4625_v4 = vpop.f32.mrf.mxu1 }
 0x606   :  { %v3392_v54 = vpop.f32.mrf.mxu1 }
 0x60e   :  { %v4640_v51 = vpop.f32.mrf.mxu0 }
 0x60f   :  { %v3515_v26 = vadd.f32 %v4640_v51, %v4620_v41 }
 0x610   :  { %v3506_v6 = vpop.f32.mrf.mxu0  ;;  %v4628_v46 = vpop.f32.mrf.mxu1 }
 0x611   :  { %v7662_v14 = vadd.f32 %v3515_v26, %v8613_v42  ;;  %v3507_v40 = vadd.f32 %v3506_v6, %v3373_v39  ;;  %v8623_v6 = vld [vmem:[#allocation16_spill] sm:$0xff]  ;;  %v8624_v42 = vld [vmem:[#allocation18_spill] sm:$0xff] }
 0x612   :  { %v4641_v10 = vpop.f32.mrf.mxu0  ;;  %v3405_v22 = vpop.f32.mrf.mxu1 }
 0x613   :  { %v7665_v60 = vadd.f32 %v3507_v40, %v8614_v1  ;;  %v3518_v59 = vadd.f32 %v4641_v10, %v4621_v23  ;;  %v3615_v16 = vsel %vm81_vm0, %v7662_v14, 0.0 }
 0x614   :  { %3616 = vadd.xlane.f32.xlu1 %v3615_v16  ;;  %v3509_v28 = vpop.f32.mrf.mxu0  ;;  %v4629_v34 = vpop.f32.mrf.mxu1 }
 0x615   :  { %v7670_v8 = vadd.f32 %v3518_v59, %v8615_v38  ;;  %v3510_v2 = vadd.f32 %v3509_v28, %v3376_v17  ;;  %v3609_v21 = vsel %vm81_vm0, %v7665_v60, 0.0 }
 0x616   :  { %v4644_v61 = vpop.f32.mrf.mxu0  ;;  %3610 = vadd.xlane.f32.xlu0 %v3609_v21  ;;  %v3408_v27 = vpop.f32.mrf.mxu1 }
 0x617   :  { %v7675_v57 = vadd.f32 %v3510_v2, %v8616_v24  ;;  %v3618_v37 = vsel %vm81_vm0, %v7670_v8, 0.0  ;;  %v3531_v56 = vadd.f32 %v4644_v61, %v4624_v18  ;;  %v8625_v2 = vld [vmem:[#allocation19_spill] sm:$0xff]  ;;  %v8626_v24 = vld [vmem:[#allocation21_spill] sm:$0xff] }
 0x618   :  { %3619 = vadd.xlane.f32.xlu1 %v3618_v37  ;;  %v3522_v32 = vpop.f32.mrf.mxu0  ;;  %v4632_v15 = vpop.f32.mrf.mxu1 }
 0x619   :  { %v3523_v45 = vadd.f32 %v3522_v32, %v3389_v12  ;;  %v3612_v48 = vsel %vm81_vm0, %v7675_v57, 0.0  ;;  %v7685_v9 = vadd.f32 %v3531_v56, %v8618_v49 }
 0x61a   :  { %v4645_v25 = vpop.f32.mrf.mxu0  ;;  %3613 = vadd.xlane.f32.xlu0 %v3612_v48  ;;  %v3421_v26 = vpop.f32.mrf.mxu1 }
 0x61b   :  { %v7682_v52 = vadd.f32 %v3523_v45, %v8617_v58  ;;  %v3534_v33 = vadd.f32 %v4645_v25, %v4625_v4  ;;  %v3627_v55 = vsel %vm81_vm0, %v7685_v9, 0.0  ;;  %v8627_v45 = vld [vmem:[#allocation20_spill] sm:$0xff]  ;;  %v8628_v25 = vld [vmem:[#allocation22_spill] sm:$0xff] }
 0x61c   :  { %v3525_v31 = vpop.f32.mrf.mxu0  ;;  %v4633_v17 = vpop.f32.mrf.mxu1 }
 0x61d   :  { %v3526_v13 = vadd.f32 %v3525_v31, %v3392_v54  ;;  %v3621_v62 = vsel %vm81_vm0, %v7682_v52, 0.0  ;;  %v7695_v29 = vadd.f32 %v3534_v33, %v8620_v53 }
 0x61e   :  { %v4648_v7 = vpop.f32.mrf.mxu0  ;;  %3622 = vadd.xlane.f32.xlu0 %v3621_v62  ;;  %v3424_v38 = vpop.f32.mrf.mxu1 }
 0x61f   :  { %v7690_v11 = vadd.f32 %v3526_v13, %v8619_v36  ;;  %v3547_v63 = vadd.f32 %v4648_v7, %v4628_v46  ;;  %v3630_v41 = vsel %vm81_vm0, %v7695_v29, 0.0 }
 0x620   :  { %v3538_v0 = vpop.f32.mrf.mxu0 }
 0x621   :  { %v3539_v5 = vadd.f32 %v3538_v0, %v3405_v22  ;;  %v3624_v43 = vsel %vm81_vm0, %v7690_v11, 0.0  ;;  %v7703_v20 = vadd.f32 %v3547_v63, %v8622_v35 }
 0x622   :  { %v4649_v30 = vpop.f32.mrf.mxu0  ;;  %3625 = vadd.xlane.f32.xlu1 %v3624_v43  ;;  %3628 = vadd.xlane.f32.xlu0 %v3627_v55 }
 0x623   :  { %v7700_v19 = vadd.f32 %v3539_v5, %v8621_v3  ;;  %v3550_v44 = vadd.f32 %v4649_v30, %v4629_v34  ;;  %v3639_v28 = vsel %vm81_vm0, %v7703_v20, 0.0 }
 0x624   :  { %v3541_v50 = vpop.f32.mrf.mxu0 }
 0x625   :  { %v3542_v47 = vadd.f32 %v3541_v50, %v3408_v27  ;;  %v3633_v51 = vsel %vm81_vm0, %v7700_v19, 0.0  ;;  %v7713_v40 = vadd.f32 %v3550_v44, %v8624_v42 }
 0x626   :  { %v4652_v39 = vpop.f32.mrf.mxu0  ;;  %3631 = vadd.xlane.f32.xlu1 %v3630_v41  ;;  %3634 = vadd.xlane.f32.xlu0 %v3633_v51 }
 0x627   :  { %v7710_v23 = vadd.f32 %v3542_v47, %v8623_v6  ;;  %v3563_v1 = vadd.f32 %v4652_v39, %v4632_v15  ;;  %v3642_v12 = vsel %vm81_vm0, %v7713_v40, 0.0 }
 0x628   :  { %v3554_v10 = vpop.f32.mrf.mxu0 }
 0x629   :  { %v3555_v59 = vadd.f32 %v3554_v10, %v3421_v26  ;;  %v3636_v16 = vsel %vm81_vm0, %v7710_v23, 0.0  ;;  %v7725_v37 = vadd.f32 %v3563_v1, %v8626_v24 }
 0x62a   :  { %v4653_v18 = vpop.f32.mrf.mxu0  ;;  %3637 = vadd.xlane.f32.xlu1 %v3636_v16  ;;  %3640 = vadd.xlane.f32.xlu0 %v3639_v28 }
 0x62b   :  { %v7720_v21 = vadd.f32 %v3555_v59, %v8625_v2  ;;  %v3566_v56 = vadd.f32 %v4653_v18, %v4633_v17  ;;  %v3651_v49 = vsel %vm81_vm0, %v7725_v37, 0.0 }
 0x62c   :  { %v3557_v61 = vpop.f32.mrf.mxu0 }
 0x62d   :  { %v3558_v32 = vadd.f32 %v3557_v61, %v3424_v38  ;;  %v3645_v4 = vsel %vm81_vm0, %v7720_v21, 0.0  ;;  %v7733_v54 = vadd.f32 %v3566_v56, %v8628_v25 }
 0x62e   :  { %3643 = vadd.xlane.f32.xlu1 %v3642_v12  ;;  %3646 = vadd.xlane.f32.xlu0 %v3645_v4 }
 0x62f   :  { %v7730_v48 = vadd.f32 %v3558_v32, %v8627_v45  ;;  %v3654_v31 = vsel %vm81_vm0, %v7733_v54, 0.0 }
 0x631   :  { %v3648_v58 = vsel %vm81_vm0, %v7730_v48, 0.0 }
 0x632   :  { %3649 = vadd.xlane.f32.xlu1 %v3648_v58  ;;  %3652 = vadd.xlane.f32.xlu0 %v3651_v49 }
 0x636   :  { %3655 = vadd.xlane.f32.xlu1 %v3654_v31  ;;  %v5056_v31 = vld [vmem:[%s8156_s15 + $0x8] sm:$0xff]  }
 0x637   :  { %4654 = vmatprep.subr.bf16.mxu1 %v5056_v31 }
 0x638   :  { %4655 = vmatpush3.bf16.msra.mxu1 %v5056_v31 }
 0x69d   :  { %v3617_v46 = vpop.xlane.xlu1 %3616 }
 0x69e   :  { %v3659_v33 = vmul.f32 0.03125, %v3617_v46 }
 0x69f   :  { %v3611_v13 = vpop.xlane.xlu0 %3610 }
 0x6a0   :  { %v3657_v62 = vmul.f32 0.03125, %v3611_v13  ;;  %v7742_v22 = vsub.f32 %v7662_v14, %v3659_v33 }
 0x6a1   :  { %v3620_v7 = vpop.xlane.xlu1 %3619 }
 0x6a2   :  { %v7745_v36 = vsub.f32 %v7665_v60, %v3657_v62  ;;  %v3660_v0 = vmul.f32 0.03125, %v3620_v7  ;;  %v3691_v30 = vmul.f32 %v7742_v22, %v7742_v22 }
 0x6a3   :  { %v3614_v34 = vpop.xlane.xlu0 %3613 }
 0x6a4   :  { %v3658_v55 = vmul.f32 0.03125, %v3614_v34  ;;  %v3689_v53 = vmul.f32 %v7745_v36, %v7745_v36  ;;  %v7750_v63 = vsub.f32 %v7670_v8, %v3660_v0  ;;  %v3711_v15 = vsel %vm81_vm0, %v3691_v30, 0.0 }
 0x6a6   :  { %v7753_v5 = vsub.f32 %v7675_v57, %v3658_v55  ;;  %v3705_v43 = vsel %vm81_vm0, %v3689_v53, 0.0  ;;  %v3692_v47 = vmul.f32 %v7750_v63, %v7750_v63 }
 0x6a7   :  { %3706 = vadd.xlane.f32.xlu0 %v3705_v43  ;;  %v3623_v27 = vpop.xlane.xlu0 %3622 }
 0x6a8   :  { %v3661_v3 = vmul.f32 0.03125, %v3623_v27  ;;  %v3690_v44 = vmul.f32 %v7753_v5, %v7753_v5  ;;  %v3714_v17 = vsel %vm81_vm0, %v3692_v47, 0.0 }
 0x6aa   :  { %v7761_v50 = vsub.f32 %v7682_v52, %v3661_v3  ;;  %v3708_v35 = vsel %vm81_vm0, %v3690_v44, 0.0 }
 0x6ab   :  { %v3626_v41 = vpop.xlane.xlu1 %3625  ;;  %3712 = vadd.xlane.f32.xlu0 %v3711_v15  ;;  %3709 = vadd.xlane.f32.xlu1 %v3708_v35  ;;  %v3629_v51 = vpop.xlane.xlu0 %3628 }
 0x6ac   :  { %v3662_v39 = vmul.f32 0.03125, %v3626_v41  ;;  %v3663_v26 = vmul.f32 0.03125, %v3629_v51  ;;  %v3693_v6 = vmul.f32 %v7761_v50, %v7761_v50 }
 0x6ae   :  { %v7770_v42 = vsub.f32 %v7690_v11, %v3662_v39  ;;  %v7773_v10 = vsub.f32 %v7685_v9, %v3663_v26  ;;  %v3717_v1 = vsel %vm81_vm0, %v3693_v6, 0.0 }
 0x6af   :  { %v3632_v59 = vpop.xlane.xlu1 %3631  ;;  %3715 = vadd.xlane.f32.xlu1 %v3714_v17  ;;  %3718 = vadd.xlane.f32.xlu0 %v3717_v1  ;;  %v3635_v16 = vpop.xlane.xlu0 %3634 }
 0x6b0   :  { %v3664_v28 = vmul.f32 0.03125, %v3632_v59  ;;  %v3665_v18 = vmul.f32 0.03125, %v3635_v16  ;;  %v3694_v38 = vmul.f32 %v7770_v42, %v7770_v42  ;;  %v3695_v2 = vmul.f32 %v7773_v10, %v7773_v10 }
 0x6b2   :  { %v7782_v61 = vsub.f32 %v7695_v29, %v3664_v28  ;;  %v7785_v12 = vsub.f32 %v7700_v19, %v3665_v18  ;;  %v3720_v24 = vsel %vm81_vm0, %v3694_v38, 0.0  ;;  %v3723_v56 = vsel %vm81_vm0, %v3695_v2, 0.0 }
 0x6b3   :  { %v3638_v32 = vpop.xlane.xlu1 %3637  ;;  %3721 = vadd.xlane.f32.xlu1 %v3720_v24  ;;  %3724 = vadd.xlane.f32.xlu0 %v3723_v56  ;;  %v3641_v4 = vpop.xlane.xlu0 %3640 }
 0x6b4   :  { %v3666_v45 = vmul.f32 0.03125, %v3638_v32  ;;  %v3667_v25 = vmul.f32 0.03125, %v3641_v4  ;;  %v3696_v58 = vmul.f32 %v7782_v61, %v7782_v61  ;;  %v3697_v49 = vmul.f32 %v7785_v12, %v7785_v12  ;;  %v5057_v4 = vld [vmem:[%s8156_s15] sm:$0xff]  }
 0x6b5   :  { %4656 = vmatprep.subr.bf16.mxu1 %v5057_v4 }
 0x6b6   :  { %v7797_v46 = vsub.f32 %v7710_v23, %v3666_v45  ;;  %v7800_v33 = vsub.f32 %v7703_v20, %v3667_v25  ;;  %v3726_v13 = vsel %vm81_vm0, %v3696_v58, 0.0  ;;  %v3729_v62 = vsel %vm81_vm0, %v3697_v49, 0.0  ;;  %4657 = vmatpush3.bf16.msra.mxu1 %v5057_v4 }
 0x6b7   :  { %v3644_v7 = vpop.xlane.xlu1 %3643  ;;  %3727 = vadd.xlane.f32.xlu1 %v3726_v13  ;;  %3730 = vadd.xlane.f32.xlu0 %v3729_v62  ;;  %v3647_v0 = vpop.xlane.xlu0 %3646 }
 0x6b8   :  { %v3668_v34 = vmul.f32 0.03125, %v3644_v7  ;;  %v3669_v55 = vmul.f32 0.03125, %v3647_v0  ;;  %v3698_v53 = vmul.f32 %v7797_v46, %v7797_v46  ;;  %v3699_v43 = vmul.f32 %v7800_v33, %v7800_v33 }
 0x6ba   :  { %v7809_v30 = vsub.f32 %v7713_v40, %v3668_v34  ;;  %v7812_v27 = vsub.f32 %v7720_v21, %v3669_v55  ;;  %v3732_v3 = vsel %vm81_vm0, %v3698_v53, 0.0  ;;  %v3735_v44 = vsel %vm81_vm0, %v3699_v43, 0.0 }
 0x6bb   :  { %v3650_v15 = vpop.xlane.xlu1 %3649  ;;  %3733 = vadd.xlane.f32.xlu1 %v3732_v3  ;;  %3736 = vadd.xlane.f32.xlu0 %v3735_v44  ;;  %v3653_v35 = vpop.xlane.xlu0 %3652 }
 0x6bc   :  { %v3670_v47 = vmul.f32 0.03125, %v3650_v15  ;;  %v3671_v41 = vmul.f32 0.03125, %v3653_v35  ;;  %v3700_v51 = vmul.f32 %v7809_v30, %v7809_v30  ;;  %v3701_v39 = vmul.f32 %v7812_v27, %v7812_v27 }
 0x6be   :  { %v7821_v26 = vsub.f32 %v7730_v48, %v3670_v47  ;;  %v7824_v6 = vsub.f32 %v7725_v37, %v3671_v41  ;;  %v3738_v17 = vsel %vm81_vm0, %v3700_v51, 0.0  ;;  %v3741_v1 = vsel %vm81_vm0, %v3701_v39, 0.0 }
 0x6bf   :  { %v3656_v59 = vpop.xlane.xlu1 %3655  ;;  %3739 = vadd.xlane.f32.xlu1 %v3738_v17  ;;  %3742 = vadd.xlane.f32.xlu0 %v3741_v1 }
 0x6c0   :  { %v3672_v16 = vmul.f32 0.03125, %v3656_v59  ;;  %v3702_v28 = vmul.f32 %v7821_v26, %v7821_v26  ;;  %v3703_v18 = vmul.f32 %v7824_v6, %v7824_v6 }
 0x6c2   :  { %v7833_v38 = vsub.f32 %v7733_v54, %v3672_v16  ;;  %v3744_v2 = vsel %vm81_vm0, %v3702_v28, 0.0  ;;  %v3747_v24 = vsel %vm81_vm0, %v3703_v18, 0.0 }
 0x6c3   :  { %3745 = vadd.xlane.f32.xlu1 %v3744_v2  ;;  %3748 = vadd.xlane.f32.xlu0 %v3747_v24  ;;  %v7846_v24 = vld [vmem:[%s8154_s13] ss:$0 sm:$0xff] }
 0x6c4   :  { %v3704_v56 = vmul.f32 %v7833_v38, %v7833_v38 }
 0x6c6   :  { %v3750_v32 = vsel %vm81_vm0, %v3704_v56, 0.0 }
 0x6c7   :  { %3751 = vadd.xlane.f32.xlu1 %v3750_v32 }
 0x730   :  { %v3707_v45 = vpop.xlane.xlu0 %3706 }
 0x731   :  { %v3753_v25 = vmul.f32 0.03125, %v3707_v45 }
 0x733   :  { %v3769_v58 = vadd.f32 1e-05, %v3753_v25 }
 0x734   :  { %v3710_v49 = vpop.xlane.xlu1 %3709  ;;  %v3713_v31 = vpop.xlane.xlu0 %3712 }
 0x735   :  { %5066 = vrsqrt.f32 %v3769_v58  ;;  %v3754_v13 = vmul.f32 0.03125, %v3710_v49  ;;  %v3755_v62 = vmul.f32 0.03125, %v3713_v31 }
 0x737   :  { %v3770_v7 = vadd.f32 1e-05, %v3754_v13  ;;  %v3771_v0 = vadd.f32 1e-05, %v3755_v62 }
 0x738   :  { %v3716_v34 = vpop.xlane.xlu1 %3715  ;;  %v3719_v55 = vpop.xlane.xlu0 %3718 }
 0x739   :  { %5068 = vrsqrt.f32 %v3770_v7  ;;  %v3756_v53 = vmul.f32 0.03125, %v3716_v34  ;;  %v3757_v43 = vmul.f32 0.03125, %v3719_v55  ;;  %v7853_v7 = vld [vmem:[%s8155_s14] ss:$0 sm:$0xff] }
 0x73a   :  { %5070 = vrsqrt.f32 %v3771_v0 }
 0x73b   :  { %v3772_v3 = vadd.f32 1e-05, %v3756_v53  ;;  %v3773_v44 = vadd.f32 1e-05, %v3757_v43 }
 0x73c   :  { %v3722_v15 = vpop.xlane.xlu1 %3721  ;;  %v3725_v35 = vpop.xlane.xlu0 %3724 }
 0x73d   :  { %5072 = vrsqrt.f32 %v3772_v3  ;;  %v3758_v47 = vmul.f32 0.03125, %v3722_v15  ;;  %v3759_v41 = vmul.f32 0.03125, %v3725_v35 }
 0x73e   :  { %5074 = vrsqrt.f32 %v3773_v44 }
 0x73f   :  { %v3774_v51 = vadd.f32 1e-05, %v3758_v47  ;;  %v3775_v39 = vadd.f32 1e-05, %v3759_v41 }
 0x740   :  { %v3728_v17 = vpop.xlane.xlu1 %3727  ;;  %v3731_v1 = vpop.xlane.xlu0 %3730 }
 0x741   :  { %5076 = vrsqrt.f32 %v3774_v51  ;;  %v3760_v59 = vmul.f32 0.03125, %v3728_v17  ;;  %v3761_v16 = vmul.f32 0.03125, %v3731_v1 }
 0x742   :  { %v5067_v28 = vpop.eup %5066  ;;  %5078 = vrsqrt.f32 %v3775_v39 }
 0x743   :  { %v3776_v18 = vadd.f32 1e-05, %v3760_v59  ;;  %v3777_v2 = vadd.f32 1e-05, %v3761_v16  ;;  %v3801_v56 = vmul.f32 %v5067_v28, %v7745_v36 }
 0x744   :  { %v3734_v32 = vpop.xlane.xlu1 %3733  ;;  %v3737_v4 = vpop.xlane.xlu0 %3736 }
 0x745   :  { %5080 = vrsqrt.f32 %v3776_v18  ;;  %v3762_v45 = vmul.f32 0.03125, %v3734_v32  ;;  %v3763_v25 = vmul.f32 0.03125, %v3737_v4  ;;  %v3823_v49 = vmul.f32 %v7846_v24, %v3801_v56 }
 0x746   :  { %v5069_v58 = vpop.eup %5068  ;;  %5082 = vrsqrt.f32 %v3777_v2 }
 0x747   :  { %v5071_v31 = vpop.eup %5070  ;;  %v3778_v13 = vadd.f32 1e-05, %v3762_v45  ;;  %v3779_v62 = vadd.f32 1e-05, %v3763_v25  ;;  %v3802_v0 = vmul.f32 %v5069_v58, %v7753_v5  ;;  %v3845_v15 = vadd.f32 %v7853_v7, %v3823_v49 }
 0x748   :  { %v3803_v36 = vmul.f32 %v5071_v31, %v7742_v22  ;;  %v3740_v34 = vpop.xlane.xlu1 %3739  ;;  %v3743_v55 = vpop.xlane.xlu0 %3742 }
 0x749   :  { %5084 = vrsqrt.f32 %v3778_v13  ;;  %v3764_v53 = vmul.f32 0.03125, %v3740_v34  ;;  %v3765_v43 = vmul.f32 0.03125, %v3743_v55  ;;  %v3824_v3 = vmul.f32 %v7846_v24, %v3802_v0 }
 0x74a   :  { %v5073_v44 = vpop.eup %5072  ;;  %5086 = vrsqrt.f32 %v3779_v62  ;;  %v3825_v17 = vmul.f32 %v7846_v24, %v3803_v36 }
 0x74b   :  { %v5075_v35 = vpop.eup %5074  ;;  %v3804_v47 = vmul.f32 %v5073_v44, %v7750_v63  ;;  %v3780_v41 = vadd.f32 1e-05, %v3764_v53  ;;  %v3781_v51 = vadd.f32 1e-05, %v3765_v43  ;;  %v3846_v5 = vadd.f32 %v7853_v7, %v3824_v3 }
 0x74c   :  { %v3746_v39 = vpop.xlane.xlu1 %3745  ;;  %v3749_v22 = vpop.xlane.xlu0 %3748  ;;  %v3805_v1 = vmul.f32 %v5075_v35, %v7761_v50  ;;  %v3847_v50 = vadd.f32 %v7853_v7, %v3825_v17 }
 0x74d   :  { %5088 = vrsqrt.f32 %v3780_v41  ;;  %v3766_v59 = vmul.f32 0.03125, %v3746_v39  ;;  %v3767_v16 = vmul.f32 0.03125, %v3749_v22  ;;  %v3861_v28 = vpack.c.bf16 %v3846_v5, %v3845_v15 }
 0x74e   :  { %v5077_v18 = vpop.eup %5076  ;;  %5090 = vrsqrt.f32 %v3781_v51  ;;  %v3826_v2 = vmul.f32 %v7846_v24, %v3804_v47  ;;  %v3827_v63 = vmul.f32 %v7846_v24, %v3805_v1 }
 0x74f   :  { %v5079_v56 = vpop.eup %5078  ;;  %v3782_v32 = vadd.f32 1e-05, %v3766_v59  ;;  %v3783_v4 = vadd.f32 1e-05, %v3767_v16  ;;  %4658 = vmatprep.mubr.msk.bf16.mxu1 %vm81_vm0, %v3861_v28  ;;  %v3806_v45 = vmul.f32 %v5077_v18, %v7770_v42 }
 0x750   :  { %v3752_v25 = vpop.xlane.xlu1 %3751  ;;  %v3848_v58 = vadd.f32 %v7853_v7, %v3826_v2  ;;  %v3807_v49 = vmul.f32 %v5079_v56, %v7773_v10  ;;  %v3849_v36 = vadd.f32 %v7853_v7, %v3827_v63 }
 0x751   :  { %5092 = vrsqrt.f32 %v3782_v32  ;;  %v3768_v31 = vmul.f32 0.03125, %v3752_v25  ;;  %v3828_v13 = vmul.f32 %v7846_v24, %v3806_v45 }
 0x752   :  { %v5081_v62 = vpop.eup %5080  ;;  %5094 = vrsqrt.f32 %v3783_v4  ;;  %v3862_v0 = vpack.c.bf16 %v3848_v58, %v3847_v50  ;;  %v3829_v43 = vmul.f32 %v7846_v24, %v3807_v49 }
 0x753   :  { %v5083_v34 = vpop.eup %5082  ;;  %v3784_v55 = vadd.f32 1e-05, %v3768_v31  ;;  %v3850_v42 = vadd.f32 %v7853_v7, %v3828_v13  ;;  %v3808_v53 = vmul.f32 %v5081_v62, %v7782_v61 }
 0x754   :  { %4659 = vmatmul.mubr.msk.bf16.vlgmr.msra.gmra.mxu1 %vm81_vm0, %v3862_v0  ;;  %v3809_v10 = vmul.f32 %v5083_v34, %v7785_v12  ;;  %v3851_v47 = vadd.f32 %v7853_v7, %v3829_v43  ;;  %v5059_v34 = vld [vmem:[%s8158_s17 + $0x30] sm:$0xff]   ;;  %v5065_v43 = vld [vmem:[%s8158_s17] sm:$0xff]  }
 0x755   :  { %5096 = vrsqrt.f32 %v3784_v55  ;;  %v3863_v3 = vpack.c.bf16 %v3850_v42, %v3849_v36  ;;  %v3830_v44 = vmul.f32 %v7846_v24, %v3808_v53  ;;  %v5062_v55 = vld [vmem:[%s8158_s17 + $0x18] sm:$0xff]   ;;  %v5063_v42 = vld [vmem:[%s8158_s17 + $0x10] sm:$0xff]   ;;  %v5064_v53 = vld [vmem:[%s8158_s17 + $0x8] sm:$0xff]  }
 0x756   :  { %v5085_v15 = vpop.eup %5084  ;;  %v3831_v51 = vmul.f32 %v7846_v24, %v3809_v10  ;;  %v7936_v10 = vld [vmem:[%s8157_s16] ss:$0 sm:$0xff] }
 0x757   :  { %v5087_v35 = vpop.eup %5086  ;;  %4662 = vmatprep.mubr.msk.bf16.mxu1 %vm81_vm0, %v3863_v3  ;;  %v3852_v41 = vadd.f32 %v7853_v7, %v3830_v44  ;;  %v3810_v61 = vmul.f32 %v5085_v15, %v7797_v46 }
 0x758   :  { %v3811_v5 = vmul.f32 %v5087_v35, %v7800_v33  ;;  %v3853_v1 = vadd.f32 %v7853_v7, %v3831_v51 }
 0x759   :  { %v3864_v39 = vpack.c.bf16 %v3852_v41, %v3851_v47  ;;  %v3832_v12 = vmul.f32 %v7846_v24, %v3810_v61 }
 0x75a   :  { %v5089_v22 = vpop.eup %5088  ;;  %v3833_v28 = vmul.f32 %v7846_v24, %v3811_v5 }
 0x75b   :  { %v5091_v17 = vpop.eup %5090  ;;  %v3854_v59 = vadd.f32 %v7853_v7, %v3832_v12  ;;  %v3812_v16 = vmul.f32 %v5089_v22, %v7809_v30 }
 0x75c   :  { %4663 = vmatmul.mubr.msk.bf16.gmra.mxu1 %vm81_vm0, %v3864_v39  ;;  %v3813_v46 = vmul.f32 %v5091_v17, %v7812_v27  ;;  %v3855_v56 = vadd.f32 %v7853_v7, %v3833_v28 }
 0x75d   :  { %v3865_v18 = vpack.c.bf16 %v3854_v59, %v3853_v1  ;;  %v3834_v33 = vmul.f32 %v7846_v24, %v3812_v16 }
 0x75e   :  { %v5093_v2 = vpop.eup %5092  ;;  %v3835_v30 = vmul.f32 %v7846_v24, %v3813_v46 }
 0x75f   :  { %v5095_v63 = vpop.eup %5094  ;;  %4666 = vmatprep.mubr.msk.bf16.mxu1 %vm81_vm0, %v3865_v18  ;;  %v3856_v32 = vadd.f32 %v7853_v7, %v3834_v33  ;;  %v3814_v4 = vmul.f32 %v5093_v2, %v7821_v26 }
 0x760   :  { %v3815_v45 = vmul.f32 %v5095_v63, %v7824_v6  ;;  %v3857_v58 = vadd.f32 %v7853_v7, %v3835_v30 }
 0x761   :  { %v3866_v25 = vpack.c.bf16 %v3856_v32, %v3855_v56  ;;  %v3836_v27 = vmul.f32 %v7846_v24, %v3814_v4 }
 0x762   :  { %v5097_v50 = vpop.eup %5096  ;;  %v3837_v13 = vmul.f32 %v7846_v24, %v3815_v45 }
 0x763   :  { %v3858_v49 = vadd.f32 %v7853_v7, %v3836_v27  ;;  %v3816_v31 = vmul.f32 %v5097_v50, %v7833_v38  ;;  %v5058_v38 = vld [vmem:[%s8158_s17 + $0x38] sm:$0xff]  }
 0x764   :  { %4667 = vmatmul.mubr.msk.bf16.gmra.mxu1 %vm81_vm0, %v3866_v25  ;;  %v3859_v6 = vadd.f32 %v7853_v7, %v3837_v13  ;;  %4674 = vmatprep.subr.bf16.mxu0 %v5058_v38 }
 0x765   :  { %v3867_v62 = vpack.c.bf16 %v3858_v49, %v3857_v58  ;;  %v3838_v26 = vmul.f32 %v7846_v24, %v3816_v31  ;;  %4675 = vmatpush3.bf16.msra.mxu0 %v5058_v38  ;;  %v5060_v24 = vld [vmem:[%s8158_s17 + $0x28] sm:$0xff]  }
 0x766   :  { %4676 = vmatprep.subr.bf16.mxu0 %v5059_v34 }
 0x767   :  { %4670 = vmatprep.mubr.msk.bf16.mxu1 %vm81_vm0, %v3867_v62  ;;  %v3860_v0 = vadd.f32 %v7853_v7, %v3838_v26  ;;  %v5061_v7 = vld [vmem:[%s8158_s17 + $0x20] sm:$0xff]  }
 0x769   :  { %v3868_v36 = vpack.c.bf16 %v3860_v0, %v3859_v6  ;;  %4677 = vmatpush3.bf16.msra.mxu0 %v5059_v34 }
 0x76a   :  { %4678 = vmatprep.subr.bf16.mxu0 %v5060_v24 }
 0x76c   :  { %4671 = vmatmul.mubr.msk.bf16.gmra.mxu1 %vm81_vm0, %v3868_v36 }
 0x76d   :  { %4679 = vmatpush3.bf16.msra.mxu0 %v5060_v24 }
 0x76e   :  { %4680 = vmatprep.subr.bf16.mxu0 %v5061_v7 }
 0x771   :  { %4681 = vmatpush3.bf16.msra.mxu0 %v5061_v7 }
 0x772   :  { %4682 = vmatprep.subr.bf16.mxu0 %v5062_v55 }
 0x775   :  { %4683 = vmatpush3.bf16.msra.mxu0 %v5062_v55 }
 0x776   :  { %4684 = vmatprep.subr.bf16.mxu0 %v5063_v42 }
 0x779   :  { %4685 = vmatpush3.bf16.msra.mxu0 %v5063_v42 }
 0x77a   :  { %4686 = vmatprep.subr.bf16.mxu0 %v5064_v53 }
 0x77d   :  { %4687 = vmatpush3.bf16.msra.mxu0 %v5064_v53 }
 0x77e   :  { %4688 = vmatprep.subr.bf16.mxu0 %v5065_v43 }
 0x781   :  { %4689 = vmatpush3.bf16.msra.mxu0 %v5065_v43 }
 0x814   :  { %v4660_v3 = vpop.f32.mrf.mxu1 }
 0x815   :  { %v7939_v44 = vadd.f32 %v4660_v3, %v7936_v10 }
 0x816   :  { %v3945_v15 = vpop.f32.mrf.mxu1 }
 0x817   :  { %v4010_v35 = vmul.f32 %v7939_v44, %v7939_v44  ;;  %v7944_v47 = vadd.f32 %v7936_v10, %v3945_v15 }
 0x818   :  { %v4661_v41 = vpop.f32.mrf.mxu1 }
 0x819   :  { %v4026_v61 = vmul.f32 %v4010_v35, %v7939_v44  ;;  %v4008_v51 = vmul.f32 %v7944_v47, %v7944_v47  ;;  %v7950_v5 = vadd.f32 %v4661_v41, %v7936_v10 }
 0x81a   :  { %v3948_v39 = vpop.f32.mrf.mxu1 }
 0x81b   :  { %v4042_v12 = vmul.f32 0.044715, %v4026_v61  ;;  %v4024_v22 = vmul.f32 %v4008_v51, %v7944_v47  ;;  %v4011_v17 = vmul.f32 %v7950_v5, %v7950_v5  ;;  %v7956_v1 = vadd.f32 %v7936_v10, %v3948_v39 }
 0x81c   :  { %v4664_v59 = vpop.f32.mrf.mxu1 }
 0x81d   :  { %v4058_v16 = vadd.f32 %v4042_v12, %v7939_v44  ;;  %v4040_v28 = vmul.f32 0.044715, %v4024_v22  ;;  %v4027_v46 = vmul.f32 %v4011_v17, %v7950_v5  ;;  %v4009_v18 = vmul.f32 %v7956_v1, %v7956_v1 }
 0x81e   :  { %v7963_v33 = vadd.f32 %v4664_v59, %v7936_v10  ;;  %v3961_v2 = vpop.f32.mrf.mxu1 }
 0x81f   :  { %v4074_v63 = vmul.f32 0.7978846, %v4058_v16  ;;  %v4056_v56 = vadd.f32 %v4040_v28, %v7944_v47  ;;  %v4043_v32 = vmul.f32 0.044715, %v4027_v46  ;;  %v4025_v4 = vmul.f32 %v4009_v18, %v7956_v1 }
 0x820   :  { %v4014_v30 = vmul.f32 %v7963_v33, %v7963_v33  ;;  %v7970_v45 = vadd.f32 %v7936_v10, %v3961_v2  ;;  %v4665_v25 = vpop.f32.mrf.mxu1 }
 0x821   :  { %5098 = vtanh.f32 %v4074_v63  ;;  %v4072_v27 = vmul.f32 0.7978846, %v4056_v56  ;;  %v4059_v50 = vadd.f32 %v4043_v32, %v7950_v5  ;;  %v4041_v58 = vmul.f32 0.044715, %v4025_v4 }
 0x822   :  { %v4030_v49 = vmul.f32 %v4014_v30, %v7963_v33  ;;  %v4012_v31 = vmul.f32 %v7970_v45, %v7970_v45  ;;  %v7977_v13 = vadd.f32 %v4665_v25, %v7936_v10  ;;  %v3964_v62 = vpop.f32.mrf.mxu1 }
 0x823   :  { %v4075_v26 = vmul.f32 0.7978846, %v4059_v50  ;;  %v4057_v6 = vadd.f32 %v4041_v58, %v7956_v1  ;;  %v7981_v0 = vadd.f32 %v7936_v10, %v3964_v62  ;;  %5100 = vtanh.f32 %v4072_v27 }
 0x824   :  { %v4046_v36 = vmul.f32 0.044715, %v4030_v49  ;;  %v4028_v38 = vmul.f32 %v4012_v31, %v7970_v45  ;;  %v4015_v34 = vmul.f32 %v7977_v13, %v7977_v13  ;;  %v4668_v24 = vpop.f32.mrf.mxu1 }
 0x825   :  { %5102 = vtanh.f32 %v4075_v26  ;;  %v4073_v7 = vmul.f32 0.7978846, %v4057_v6  ;;  %v4013_v55 = vmul.f32 %v7981_v0, %v7981_v0  ;;  %v7989_v42 = vadd.f32 %v4668_v24, %v7936_v10 }
 0x826   :  { %v4062_v53 = vadd.f32 %v4046_v36, %v7963_v33  ;;  %v4044_v43 = vmul.f32 0.044715, %v4028_v38  ;;  %v4031_v3 = vmul.f32 %v4015_v34, %v7977_v13  ;;  %v3977_v15 = vpop.f32.mrf.mxu1 }
 0x827   :  { %5104 = vtanh.f32 %v4073_v7  ;;  %v4029_v35 = vmul.f32 %v4013_v55, %v7981_v0  ;;  %v4018_v41 = vmul.f32 %v7989_v42, %v7989_v42  ;;  %v7997_v61 = vadd.f32 %v7936_v10, %v3977_v15 }
 0x828   :  { %v4078_v51 = vmul.f32 0.7978846, %v4062_v53  ;;  %v4060_v39 = vadd.f32 %v4044_v43, %v7970_v45  ;;  %v4047_v12 = vmul.f32 0.044715, %v4031_v3  ;;  %v4669_v22 = vpop.f32.mrf.mxu1 }
 0x829   :  { %v4045_v17 = vmul.f32 0.044715, %v4029_v35  ;;  %v4034_v59 = vmul.f32 %v4018_v41, %v7989_v42  ;;  %v4016_v16 = vmul.f32 %v7997_v61, %v7997_v61  ;;  %v8004_v28 = vadd.f32 %v4669_v22, %v7936_v10 }
 0x82a   :  { %5106 = vtanh.f32 %v4078_v51  ;;  %v4076_v46 = vmul.f32 0.7978846, %v4060_v39  ;;  %v4063_v18 = vadd.f32 %v4047_v12, %v7977_v13  ;;  %v3980_v2 = vpop.f32.mrf.mxu1 }
 0x82b   :  { %v4061_v63 = vadd.f32 %v4045_v17, %v7981_v0  ;;  %v4050_v56 = vmul.f32 0.044715, %v4034_v59  ;;  %v4032_v32 = vmul.f32 %v4016_v16, %v7997_v61  ;;  %v4019_v4 = vmul.f32 %v8004_v28, %v8004_v28 }
 0x82c   :  { %5108 = vtanh.f32 %v4076_v46  ;;  %v4079_v30 = vmul.f32 0.7978846, %v4063_v18  ;;  %v8012_v25 = vadd.f32 %v7936_v10, %v3980_v2  ;;  %v4672_v27 = vpop.f32.mrf.mxu1 }
 0x82d   :  { %v4077_v50 = vmul.f32 0.7978846, %v4061_v63  ;;  %v4066_v58 = vadd.f32 %v4050_v56, %v7989_v42  ;;  %v4048_v49 = vmul.f32 0.044715, %v4032_v32  ;;  %v4035_v31 = vmul.f32 %v4019_v4, %v8004_v28 }
 0x82e   :  { %v5099_v62 = vpop.eup %5098  ;;  %5110 = vtanh.f32 %v4079_v30  ;;  %v4017_v26 = vmul.f32 %v8012_v25, %v8012_v25  ;;  %v8019_v6 = vadd.f32 %v4672_v27, %v7936_v10  ;;  %v3993_v36 = vpop.f32.mrf.mxu1 }
 0x82f   :  { %v4106_v38 = vadd.f32 1.0, %v5099_v62  ;;  %5112 = vtanh.f32 %v4077_v50  ;;  %v4082_v34 = vmul.f32 0.7978846, %v4066_v58  ;;  %v4064_v24 = vadd.f32 %v4048_v49, %v7997_v61 }
 0x830   :  { %v4051_v7 = vmul.f32 0.044715, %v4035_v31  ;;  %v4033_v55 = vmul.f32 %v4017_v26, %v8012_v25  ;;  %v4022_v53 = vmul.f32 %v8019_v6, %v8019_v6  ;;  %v8026_v43 = vadd.f32 %v7936_v10, %v3993_v36  ;;  %v4673_v3 = vpop.f32.mrf.mxu1  ;;  %v5101_v15 = vpop.eup %5100 }
 0x831   :  { %5114 = vtanh.f32 %v4082_v34  ;;  %v4080_v35 = vmul.f32 0.7978846, %v4064_v24  ;;  %v8029_v41 = vadd.f32 %v4673_v3, %v7936_v10  ;;  %v4122_v16 = vmul.f32 0.5, %v4106_v38 }
 0x832   :  { %v5103_v51 = vpop.eup %5102  ;;  %v4067_v39 = vadd.f32 %v4051_v7, %v8004_v28  ;;  %v4049_v12 = vmul.f32 0.044715, %v4033_v55  ;;  %v4038_v22 = vmul.f32 %v4022_v53, %v8019_v6  ;;  %v4020_v17 = vmul.f32 %v8026_v43, %v8026_v43  ;;  %v3996_v59 = vpop.f32.mrf.mxu1 }
 0x833   :  { %v4107_v46 = vadd.f32 1.0, %v5103_v51  ;;  %5116 = vtanh.f32 %v4080_v35  ;;  %v4023_v18 = vmul.f32 %v8029_v41, %v8029_v41  ;;  %v8041_v50 = vadd.f32 %v7936_v10, %v3996_v59 }
 0x834   :  { %v5105_v2 = vpop.eup %5104  ;;  %v4083_v63 = vmul.f32 0.7978846, %v4067_v39  ;;  %v4065_v56 = vadd.f32 %v4049_v12, %v8012_v25  ;;  %v4054_v32 = vmul.f32 0.044715, %v4038_v22  ;;  %v4036_v4 = vmul.f32 %v4020_v17, %v8026_v43 }
 0x835   :  { %v4123_v30 = vmul.f32 0.5, %v4107_v46  ;;  %v4039_v27 = vmul.f32 %v4023_v18, %v8029_v41  ;;  %v4104_v58 = vadd.f32 1.0, %v5101_v15  ;;  %v4021_v38 = vmul.f32 %v8041_v50, %v8041_v50 }
 0x836   :  { %5118 = vtanh.f32 %v4083_v63  ;;  %v4081_v49 = vmul.f32 0.7978846, %v4065_v56  ;;  %v4070_v31 = vadd.f32 %v4054_v32, %v8019_v6  ;;  %v4052_v62 = vmul.f32 0.044715, %v4036_v4 }
 0x837   :  { %v5107_v26 = vpop.eup %5106  ;;  %v4055_v36 = vmul.f32 0.044715, %v4039_v27  ;;  %v4105_v34 = vadd.f32 1.0, %v5105_v2  ;;  %v4120_v55 = vmul.f32 0.5, %v4104_v58  ;;  %v4138_v10 = vmul.f32 %v4122_v16, %v7939_v44 }
 0x838   :  { %5120 = vtanh.f32 %v4081_v49  ;;  %v4086_v24 = vmul.f32 0.7978846, %v4070_v31  ;;  %v4068_v7 = vadd.f32 %v4052_v62, %v8026_v43  ;;  %v4037_v15 = vmul.f32 %v4021_v38, %v8041_v50 }
 0x839   :  { %v5109_v53 = vpop.eup %5108  ;;  %v4071_v3 = vadd.f32 %v4055_v36, %v8029_v41  ;;  %v4121_v35 = vmul.f32 0.5, %v4105_v34  ;;  %v4139_v51 = vmul.f32 %v4123_v30, %v7950_v5  ;;  %v4136_v46 = vmul.f32 %v4120_v55, %v7944_v47 }
 0x83a   :  { %5122 = vtanh.f32 %v4086_v24  ;;  %v4084_v39 = vmul.f32 0.7978846, %v4068_v7  ;;  %v4108_v12 = vadd.f32 1.0, %v5109_v53  ;;  %v4053_v59 = vmul.f32 0.044715, %v4037_v15 }
 0x83b   :  { %v5111_v22 = vpop.eup %5110  ;;  %v4087_v17 = vmul.f32 0.7978846, %v4071_v3  ;;  %v4137_v18 = vmul.f32 %v4121_v35, %v7956_v1  ;;  %v4110_v16 = vadd.f32 1.0, %v5107_v26  ;;  %v4153_v30 = vpack.c.bf16 %v4139_v51, %v4138_v10 }
 0x83c   :  { %v5113_v2 = vpop.eup %5112  ;;  %5124 = vtanh.f32 %v4084_v39  ;;  %v4124_v44 = vmul.f32 0.5, %v4108_v12  ;;  %v4111_v63 = vadd.f32 1.0, %v5111_v22  ;;  %v4069_v56 = vadd.f32 %v4053_v59, %v8041_v50 }
 0x83d   :  { %5126 = vtanh.f32 %v4087_v17  ;;  %v4152_v32 = vpack.c.bf16 %v4137_v18, %v4136_v46  ;;  %v4109_v5 = vadd.f32 1.0, %v5113_v2  ;;  %v4126_v47 = vmul.f32 0.5, %v4110_v16 }
 0x83e   :  { %v5115_v4 = vpop.eup %5114  ;;  %v4127_v27 = vmul.f32 0.5, %v4111_v63  ;;  %v4085_v58 = vmul.f32 0.7978846, %v4069_v56  ;;  %v4140_v1 = vmul.f32 %v4124_v44, %v7970_v45 }
 0x83f   :  { %4690 = vmatprep.mubr.bf16.mxu0 %v4152_v32  ;;  %v4125_v49 = vmul.f32 0.5, %v4109_v5  ;;  %v4142_v24 = vmul.f32 %v4126_v47, %v7963_v33  ;;  %v4114_v7 = vadd.f32 1.0, %v5115_v4 }
 0x840   :  { %v5117_v31 = vpop.eup %5116  ;;  %4691 = vmatmul.mubr.bf16.vlgmr.msra.gmra.mxu0 %v4153_v30  ;;  %5128 = vtanh.f32 %v4085_v58  ;;  %v4143_v26 = vmul.f32 %v4127_v27, %v7977_v13  ;;  %v4472_v58 = vld [vmem:[%s8159_s18] ss:$0 sm:$0xff] }
 0x841   :  { %v4141_v62 = vmul.f32 %v4125_v49, %v7981_v0  ;;  %v4112_v36 = vadd.f32 1.0, %v5117_v31  ;;  %v4130_v39 = vmul.f32 0.5, %v4114_v7 }
 0x842   :  { %v4155_v10 = vpack.c.bf16 %v4143_v26, %v4142_v24 }
 0x843   :  { %v5119_v38 = vpop.eup %5118  ;;  %v4154_v34 = vpack.c.bf16 %v4141_v62, %v4140_v1  ;;  %v4128_v15 = vmul.f32 0.5, %v4112_v36  ;;  %v4146_v18 = vmul.f32 %v4130_v39, %v7989_v42 }
 0x844   :  { %v4115_v55 = vadd.f32 1.0, %v5119_v38 }
 0x845   :  { %v5121_v53 = vpop.eup %5120  ;;  %4694 = vmatprep.mubr.bf16.mxu0 %v4154_v34  ;;  %v4144_v13 = vmul.f32 %v4128_v15, %v7997_v61 }
 0x846   :  { %v4113_v3 = vadd.f32 1.0, %v5121_v53  ;;  %v4131_v35 = vmul.f32 0.5, %v4115_v55 }
 0x847   :  { %v5123_v51 = vpop.eup %5122 }
 0x848   :  { %4695 = vmatmul.mubr.bf16.gmra.mxu0 %v4155_v10  ;;  %v4129_v45 = vmul.f32 0.5, %v4113_v3  ;;  %v4147_v33 = vmul.f32 %v4131_v35, %v8004_v28  ;;  %v4118_v2 = vadd.f32 1.0, %v5123_v51 }
 0x849   :  { %v5125_v0 = vpop.eup %5124 }
 0x84a   :  { %v5127_v12 = vpop.eup %5126  ;;  %v4145_v22 = vmul.f32 %v4129_v45, %v8012_v25  ;;  %v4116_v17 = vadd.f32 1.0, %v5125_v0  ;;  %v4157_v16 = vpack.c.bf16 %v4147_v33, %v4146_v18  ;;  %v4134_v5 = vmul.f32 0.5, %v4118_v2 }
 0x84b   :  { %v4119_v59 = vadd.f32 1.0, %v5127_v12 }
 0x84c   :  { %v4156_v46 = vpack.c.bf16 %v4145_v22, %v4144_v13  ;;  %v4132_v32 = vmul.f32 0.5, %v4116_v17  ;;  %v4150_v30 = vmul.f32 %v4134_v5, %v8019_v6 }
 0x84d   :  { %v5129_v44 = vpop.eup %5128  ;;  %v4135_v63 = vmul.f32 0.5, %v4119_v59 }
 0x84e   :  { %4698 = vmatprep.mubr.bf16.mxu0 %v4156_v46  ;;  %v4117_v56 = vadd.f32 1.0, %v5129_v44  ;;  %v4148_v25 = vmul.f32 %v4132_v32, %v8026_v43 }
 0x84f   :  { %v4151_v61 = vmul.f32 %v4135_v63, %v8029_v41 }
 0x850   :  { %4699 = vmatmul.mubr.bf16.gmra.mxu0 %v4157_v16  ;;  %v4133_v4 = vmul.f32 0.5, %v4117_v56 }
 0x851   :  { %v4159_v42 = vpack.c.bf16 %v4151_v61, %v4150_v30 }
 0x852   :  { %v4149_v28 = vmul.f32 %v4133_v4, %v8041_v50 }
 0x854   :  { %v4158_v27 = vpack.c.bf16 %v4149_v28, %v4148_v25 }
 0x856   :  { %4702 = vmatprep.mubr.bf16.mxu0 %v4158_v27 }
 0x858   :  { %4703 = vmatmul.mubr.bf16.gmra.mxu0 %v4159_v42 }
 0x900   :  { %v4692_v49 = vpop.f32.mrf.mxu0 }
 0x901   :  { %v4257_v31 = vadd.f32 %v4692_v49, %v4472_v58 }
 0x902   :  { %v4248_v47 = vpop.f32.mrf.mxu0 }
 0x903   :  { %v4313_v1 = vadd.f32 %v4257_v31, %v7662_v14  ;;  %v4249_v41 = vadd.f32 %v4472_v58, %v4248_v47 }
 0x904   :  { %v4693_v62 = vpop.f32.mrf.mxu0 }
 0x905   :  { %4329 = vst.msk [vmem:[%s8160_s19 + $0x10] sm:$0xff] %vm81_vm0, %v4313_v1  ;;  %v4311_v6 = vadd.f32 %v4249_v41, %v7665_v60  ;;  %v4260_v43 = vadd.f32 %v4693_v62, %v4472_v58 }
 0x906   :  { %v4251_v50 = vpop.f32.mrf.mxu0 }
 0x907   :  { %4327 = vst.msk [vmem:[%s8160_s19] sm:$0xff] %vm81_vm0, %v4311_v6  ;;  %v4314_v26 = vadd.f32 %v4260_v43, %v7670_v8  ;;  %v4252_v36 = vadd.f32 %v4472_v58, %v4251_v50 }
 0x908   :  { %v4696_v14 = vpop.f32.mrf.mxu0 }
 0x909   :  { %4330 = vst.msk [vmem:[%s8160_s19 + $0x18] sm:$0xff] %vm81_vm0, %v4314_v26  ;;  %v4312_v38 = vadd.f32 %v4252_v36, %v7675_v57  ;;  %v4273_v34 = vadd.f32 %v4696_v14, %v4472_v58 }
 0x90a   :  { %v4264_v60 = vpop.f32.mrf.mxu0 }
 0x90b   :  { %4328 = vst.msk [vmem:[%s8160_s19 + $0x8] sm:$0xff] %vm81_vm0, %v4312_v38  ;;  %v4317_v24 = vadd.f32 %v4273_v34, %v7685_v9  ;;  %v4265_v7 = vadd.f32 %v4472_v58, %v4264_v60 }
 0x90c   :  { %v4697_v8 = vpop.f32.mrf.mxu0 }
 0x90d   :  { %4333 = vst.msk [vmem:[%s8160_s19 + $0x30] sm:$0xff] %vm81_vm0, %v4317_v24  ;;  %v4315_v55 = vadd.f32 %v4265_v7, %v7682_v52  ;;  %v4276_v53 = vadd.f32 %v4697_v8, %v4472_v58 }
 0x90e   :  { %v4267_v57 = vpop.f32.mrf.mxu0 }
 0x90f   :  { %4331 = vst.msk [vmem:[%s8160_s19 + $0x20] sm:$0xff] %vm81_vm0, %v4315_v55  ;;  %v4318_v10 = vadd.f32 %v4276_v53, %v7695_v29  ;;  %v4268_v3 = vadd.f32 %v4472_v58, %v4267_v57 }
 0x910   :  { %v4700_v9 = vpop.f32.mrf.mxu0 }
 0x911   :  { %4334 = vst.msk [vmem:[%s8160_s19 + $0x38] sm:$0xff] %vm81_vm0, %v4318_v10  ;;  %v4316_v15 = vadd.f32 %v4268_v3, %v7690_v11  ;;  %v4289_v35 = vadd.f32 %v4700_v9, %v4472_v58 }
 0x912   :  { %v4280_v52 = vpop.f32.mrf.mxu0 }
 0x913   :  { %4332 = vst.msk [vmem:[%s8160_s19 + $0x28] sm:$0xff] %vm81_vm0, %v4316_v15  ;;  %v4321_v51 = vadd.f32 %v4289_v35, %v7703_v20  ;;  %v4281_v45 = vadd.f32 %v4472_v58, %v4280_v52 }
 0x914   :  { %v4701_v29 = vpop.f32.mrf.mxu0 }
 0x915   :  { %4337 = vst.msk [vmem:[%s8160_s19 + $0x50] sm:$0xff] %vm81_vm0, %v4321_v51  ;;  %v4319_v39 = vadd.f32 %v4281_v45, %v7700_v19  ;;  %v4292_v0 = vadd.f32 %v4701_v29, %v4472_v58 }
 0x916   :  { %v4283_v11 = vpop.f32.mrf.mxu0 }
 0x917   :  { %4335 = vst.msk [vmem:[%s8160_s19 + $0x40] sm:$0xff] %vm81_vm0, %v4319_v39  ;;  %v4322_v12 = vadd.f32 %v4292_v0, %v7713_v40  ;;  %v4284_v13 = vadd.f32 %v4472_v58, %v4283_v11 }
 0x918   :  { %v4704_v20 = vpop.f32.mrf.mxu0 }
 0x919   :  { %4338 = vst.msk [vmem:[%s8160_s19 + $0x58] sm:$0xff] %vm81_vm0, %v4322_v12  ;;  %v4320_v22 = vadd.f32 %v4284_v13, %v7710_v23  ;;  %v4305_v33 = vadd.f32 %v4704_v20, %v4472_v58 }
 0x91a   :  { %v4296_v19 = vpop.f32.mrf.mxu0 }
 0x91b   :  { %4336 = vst.msk [vmem:[%s8160_s19 + $0x48] sm:$0xff] %vm81_vm0, %v4320_v22  ;;  %v4325_v17 = vadd.f32 %v4305_v33, %v7725_v37  ;;  %v4297_v59 = vadd.f32 %v4472_v58, %v4296_v19 }
 0x91c   :  { %v4705_v40 = vpop.f32.mrf.mxu0 }
 0x91d   :  { %4341 = vst.msk [vmem:[%s8160_s19 + $0x70] sm:$0xff] %vm81_vm0, %v4325_v17  ;;  %v4323_v46 = vadd.f32 %v4297_v59, %v7720_v21  ;;  %v4308_v18 = vadd.f32 %v4705_v40, %v4472_v58 }
 0x91e   :  { %v4299_v23 = vpop.f32.mrf.mxu0 }
 0x91f   :  { %4339 = vst.msk [vmem:[%s8160_s19 + $0x60] sm:$0xff] %vm81_vm0, %v4323_v46  ;;  %v4326_v2 = vadd.f32 %v4308_v18, %v7733_v54  ;;  %v4300_v44 = vadd.f32 %v4472_v58, %v4299_v23 }
 0x921   :  { %4342 = vst.msk [vmem:[%s8160_s19 + $0x78] sm:$0xff] %vm81_vm0, %v4326_v2  ;;  %v4324_v37 = vadd.f32 %v4300_v44, %v7730_v48 }
 0x923   :  { %4340 = vst.msk [vmem:[%s8160_s19 + $0x68] sm:$0xff] %vm81_vm0, %v4324_v37 }

// kernel: _lambda_.3
= control target key start
LH: loop header
LB: loop body
LE: loop exit
PB: predicated region body
PF: predicated region fallthrough
CT: control target
= control target key end

     0   :  { %v141_v0 = vlaneseq  ;;  %v8059_v2 = vmov 1983009808   ;;  %vm284_vm0 = vcmask 261120   ;;  %vm8061_vm1 = vmmov 0   ;;  %s8062_s18 = smov 96   ;;  %s8063_s19 = smov 64   ;;  %s10624_s1 = inlined_call_operand.vmem [shape: bf16[32,96], index: 1, kind: input, shape index: {}]   ;;  %s10625_s0 = inlined_call_operand.vmem [shape: f32[4,4,2,4,32], index: 0, kind: input, shape index: {}]   ;;  %s10626_s2 = inlined_call_operand.vmem [shape: bf16[32,32], index: 2, kind: input, shape index: {}]   ;;  %s10627_s3 = inlined_call_operand.vmem [shape: f32[1,32], index: 3, kind: input, shape index: {}, may-alias: {3,5,9}]   ;;  %s10628_s6 = inlined_call_operand.vmem [shape: bf16[32,128], index: 6, kind: input, shape index: {}]   ;;  %s10629_s4 = inlined_call_operand.vmem [shape: f32[1,32], index: 4, kind: input, shape index: {}]   ;;  %s10630_s5 = inlined_call_operand.vmem [shape: f32[1,32], index: 5, kind: input, shape index: {}, may-alias: {3,5,9}]   ;;  %s10631_s8 = inlined_call_operand.vmem [shape: bf16[128,32], index: 8, kind: input, shape index: {}]   ;;  %s10632_s7 = inlined_call_operand.vmem [shape: f32[1,128], index: 7, kind: input, shape index: {}]   ;;  %s10633_s9 = inlined_call_operand.vmem [shape: f32[1,32], index: 9, kind: input, shape index: {}, may-alias: {3,5,9}]   ;;  %s10634_s10 = inlined_call_operand.vmem [shape: f32[4,4,2,4,32], index: 10, kind: output, shape index: {}]  }
   0x1   :  { %v7693_v1 = vld [vmem:[%s10624_s1 + $0x8] sm:$0xff]   ;;  %v139_v3 = vunpack.c.l.s4 %v8059_v2  ;;  %v7694_v4 = vld [vmem:[%s10624_s1] sm:$0xff]   ;;  %v40_v8 = vld [vmem:[%s10625_s0 + $0x10] sm:$0xf]  ;;  %vm417_vm2 = vcmask 64512   ;;  %vm831_vm3 = vcmask 130048  }
   0x2   :  { %v8139_v5 = vshrl.u32 %v141_v0, 7  ;;  %7074 = vmatprep.subr.bf16.mxu0 %v7693_v1  ;;  %7550 = vmatprep.subr.bf16.mxu1 %v7693_v1  ;;  %v36_v6 = vld [vmem:[%s10625_s0] sm:$0xf]  ;;  %v38_v7 = vld [vmem:[%s10625_s0 + $0x8] sm:$0xf]  ;;  %s8064_s20 = smov 88  }
   0x3   :  { %v140_v9 = vunpack.c.0.s8 %v139_v3  ;;  %7075 = vmatpush3.bf16.msra.mxu0 %v7693_v1  ;;  %7552 = vmatpush3.bf16.msra.mxu1 %v7693_v1  ;;  %v42_v10 = vld [vmem:[%s10625_s0 + $0x18] sm:$0xf]  ;;  %v6761_v11 = vpack.c.bf16 %v38_v7, %v36_v6  ;;  %v37_v12 = vld [vmem:[%s10625_s0 + $0x4] sm:$0xf]  ;;  %v39_v13 = vld [vmem:[%s10625_s0 + $0xc] sm:$0xf] }
   0x4   :  { %10667 = vst [vmem:[#allocation2_spill] sm:$0xff] %v8139_v5  ;;  %7076 = vmatprep.subr.bf16.mxu0 %v7694_v4  ;;  %7551 = vmatprep.subr.bf16.mxu1 %v7694_v4  ;;  %v6762_v14 = vpack.c.bf16 %v42_v10, %v40_v8  ;;  %v41_v16 = vld [vmem:[%s10625_s0 + $0x14] sm:$0xf]  ;;  %v43_v17 = vld [vmem:[%s10625_s0 + $0x1c] sm:$0xf]  ;;  %v6763_v18 = vpack.c.bf16 %v39_v13, %v37_v12  ;;  %s8065_s21 = smov 120  }
   0x5   :  { %v8160_v15 = vsub.s32 %v140_v9, %v8139_v5  ;;  %v52_v19 = vld [vmem:[%s10625_s0 + $0x40] sm:$0xf]  ;;  %v6764_v20 = vpack.c.bf16 %v43_v17, %v41_v16  ;;  %v54_v21 = vld [vmem:[%s10625_s0 + $0x48] sm:$0xf]  ;;  %v56_v22 = vld [vmem:[%s10625_s0 + $0x50] sm:$0xf] }
   0x6   :  { %v58_v23 = vld [vmem:[%s10625_s0 + $0x58] sm:$0xf]  ;;  %v6769_v27 = vpack.c.bf16 %v54_v21, %v52_v19  ;;  %v53_v28 = vld [vmem:[%s10625_s0 + $0x44] sm:$0xf]  ;;  %v55_v29 = vld [vmem:[%s10625_s0 + $0x4c] sm:$0xf] }
   0x7   :  { %10668 = vst [vmem:[#allocation3_spill] sm:$0xff] %v8160_v15  ;;  %v144_v24 = vrot.slane %v6761_v11, %v8160_v15  ;;  %v151_v25 = vrot.slane %v6762_v14, %v8160_v15  ;;  %v161_v26 = vrot.slane %v6763_v18, %v8160_v15  ;;  %v57_v30 = vld [vmem:[%s10625_s0 + $0x54] sm:$0xf]  ;;  %7077 = vmatpush3.bf16.msra.mxu0 %v7694_v4  ;;  %v59_v33 = vld [vmem:[%s10625_s0 + $0x5c] sm:$0xf]  ;;  %v10635_v18 = vmov 0.0  }
   0x8   :  { %7553 = vmatpush3.bf16.msra.mxu1 %v7694_v4  ;;  %v168_v31 = vrot.slane %v6764_v20, %v8160_v15  ;;  %v6770_v32 = vpack.c.bf16 %v58_v23, %v56_v22  ;;  %v6771_v34 = vpack.c.bf16 %v55_v29, %v53_v28  ;;  %v44_v35 = vld [vmem:[%s10625_s0 + $0x20] sm:$0xf]  ;;  %v46_v36 = vld [vmem:[%s10625_s0 + $0x28] sm:$0xf]  ;;  %v212_v38 = vrot.slane %v6769_v27, %v8160_v15  ;;  %v48_v40 = vld [vmem:[%s10625_s0 + $0x30] sm:$0xf] }
   0x9   :  { %v152_v37 = vcombine.low %v144_v24, %v151_v25  ;;  %v6772_v39 = vpack.c.bf16 %v59_v33, %v57_v30  ;;  %v50_v41 = vld [vmem:[%s10625_s0 + $0x38] sm:$0xf]  ;;  %v6765_v42 = vpack.c.bf16 %v46_v36, %v44_v35  ;;  %v45_v43 = vld [vmem:[%s10625_s0 + $0x24] sm:$0xf]  ;;  %v47_v48 = vld [vmem:[%s10625_s0 + $0x2c] sm:$0xf]  ;;  %7094 = vmatprep.subr.bf16.mxu1 %v10635_v18  ;;  %7118 = vmatprep.subr.bf16.mxu0 %v10635_v18 }
   0xa   :  { %v169_v44 = vcombine.low %v161_v26, %v168_v31  ;;  %v219_v45 = vrot.slane %v6770_v32, %v8160_v15  ;;  %v229_v46 = vrot.slane %v6771_v34, %v8160_v15  ;;  %v6766_v47 = vpack.c.bf16 %v50_v41, %v48_v40  ;;  %v49_v49 = vld [vmem:[%s10625_s0 + $0x34] sm:$0xf]  ;;  %v51_v50 = vld [vmem:[%s10625_s0 + $0x3c] sm:$0xf]  ;;  %v60_v55 = vld [vmem:[%s10625_s0 + $0x60] sm:$0xf] }
   0xb   :  { %7078 = vmatprep.mubr.msk.bf16.mxu0 %vm284_vm0, %v152_v37  ;;  %v236_v51 = vrot.slane %v6772_v39, %v8160_v15  ;;  %v178_v52 = vrot.slane %v6765_v42, %v8160_v15  ;;  %v6767_v53 = vpack.c.bf16 %v47_v48, %v45_v43  ;;  %v6768_v54 = vpack.c.bf16 %v51_v50, %v49_v49  ;;  %v62_v56 = vld [vmem:[%s10625_s0 + $0x68] sm:$0xf]  ;;  %v64_v57 = vld [vmem:[%s10625_s0 + $0x70] sm:$0xf]  ;;  %v66_v60 = vld [vmem:[%s10625_s0 + $0x78] sm:$0xf] }
   0xc   :  { %7079 = vmatmul.mubr.msk.bf16.vlgmr.msra.gmra.mxu0 %vm284_vm0, %v169_v44  ;;  %v220_v58 = vcombine.low %v212_v38, %v219_v45  ;;  %v185_v59 = vrot.slane %v6766_v47, %v8160_v15  ;;  %v6773_v61 = vpack.c.bf16 %v62_v56, %v60_v55  ;;  %v61_v62 = vld [vmem:[%s10625_s0 + $0x64] sm:$0xf]  ;;  %v63_v63 = vld [vmem:[%s10625_s0 + $0x6c] sm:$0xf]  ;;  %v6774_v3 = vpack.c.bf16 %v66_v60, %v64_v57  ;;  %v65_v4 = vld [vmem:[%s10625_s0 + $0x74] sm:$0xf] }
   0xd   :  { %v237_v0 = vcombine.low %v229_v46, %v236_v51  ;;  %v195_v1 = vrot.slane %v6767_v53, %v8160_v15  ;;  %v202_v2 = vrot.slane %v6768_v54, %v8160_v15  ;;  %v67_v6 = vld [vmem:[%s10625_s0 + $0x7c] sm:$0xf]  ;;  %v6775_v9 = vpack.c.bf16 %v63_v63, %v61_v62  ;;  %s8066_s22 = smov 56   ;;  %s8067_s1 = smov 80  }
   0xe   :  { %7086 = vmatprep.mubr.msk.bf16.mxu1 %vm284_vm0, %v220_v58  ;;  %v186_v7 = vcombine.low %v178_v52, %v185_v59  ;;  %v246_v8 = vrot.slane %v6773_v61, %v8160_v15  ;;  %v6776_v10 = vpack.c.bf16 %v67_v6, %v65_v4  ;;  %v253_v11 = vrot.slane %v6774_v3, %v8160_v15  ;;  %s8068_s23 = smov 112   ;;  %s8069_s24 = smov 48  }
   0xf   :  { %7087 = vmatmul.mubr.msk.bf16.vlgmr.msra.gmra.mxu1 %vm284_vm0, %v237_v0  ;;  %v203_v12 = vcombine.low %v195_v1, %v202_v2  ;;  %v263_v13 = vrot.slane %v6775_v9, %v8160_v15  ;;  %s8070_s25 = smov 72   ;;  %s8071_s26 = smov 104   ;;  %vm4568_vm4 = vcmask 195584   ;;  %vm6724_vm5 = vcmask 257024  }
  0x10   :  { %7082 = vmatprep.mubr.msk.bf16.mxu0 %vm284_vm0, %v186_v7  ;;  %v270_v14 = vrot.slane %v6776_v10, %v8160_v15  ;;  %v254_v16 = vcombine.low %v246_v8, %v253_v11  ;;  %s8072_s27 = smov 40   ;;  %s8073_s28 = smov 8  }
  0x11   :  { %s8074_s29 = smov 16   ;;  %s8075_s12 = smov 24  }
  0x12   :  { %7090 = vmatprep.mubr.msk.bf16.mxu1 %vm284_vm0, %v254_v16  ;;  %v271_v17 = vcombine.low %v263_v13, %v270_v14 }
  0x14   :  { %7083 = vmatmul.mubr.msk.bf16.gmra.mxu0 %vm284_vm0, %v203_v12 }
  0x15   :  { %7120 = vmatprep.mubr.msk.bf16.mxu0 %vm8061_vm1, %v10635_v18 }
  0x17   :  { %7091 = vmatmul.mubr.msk.bf16.gmra.mxu1 %vm284_vm0, %v271_v17 }
  0x18   :  { %7096 = vmatprep.mubr.msk.bf16.mxu1 %vm8061_vm1, %v10635_v18 }
  0xcc   :  { %v7080_v19 = vpop.f32.mrf.mxu0 }
  0xce   :  { %v343_v20 = vpop.f32.mrf.mxu0 }
  0xcf   :  { %v7088_v21 = vpop.f32.mrf.mxu1 }
  0xd0   :  { %v7081_v22 = vpop.f32.mrf.mxu0 }
  0xd1   :  { %v375_v23 = vpop.f32.mrf.mxu1  ;;  %v8273_v30 = vpack.c.bf16 %v7081_v22, %v7080_v19 }
  0xd2   :  { %v346_v24 = vpop.f32.mrf.mxu0 }
  0xd3   :  { %v8270_v25 = vpack.c.bf16 %v346_v24, %v343_v20  ;;  %v7089_v26 = vpop.f32.mrf.mxu1 }
  0xd4   :  { %v7084_v27 = vpop.f32.mrf.mxu0  ;;  %v8288_v41 = vpack.c.bf16 %v7089_v26, %v7088_v21 }
  0xd5   :  { %v378_v28 = vpop.f32.mrf.mxu1  ;;  %415 = vrot.lane.b32.xlu0 %v8270_v25, %s8062_s18 }
  0xd6   :  { %v359_v29 = vpop.f32.mrf.mxu0  ;;  %v8276_v35 = vpack.c.bf16 %v378_v28, %v375_v23 }
  0xd7   :  { %v7092_v31 = vpop.f32.mrf.mxu1 }
  0xd8   :  { %v7085_v32 = vpop.f32.mrf.mxu0 }
  0xd9   :  { %466 = vrot.lane.b32.xlu0 %v8273_v30, %s8062_s18  ;;  %v391_v33 = vpop.f32.mrf.mxu1  ;;  %v8284_v40 = vpack.c.bf16 %v7085_v32, %v7084_v27 }
  0xda   :  { %v362_v34 = vpop.f32.mrf.mxu0 }
  0xdb   :  { %v8278_v36 = vpack.c.bf16 %v362_v34, %v359_v29  ;;  %v7093_v37 = vpop.f32.mrf.mxu1 }
  0xdc   :  { %v8293_v42 = vpack.c.bf16 %v7093_v37, %v7092_v31 }
  0xdd   :  { %616 = vrot.lane.b32.xlu0 %v8276_v35, %s8062_s18  ;;  %516 = vrot.lane.b32.xlu1 %v8278_v36, %s8062_s18  ;;  %v394_v38 = vpop.f32.mrf.mxu1 }
  0xde   :  { %v8282_v39 = vpack.c.bf16 %v394_v38, %v391_v33 }
  0xe1   :  { %716 = vrot.lane.b32.xlu0 %v8282_v39, %s8062_s18  ;;  %566 = vrot.lane.b32.xlu1 %v8284_v40, %s8062_s18 }
  0xe5   :  { %1063 = vrot.lane.b32.xlu0 %v8273_v30, %s8063_s19  ;;  %666 = vrot.lane.b32.xlu1 %v8288_v41, %s8062_s18 }
  0xe9   :  { %766 = vrot.lane.b32.xlu1 %v8293_v42, %s8062_s18 }
  0xed   :  { %1016 = vrot.lane.b32.xlu1 %v8270_v25, %s8063_s19 }
  0xf1   :  { %1157 = vrot.lane.b32.xlu1 %v8284_v40, %s8063_s19 }
  0xf5   :  { %1110 = vrot.lane.b32.xlu1 %v8278_v36, %s8063_s19 }
 0x147   :  { %v416_v43 = vpop.permute.xlu0 %415 }
 0x148   :  { %v422_v44 = vsel %vm417_vm2, %v416_v43, 0 }
 0x149   :  { %7095 = vmatpush3.bf16.xpose.msra.mxu1 %v422_v44 }
 0x14a   :  { %7100 = vmatprep.subr.bf16.mxu1 %v10635_v18 }
 0x14b   :  { %v467_v45 = vpop.permute.xlu0 %466 }
 0x14c   :  { %v472_v48 = vsel %vm417_vm2, %v467_v45, 0 }
 0x14f   :  { %v617_v46 = vpop.permute.xlu0 %616  ;;  %v517_v47 = vpop.permute.xlu1 %516 }
 0x150   :  { %v622_v49 = vsel %vm417_vm2, %v617_v46, 0  ;;  %7097 = vmatmul.mubr.msk.bf16.vlgmr.msra.gmra.mxu1 %vm417_vm2, %v8270_v25  ;;  %v522_v53 = vsel %vm417_vm2, %v517_v47, 0 }
 0x151   :  { %7101 = vmatpush3.bf16.xpose.msra.mxu1 %v472_v48  ;;  %7119 = vmatpush3.bf16.xpose.msra.mxu0 %v622_v49 }
 0x152   :  { %7102 = vmatprep.mubr.msk.bf16.mxu1 %vm8061_vm1, %v10635_v18  ;;  %7106 = vmatprep.subr.bf16.mxu1 %v10635_v18 }
 0x153   :  { %v567_v50 = vpop.permute.xlu1 %566  ;;  %7130 = vmatprep.subr.bf16.mxu0 %v10635_v18  ;;  %v717_v51 = vpop.permute.xlu0 %716 }
 0x154   :  { %v722_v54 = vsel %vm417_vm2, %v717_v51, 0  ;;  %v572_v57 = vsel %vm417_vm2, %v567_v50, 0 }
 0x157   :  { %v667_v52 = vpop.permute.xlu1 %666  ;;  %v1064_v60 = vpop.permute.xlu0 %1063 }
 0x158   :  { %7103 = vmatmul.mubr.msk.bf16.vlgmr.msra.gmra.mxu1 %vm417_vm2, %v8273_v30  ;;  %7121 = vmatmul.mubr.msk.bf16.vlgmr.msra.gmra.mxu0 %vm417_vm2, %v8276_v35  ;;  %v672_v58 = vsel %vm417_vm2, %v667_v52, 0 }
 0x159   :  { %7107 = vmatpush3.bf16.xpose.msra.mxu1 %v522_v53  ;;  %7131 = vmatpush3.bf16.xpose.msra.mxu0 %v722_v54 }
 0x15a   :  { %7108 = vmatprep.mubr.msk.bf16.mxu1 %vm8061_vm1, %v10635_v18  ;;  %7132 = vmatprep.mubr.msk.bf16.mxu0 %vm8061_vm1, %v10635_v18 }
 0x15b   :  { %v767_v55 = vpop.permute.xlu1 %766  ;;  %7112 = vmatprep.subr.bf16.mxu1 %v10635_v18  ;;  %7142 = vmatprep.subr.bf16.mxu0 %v10635_v18 }
 0x15c   :  { %v772_v59 = vsel %vm417_vm2, %v767_v55, 0 }
 0x15f   :  { %v1017_v56 = vpop.permute.xlu1 %1016 }
 0x160   :  { %7109 = vmatmul.mubr.msk.bf16.vlgmr.msra.gmra.mxu1 %vm417_vm2, %v8278_v36  ;;  %7133 = vmatmul.mubr.msk.bf16.vlgmr.msra.gmra.mxu0 %vm417_vm2, %v8282_v39 }
 0x161   :  { %7113 = vmatpush3.bf16.xpose.msra.mxu1 %v572_v57  ;;  %7143 = vmatpush3.bf16.msra.mxu0 %v1017_v56 }
 0x162   :  { %7114 = vmatprep.mubr.msk.bf16.mxu1 %vm8061_vm1, %v10635_v18  ;;  %7124 = vmatprep.subr.bf16.mxu1 %v10635_v18 }
 0x163   :  { %7144 = vmatprep.mubr.msk.bf16.mxu0 %vm8061_vm1, %v10635_v18  ;;  %7154 = vmatprep.subr.bf16.mxu0 %v10635_v18 }
 0x168   :  { %7115 = vmatmul.mubr.msk.bf16.vlgmr.msra.gmra.mxu1 %vm417_vm2, %v8284_v40 }
 0x169   :  { %7125 = vmatpush3.bf16.xpose.msra.mxu1 %v672_v58  ;;  %7126 = vmatprep.mubr.msk.bf16.mxu1 %vm8061_vm1, %v10635_v18 }
 0x16a   :  { %7136 = vmatprep.subr.bf16.mxu1 %v10635_v18 }
 0x170   :  { %7127 = vmatmul.mubr.msk.bf16.vlgmr.msra.gmra.mxu1 %vm417_vm2, %v8288_v41 }
 0x171   :  { %7137 = vmatpush3.bf16.xpose.msra.mxu1 %v772_v59  ;;  %7138 = vmatprep.mubr.msk.bf16.mxu1 %vm8061_vm1, %v10635_v18 }
 0x172   :  { %7148 = vmatprep.subr.bf16.mxu1 %v10635_v18 }
 0x178   :  { %7139 = vmatmul.mubr.msk.bf16.vlgmr.msra.gmra.mxu1 %vm417_vm2, %v8293_v42 }
 0x179   :  { %7149 = vmatpush3.bf16.msra.mxu1 %v1064_v60  ;;  %7150 = vmatprep.mubr.msk.bf16.mxu1 %vm8061_vm1, %v10635_v18 }
 0x17a   :  { %7160 = vmatprep.subr.bf16.mxu1 %v10635_v18 }
 0x210   :  { %v458_v61 = vpop.f32.mrf.mxu1 }
 0x211   :  { %v8352_v62 = vmul.f32 0.35355338, %v458_v61 }
 0x212   :  { %v7098_v63 = vpop.f32.mrf.mxu1 }
 0x213   :  { %v832_v0 = vsel %vm831_vm3, %v8352_v62, -inf }
 0x214   :  { %833 = vmax.xlane.f32.xlu0 %v832_v0  ;;  %v461_v1 = vpop.f32.mrf.mxu1 }
 0x215   :  { %v8358_v9 = vmul.f32 0.35355338, %v461_v1 }
 0x216   :  { %v7099_v2 = vpop.f32.mrf.mxu1 }
 0x217   :  { %v835_v20 = vsel %vm831_vm3, %v8358_v9, -inf }
 0x218   :  { %v508_v3 = vpop.f32.mrf.mxu1  ;;  %v658_v4 = vpop.f32.mrf.mxu0 }
 0x219   :  { %v8356_v6 = vmul.f32 0.35355338, %v658_v4  ;;  %v8364_v17 = vmul.f32 0.35355338, %v508_v3 }
 0x21a   :  { %v7104_v7 = vpop.f32.mrf.mxu1  ;;  %v7122_v8 = vpop.f32.mrf.mxu0 }
 0x21b   :  { %v856_v10 = vsel %vm831_vm3, %v8356_v6, -inf  ;;  %v838_v29 = vsel %vm831_vm3, %v8364_v17, -inf }
 0x21c   :  { %v511_v11 = vpop.f32.mrf.mxu1  ;;  %v661_v12 = vpop.f32.mrf.mxu0  ;;  %857 = vmax.xlane.f32.xlu1 %v856_v10 }
 0x21d   :  { %v8362_v13 = vmul.f32 0.35355338, %v661_v12  ;;  %v8372_v27 = vmul.f32 0.35355338, %v511_v11  ;;  %v8420_v12 = vpop.permute.xlu1 %1157 }
 0x21e   :  { %v7105_v14 = vpop.f32.mrf.mxu1  ;;  %v7123_v16 = vpop.f32.mrf.mxu0 }
 0x21f   :  { %v859_v19 = vsel %vm831_vm3, %v8362_v13, -inf  ;;  %v841_v43 = vsel %vm831_vm3, %v8372_v27, -inf }
 0x220   :  { %860 = vmax.xlane.f32.xlu0 %v859_v19  ;;  %v758_v21 = vpop.f32.mrf.mxu0  ;;  %836 = vmax.xlane.f32.xlu1 %v835_v20  ;;  %v558_v22 = vpop.f32.mrf.mxu1 }
 0x221   :  { %v8370_v23 = vmul.f32 0.35355338, %v758_v21  ;;  %v8374_v28 = vmul.f32 0.35355338, %v558_v22  ;;  %v8423_v20 = vpop.permute.xlu1 %1110 }
 0x222   :  { %v7110_v24 = vpop.f32.mrf.mxu1  ;;  %v7134_v26 = vpop.f32.mrf.mxu0 }
 0x223   :  { %v868_v31 = vsel %vm831_vm3, %v8370_v23, -inf  ;;  %v844_v44 = vsel %vm831_vm3, %v8374_v28, -inf }
 0x224   :  { %839 = vmax.xlane.f32.xlu0 %v838_v29  ;;  %v761_v32 = vpop.f32.mrf.mxu0  ;;  %869 = vmax.xlane.f32.xlu1 %v868_v31  ;;  %v561_v33 = vpop.f32.mrf.mxu1 }
 0x225   :  { %v8380_v38 = vmul.f32 0.35355338, %v761_v32  ;;  %v8388_v48 = vmul.f32 0.35355338, %v561_v33 }
 0x226   :  { %v7111_v34 = vpop.f32.mrf.mxu1  ;;  %v7135_v37 = vpop.f32.mrf.mxu0 }
 0x227   :  { %v871_v49 = vsel %vm831_vm3, %v8380_v38, -inf  ;;  %v847_v54 = vsel %vm831_vm3, %v8388_v48, -inf }
 0x228   :  { %842 = vmax.xlane.f32.xlu0 %v841_v43  ;;  %845 = vmax.xlane.f32.xlu1 %v844_v44  ;;  %v608_v45 = vpop.f32.mrf.mxu1 }
 0x229   :  { %v8386_v46 = vmul.f32 0.35355338, %v608_v45 }
 0x22a   :  { %v7116_v47 = vpop.f32.mrf.mxu1 }
 0x22b   :  { %v850_v50 = vsel %vm831_vm3, %v8386_v46, -inf }
 0x22c   :  { %872 = vmax.xlane.f32.xlu0 %v871_v49  ;;  %851 = vmax.xlane.f32.xlu1 %v850_v50  ;;  %v611_v51 = vpop.f32.mrf.mxu1 }
 0x22d   :  { %v8394_v53 = vmul.f32 0.35355338, %v611_v51 }
 0x22e   :  { %v7117_v52 = vpop.f32.mrf.mxu1 }
 0x22f   :  { %v853_v58 = vsel %vm831_vm3, %v8394_v53, -inf }
 0x230   :  { %848 = vmax.xlane.f32.xlu0 %v847_v54  ;;  %v708_v55 = vpop.f32.mrf.mxu1 }
 0x231   :  { %v8398_v56 = vmul.f32 0.35355338, %v708_v55 }
 0x232   :  { %v7128_v57 = vpop.f32.mrf.mxu1 }
 0x233   :  { %v862_v59 = vsel %vm831_vm3, %v8398_v56, -inf }
 0x234   :  { %854 = vmax.xlane.f32.xlu0 %v853_v58  ;;  %863 = vmax.xlane.f32.xlu1 %v862_v59  ;;  %v711_v60 = vpop.f32.mrf.mxu1 }
 0x235   :  { %v8404_v61 = vmul.f32 0.35355338, %v711_v60 }
 0x236   :  { %v7129_v63 = vpop.f32.mrf.mxu1 }
 0x237   :  { %v865_v0 = vsel %vm831_vm3, %v8404_v61, -inf }
 0x238   :  { %866 = vmax.xlane.f32.xlu0 %v865_v0  ;;  %v808_v1 = vpop.f32.mrf.mxu1 }
 0x239   :  { %v8408_v2 = vmul.f32 0.35355338, %v808_v1 }
 0x23a   :  { %v7140_v3 = vpop.f32.mrf.mxu1 }
 0x23b   :  { %v874_v4 = vsel %vm831_vm3, %v8408_v2, -inf }
 0x23c   :  { %875 = vmax.xlane.f32.xlu1 %v874_v4  ;;  %v811_v7 = vpop.f32.mrf.mxu1 }
 0x23d   :  { %v8412_v8 = vmul.f32 0.35355338, %v811_v7 }
 0x23e   :  { %v7141_v10 = vpop.f32.mrf.mxu1 }
 0x23f   :  { %v877_v11 = vsel %vm831_vm3, %v8412_v8, -inf }
 0x240   :  { %878 = vmax.xlane.f32.xlu0 %v877_v11 }
 0x24d   :  { %1251 = vrot.lane.b32.xlu1 %v8288_v41, %s8063_s19 }
 0x256   :  { %1204 = vrot.lane.b32.xlu0 %v8276_v35, %s8063_s19 }
 0x29d   :  { %v834_v14 = vpop.xlane.xlu0 %833 }
 0x29e   :  { %v880_v16 = vsub.f32 %v8352_v62, %v834_v14 }
 0x2a0   :  { %v896_v19 = vmul.f32 1.442695, %v880_v16 }
 0x2a2   :  { %7707 = vpow2.f32 %v896_v19 }
 0x2a5   :  { %v858_v21 = vpop.xlane.xlu1 %857 }
 0x2a6   :  { %v888_v22 = vsub.f32 %v8356_v6, %v858_v21 }
 0x2a8   :  { %v912_v24 = vmul.f32 1.442695, %v888_v22 }
 0x2a9   :  { %v861_v26 = vpop.xlane.xlu0 %860  ;;  %v837_v29 = vpop.xlane.xlu1 %836 }
 0x2aa   :  { %7709 = vpow2.f32 %v912_v24  ;;  %v889_v31 = vsub.f32 %v8362_v13, %v861_v26  ;;  %v881_v32 = vsub.f32 %v8358_v9, %v837_v29 }
 0x2ac   :  { %v898_v33 = vmul.f32 1.442695, %v881_v32  ;;  %v914_v34 = vmul.f32 1.442695, %v889_v31 }
 0x2ad   :  { %v840_v37 = vpop.xlane.xlu0 %839  ;;  %v870_v43 = vpop.xlane.xlu1 %869 }
 0x2ae   :  { %v882_v62 = vsub.f32 %v8364_v17, %v840_v37  ;;  %v892_v44 = vsub.f32 %v8370_v23, %v870_v43  ;;  %7711 = vpow2.f32 %v898_v33 }
 0x2af   :  { %v8430_v45 = vpop.eup %7707  ;;  %7713 = vpow2.f32 %v914_v34 }
 0x2b0   :  { %v900_v6 = vmul.f32 1.442695, %v882_v62  ;;  %v920_v47 = vmul.f32 1.442695, %v892_v44  ;;  %v928_v49 = vsel %vm831_vm3, %v8430_v45, 0.0 }
 0x2b1   :  { %v843_v13 = vpop.xlane.xlu0 %842  ;;  %929 = vadd.xlane.f32.xlu1 %v928_v49  ;;  %v846_v9 = vpop.xlane.xlu1 %845 }
 0x2b2   :  { %7715 = vpow2.f32 %v900_v6  ;;  %v883_v50 = vsub.f32 %v8372_v27, %v843_v13  ;;  %v884_v51 = vsub.f32 %v8374_v28, %v846_v9 }
 0x2b3   :  { %7717 = vpow2.f32 %v920_v47 }
 0x2b4   :  { %v902_v17 = vmul.f32 1.442695, %v883_v50  ;;  %v904_v23 = vmul.f32 1.442695, %v884_v51 }
 0x2b5   :  { %v873_v52 = vpop.xlane.xlu0 %872  ;;  %v852_v54 = vpop.xlane.xlu1 %851 }
 0x2b6   :  { %7719 = vpow2.f32 %v902_v17  ;;  %v893_v55 = vsub.f32 %v8380_v38, %v873_v52  ;;  %v886_v57 = vsub.f32 %v8386_v46, %v852_v54 }
 0x2b7   :  { %v8438_v58 = vpop.eup %7709  ;;  %7721 = vpow2.f32 %v904_v23 }
 0x2b8   :  { %v922_v59 = vmul.f32 1.442695, %v893_v55  ;;  %v908_v60 = vmul.f32 1.442695, %v886_v57  ;;  %v952_v27 = vsel %vm831_vm3, %v8438_v58, 0.0 }
 0x2b9   :  { %v849_v63 = vpop.xlane.xlu0 %848  ;;  %953 = vadd.xlane.f32.xlu1 %v952_v27 }
 0x2ba   :  { %7723 = vpow2.f32 %v922_v59  ;;  %v885_v28 = vsub.f32 %v8388_v48, %v849_v63 }
 0x2bb   :  { %v8443_v0 = vpop.eup %7711  ;;  %7725 = vpow2.f32 %v908_v60 }
 0x2bc   :  { %v906_v1 = vmul.f32 1.442695, %v885_v28  ;;  %v931_v46 = vsel %vm831_vm3, %v8443_v0, 0.0  ;;  %v8447_v4 = vpop.eup %7713 }
 0x2bd   :  { %v855_v38 = vpop.xlane.xlu0 %854  ;;  %v864_v3 = vpop.xlane.xlu1 %863  ;;  %932 = vadd.xlane.f32.xlu0 %v931_v46  ;;  %v955_v22 = vsel %vm831_vm3, %v8447_v4, 0.0 }
 0x2be   :  { %7727 = vpow2.f32 %v906_v1  ;;  %v887_v7 = vsub.f32 %v8394_v53, %v855_v38  ;;  %v890_v10 = vsub.f32 %v8398_v56, %v864_v3 }
 0x2bf   :  { %v8451_v11 = vpop.eup %7715 }
 0x2c0   :  { %v910_v48 = vmul.f32 1.442695, %v887_v7  ;;  %v916_v14 = vmul.f32 1.442695, %v890_v10  ;;  %v934_v16 = vsel %vm831_vm3, %v8451_v11, 0.0  ;;  %v8455_v19 = vpop.eup %7717 }
 0x2c1   :  { %v867_v21 = vpop.xlane.xlu0 %866  ;;  %935 = vadd.xlane.f32.xlu1 %v934_v16  ;;  %956 = vadd.xlane.f32.xlu0 %v955_v22  ;;  %v964_v29 = vsel %vm831_vm3, %v8455_v19, 0.0 }
 0x2c2   :  { %7729 = vpow2.f32 %v910_v48  ;;  %v891_v53 = vsub.f32 %v8404_v61, %v867_v21 }
 0x2c3   :  { %v8460_v24 = vpop.eup %7719  ;;  %7731 = vpow2.f32 %v916_v14 }
 0x2c4   :  { %v918_v56 = vmul.f32 1.442695, %v891_v53  ;;  %v937_v26 = vsel %vm831_vm3, %v8460_v24, 0.0  ;;  %v8466_v31 = vpop.eup %7721 }
 0x2c5   :  { %965 = vadd.xlane.f32.xlu1 %v964_v29  ;;  %938 = vadd.xlane.f32.xlu0 %v937_v26  ;;  %v940_v33 = vsel %vm831_vm3, %v8466_v31, 0.0  ;;  %v876_v50 = vpop.xlane.xlu1 %875 }
 0x2c6   :  { %7733 = vpow2.f32 %v918_v56  ;;  %v894_v51 = vsub.f32 %v8408_v2, %v876_v50 }
 0x2c7   :  { %v8468_v32 = vpop.eup %7723 }
 0x2c8   :  { %v967_v61 = vsel %vm831_vm3, %v8468_v32, 0.0  ;;  %v8474_v34 = vpop.eup %7725  ;;  %v924_v23 = vmul.f32 1.442695, %v894_v51 }
 0x2c9   :  { %941 = vadd.xlane.f32.xlu1 %v940_v33  ;;  %968 = vadd.xlane.f32.xlu0 %v967_v61  ;;  %v946_v62 = vsel %vm831_vm3, %v8474_v34, 0.0  ;;  %v879_v17 = vpop.xlane.xlu0 %878  ;;  %v8526_v2 = vpop.permute.xlu1 %1251 }
 0x2ca   :  { %v895_v52 = vsub.f32 %v8412_v8, %v879_v17  ;;  %7735 = vpow2.f32 %v924_v23 }
 0x2cb   :  { %v8476_v37 = vpop.eup %7727 }
 0x2cc   :  { %v943_v43 = vsel %vm831_vm3, %v8476_v37, 0.0  ;;  %v926_v54 = vmul.f32 1.442695, %v895_v52 }
 0x2cd   :  { %947 = vadd.xlane.f32.xlu1 %v946_v62  ;;  %944 = vadd.xlane.f32.xlu0 %v943_v43  ;;  %v1205_v27 = vpop.permute.xlu0 %1204 }
 0x2ce   :  { %7737 = vpow2.f32 %v926_v54 }
 0x2cf   :  { %v8482_v44 = vpop.eup %7729 }
 0x2d0   :  { %v8484_v6 = vpop.eup %7731  ;;  %v949_v47 = vsel %vm831_vm3, %v8482_v44, 0.0 }
 0x2d1   :  { %v958_v49 = vsel %vm831_vm3, %v8484_v6, 0.0  ;;  %950 = vadd.xlane.f32.xlu0 %v949_v47 }
 0x2d2   :  { %959 = vadd.xlane.f32.xlu1 %v958_v49 }
 0x2d3   :  { %v8490_v13 = vpop.eup %7733 }
 0x2d4   :  { %v961_v9 = vsel %vm831_vm3, %v8490_v13, 0.0 }
 0x2d5   :  { %962 = vadd.xlane.f32.xlu0 %v961_v9 }
 0x2d7   :  { %v8500_v55 = vpop.eup %7735 }
 0x2d8   :  { %v970_v57 = vsel %vm831_vm3, %v8500_v55, 0.0 }
 0x2db   :  { %v8504_v59 = vpop.eup %7737 }
 0x2dc   :  { %v973_v60 = vsel %vm831_vm3, %v8504_v59, 0.0 }
 0x2e3   :  { %1345 = vrot.lane.b32.xlu1 %v8293_v42, %s8063_s19 }
 0x2eb   :  { %1298 = vrot.lane.b32.xlu0 %v8282_v39, %s8063_s19 }
 0x307   :  { %971 = vadd.xlane.f32.xlu1 %v970_v57 }
 0x30a   :  { %974 = vadd.xlane.f32.xlu0 %v973_v60 }
 0x318   :  { %1445 = vrot.lane.b32.xlu1 %v8273_v30, %s8064_s20 }
 0x31c   :  { %1443 = vrot.lane.b32.xlu1 %v8273_v30, %s8065_s21 }
 0x320   :  { %1547 = vrot.lane.b32.xlu1 %v8284_v40, %s8064_s20  ;;  %1394 = vrot.lane.b32.xlu0 %v8270_v25, %s8064_s20 }
 0x324   :  { %1545 = vrot.lane.b32.xlu1 %v8284_v40, %s8065_s21  ;;  %1392 = vrot.lane.b32.xlu0 %v8270_v25, %s8065_s21 }
 0x328   :  { %1649 = vrot.lane.b32.xlu1 %v8288_v41, %s8064_s20  ;;  %1496 = vrot.lane.b32.xlu0 %v8278_v36, %s8064_s20 }
 0x32c   :  { %1647 = vrot.lane.b32.xlu1 %v8288_v41, %s8065_s21  ;;  %1494 = vrot.lane.b32.xlu0 %v8278_v36, %s8065_s21 }
 0x330   :  { %1751 = vrot.lane.b32.xlu1 %v8293_v42, %s8064_s20  ;;  %1598 = vrot.lane.b32.xlu0 %v8276_v35, %s8064_s20 }
 0x334   :  { %1749 = vrot.lane.b32.xlu1 %v8293_v42, %s8065_s21  ;;  %1596 = vrot.lane.b32.xlu0 %v8276_v35, %s8065_s21 }
 0x338   :  { %2000 = vrot.lane.b32.xlu1 %v8270_v25, %s8066_s22  ;;  %1700 = vrot.lane.b32.xlu0 %v8282_v39, %s8064_s20 }
 0x33a   :  { %v930_v8 = vpop.xlane.xlu1 %929 }
 0x33b   :  { %7739 = vrcp.f32 %v930_v8 }
 0x33c   :  { %1698 = vrot.lane.b32.xlu0 %v8282_v39, %s8065_s21 }
 0x342   :  { %v954_v63 = vpop.xlane.xlu1 %953 }
 0x346   :  { %v933_v28 = vpop.xlane.xlu0 %932 }
 0x347   :  { %7741 = vrcp.f32 %v933_v28 }
 0x348   :  { %v7740_v10 = vpop.eup %7739 }
 0x349   :  { %v992_v16 = vmul.f32 %v7740_v10, %v8430_v45 }
 0x34a   :  { %v936_v1 = vpop.xlane.xlu1 %935  ;;  %v957_v38 = vpop.xlane.xlu0 %956 }
 0x34b   :  { %7743 = vrcp.f32 %v936_v1 }
 0x34e   :  { %v966_v46 = vpop.xlane.xlu1 %965  ;;  %v939_v3 = vpop.xlane.xlu0 %938 }
 0x34f   :  { %7745 = vrcp.f32 %v939_v3 }
 0x352   :  { %v942_v7 = vpop.xlane.xlu1 %941  ;;  %v969_v48 = vpop.xlane.xlu0 %968 }
 0x353   :  { %7747 = vrcp.f32 %v942_v7 }
 0x354   :  { %v7742_v14 = vpop.eup %7741 }
 0x355   :  { %v993_v21 = vmul.f32 %v7742_v14, %v8443_v0 }
 0x356   :  { %v945_v22 = vpop.xlane.xlu0 %944  ;;  %v948_v53 = vpop.xlane.xlu1 %947 }
 0x357   :  { %7749 = vrcp.f32 %v945_v22  ;;  %v1008_v56 = vpack.c.bf16 %v993_v21, %v992_v16 }
 0x358   :  { %7751 = vrcp.f32 %v948_v53  ;;  %v7744_v26 = vpop.eup %7743 }
 0x359   :  { %7145 = vmatmul.mubr.msk.bf16.vlgmr.msra.gmra.mxu0 %vm831_vm3, %v1008_v56  ;;  %7753 = vrcp.f32 %v957_v38  ;;  %v994_v0 = vmul.f32 %v7744_v26, %v8451_v11 }
 0x35a   :  { %7155 = vmatpush3.bf16.msra.mxu0 %v8423_v20  ;;  %v951_v29 = vpop.xlane.xlu0 %950  ;;  %7156 = vmatprep.mubr.msk.bf16.mxu0 %vm8061_vm1, %v10635_v18 }
 0x35b   :  { %7755 = vrcp.f32 %v951_v29  ;;  %7166 = vmatprep.subr.bf16.mxu0 %v10635_v18  ;;  %v960_v33 = vpop.xlane.xlu1 %959 }
 0x35c   :  { %v7746_v45 = vpop.eup %7745  ;;  %7757 = vrcp.f32 %v954_v63 }
 0x35d   :  { %v995_v61 = vmul.f32 %v7746_v45, %v8460_v24 }
 0x35e   :  { %v963_v43 = vpop.xlane.xlu0 %962 }
 0x35f   :  { %7759 = vrcp.f32 %v963_v43  ;;  %v1009_v62 = vpack.c.bf16 %v995_v61, %v994_v0  ;;  %v1346_v63 = vpop.permute.xlu1 %1345 }
 0x360   :  { %7761 = vrcp.f32 %v960_v33  ;;  %v7748_v20 = vpop.eup %7747 }
 0x361   :  { %7151 = vmatmul.mubr.msk.bf16.vlgmr.msra.gmra.mxu1 %vm831_vm3, %v1009_v62  ;;  %7763 = vrcp.f32 %v969_v48  ;;  %v996_v11 = vmul.f32 %v7748_v20, %v8466_v31 }
 0x362   :  { %7161 = vmatpush3.bf16.msra.mxu1 %v8420_v12  ;;  %7162 = vmatprep.mubr.msk.bf16.mxu1 %vm8061_vm1, %v10635_v18  ;;  %7765 = vrcp.f32 %v966_v46  ;;  %v1299_v8 = vpop.permute.xlu0 %1298 }
 0x363   :  { %7172 = vmatprep.subr.bf16.mxu1 %v10635_v18 }
 0x364   :  { %v7750_v47 = vpop.eup %7749 }
 0x365   :  { %v997_v24 = vmul.f32 %v7750_v47, %v8476_v37  ;;  %v7752_v49 = vpop.eup %7751 }
 0x366   :  { %v7754_v9 = vpop.eup %7753  ;;  %v998_v12 = vmul.f32 %v7752_v49, %v8474_v34 }
 0x367   :  { %v1010_v50 = vpack.c.bf16 %v997_v24, %v996_v11  ;;  %v1001_v31 = vmul.f32 %v7754_v9, %v8447_v4 }
 0x368   :  { %v7756_v51 = vpop.eup %7755 }
 0x369   :  { %7157 = vmatmul.mubr.msk.bf16.vlgmr.msra.gmra.mxu0 %vm831_vm3, %v1010_v50  ;;  %v999_v17 = vmul.f32 %v7756_v51, %v8482_v44  ;;  %v7758_v23 = vpop.eup %7757 }
 0x36a   :  { %7167 = vmatpush3.bf16.msra.mxu0 %v1205_v27  ;;  %7168 = vmatprep.mubr.msk.bf16.mxu0 %vm8061_vm1, %v10635_v18  ;;  %v1000_v54 = vmul.f32 %v7758_v23, %v8438_v58 }
 0x36b   :  { %v1011_v52 = vpack.c.bf16 %v999_v17, %v998_v12  ;;  %7178 = vmatprep.subr.bf16.mxu0 %v10635_v18 }
 0x36c   :  { %v7760_v37 = vpop.eup %7759  ;;  %v1012_v34 = vpack.c.bf16 %v1001_v31, %v1000_v54 }
 0x36d   :  { %7163 = vmatmul.mubr.msk.bf16.vlgmr.msra.gmra.mxu1 %vm831_vm3, %v1011_v52  ;;  %v7762_v57 = vpop.eup %7761  ;;  %v1003_v44 = vmul.f32 %v7760_v37, %v8490_v13 }
 0x36e   :  { %7173 = vmatpush3.bf16.msra.mxu1 %v8526_v2  ;;  %7174 = vmatprep.mubr.msk.bf16.mxu1 %vm8061_vm1, %v10635_v18  ;;  %v7764_v60 = vpop.eup %7763  ;;  %v1002_v4 = vmul.f32 %v7762_v57, %v8484_v6 }
 0x36f   :  { %7184 = vmatprep.subr.bf16.mxu1 %v10635_v18  ;;  %v7766_v27 = vpop.eup %7765  ;;  %v1005_v2 = vmul.f32 %v7764_v60, %v8468_v32 }
 0x370   :  { %v1013_v58 = vpack.c.bf16 %v1003_v44, %v1002_v4  ;;  %v1004_v13 = vmul.f32 %v7766_v27, %v8455_v19 }
 0x371   :  { %7169 = vmatmul.mubr.msk.bf16.vlgmr.msra.gmra.mxu0 %vm831_vm3, %v1012_v34 }
 0x372   :  { %7179 = vmatpush3.bf16.msra.mxu0 %v1299_v8  ;;  %7180 = vmatprep.mubr.msk.bf16.mxu0 %vm8061_vm1, %v10635_v18  ;;  %v1014_v6 = vpack.c.bf16 %v1005_v2, %v1004_v13 }
 0x373   :  { %7190 = vmatprep.subr.bf16.mxu0 %v10635_v18 }
 0x375   :  { %7175 = vmatmul.mubr.msk.bf16.vlgmr.msra.gmra.mxu1 %vm831_vm3, %v1013_v58 }
 0x376   :  { %7185 = vmatpush3.bf16.msra.mxu1 %v1346_v63  ;;  %7186 = vmatprep.mubr.msk.bf16.mxu1 %vm8061_vm1, %v10635_v18 }
 0x377   :  { %7196 = vmatprep.subr.bf16.mxu1 %v10635_v18 }
 0x379   :  { %7181 = vmatmul.mubr.msk.bf16.vlgmr.msra.gmra.mxu0 %vm831_vm3, %v1014_v6 }
 0x37a   :  { %7192 = vmatprep.mubr.msk.bf16.mxu0 %vm8061_vm1, %v10635_v18 }
 0x390   :  { %v972_v32 = vpop.xlane.xlu1 %971 }
 0x391   :  { %7767 = vrcp.f32 %v972_v32 }
 0x393   :  { %v975_v28 = vpop.xlane.xlu0 %974 }
 0x394   :  { %v1446_v1 = vpop.permute.xlu1 %1445  ;;  %7769 = vrcp.f32 %v975_v28 }
 0x395   :  { %v1451_v45 = vsel %vm417_vm2, %v1446_v1, 0 }
 0x397   :  { %v1395_v38 = vpop.permute.xlu0 %1394 }
 0x398   :  { %v1444_v46 = vpop.permute.xlu1 %1443  ;;  %v1400_v19 = vsel %vm417_vm2, %v1395_v38, 0 }
 0x399   :  { %7191 = vmatpush3.bf16.xpose.msra.mxu0 %v1400_v19 }
 0x39a   :  { %7202 = vmatprep.subr.bf16.mxu0 %v10635_v18 }
 0x39b   :  { %v1393_v3 = vpop.permute.xlu0 %1392 }
 0x39c   :  { %v1548_v7 = vpop.permute.xlu1 %1547 }
 0x39d   :  { %v1553_v43 = vsel %vm417_vm2, %v1548_v7, 0 }
 0x39e   :  { %v7768_v10 = vpop.eup %7767 }
 0x39f   :  { %v1497_v48 = vpop.permute.xlu0 %1496  ;;  %v1006_v22 = vmul.f32 %v7768_v10, %v8500_v55 }
 0x3a0   :  { %v1546_v14 = vpop.permute.xlu1 %1545  ;;  %v1502_v16 = vsel %vm417_vm2, %v1497_v48, 0  ;;  %7193 = vmatmul.mubr.msk.bf16.vlgmr.msra.gmra.mxu0 %vm417_vm2, %v1393_v3 }
 0x3a1   :  { %v7770_v21 = vpop.eup %7769  ;;  %7203 = vmatpush3.bf16.xpose.msra.mxu0 %v1502_v16  ;;  %7204 = vmatprep.mubr.msk.bf16.mxu0 %vm8061_vm1, %v10635_v18 }
 0x3a2   :  { %v1007_v53 = vmul.f32 %v7770_v21, %v8504_v59  ;;  %7214 = vmatprep.subr.bf16.mxu0 %v10635_v18 }
 0x3a3   :  { %v1495_v56 = vpop.permute.xlu0 %1494 }
 0x3a4   :  { %v1650_v26 = vpop.permute.xlu1 %1649  ;;  %v1015_v29 = vpack.c.bf16 %v1007_v53, %v1006_v22 }
 0x3a5   :  { %v1655_v11 = vsel %vm417_vm2, %v1650_v26, 0 }
 0x3a6   :  { %7187 = vmatmul.mubr.msk.bf16.vlgmr.msra.gmra.mxu1 %vm831_vm3, %v1015_v29 }
 0x3a7   :  { %7197 = vmatpush3.bf16.xpose.msra.mxu1 %v1451_v45  ;;  %v1599_v0 = vpop.permute.xlu0 %1598  ;;  %7198 = vmatprep.mubr.msk.bf16.mxu1 %vm8061_vm1, %v10635_v18 }
 0x3a8   :  { %v1648_v61 = vpop.permute.xlu1 %1647  ;;  %v1604_v33 = vsel %vm417_vm2, %v1599_v0, 0  ;;  %7205 = vmatmul.mubr.msk.bf16.vlgmr.msra.gmra.mxu0 %vm417_vm2, %v1495_v56  ;;  %7208 = vmatprep.subr.bf16.mxu1 %v10635_v18 }
 0x3a9   :  { %7215 = vmatpush3.bf16.xpose.msra.mxu0 %v1604_v33  ;;  %7216 = vmatprep.mubr.msk.bf16.mxu0 %vm8061_vm1, %v10635_v18 }
 0x3aa   :  { %7226 = vmatprep.subr.bf16.mxu0 %v10635_v18 }
 0x3ab   :  { %v1597_v55 = vpop.permute.xlu0 %1596 }
 0x3ac   :  { %v1752_v59 = vpop.permute.xlu1 %1751 }
 0x3ad   :  { %v1757_v9 = vsel %vm417_vm2, %v1752_v59, 0 }
 0x3ae   :  { %7199 = vmatmul.mubr.msk.bf16.vlgmr.msra.gmra.mxu1 %vm417_vm2, %v1444_v46 }
 0x3af   :  { %7209 = vmatpush3.bf16.xpose.msra.mxu1 %v1553_v43  ;;  %v1701_v62 = vpop.permute.xlu0 %1700  ;;  %7210 = vmatprep.mubr.msk.bf16.mxu1 %vm8061_vm1, %v10635_v18 }
 0x3b0   :  { %v1706_v20 = vsel %vm417_vm2, %v1701_v62, 0  ;;  %7217 = vmatmul.mubr.msk.bf16.vlgmr.msra.gmra.mxu0 %vm417_vm2, %v1597_v55  ;;  %7220 = vmatprep.subr.bf16.mxu1 %v10635_v18  ;;  %v1750_v47 = vpop.permute.xlu1 %1749 }
 0x3b1   :  { %7227 = vmatpush3.bf16.xpose.msra.mxu0 %v1706_v20  ;;  %7228 = vmatprep.mubr.msk.bf16.mxu0 %vm8061_vm1, %v10635_v18 }
 0x3b2   :  { %7238 = vmatprep.subr.bf16.mxu0 %v10635_v18 }
 0x3b3   :  { %v1699_v24 = vpop.permute.xlu0 %1698 }
 0x3b4   :  { %v2001_v49 = vpop.permute.xlu1 %2000 }
 0x3b6   :  { %7211 = vmatmul.mubr.msk.bf16.vlgmr.msra.gmra.mxu1 %vm417_vm2, %v1546_v14 }
 0x3b7   :  { %7221 = vmatpush3.bf16.xpose.msra.mxu1 %v1655_v11  ;;  %7222 = vmatprep.mubr.msk.bf16.mxu1 %vm8061_vm1, %v10635_v18 }
 0x3b8   :  { %7229 = vmatmul.mubr.msk.bf16.vlgmr.msra.gmra.mxu0 %vm417_vm2, %v1699_v24  ;;  %7232 = vmatprep.subr.bf16.mxu1 %v10635_v18 }
 0x3b9   :  { %7239 = vmatpush3.bf16.msra.mxu0 %v2001_v49  ;;  %7240 = vmatprep.mubr.msk.bf16.mxu0 %vm8061_vm1, %v10635_v18 }
 0x3ba   :  { %7250 = vmatprep.subr.bf16.mxu0 %v10635_v18 }
 0x3be   :  { %7223 = vmatmul.mubr.msk.bf16.vlgmr.msra.gmra.mxu1 %vm417_vm2, %v1648_v61 }
 0x3bf   :  { %7233 = vmatpush3.bf16.xpose.msra.mxu1 %v1757_v9  ;;  %7234 = vmatprep.mubr.msk.bf16.mxu1 %vm8061_vm1, %v10635_v18 }
 0x3c0   :  { %7244 = vmatprep.subr.bf16.mxu1 %v10635_v18 }
 0x3c6   :  { %7235 = vmatmul.mubr.msk.bf16.vlgmr.msra.gmra.mxu1 %vm417_vm2, %v1750_v47 }
 0x3c7   :  { %7246 = vmatprep.mubr.msk.bf16.mxu1 %vm8061_vm1, %v10635_v18 }
 0x419   :  { %v8618_v50 = vpop.f32.mrf.mxu0 }
 0x41a   :  { %10669 = vst [vmem:[#allocation4_spill] sm:$0xff] %v8618_v50 }
 0x41b   :  { %v7146_v51 = vpop.f32.mrf.mxu0 }
 0x41d   :  { %v8620_v12 = vpop.f32.mrf.mxu0 }
 0x41e   :  { %10670 = vst [vmem:[#allocation5_spill] sm:$0xff] %v8620_v12 }
 0x41f   :  { %v7147_v17 = vpop.f32.mrf.mxu0 }
 0x421   :  { %v8622_v23 = vpop.f32.mrf.mxu1 }
 0x422   :  { %10671 = vst [vmem:[#allocation6_spill] sm:$0xff] %v8622_v23 }
 0x423   :  { %v7152_v52 = vpop.f32.mrf.mxu1 }
 0x425   :  { %v8624_v31 = vpop.f32.mrf.mxu1 }
 0x426   :  { %10672 = vst [vmem:[#allocation7_spill] sm:$0xff] %v8624_v31 }
 0x427   :  { %v7153_v37 = vpop.f32.mrf.mxu1 }
 0x429   :  { %v8626_v54 = vpop.f32.mrf.mxu0 }
 0x42a   :  { %10673 = vst [vmem:[#allocation8_spill] sm:$0xff] %v8626_v54 }
 0x42b   :  { %v7158_v57 = vpop.f32.mrf.mxu0 }
 0x42d   :  { %v8628_v34 = vpop.f32.mrf.mxu0  ;;  %v8630_v44 = vpop.f32.mrf.mxu1 }
 0x42e   :  { %10674 = vst [vmem:[#allocation9_spill] sm:$0xff] %v8628_v34  ;;  %10675 = vst [vmem:[#allocation10_spill] sm:$0xff] %v8630_v44 }
 0x42f   :  { %v7159_v60 = vpop.f32.mrf.mxu0  ;;  %v7164_v8 = vpop.f32.mrf.mxu1 }
 0x431   :  { %v8632_v4 = vpop.f32.mrf.mxu1  ;;  %v8634_v27 = vpop.f32.mrf.mxu0 }
 0x432   :  { %10676 = vst [vmem:[#allocation11_spill] sm:$0xff] %v8632_v4  ;;  %10677 = vst [vmem:[#allocation12_spill] sm:$0xff] %v8634_v27 }
 0x433   :  { %v7165_v58 = vpop.f32.mrf.mxu1  ;;  %v7170_v2 = vpop.f32.mrf.mxu0 }
 0x435   :  { %v8636_v63 = vpop.f32.mrf.mxu0  ;;  %v8638_v13 = vpop.f32.mrf.mxu1 }
 0x436   :  { %10678 = vst [vmem:[#allocation13_spill] sm:$0xff] %v8636_v63  ;;  %10679 = vst [vmem:[#allocation14_spill] sm:$0xff] %v8638_v13 }
 0x437   :  { %v7171_v6 = vpop.f32.mrf.mxu0  ;;  %v7176_v32 = vpop.f32.mrf.mxu1 }
 0x439   :  { %v8640_v28 = vpop.f32.mrf.mxu1  ;;  %v8642_v1 = vpop.f32.mrf.mxu0 }
 0x43a   :  { %10680 = vst [vmem:[#allocation15_spill] sm:$0xff] %v8640_v28  ;;  %10681 = vst [vmem:[#allocation16_spill] sm:$0xff] %v8642_v1 }
 0x43b   :  { %v7177_v38 = vpop.f32.mrf.mxu1  ;;  %v7182_v46 = vpop.f32.mrf.mxu0 }
 0x43d   :  { %v8644_v19 = vpop.f32.mrf.mxu0 }
 0x43e   :  { %10682 = vst [vmem:[#allocation17_spill] sm:$0xff] %v8644_v19 }
 0x43f   :  { %v7183_v3 = vpop.f32.mrf.mxu0 }
 0x460   :  { %v1436_v7 = vpop.f32.mrf.mxu0 }
 0x461   :  { %v8646_v10 = vmul.f32 0.35355338, %v1436_v7 }
 0x462   :  { %v7194_v48 = vpop.f32.mrf.mxu0 }
 0x463   :  { %v1816_v14 = vsel %vm831_vm3, %v8646_v10, -inf }
 0x464   :  { %1817 = vmax.xlane.f32.xlu0 %v1816_v14  ;;  %v1439_v16 = vpop.f32.mrf.mxu0 }
 0x465   :  { %v8650_v21 = vmul.f32 0.35355338, %v1439_v16 }
 0x466   :  { %v8652_v22 = vpop.f32.mrf.mxu1  ;;  %v7195_v53 = vpop.f32.mrf.mxu0 }
 0x467   :  { %10683 = vst [vmem:[#allocation18_spill] sm:$0xff] %v8652_v22  ;;  %v1819_v56 = vsel %vm831_vm3, %v8650_v21, -inf }
 0x468   :  { %1820 = vmax.xlane.f32.xlu1 %v1819_v56  ;;  %v7188_v26 = vpop.f32.mrf.mxu1  ;;  %v1538_v29 = vpop.f32.mrf.mxu0 }
 0x469   :  { %v8656_v45 = vmul.f32 0.35355338, %v1538_v29 }
 0x46a   :  { %v8658_v0 = vpop.f32.mrf.mxu1  ;;  %v7206_v61 = vpop.f32.mrf.mxu0 }
 0x46b   :  { %10684 = vst [vmem:[#allocation19_spill] sm:$0xff] %v8658_v0  ;;  %v1828_v33 = vsel %vm831_vm3, %v8656_v45, -inf }
 0x46c   :  { %1829 = vmax.xlane.f32.xlu1 %v1828_v33  ;;  %v7189_v55 = vpop.f32.mrf.mxu1  ;;  %v1541_v59 = vpop.f32.mrf.mxu0 }
 0x46d   :  { %v8668_v37 = vmul.f32 0.35355338, %v1541_v59 }
 0x46e   :  { %v1487_v43 = vpop.f32.mrf.mxu1  ;;  %v7207_v62 = vpop.f32.mrf.mxu0 }
 0x46f   :  { %v8662_v20 = vmul.f32 0.35355338, %v1487_v43  ;;  %v1831_v38 = vsel %vm831_vm3, %v8668_v37, -inf }
 0x470   :  { %v7200_v47 = vpop.f32.mrf.mxu1  ;;  %v1640_v11 = vpop.f32.mrf.mxu0 }
 0x471   :  { %v1822_v24 = vsel %vm831_vm3, %v8662_v20, -inf  ;;  %v8674_v32 = vmul.f32 0.35355338, %v1640_v11 }
 0x472   :  { %v7218_v49 = vpop.f32.mrf.mxu0  ;;  %1823 = vmax.xlane.f32.xlu0 %v1822_v24  ;;  %v1490_v9 = vpop.f32.mrf.mxu1 }
 0x473   :  { %v8666_v51 = vmul.f32 0.35355338, %v1490_v9  ;;  %v1840_v56 = vsel %vm831_vm3, %v8674_v32, -inf }
 0x474   :  { %v7201_v17 = vpop.f32.mrf.mxu1  ;;  %v1643_v52 = vpop.f32.mrf.mxu0 }
 0x475   :  { %v1825_v57 = vsel %vm831_vm3, %v8666_v51, -inf  ;;  %v8682_v53 = vmul.f32 0.35355338, %v1643_v52 }
 0x476   :  { %v7219_v60 = vpop.f32.mrf.mxu0  ;;  %1826 = vmax.xlane.f32.xlu0 %v1825_v57  ;;  %v1589_v8 = vpop.f32.mrf.mxu1 }
 0x477   :  { %v8672_v58 = vmul.f32 0.35355338, %v1589_v8  ;;  %v1843_v43 = vsel %vm831_vm3, %v8682_v53, -inf }
 0x478   :  { %v7212_v2 = vpop.f32.mrf.mxu1  ;;  %v1742_v6 = vpop.f32.mrf.mxu0 }
 0x479   :  { %v1834_v46 = vsel %vm831_vm3, %v8672_v58, -inf  ;;  %v8690_v59 = vmul.f32 0.35355338, %v1742_v6 }
 0x47a   :  { %v7230_v3 = vpop.f32.mrf.mxu0  ;;  %1832 = vmax.xlane.f32.xlu0 %v1831_v38  ;;  %1835 = vmax.xlane.f32.xlu1 %v1834_v46  ;;  %v1592_v7 = vpop.f32.mrf.mxu1 }
 0x47b   :  { %v8680_v48 = vmul.f32 0.35355338, %v1592_v7  ;;  %v1852_v9 = vsel %vm831_vm3, %v8690_v59, -inf }
 0x47c   :  { %v7213_v14 = vpop.f32.mrf.mxu1  ;;  %v1745_v16 = vpop.f32.mrf.mxu0 }
 0x47d   :  { %v1837_v26 = vsel %vm831_vm3, %v8680_v48, -inf  ;;  %v8698_v49 = vmul.f32 0.35355338, %v1745_v16 }
 0x47e   :  { %v7231_v29 = vpop.f32.mrf.mxu0  ;;  %1841 = vmax.xlane.f32.xlu1 %v1840_v56  ;;  %1838 = vmax.xlane.f32.xlu0 %v1837_v26  ;;  %v1691_v61 = vpop.f32.mrf.mxu1 }
 0x47f   :  { %v8688_v33 = vmul.f32 0.35355338, %v1691_v61  ;;  %v1855_v8 = vsel %vm831_vm3, %v8698_v49, -inf }
 0x480   :  { %v7224_v55 = vpop.f32.mrf.mxu1 }
 0x481   :  { %v1846_v62 = vsel %vm831_vm3, %v8688_v33, -inf }
 0x482   :  { %1844 = vmax.xlane.f32.xlu0 %v1843_v43  ;;  %1847 = vmax.xlane.f32.xlu1 %v1846_v62  ;;  %v1694_v47 = vpop.f32.mrf.mxu1 }
 0x483   :  { %v8696_v11 = vmul.f32 0.35355338, %v1694_v47 }
 0x484   :  { %v7225_v24 = vpop.f32.mrf.mxu1 }
 0x485   :  { %v1849_v17 = vsel %vm831_vm3, %v8696_v11, -inf }
 0x486   :  { %1853 = vmax.xlane.f32.xlu1 %v1852_v9  ;;  %1850 = vmax.xlane.f32.xlu0 %v1849_v17  ;;  %v1793_v52 = vpop.f32.mrf.mxu1 }
 0x487   :  { %v8704_v57 = vmul.f32 0.35355338, %v1793_v52 }
 0x488   :  { %v7236_v60 = vpop.f32.mrf.mxu1 }
 0x489   :  { %v1858_v2 = vsel %vm831_vm3, %v8704_v57, -inf }
 0x48a   :  { %1856 = vmax.xlane.f32.xlu0 %v1855_v8  ;;  %1859 = vmax.xlane.f32.xlu1 %v1858_v2  ;;  %v1796_v6 = vpop.f32.mrf.mxu1 }
 0x48b   :  { %v8710_v38 = vmul.f32 0.35355338, %v1796_v6 }
 0x48c   :  { %v7237_v46 = vpop.f32.mrf.mxu1 }
 0x48d   :  { %v1861_v3 = vsel %vm831_vm3, %v8710_v38, -inf }
 0x48e   :  { %1862 = vmax.xlane.f32.xlu0 %v1861_v3 }
 0x49b   :  { %2094 = vrot.lane.b32.xlu1 %v8278_v36, %s8066_s22 }
 0x49f   :  { %2141 = vrot.lane.b32.xlu1 %v8284_v40, %s8066_s22 }
 0x4a3   :  { %2235 = vrot.lane.b32.xlu1 %v8288_v41, %s8066_s22 }
 0x4a4   :  { %2047 = vrot.lane.b32.xlu0 %v8273_v30, %s8066_s22 }
 0x4a7   :  { %2329 = vrot.lane.b32.xlu1 %v8293_v42, %s8066_s22 }
 0x4a8   :  { %2188 = vrot.lane.b32.xlu0 %v8276_v35, %s8066_s22 }
 0x4ac   :  { %2282 = vrot.lane.b32.xlu0 %v8282_v39, %s8066_s22 }
 0x4ed   :  { %v1818_v7 = vpop.xlane.xlu0 %1817 }
 0x4ee   :  { %v1864_v14 = vsub.f32 %v8646_v10, %v1818_v7 }
 0x4f0   :  { %v1880_v16 = vmul.f32 1.442695, %v1864_v14 }
 0x4f1   :  { %v1821_v56 = vpop.xlane.xlu1 %1820 }
 0x4f2   :  { %7771 = vpow2.f32 %v1880_v16  ;;  %v1865_v26 = vsub.f32 %v8650_v21, %v1821_v56 }
 0x4f4   :  { %v1882_v29 = vmul.f32 1.442695, %v1865_v26 }
 0x4f5   :  { %v1830_v61 = vpop.xlane.xlu1 %1829 }
 0x4f6   :  { %7773 = vpow2.f32 %v1882_v29  ;;  %v1868_v55 = vsub.f32 %v8656_v45, %v1830_v61 }
 0x4f8   :  { %v1888_v47 = vmul.f32 1.442695, %v1868_v55 }
 0x4fb   :  { %v1824_v43 = vpop.xlane.xlu0 %1823 }
 0x4fc   :  { %v1866_v62 = vsub.f32 %v8662_v20, %v1824_v43 }
 0x4fe   :  { %v1884_v24 = vmul.f32 1.442695, %v1866_v62 }
 0x4ff   :  { %v8732_v9 = vpop.eup %7771  ;;  %v1827_v17 = vpop.xlane.xlu0 %1826 }
 0x500   :  { %7775 = vpow2.f32 %v1884_v24  ;;  %v1867_v10 = vsub.f32 %v8666_v51, %v1827_v17  ;;  %v1912_v52 = vsel %vm831_vm3, %v8732_v9, 0.0 }
 0x501   :  { %1913 = vadd.xlane.f32.xlu1 %v1912_v52  ;;  %7777 = vpow2.f32 %v1888_v47 }
 0x502   :  { %v1886_v21 = vmul.f32 1.442695, %v1867_v10 }
 0x503   :  { %v8737_v60 = vpop.eup %7773  ;;  %v1833_v45 = vpop.xlane.xlu0 %1832 }
 0x504   :  { %v1836_v8 = vpop.xlane.xlu1 %1835  ;;  %7779 = vpow2.f32 %v1886_v21  ;;  %v1869_v20 = vsub.f32 %v8668_v37, %v1833_v45  ;;  %v1915_v6 = vsel %vm831_vm3, %v8737_v60, 0.0 }
 0x505   :  { %v1870_v2 = vsub.f32 %v8672_v58, %v1836_v8  ;;  %1916 = vadd.xlane.f32.xlu0 %v1915_v6 }
 0x506   :  { %v1890_v51 = vmul.f32 1.442695, %v1869_v20 }
 0x507   :  { %v1892_v46 = vmul.f32 1.442695, %v1870_v2  ;;  %v1839_v3 = vpop.xlane.xlu0 %1838 }
 0x508   :  { %v1842_v7 = vpop.xlane.xlu1 %1841  ;;  %7781 = vpow2.f32 %v1890_v51  ;;  %v1871_v14 = vsub.f32 %v8680_v48, %v1839_v3 }
 0x509   :  { %v1872_v16 = vsub.f32 %v8674_v32, %v1842_v7  ;;  %7783 = vpow2.f32 %v1892_v46 }
 0x50a   :  { %v1894_v56 = vmul.f32 1.442695, %v1871_v14 }
 0x50b   :  { %v1896_v26 = vmul.f32 1.442695, %v1872_v16  ;;  %v1845_v29 = vpop.xlane.xlu0 %1844 }
 0x50c   :  { %v1848_v37 = vpop.xlane.xlu1 %1847  ;;  %7785 = vpow2.f32 %v1894_v56  ;;  %v1873_v58 = vsub.f32 %v8682_v53, %v1845_v29 }
 0x50d   :  { %v1874_v61 = vsub.f32 %v8688_v33, %v1848_v37  ;;  %v8747_v55 = vpop.eup %7775  ;;  %7787 = vpow2.f32 %v1896_v26 }
 0x50e   :  { %v1898_v43 = vmul.f32 1.442695, %v1873_v58  ;;  %v1918_v48 = vsel %vm831_vm3, %v8747_v55, 0.0  ;;  %v8751_v47 = vpop.eup %7777 }
 0x50f   :  { %v1900_v62 = vmul.f32 1.442695, %v1874_v61  ;;  %v1851_v32 = vpop.xlane.xlu0 %1850  ;;  %1919 = vadd.xlane.f32.xlu1 %v1918_v48  ;;  %v1924_v45 = vsel %vm831_vm3, %v8751_v47, 0.0 }
 0x510   :  { %v1854_v24 = vpop.xlane.xlu1 %1853  ;;  %7789 = vpow2.f32 %v1898_v43  ;;  %v1875_v17 = vsub.f32 %v8696_v11, %v1851_v32 }
 0x511   :  { %v1876_v53 = vsub.f32 %v8690_v59, %v1854_v24  ;;  %v8755_v10 = vpop.eup %7779  ;;  %7791 = vpow2.f32 %v1900_v62 }
 0x512   :  { %v1902_v33 = vmul.f32 1.442695, %v1875_v17  ;;  %v1921_v21 = vsel %vm831_vm3, %v8755_v10, 0.0 }
 0x513   :  { %v1904_v52 = vmul.f32 1.442695, %v1876_v53  ;;  %v1857_v8 = vpop.xlane.xlu0 %1856  ;;  %1922 = vadd.xlane.f32.xlu0 %v1921_v21  ;;  %1925 = vadd.xlane.f32.xlu1 %v1924_v45 }
 0x514   :  { %v1860_v20 = vpop.xlane.xlu1 %1859  ;;  %7793 = vpow2.f32 %v1902_v33  ;;  %v1877_v11 = vsub.f32 %v8698_v49, %v1857_v8 }
 0x515   :  { %v1878_v59 = vsub.f32 %v8704_v57, %v1860_v20  ;;  %v8763_v2 = vpop.eup %7781  ;;  %7795 = vpow2.f32 %v1904_v52 }
 0x516   :  { %v8765_v6 = vpop.eup %7783  ;;  %v1906_v51 = vmul.f32 1.442695, %v1877_v11  ;;  %v1927_v3 = vsel %vm831_vm3, %v8763_v2, 0.0 }
 0x517   :  { %v1908_v46 = vmul.f32 1.442695, %v1878_v59  ;;  %v1863_v7 = vpop.xlane.xlu0 %1862  ;;  %1928 = vadd.xlane.f32.xlu0 %v1927_v3  ;;  %v1930_v14 = vsel %vm831_vm3, %v8765_v6, 0.0 }
 0x518   :  { %7797 = vpow2.f32 %v1906_v51  ;;  %v1879_v49 = vsub.f32 %v8710_v38, %v1863_v7  ;;  %1931 = vadd.xlane.f32.xlu1 %v1930_v14  ;;  %v2095_v8 = vpop.permute.xlu1 %2094 }
 0x519   :  { %v8772_v57 = vpop.eup %7785  ;;  %7799 = vpow2.f32 %v1908_v46 }
 0x51a   :  { %v8774_v16 = vpop.eup %7787  ;;  %v1910_v56 = vmul.f32 1.442695, %v1879_v49  ;;  %v1933_v26 = vsel %vm831_vm3, %v8772_v57, 0.0 }
 0x51b   :  { %v2048_v29 = vpop.permute.xlu0 %2047  ;;  %1934 = vadd.xlane.f32.xlu0 %v1933_v26  ;;  %v1936_v37 = vsel %vm831_vm3, %v8774_v16, 0.0 }
 0x51c   :  { %7801 = vpow2.f32 %v1910_v56  ;;  %1937 = vadd.xlane.f32.xlu1 %v1936_v37  ;;  %7245 = vmatpush3.bf16.msra.mxu1 %v2048_v29  ;;  %v2142_v20 = vpop.permute.xlu1 %2141 }
 0x51d   :  { %v8780_v58 = vpop.eup %7789  ;;  %7256 = vmatprep.subr.bf16.mxu1 %v10635_v18 }
 0x51e   :  { %v8783_v38 = vpop.eup %7791  ;;  %v1939_v61 = vsel %vm831_vm3, %v8780_v58, 0.0 }
 0x51f   :  { %1940 = vadd.xlane.f32.xlu0 %v1939_v61  ;;  %v1942_v43 = vsel %vm831_vm3, %v8783_v38, 0.0  ;;  %v2189_v59 = vpop.permute.xlu0 %2188 }
 0x520   :  { %1943 = vadd.xlane.f32.xlu1 %v1942_v43  ;;  %v8827_v11 = vpop.permute.xlu1 %2235 }
 0x521   :  { %v8789_v62 = vpop.eup %7793 }
 0x522   :  { %v8791_v48 = vpop.eup %7795  ;;  %v1945_v32 = vsel %vm831_vm3, %v8789_v62, 0.0 }
 0x523   :  { %1946 = vadd.xlane.f32.xlu0 %v1945_v32  ;;  %v1948_v24 = vsel %vm831_vm3, %v8791_v48, 0.0  ;;  %v8831_v46 = vpop.permute.xlu0 %2282 }
 0x524   :  { %1949 = vadd.xlane.f32.xlu1 %v1948_v24  ;;  %v8829_v51 = vpop.permute.xlu1 %2329 }
 0x525   :  { %v8797_v17 = vpop.eup %7797 }
 0x526   :  { %v8799_v53 = vpop.eup %7799  ;;  %v1951_v33 = vsel %vm831_vm3, %v8797_v17, 0.0 }
 0x527   :  { %1952 = vadd.xlane.f32.xlu0 %v1951_v33  ;;  %v1954_v52 = vsel %vm831_vm3, %v8799_v53, 0.0 }
 0x528   :  { %1955 = vadd.xlane.f32.xlu1 %v1954_v52 }
 0x529   :  { %v8805_v21 = vpop.eup %7801 }
 0x52a   :  { %v1957_v45 = vsel %vm831_vm3, %v8805_v21, 0.0 }
 0x52b   :  { %1958 = vadd.xlane.f32.xlu0 %v1957_v45 }
 0x539   :  { %2429 = vrot.lane.b32.xlu1 %v8273_v30, %s8067_s1 }
 0x53d   :  { %2427 = vrot.lane.b32.xlu1 %v8273_v30, %s8068_s23 }
 0x541   :  { %2531 = vrot.lane.b32.xlu1 %v8284_v40, %s8067_s1  ;;  %2378 = vrot.lane.b32.xlu0 %v8270_v25, %s8067_s1 }
 0x545   :  { %2529 = vrot.lane.b32.xlu1 %v8284_v40, %s8068_s23  ;;  %2376 = vrot.lane.b32.xlu0 %v8270_v25, %s8068_s23 }
 0x549   :  { %2633 = vrot.lane.b32.xlu1 %v8288_v41, %s8067_s1  ;;  %2480 = vrot.lane.b32.xlu0 %v8278_v36, %s8067_s1 }
 0x54d   :  { %2631 = vrot.lane.b32.xlu1 %v8288_v41, %s8068_s23  ;;  %2478 = vrot.lane.b32.xlu0 %v8278_v36, %s8068_s23 }
 0x551   :  { %2735 = vrot.lane.b32.xlu1 %v8293_v42, %s8067_s1  ;;  %2582 = vrot.lane.b32.xlu0 %v8276_v35, %s8067_s1 }
 0x555   :  { %2733 = vrot.lane.b32.xlu1 %v8293_v42, %s8068_s23  ;;  %2580 = vrot.lane.b32.xlu0 %v8276_v35, %s8068_s23 }
 0x559   :  { %2984 = vrot.lane.b32.xlu1 %v8270_v25, %s8069_s24  ;;  %2684 = vrot.lane.b32.xlu0 %v8282_v39, %s8067_s1 }
 0x55d   :  { %2682 = vrot.lane.b32.xlu0 %v8282_v39, %s8068_s23 }
 0x58a   :  { %v1914_v3 = vpop.xlane.xlu1 %1913 }
 0x58b   :  { %7803 = vrcp.f32 %v1914_v3 }
 0x58e   :  { %v1917_v7 = vpop.xlane.xlu0 %1916 }
 0x58f   :  { %7805 = vrcp.f32 %v1917_v7 }
 0x598   :  { %v1920_v14 = vpop.xlane.xlu1 %1919  ;;  %v7804_v49 = vpop.eup %7803 }
 0x599   :  { %7807 = vrcp.f32 %v1920_v14  ;;  %v1976_v37 = vmul.f32 %v7804_v49, %v8732_v9 }
 0x59c   :  { %v7806_v56 = vpop.eup %7805  ;;  %v1923_v26 = vpop.xlane.xlu0 %1922 }
 0x59d   :  { %v1926_v29 = vpop.xlane.xlu1 %1925  ;;  %7809 = vrcp.f32 %v1923_v26  ;;  %v1977_v61 = vmul.f32 %v7806_v56, %v8737_v60 }
 0x59e   :  { %7811 = vrcp.f32 %v1926_v29 }
 0x59f   :  { %v1992_v43 = vpack.c.bf16 %v1977_v61, %v1976_v37 }
 0x5a0   :  { %v1929_v32 = vpop.xlane.xlu0 %1928 }
 0x5a1   :  { %7813 = vrcp.f32 %v1929_v32  ;;  %v1932_v24 = vpop.xlane.xlu1 %1931  ;;  %7241 = vmatmul.mubr.msk.bf16.vlgmr.msra.gmra.mxu0 %vm831_vm3, %v1992_v43 }
 0x5a2   :  { %7251 = vmatpush3.bf16.msra.mxu0 %v2095_v8  ;;  %7252 = vmatprep.mubr.msk.bf16.mxu0 %vm8061_vm1, %v10635_v18  ;;  %7815 = vrcp.f32 %v1932_v24 }
 0x5a3   :  { %7262 = vmatprep.subr.bf16.mxu0 %v10635_v18 }
 0x5a4   :  { %v1935_v33 = vpop.xlane.xlu0 %1934 }
 0x5a5   :  { %7817 = vrcp.f32 %v1935_v33  ;;  %v1938_v52 = vpop.xlane.xlu1 %1937 }
 0x5a6   :  { %7819 = vrcp.f32 %v1938_v52  ;;  %v7808_v9 = vpop.eup %7807 }
 0x5a7   :  { %v1978_v7 = vmul.f32 %v7808_v9, %v8747_v55 }
 0x5a8   :  { %v1941_v60 = vpop.xlane.xlu0 %1940 }
 0x5a9   :  { %7821 = vrcp.f32 %v1941_v60  ;;  %v1944_v45 = vpop.xlane.xlu1 %1943 }
 0x5aa   :  { %v7810_v3 = vpop.eup %7809  ;;  %7823 = vrcp.f32 %v1944_v45 }
 0x5ab   :  { %v1979_v8 = vmul.f32 %v7810_v3, %v8755_v10  ;;  %v7812_v14 = vpop.eup %7811 }
 0x5ac   :  { %v1947_v49 = vpop.xlane.xlu0 %1946  ;;  %v1980_v37 = vmul.f32 %v7812_v14, %v8751_v47 }
 0x5ad   :  { %7825 = vrcp.f32 %v1947_v49  ;;  %v1950_v56 = vpop.xlane.xlu1 %1949  ;;  %v1993_v26 = vpack.c.bf16 %v1979_v8, %v1978_v7 }
 0x5ae   :  { %v7814_v29 = vpop.eup %7813  ;;  %7827 = vrcp.f32 %v1950_v56 }
 0x5af   :  { %7247 = vmatmul.mubr.msk.bf16.vlgmr.msra.gmra.mxu1 %vm831_vm3, %v1993_v26  ;;  %v1981_v61 = vmul.f32 %v7814_v29, %v8763_v2  ;;  %v7816_v43 = vpop.eup %7815 }
 0x5b0   :  { %7257 = vmatpush3.bf16.msra.mxu1 %v2142_v20  ;;  %v1953_v32 = vpop.xlane.xlu0 %1952  ;;  %7258 = vmatprep.mubr.msk.bf16.mxu1 %vm8061_vm1, %v10635_v18  ;;  %v1982_v33 = vmul.f32 %v7816_v43, %v8765_v6 }
 0x5b1   :  { %7829 = vrcp.f32 %v1953_v32  ;;  %v1956_v55 = vpop.xlane.xlu1 %1955  ;;  %v1994_v10 = vpack.c.bf16 %v1981_v61, %v1980_v37  ;;  %7268 = vmatprep.subr.bf16.mxu1 %v10635_v18 }
 0x5b2   :  { %v7818_v24 = vpop.eup %7817  ;;  %7831 = vrcp.f32 %v1956_v55 }
 0x5b3   :  { %7253 = vmatmul.mubr.msk.bf16.vlgmr.msra.gmra.mxu0 %vm831_vm3, %v1994_v10  ;;  %v1983_v47 = vmul.f32 %v7818_v24, %v8772_v57  ;;  %v7820_v2 = vpop.eup %7819 }
 0x5b4   :  { %7263 = vmatpush3.bf16.msra.mxu0 %v2189_v59  ;;  %v1959_v20 = vpop.xlane.xlu0 %1958  ;;  %7264 = vmatprep.mubr.msk.bf16.mxu0 %vm8061_vm1, %v10635_v18  ;;  %v1984_v45 = vmul.f32 %v7820_v2, %v8774_v16 }
 0x5b5   :  { %7833 = vrcp.f32 %v1959_v20  ;;  %v2430_v52 = vpop.permute.xlu1 %2429  ;;  %v1995_v9 = vpack.c.bf16 %v1983_v47, %v1982_v33  ;;  %7274 = vmatprep.subr.bf16.mxu0 %v10635_v18 }
 0x5b6   :  { %v7822_v60 = vpop.eup %7821  ;;  %v2435_v10 = vsel %vm417_vm2, %v2430_v52, 0 }
 0x5b7   :  { %7259 = vmatmul.mubr.msk.bf16.vlgmr.msra.gmra.mxu1 %vm831_vm3, %v1995_v9  ;;  %v1985_v6 = vmul.f32 %v7822_v60, %v8780_v58  ;;  %v7824_v3 = vpop.eup %7823 }
 0x5b8   :  { %7269 = vmatpush3.bf16.msra.mxu1 %v8827_v11  ;;  %v2379_v57 = vpop.permute.xlu0 %2378  ;;  %7270 = vmatprep.mubr.msk.bf16.mxu1 %vm8061_vm1, %v10635_v18  ;;  %v1986_v14 = vmul.f32 %v7824_v3, %v8783_v38 }
 0x5b9   :  { %v2428_v59 = vpop.permute.xlu1 %2427  ;;  %v1996_v7 = vpack.c.bf16 %v1985_v6, %v1984_v45  ;;  %7280 = vmatprep.subr.bf16.mxu1 %v10635_v18  ;;  %v2384_v43 = vsel %vm417_vm2, %v2379_v57, 0 }
 0x5ba   :  { %v7826_v8 = vpop.eup %7825 }
 0x5bb   :  { %7265 = vmatmul.mubr.msk.bf16.vlgmr.msra.gmra.mxu0 %vm831_vm3, %v1996_v7  ;;  %v1987_v16 = vmul.f32 %v7826_v8, %v8789_v62  ;;  %v7828_v49 = vpop.eup %7827 }
 0x5bc   :  { %7275 = vmatpush3.bf16.msra.mxu0 %v8831_v46  ;;  %v2377_v58 = vpop.permute.xlu0 %2376  ;;  %7276 = vmatprep.mubr.msk.bf16.mxu0 %vm8061_vm1, %v10635_v18  ;;  %v1988_v29 = vmul.f32 %v7828_v49, %v8791_v48 }
 0x5bd   :  { %v1997_v11 = vpack.c.bf16 %v1987_v16, %v1986_v14  ;;  %7286 = vmatprep.subr.bf16.mxu0 %v10635_v18  ;;  %v2532_v26 = vpop.permute.xlu1 %2531 }
 0x5be   :  { %v7830_v56 = vpop.eup %7829  ;;  %v2537_v33 = vsel %vm417_vm2, %v2532_v26, 0 }
 0x5bf   :  { %7271 = vmatmul.mubr.msk.bf16.vlgmr.msra.gmra.mxu1 %vm831_vm3, %v1997_v11  ;;  %v1989_v38 = vmul.f32 %v7830_v56, %v8797_v17  ;;  %v7832_v37 = vpop.eup %7831 }
 0x5c0   :  { %7281 = vmatpush3.bf16.msra.mxu1 %v8829_v51  ;;  %v2481_v62 = vpop.permute.xlu0 %2480  ;;  %7282 = vmatprep.mubr.msk.bf16.mxu1 %vm8061_vm1, %v10635_v18  ;;  %v1990_v32 = vmul.f32 %v7832_v37, %v8799_v53 }
 0x5c1   :  { %v1998_v46 = vpack.c.bf16 %v1989_v38, %v1988_v29  ;;  %7292 = vmatprep.subr.bf16.mxu1 %v10635_v18  ;;  %v2530_v17 = vpop.permute.xlu1 %2529  ;;  %v2486_v53 = vsel %vm417_vm2, %v2481_v62, 0 }
 0x5c2   :  { %v7834_v61 = vpop.eup %7833 }
 0x5c3   :  { %7277 = vmatmul.mubr.msk.bf16.vlgmr.msra.gmra.mxu0 %vm831_vm3, %v1998_v46  ;;  %v1991_v48 = vmul.f32 %v7834_v61, %v8805_v21 }
 0x5c4   :  { %7287 = vmatpush3.bf16.xpose.msra.mxu0 %v2384_v43  ;;  %7288 = vmatprep.mubr.msk.bf16.mxu0 %vm8061_vm1, %v10635_v18  ;;  %v2479_v55 = vpop.permute.xlu0 %2478 }
 0x5c5   :  { %v1999_v51 = vpack.c.bf16 %v1991_v48, %v1990_v32  ;;  %7298 = vmatprep.subr.bf16.mxu0 %v10635_v18  ;;  %v2634_v21 = vpop.permute.xlu1 %2633 }
 0x5c6   :  { %v2639_v52 = vsel %vm417_vm2, %v2634_v21, 0 }
 0x5c7   :  { %7283 = vmatmul.mubr.msk.bf16.vlgmr.msra.gmra.mxu1 %vm831_vm3, %v1999_v51 }
 0x5c8   :  { %7293 = vmatpush3.bf16.xpose.msra.mxu1 %v2435_v10  ;;  %7294 = vmatprep.mubr.msk.bf16.mxu1 %vm8061_vm1, %v10635_v18  ;;  %v2583_v24 = vpop.permute.xlu0 %2582 }
 0x5c9   :  { %7304 = vmatprep.subr.bf16.mxu1 %v10635_v18  ;;  %v2632_v47 = vpop.permute.xlu1 %2631  ;;  %v2588_v20 = vsel %vm417_vm2, %v2583_v24, 0 }
 0x5cb   :  { %7289 = vmatmul.mubr.msk.bf16.vlgmr.msra.gmra.mxu0 %vm417_vm2, %v2377_v58 }
 0x5cc   :  { %7299 = vmatpush3.bf16.xpose.msra.mxu0 %v2486_v53  ;;  %7300 = vmatprep.mubr.msk.bf16.mxu0 %vm8061_vm1, %v10635_v18  ;;  %v2581_v2 = vpop.permute.xlu0 %2580 }
 0x5cd   :  { %7310 = vmatprep.subr.bf16.mxu0 %v10635_v18  ;;  %v2736_v9 = vpop.permute.xlu1 %2735 }
 0x5ce   :  { %v2741_v3 = vsel %vm417_vm2, %v2736_v9, 0 }
 0x5cf   :  { %7295 = vmatmul.mubr.msk.bf16.vlgmr.msra.gmra.mxu1 %vm417_vm2, %v2428_v59 }
 0x5d0   :  { %7305 = vmatpush3.bf16.xpose.msra.mxu1 %v2537_v33  ;;  %7306 = vmatprep.mubr.msk.bf16.mxu1 %vm8061_vm1, %v10635_v18  ;;  %v2685_v60 = vpop.permute.xlu0 %2684 }
 0x5d1   :  { %7316 = vmatprep.subr.bf16.mxu1 %v10635_v18  ;;  %v2690_v45 = vsel %vm417_vm2, %v2685_v60, 0  ;;  %v2734_v6 = vpop.permute.xlu1 %2733 }
 0x5d3   :  { %7301 = vmatmul.mubr.msk.bf16.vlgmr.msra.gmra.mxu0 %vm417_vm2, %v2479_v55 }
 0x5d4   :  { %7311 = vmatpush3.bf16.xpose.msra.mxu0 %v2588_v20  ;;  %7312 = vmatprep.mubr.msk.bf16.mxu0 %vm8061_vm1, %v10635_v18  ;;  %v2683_v57 = vpop.permute.xlu0 %2682 }
 0x5d5   :  { %7322 = vmatprep.subr.bf16.mxu0 %v10635_v18  ;;  %v2985_v59 = vpop.permute.xlu1 %2984 }
 0x5d7   :  { %7307 = vmatmul.mubr.msk.bf16.vlgmr.msra.gmra.mxu1 %vm417_vm2, %v2530_v17 }
 0x5d8   :  { %7317 = vmatpush3.bf16.xpose.msra.mxu1 %v2639_v52  ;;  %7318 = vmatprep.mubr.msk.bf16.mxu1 %vm8061_vm1, %v10635_v18 }
 0x5d9   :  { %7328 = vmatprep.subr.bf16.mxu1 %v10635_v18 }
 0x5db   :  { %7313 = vmatmul.mubr.msk.bf16.vlgmr.msra.gmra.mxu0 %vm417_vm2, %v2581_v2 }
 0x5dc   :  { %7323 = vmatpush3.bf16.xpose.msra.mxu0 %v2690_v45  ;;  %7324 = vmatprep.mubr.msk.bf16.mxu0 %vm8061_vm1, %v10635_v18 }
 0x5dd   :  { %7334 = vmatprep.subr.bf16.mxu0 %v10635_v18 }
 0x5df   :  { %7319 = vmatmul.mubr.msk.bf16.vlgmr.msra.gmra.mxu1 %vm417_vm2, %v2632_v47 }
 0x5e0   :  { %7329 = vmatpush3.bf16.xpose.msra.mxu1 %v2741_v3  ;;  %7330 = vmatprep.mubr.msk.bf16.mxu1 %vm8061_vm1, %v10635_v18 }
 0x5e1   :  { %7340 = vmatprep.subr.bf16.mxu1 %v10635_v18 }
 0x5e3   :  { %7325 = vmatmul.mubr.msk.bf16.vlgmr.msra.gmra.mxu0 %vm417_vm2, %v2683_v57 }
 0x5e4   :  { %7335 = vmatpush3.bf16.msra.mxu0 %v2985_v59  ;;  %7336 = vmatprep.mubr.msk.bf16.mxu0 %vm8061_vm1, %v10635_v18 }
 0x5e5   :  { %7346 = vmatprep.subr.bf16.mxu0 %v10635_v18 }
 0x5e7   :  { %7331 = vmatmul.mubr.msk.bf16.vlgmr.msra.gmra.mxu1 %vm417_vm2, %v2734_v6 }
 0x5e8   :  { %7342 = vmatprep.mubr.msk.bf16.mxu1 %vm8061_vm1, %v10635_v18 }
 0x661   :  { %v8923_v7 = vpop.f32.mrf.mxu0 }
 0x663   :  { %v7242_v8 = vpop.f32.mrf.mxu0 }
 0x665   :  { %v8925_v14 = vpop.f32.mrf.mxu0 }
 0x667   :  { %v7243_v49 = vpop.f32.mrf.mxu0 }
 0x66f   :  { %v8929_v58 = vpop.f32.mrf.mxu1 }
 0x671   :  { %v7248_v11 = vpop.f32.mrf.mxu1 }
 0x673   :  { %v8931_v56 = vpop.f32.mrf.mxu1  ;;  %v8933_v26 = vpop.f32.mrf.mxu0 }
 0x675   :  { %v7249_v38 = vpop.f32.mrf.mxu1  ;;  %v7254_v37 = vpop.f32.mrf.mxu0 }
 0x677   :  { %v8937_v62 = vpop.f32.mrf.mxu0  ;;  %v8939_v46 = vpop.f32.mrf.mxu1 }
 0x679   :  { %v7255_v43 = vpop.f32.mrf.mxu0  ;;  %v7260_v32 = vpop.f32.mrf.mxu1 }
 0x67b   :  { %v8943_v48 = vpop.f32.mrf.mxu1  ;;  %v8945_v17 = vpop.f32.mrf.mxu0 }
 0x67d   :  { %v7261_v55 = vpop.f32.mrf.mxu1  ;;  %v7266_v10 = vpop.f32.mrf.mxu0 }
 0x67f   :  { %v8949_v53 = vpop.f32.mrf.mxu0  ;;  %v8951_v21 = vpop.f32.mrf.mxu1 }
 0x681   :  { %v7267_v33 = vpop.f32.mrf.mxu0  ;;  %v7272_v47 = vpop.f32.mrf.mxu1 }
 0x683   :  { %v8955_v2 = vpop.f32.mrf.mxu1  ;;  %v8957_v20 = vpop.f32.mrf.mxu0 }
 0x685   :  { %v7273_v9 = vpop.f32.mrf.mxu1  ;;  %v7278_v60 = vpop.f32.mrf.mxu0 }
 0x687   :  { %v8961_v45 = vpop.f32.mrf.mxu0  ;;  %v8963_v6 = vpop.f32.mrf.mxu1 }
 0x689   :  { %v7279_v57 = vpop.f32.mrf.mxu0  ;;  %v7284_v59 = vpop.f32.mrf.mxu1 }
 0x68b   :  { %v8967_v8 = vpop.f32.mrf.mxu1  ;;  %v2420_v49 = vpop.f32.mrf.mxu0 }
 0x68c   :  { %v8971_v38 = vmul.f32 0.35355338, %v2420_v49 }
 0x68d   :  { %v7285_v37 = vpop.f32.mrf.mxu1  ;;  %v7290_v43 = vpop.f32.mrf.mxu0 }
 0x68e   :  { %v2800_v32 = vsel %vm831_vm3, %v8971_v38, -inf }
 0x68f   :  { %2801 = vmax.xlane.f32.xlu0 %v2800_v32  ;;  %v2423_v55 = vpop.f32.mrf.mxu0  ;;  %v2471_v10 = vpop.f32.mrf.mxu1 }
 0x690   :  { %v8975_v33 = vmul.f32 0.35355338, %v2423_v55  ;;  %v8977_v47 = vmul.f32 0.35355338, %v2471_v10 }
 0x691   :  { %v7291_v9 = vpop.f32.mrf.mxu0  ;;  %v7296_v60 = vpop.f32.mrf.mxu1 }
 0x692   :  { %v2803_v57 = vsel %vm831_vm3, %v8975_v33, -inf  ;;  %v2806_v59 = vsel %vm831_vm3, %v8977_v47, -inf }
 0x693   :  { %2804 = vmax.xlane.f32.xlu1 %v2803_v57  ;;  %v2522_v49 = vpop.f32.mrf.mxu0  ;;  %2807 = vmax.xlane.f32.xlu0 %v2806_v59  ;;  %v2474_v37 = vpop.f32.mrf.mxu1 }
 0x694   :  { %v8983_v43 = vmul.f32 0.35355338, %v2522_v49  ;;  %v8985_v32 = vmul.f32 0.35355338, %v2474_v37 }
 0x695   :  { %v7297_v55 = vpop.f32.mrf.mxu1  ;;  %v7302_v11 = vpop.f32.mrf.mxu0 }
 0x696   :  { %v2812_v10 = vsel %vm831_vm3, %v8983_v43, -inf  ;;  %v2809_v9 = vsel %vm831_vm3, %v8985_v32, -inf }
 0x697   :  { %2813 = vmax.xlane.f32.xlu1 %v2812_v10  ;;  %v2525_v60 = vpop.f32.mrf.mxu0  ;;  %2810 = vmax.xlane.f32.xlu0 %v2809_v9  ;;  %v2573_v3 = vpop.f32.mrf.mxu1 }
 0x698   :  { %v8991_v57 = vmul.f32 0.35355338, %v2525_v60  ;;  %v8993_v59 = vmul.f32 0.35355338, %v2573_v3 }
 0x699   :  { %v7303_v49 = vpop.f32.mrf.mxu0  ;;  %v7308_v24 = vpop.f32.mrf.mxu1 }
 0x69a   :  { %v2815_v37 = vsel %vm831_vm3, %v8991_v57, -inf  ;;  %v2818_v11 = vsel %vm831_vm3, %v8993_v59, -inf }
 0x69b   :  { %v2624_v55 = vpop.f32.mrf.mxu0  ;;  %2816 = vmax.xlane.f32.xlu0 %v2815_v37  ;;  %2819 = vmax.xlane.f32.xlu1 %v2818_v11  ;;  %v2576_v61 = vpop.f32.mrf.mxu1 }
 0x69c   :  { %v8999_v10 = vmul.f32 0.35355338, %v2624_v55  ;;  %v9001_v9 = vmul.f32 0.35355338, %v2576_v61 }
 0x69d   :  { %v7309_v60 = vpop.f32.mrf.mxu1  ;;  %v7314_v52 = vpop.f32.mrf.mxu0 }
 0x69e   :  { %v2824_v3 = vsel %vm831_vm3, %v8999_v10, -inf  ;;  %v2821_v24 = vsel %vm831_vm3, %v9001_v9, -inf }
 0x69f   :  { %v2627_v49 = vpop.f32.mrf.mxu0  ;;  %2825 = vmax.xlane.f32.xlu1 %v2824_v3  ;;  %2822 = vmax.xlane.f32.xlu0 %v2821_v24  ;;  %v2675_v16 = vpop.f32.mrf.mxu1 }
 0x6a0   :  { %v9007_v51 = vmul.f32 0.35355338, %v2627_v49  ;;  %v9009_v37 = vmul.f32 0.35355338, %v2675_v16 }
 0x6a1   :  { %v7315_v11 = vpop.f32.mrf.mxu0  ;;  %v7320_v55 = vpop.f32.mrf.mxu1 }
 0x6a2   :  { %v2827_v61 = vsel %vm831_vm3, %v9007_v51, -inf  ;;  %v2830_v52 = vsel %vm831_vm3, %v9009_v37, -inf }
 0x6a3   :  { %v2726_v60 = vpop.f32.mrf.mxu0  ;;  %2828 = vmax.xlane.f32.xlu0 %v2827_v61  ;;  %2831 = vmax.xlane.f32.xlu1 %v2830_v52  ;;  %v2678_v29 = vpop.f32.mrf.mxu1 }
 0x6a4   :  { %v9015_v18 = vmul.f32 0.35355338, %v2726_v60  ;;  %v9017_v3 = vmul.f32 0.35355338, %v2678_v29 }
 0x6a5   :  { %v7321_v24 = vpop.f32.mrf.mxu1  ;;  %v7326_v49 = vpop.f32.mrf.mxu0 }
 0x6a6   :  { %v2836_v16 = vsel %vm831_vm3, %v9015_v18, -inf  ;;  %v2833_v11 = vsel %vm831_vm3, %v9017_v3, -inf }
 0x6a7   :  { %v2729_v55 = vpop.f32.mrf.mxu0  ;;  %2837 = vmax.xlane.f32.xlu1 %v2836_v16  ;;  %2834 = vmax.xlane.f32.xlu0 %v2833_v11  ;;  %v2777_v5 = vpop.f32.mrf.mxu1 }
 0x6a8   :  { %v9023_v22 = vmul.f32 0.35355338, %v2729_v55  ;;  %v9025_v61 = vmul.f32 0.35355338, %v2777_v5 }
 0x6a9   :  { %v7327_v52 = vpop.f32.mrf.mxu0  ;;  %v7332_v60 = vpop.f32.mrf.mxu1 }
 0x6aa   :  { %v2839_v29 = vsel %vm831_vm3, %v9023_v22, -inf  ;;  %v2842_v24 = vsel %vm831_vm3, %v9025_v61, -inf }
 0x6ab   :  { %2840 = vmax.xlane.f32.xlu0 %v2839_v29  ;;  %2843 = vmax.xlane.f32.xlu1 %v2842_v24  ;;  %v2780_v49 = vpop.f32.mrf.mxu1 }
 0x6ac   :  { %v9031_v0 = vmul.f32 0.35355338, %v2780_v49 }
 0x6ad   :  { %v7333_v16 = vpop.f32.mrf.mxu1 }
 0x6ae   :  { %v2845_v11 = vsel %vm831_vm3, %v9031_v0, -inf }
 0x6af   :  { %2846 = vmax.xlane.f32.xlu0 %v2845_v11 }
 0x6bc   :  { %3078 = vrot.lane.b32.xlu1 %v8278_v36, %s8069_s24 }
 0x6c0   :  { %3125 = vrot.lane.b32.xlu1 %v8284_v40, %s8069_s24 }
 0x6c4   :  { %3219 = vrot.lane.b32.xlu1 %v8288_v41, %s8069_s24 }
 0x6c5   :  { %3031 = vrot.lane.b32.xlu0 %v8273_v30, %s8069_s24 }
 0x6c8   :  { %3313 = vrot.lane.b32.xlu1 %v8293_v42, %s8069_s24 }
 0x6c9   :  { %3172 = vrot.lane.b32.xlu0 %v8276_v35, %s8069_s24 }
 0x6cd   :  { %3266 = vrot.lane.b32.xlu0 %v8282_v39, %s8069_s24 }
 0x718   :  { %v2802_v5 = vpop.xlane.xlu0 %2801 }
 0x719   :  { %v2848_v55 = vsub.f32 %v8971_v38, %v2802_v5 }
 0x71b   :  { %v2864_v52 = vmul.f32 1.442695, %v2848_v55 }
 0x71c   :  { %v2808_v60 = vpop.xlane.xlu0 %2807  ;;  %v2805_v29 = vpop.xlane.xlu1 %2804 }
 0x71d   :  { %7835 = vpow2.f32 %v2864_v52  ;;  %v2850_v24 = vsub.f32 %v8977_v47, %v2808_v60  ;;  %v2849_v49 = vsub.f32 %v8975_v33, %v2805_v29 }
 0x71f   :  { %v2868_v16 = vmul.f32 1.442695, %v2850_v24  ;;  %v2866_v11 = vmul.f32 1.442695, %v2849_v49 }
 0x720   :  { %v2811_v1 = vpop.xlane.xlu0 %2810  ;;  %v2814_v19 = vpop.xlane.xlu1 %2813 }
 0x721   :  { %7837 = vpow2.f32 %v2868_v16  ;;  %v2851_v27 = vsub.f32 %v8985_v32, %v2811_v1  ;;  %v2852_v15 = vsub.f32 %v8983_v43, %v2814_v19 }
 0x722   :  { %7839 = vpow2.f32 %v2866_v11 }
 0x723   :  { %v2870_v63 = vmul.f32 1.442695, %v2851_v27  ;;  %v2872_v38 = vmul.f32 1.442695, %v2852_v15 }
 0x724   :  { %v2817_v5 = vpop.xlane.xlu0 %2816  ;;  %v2820_v55 = vpop.xlane.xlu1 %2819 }
 0x725   :  { %7841 = vpow2.f32 %v2870_v63  ;;  %v2853_v52 = vsub.f32 %v8991_v57, %v2817_v5  ;;  %v2854_v47 = vsub.f32 %v8993_v59, %v2820_v55 }
 0x726   :  { %7843 = vpow2.f32 %v2872_v38 }
 0x727   :  { %v2874_v33 = vmul.f32 1.442695, %v2853_v52  ;;  %v2876_v60 = vmul.f32 1.442695, %v2854_v47 }
 0x728   :  { %v2823_v29 = vpop.xlane.xlu0 %2822  ;;  %v2826_v24 = vpop.xlane.xlu1 %2825 }
 0x729   :  { %7845 = vpow2.f32 %v2874_v33  ;;  %v2855_v1 = vsub.f32 %v9001_v9, %v2823_v29  ;;  %v2856_v19 = vsub.f32 %v8999_v10, %v2826_v24 }
 0x72a   :  { %v9058_v43 = vpop.eup %7835  ;;  %7847 = vpow2.f32 %v2876_v60 }
 0x72b   :  { %v2878_v15 = vmul.f32 1.442695, %v2855_v1  ;;  %v2880_v27 = vmul.f32 1.442695, %v2856_v19  ;;  %v2896_v63 = vsel %vm831_vm3, %v9058_v43, 0.0 }
 0x72c   :  { %v2829_v32 = vpop.xlane.xlu0 %2828  ;;  %2897 = vadd.xlane.f32.xlu1 %v2896_v63  ;;  %v2832_v57 = vpop.xlane.xlu1 %2831 }
 0x72d   :  { %7849 = vpow2.f32 %v2878_v15  ;;  %v2857_v59 = vsub.f32 %v9007_v51, %v2829_v32  ;;  %v2858_v49 = vsub.f32 %v9009_v37, %v2832_v57 }
 0x72e   :  { %v9064_v16 = vpop.eup %7837  ;;  %7851 = vpow2.f32 %v2880_v27 }
 0x72f   :  { %v9066_v10 = vpop.eup %7839  ;;  %v2882_v9 = vmul.f32 1.442695, %v2857_v59  ;;  %v2884_v11 = vmul.f32 1.442695, %v2858_v49  ;;  %v2902_v38 = vsel %vm831_vm3, %v9064_v16, 0.0 }
 0x730   :  { %v2835_v5 = vpop.xlane.xlu0 %2834  ;;  %2903 = vadd.xlane.f32.xlu1 %v2902_v38  ;;  %v2899_v55 = vsel %vm831_vm3, %v9066_v10, 0.0  ;;  %v2838_v52 = vpop.xlane.xlu1 %2837 }
 0x731   :  { %7853 = vpow2.f32 %v2882_v9  ;;  %v2859_v51 = vsub.f32 %v9017_v3, %v2835_v5  ;;  %2900 = vadd.xlane.f32.xlu0 %v2899_v55  ;;  %v2860_v37 = vsub.f32 %v9015_v18, %v2838_v52 }
 0x732   :  { %v9074_v47 = vpop.eup %7841  ;;  %7855 = vpow2.f32 %v2884_v11 }
 0x733   :  { %v9076_v33 = vpop.eup %7843  ;;  %v2886_v60 = vmul.f32 1.442695, %v2859_v51  ;;  %v2888_v29 = vmul.f32 1.442695, %v2860_v37  ;;  %v2905_v24 = vsel %vm831_vm3, %v9074_v47, 0.0 }
 0x734   :  { %v2841_v1 = vpop.xlane.xlu0 %2840  ;;  %v2908_v19 = vsel %vm831_vm3, %v9076_v33, 0.0  ;;  %v2844_v15 = vpop.xlane.xlu1 %2843 }
 0x735   :  { %7857 = vpow2.f32 %v2886_v60  ;;  %v2861_v3 = vsub.f32 %v9023_v22, %v2841_v1  ;;  %2906 = vadd.xlane.f32.xlu0 %v2905_v24  ;;  %2909 = vadd.xlane.f32.xlu1 %v2908_v19  ;;  %v2862_v18 = vsub.f32 %v9025_v61, %v2844_v15  ;;  %v10685_v60 = vmov 0.0  }
 0x736   :  { %v9084_v27 = vpop.eup %7845  ;;  %7859 = vpow2.f32 %v2888_v29 }
 0x737   :  { %v9086_v63 = vpop.eup %7847  ;;  %v2890_v32 = vmul.f32 1.442695, %v2861_v3  ;;  %v2892_v57 = vmul.f32 1.442695, %v2862_v18  ;;  %v2911_v59 = vsel %vm831_vm3, %v9084_v27, 0.0 }
 0x738   :  { %v2847_v49 = vpop.xlane.xlu0 %2846  ;;  %v2914_v9 = vsel %vm831_vm3, %v9086_v63, 0.0 }
 0x739   :  { %7861 = vpow2.f32 %v2890_v32  ;;  %v2863_v22 = vsub.f32 %v9031_v0, %v2847_v49  ;;  %2912 = vadd.xlane.f32.xlu0 %v2911_v59  ;;  %2915 = vadd.xlane.f32.xlu1 %v2914_v9  ;;  %v3079_v9 = vpop.permute.xlu1 %3078 }
 0x73a   :  { %v9093_v61 = vpop.eup %7849  ;;  %7863 = vpow2.f32 %v2892_v57 }
 0x73b   :  { %v9095_v11 = vpop.eup %7851  ;;  %v2894_v38 = vmul.f32 1.442695, %v2863_v22  ;;  %v2917_v5 = vsel %vm831_vm3, %v9093_v61, 0.0 }
 0x73c   :  { %v3032_v55 = vpop.permute.xlu0 %3031  ;;  %v2920_v52 = vsel %vm831_vm3, %v9095_v11, 0.0 }
 0x73d   :  { %7865 = vpow2.f32 %v2894_v38  ;;  %2918 = vadd.xlane.f32.xlu0 %v2917_v5  ;;  %2921 = vadd.xlane.f32.xlu1 %v2920_v52  ;;  %v3126_v22 = vpop.permute.xlu1 %3125 }
 0x73e   :  { %v9101_v51 = vpop.eup %7853  ;;  %7341 = vmatpush3.bf16.msra.mxu1 %v3032_v55 }
 0x73f   :  { %v9103_v0 = vpop.eup %7855  ;;  %v2923_v37 = vsel %vm831_vm3, %v9101_v51, 0.0  ;;  %7352 = vmatprep.subr.bf16.mxu1 %v10685_v60 }
 0x740   :  { %v2926_v29 = vsel %vm831_vm3, %v9103_v0, 0.0  ;;  %v3173_v5 = vpop.permute.xlu0 %3172 }
 0x741   :  { %2924 = vadd.xlane.f32.xlu0 %v2923_v37  ;;  %2927 = vadd.xlane.f32.xlu1 %v2926_v29  ;;  %v9148_v38 = vpop.permute.xlu1 %3219 }
 0x742   :  { %v9110_v24 = vpop.eup %7857 }
 0x743   :  { %v9112_v1 = vpop.eup %7859  ;;  %v2929_v19 = vsel %vm831_vm3, %v9110_v24, 0.0 }
 0x744   :  { %v2932_v15 = vsel %vm831_vm3, %v9112_v1, 0.0  ;;  %v9152_v37 = vpop.permute.xlu0 %3266 }
 0x745   :  { %2930 = vadd.xlane.f32.xlu0 %v2929_v19  ;;  %2933 = vadd.xlane.f32.xlu1 %v2932_v15  ;;  %v9150_v55 = vpop.permute.xlu1 %3313 }
 0x746   :  { %v9118_v3 = vpop.eup %7861 }
 0x747   :  { %v9120_v18 = vpop.eup %7863  ;;  %v2935_v32 = vsel %vm831_vm3, %v9118_v3, 0.0 }
 0x748   :  { %v2938_v57 = vsel %vm831_vm3, %v9120_v18, 0.0 }
 0x749   :  { %2936 = vadd.xlane.f32.xlu0 %v2935_v32  ;;  %2939 = vadd.xlane.f32.xlu1 %v2938_v57 }
 0x74a   :  { %v9126_v59 = vpop.eup %7865 }
 0x74b   :  { %v2941_v49 = vsel %vm831_vm3, %v9126_v59, 0.0 }
 0x74d   :  { %2942 = vadd.xlane.f32.xlu0 %v2941_v49 }
 0x75a   :  { %3413 = vrot.lane.b32.xlu1 %v8273_v30, %s8070_s25 }
 0x75e   :  { %3411 = vrot.lane.b32.xlu1 %v8273_v30, %s8071_s26 }
 0x762   :  { %3515 = vrot.lane.b32.xlu1 %v8284_v40, %s8070_s25 }
 0x763   :  { %3362 = vrot.lane.b32.xlu0 %v8270_v25, %s8070_s25 }
 0x766   :  { %3513 = vrot.lane.b32.xlu1 %v8284_v40, %s8071_s26 }
 0x767   :  { %3360 = vrot.lane.b32.xlu0 %v8270_v25, %s8071_s26 }
 0x76a   :  { %3617 = vrot.lane.b32.xlu1 %v8288_v41, %s8070_s25 }
 0x76b   :  { %3464 = vrot.lane.b32.xlu0 %v8278_v36, %s8070_s25 }
 0x76e   :  { %3615 = vrot.lane.b32.xlu1 %v8288_v41, %s8071_s26 }
 0x76f   :  { %3462 = vrot.lane.b32.xlu0 %v8278_v36, %s8071_s26 }
 0x772   :  { %3719 = vrot.lane.b32.xlu1 %v8293_v42, %s8070_s25 }
 0x773   :  { %3566 = vrot.lane.b32.xlu0 %v8276_v35, %s8070_s25 }
 0x776   :  { %3717 = vrot.lane.b32.xlu1 %v8293_v42, %s8071_s26 }
 0x777   :  { %3564 = vrot.lane.b32.xlu0 %v8276_v35, %s8071_s26 }
 0x77a   :  { %3968 = vrot.lane.b32.xlu1 %v8270_v25, %s8072_s27 }
 0x77b   :  { %3668 = vrot.lane.b32.xlu0 %v8282_v39, %s8070_s25 }
 0x77f   :  { %3666 = vrot.lane.b32.xlu0 %v8282_v39, %s8071_s26 }
 0x7b5   :  { %v2898_v52 = vpop.xlane.xlu1 %2897 }
 0x7b6   :  { %7867 = vrcp.f32 %v2898_v52 }
 0x7b9   :  { %v2904_v29 = vpop.xlane.xlu1 %2903 }
 0x7ba   :  { %v2901_v19 = vpop.xlane.xlu0 %2900 }
 0x7bb   :  { %7869 = vrcp.f32 %v2901_v19 }
 0x7bc   :  { %7871 = vrcp.f32 %v2904_v29 }
 0x7be   :  { %v2907_v25 = vpop.xlane.xlu0 %2906  ;;  %v2910_v15 = vpop.xlane.xlu1 %2909 }
 0x7bf   :  { %7873 = vrcp.f32 %v2907_v25 }
 0x7c0   :  { %7875 = vrcp.f32 %v2910_v15 }
 0x7c2   :  { %v2913_v32 = vpop.xlane.xlu0 %2912  ;;  %v2916_v57 = vpop.xlane.xlu1 %2915 }
 0x7c3   :  { %7877 = vrcp.f32 %v2913_v32  ;;  %v7868_v49 = vpop.eup %7867 }
 0x7c4   :  { %7879 = vrcp.f32 %v2916_v57  ;;  %v2960_v52 = vmul.f32 %v7868_v49, %v9058_v43 }
 0x7c6   :  { %v2919_v13 = vpop.xlane.xlu0 %2918  ;;  %v2922_v28 = vpop.xlane.xlu1 %2921 }
 0x7c7   :  { %7881 = vrcp.f32 %v2919_v13 }
 0x7c8   :  { %v7870_v54 = vpop.eup %7869  ;;  %7883 = vrcp.f32 %v2922_v28 }
 0x7c9   :  { %v2961_v34 = vmul.f32 %v7870_v54, %v9066_v10  ;;  %v7872_v19 = vpop.eup %7871 }
 0x7ca   :  { %v2925_v29 = vpop.xlane.xlu0 %2924  ;;  %v2928_v44 = vpop.xlane.xlu1 %2927  ;;  %v2962_v32 = vmul.f32 %v7872_v19, %v9064_v16 }
 0x7cb   :  { %7885 = vrcp.f32 %v2925_v29  ;;  %v2976_v25 = vpack.c.bf16 %v2961_v34, %v2960_v52 }
 0x7cc   :  { %v7874_v15 = vpop.eup %7873  ;;  %7887 = vrcp.f32 %v2928_v44 }
 0x7cd   :  { %7337 = vmatmul.mubr.msk.bf16.vlgmr.msra.gmra.mxu0 %vm831_vm3, %v2976_v25  ;;  %v2963_v57 = vmul.f32 %v7874_v15, %v9074_v47  ;;  %v7876_v13 = vpop.eup %7875 }
 0x7ce   :  { %7347 = vmatpush3.bf16.msra.mxu0 %v3079_v9  ;;  %v2931_v28 = vpop.xlane.xlu0 %2930  ;;  %v2934_v4 = vpop.xlane.xlu1 %2933  ;;  %7348 = vmatprep.mubr.msk.bf16.mxu0 %vm8061_vm1, %v10685_v60  ;;  %v2964_v44 = vmul.f32 %v7876_v13, %v9076_v33 }
 0x7cf   :  { %7889 = vrcp.f32 %v2931_v28  ;;  %v2977_v54 = vpack.c.bf16 %v2963_v57, %v2962_v32  ;;  %7358 = vmatprep.subr.bf16.mxu0 %v10685_v60 }
 0x7d0   :  { %v7878_v34 = vpop.eup %7877  ;;  %7891 = vrcp.f32 %v2934_v4 }
 0x7d1   :  { %7343 = vmatmul.mubr.msk.bf16.vlgmr.msra.gmra.mxu1 %vm831_vm3, %v2977_v54  ;;  %v2965_v43 = vmul.f32 %v7878_v34, %v9084_v27  ;;  %v7880_v16 = vpop.eup %7879 }
 0x7d2   :  { %7353 = vmatpush3.bf16.msra.mxu1 %v3126_v22  ;;  %v2937_v10 = vpop.xlane.xlu0 %2936  ;;  %v2940_v47 = vpop.xlane.xlu1 %2939  ;;  %7354 = vmatprep.mubr.msk.bf16.mxu1 %vm8061_vm1, %v10685_v60  ;;  %v2966_v4 = vmul.f32 %v7880_v16, %v9086_v63 }
 0x7d3   :  { %7893 = vrcp.f32 %v2937_v10  ;;  %v2978_v9 = vpack.c.bf16 %v2965_v43, %v2964_v44  ;;  %7364 = vmatprep.subr.bf16.mxu1 %v10685_v60 }
 0x7d4   :  { %v7882_v49 = vpop.eup %7881  ;;  %7895 = vrcp.f32 %v2940_v47 }
 0x7d5   :  { %7349 = vmatmul.mubr.msk.bf16.vlgmr.msra.gmra.mxu0 %vm831_vm3, %v2978_v9  ;;  %v2967_v33 = vmul.f32 %v7882_v49, %v9093_v61  ;;  %v7884_v27 = vpop.eup %7883 }
 0x7d6   :  { %7359 = vmatpush3.bf16.msra.mxu0 %v3173_v5  ;;  %v2943_v22 = vpop.xlane.xlu0 %2942  ;;  %v3414_v52 = vpop.permute.xlu1 %3413  ;;  %7360 = vmatprep.mubr.msk.bf16.mxu0 %vm8061_vm1, %v10685_v60  ;;  %v2968_v25 = vmul.f32 %v7884_v27, %v9095_v11 }
 0x7d7   :  { %7897 = vrcp.f32 %v2943_v22  ;;  %v2979_v19 = vpack.c.bf16 %v2967_v33, %v2966_v4  ;;  %7370 = vmatprep.subr.bf16.mxu0 %v10685_v60  ;;  %v3419_v49 = vsel %vm417_vm2, %v3414_v52, 0 }
 0x7d8   :  { %v7886_v29 = vpop.eup %7885 }
 0x7d9   :  { %7355 = vmatmul.mubr.msk.bf16.vlgmr.msra.gmra.mxu1 %vm831_vm3, %v2979_v19  ;;  %v2969_v63 = vmul.f32 %v7886_v29, %v9101_v51  ;;  %v7888_v15 = vpop.eup %7887 }
 0x7da   :  { %7365 = vmatpush3.bf16.msra.mxu1 %v9148_v38  ;;  %v3363_v61 = vpop.permute.xlu0 %3362  ;;  %7366 = vmatprep.mubr.msk.bf16.mxu1 %vm8061_vm1, %v10685_v60  ;;  %v3412_v5 = vpop.permute.xlu1 %3411  ;;  %v2970_v13 = vmul.f32 %v7888_v15, %v9103_v0 }
 0x7db   :  { %v2980_v32 = vpack.c.bf16 %v2969_v63, %v2968_v25  ;;  %7376 = vmatprep.subr.bf16.mxu1 %v10685_v60  ;;  %v3368_v10 = vsel %vm417_vm2, %v3363_v61, 0 }
 0x7dc   :  { %v7890_v57 = vpop.eup %7889 }
 0x7dd   :  { %7361 = vmatmul.mubr.msk.bf16.vlgmr.msra.gmra.mxu0 %vm831_vm3, %v2980_v32  ;;  %v2971_v11 = vmul.f32 %v7890_v57, %v9110_v24  ;;  %v7892_v28 = vpop.eup %7891 }
 0x7de   :  { %7371 = vmatpush3.bf16.msra.mxu0 %v9152_v37  ;;  %v3361_v51 = vpop.permute.xlu0 %3360  ;;  %7372 = vmatprep.mubr.msk.bf16.mxu0 %vm8061_vm1, %v10685_v60  ;;  %v3516_v34 = vpop.permute.xlu1 %3515  ;;  %v2972_v44 = vmul.f32 %v7892_v28, %v9112_v1 }
 0x7df   :  { %v2981_v38 = vpack.c.bf16 %v2971_v11, %v2970_v13  ;;  %7382 = vmatprep.subr.bf16.mxu0 %v10685_v60  ;;  %v3521_v33 = vsel %vm417_vm2, %v3516_v34, 0 }
 0x7e0   :  { %v7894_v54 = vpop.eup %7893 }
 0x7e1   :  { %7367 = vmatmul.mubr.msk.bf16.vlgmr.msra.gmra.mxu1 %vm831_vm3, %v2981_v38  ;;  %v2973_v0 = vmul.f32 %v7894_v54, %v9118_v3  ;;  %v7896_v43 = vpop.eup %7895 }
 0x7e2   :  { %7377 = vmatpush3.bf16.msra.mxu1 %v9150_v55  ;;  %v3465_v24 = vpop.permute.xlu0 %3464  ;;  %7378 = vmatprep.mubr.msk.bf16.mxu1 %vm8061_vm1, %v10685_v60  ;;  %v2974_v47 = vmul.f32 %v7896_v43, %v9120_v18  ;;  %v3514_v3 = vpop.permute.xlu1 %3513 }
 0x7e3   :  { %v2982_v37 = vpack.c.bf16 %v2973_v0, %v2972_v44  ;;  %7388 = vmatprep.subr.bf16.mxu1 %v10685_v60  ;;  %v3470_v18 = vsel %vm417_vm2, %v3465_v24, 0 }
 0x7e4   :  { %v7898_v16 = vpop.eup %7897 }
 0x7e5   :  { %7373 = vmatmul.mubr.msk.bf16.vlgmr.msra.gmra.mxu0 %vm831_vm3, %v2982_v37  ;;  %v2975_v1 = vmul.f32 %v7898_v16, %v9126_v59 }
 0x7e6   :  { %7383 = vmatpush3.bf16.xpose.msra.mxu0 %v3368_v10  ;;  %7384 = vmatprep.mubr.msk.bf16.mxu0 %vm8061_vm1, %v10685_v60  ;;  %v3463_v9 = vpop.permute.xlu0 %3462  ;;  %v3618_v59 = vpop.permute.xlu1 %3617 }
 0x7e7   :  { %v2983_v55 = vpack.c.bf16 %v2975_v1, %v2974_v47  ;;  %7394 = vmatprep.subr.bf16.mxu0 %v10685_v60  ;;  %v3623_v19 = vsel %vm417_vm2, %v3618_v59, 0 }
 0x7e9   :  { %7379 = vmatmul.mubr.msk.bf16.vlgmr.msra.gmra.mxu1 %vm831_vm3, %v2983_v55 }
 0x7ea   :  { %7389 = vmatpush3.bf16.xpose.msra.mxu1 %v3419_v49  ;;  %7390 = vmatprep.mubr.msk.bf16.mxu1 %vm8061_vm1, %v10685_v60  ;;  %v3567_v4 = vpop.permute.xlu0 %3566  ;;  %v3616_v27 = vpop.permute.xlu1 %3615 }
 0x7eb   :  { %7400 = vmatprep.subr.bf16.mxu1 %v10685_v60  ;;  %v3572_v52 = vsel %vm417_vm2, %v3567_v4, 0 }
 0x7ed   :  { %7385 = vmatmul.mubr.msk.bf16.vlgmr.msra.gmra.mxu0 %vm417_vm2, %v3361_v51 }
 0x7ee   :  { %7395 = vmatpush3.bf16.xpose.msra.mxu0 %v3470_v18  ;;  %7396 = vmatprep.mubr.msk.bf16.mxu0 %vm8061_vm1, %v10685_v60  ;;  %v3565_v22 = vpop.permute.xlu0 %3564  ;;  %v3720_v29 = vpop.permute.xlu1 %3719 }
 0x7ef   :  { %7406 = vmatprep.subr.bf16.mxu0 %v10685_v60  ;;  %v3725_v61 = vsel %vm417_vm2, %v3720_v29, 0 }
 0x7f1   :  { %7391 = vmatmul.mubr.msk.bf16.vlgmr.msra.gmra.mxu1 %vm417_vm2, %v3412_v5 }
 0x7f2   :  { %7401 = vmatpush3.bf16.xpose.msra.mxu1 %v3521_v33  ;;  %7402 = vmatprep.mubr.msk.bf16.mxu1 %vm8061_vm1, %v10685_v60  ;;  %v3669_v25 = vpop.permute.xlu0 %3668  ;;  %v3718_v15 = vpop.permute.xlu1 %3717 }
 0x7f3   :  { %7412 = vmatprep.subr.bf16.mxu1 %v10685_v60  ;;  %v3674_v63 = vsel %vm417_vm2, %v3669_v25, 0 }
 0x7f5   :  { %7397 = vmatmul.mubr.msk.bf16.vlgmr.msra.gmra.mxu0 %vm417_vm2, %v3463_v9 }
 0x7f6   :  { %7407 = vmatpush3.bf16.xpose.msra.mxu0 %v3572_v52  ;;  %7408 = vmatprep.mubr.msk.bf16.mxu0 %vm8061_vm1, %v10685_v60  ;;  %v3667_v5 = vpop.permute.xlu0 %3666  ;;  %v3969_v32 = vpop.permute.xlu1 %3968 }
 0x7f7   :  { %7418 = vmatprep.subr.bf16.mxu0 %v10685_v60 }
 0x7f9   :  { %7403 = vmatmul.mubr.msk.bf16.vlgmr.msra.gmra.mxu1 %vm417_vm2, %v3514_v3 }
 0x7fa   :  { %7413 = vmatpush3.bf16.xpose.msra.mxu1 %v3623_v19  ;;  %7414 = vmatprep.mubr.msk.bf16.mxu1 %vm8061_vm1, %v10685_v60 }
 0x7fb   :  { %7424 = vmatprep.subr.bf16.mxu1 %v10685_v60 }
 0x7fd   :  { %7409 = vmatmul.mubr.msk.bf16.vlgmr.msra.gmra.mxu0 %vm417_vm2, %v3565_v22 }
 0x7fe   :  { %7419 = vmatpush3.bf16.xpose.msra.mxu0 %v3674_v63  ;;  %7420 = vmatprep.mubr.msk.bf16.mxu0 %vm8061_vm1, %v10685_v60 }
 0x7ff   :  { %7430 = vmatprep.subr.bf16.mxu0 %v10685_v60 }
 0x801   :  { %7415 = vmatmul.mubr.msk.bf16.vlgmr.msra.gmra.mxu1 %vm417_vm2, %v3616_v27 }
 0x802   :  { %7425 = vmatpush3.bf16.xpose.msra.mxu1 %v3725_v61  ;;  %7426 = vmatprep.mubr.msk.bf16.mxu1 %vm8061_vm1, %v10685_v60 }
 0x803   :  { %7436 = vmatprep.subr.bf16.mxu1 %v10685_v60 }
 0x805   :  { %7421 = vmatmul.mubr.msk.bf16.vlgmr.msra.gmra.mxu0 %vm417_vm2, %v3667_v5 }
 0x806   :  { %7431 = vmatpush3.bf16.msra.mxu0 %v3969_v32  ;;  %7432 = vmatprep.mubr.msk.bf16.mxu0 %vm8061_vm1, %v10685_v60 }
 0x807   :  { %7442 = vmatprep.subr.bf16.mxu0 %v10685_v60 }
 0x809   :  { %7427 = vmatmul.mubr.msk.bf16.vlgmr.msra.gmra.mxu1 %vm417_vm2, %v3718_v15 }
 0x80a   :  { %7438 = vmatprep.mubr.msk.bf16.mxu1 %vm8061_vm1, %v10685_v60 }
 0x88d   :  { %v9244_v57 = vpop.f32.mrf.mxu0 }
 0x88f   :  { %v7338_v13 = vpop.f32.mrf.mxu0 }
 0x891   :  { %v9246_v11 = vpop.f32.mrf.mxu0  ;;  %v9248_v28 = vpop.f32.mrf.mxu1 }
 0x893   :  { %v7339_v38 = vpop.f32.mrf.mxu0  ;;  %v7344_v54 = vpop.f32.mrf.mxu1 }
 0x895   :  { %v9252_v34 = vpop.f32.mrf.mxu1  ;;  %v9254_v44 = vpop.f32.mrf.mxu0 }
 0x897   :  { %v7345_v43 = vpop.f32.mrf.mxu1  ;;  %v7350_v24 = vpop.f32.mrf.mxu0 }
 0x899   :  { %v9258_v37 = vpop.f32.mrf.mxu0  ;;  %v9260_v16 = vpop.f32.mrf.mxu1 }
 0x89b   :  { %v7351_v47 = vpop.f32.mrf.mxu0  ;;  %v7356_v1 = vpop.f32.mrf.mxu1 }
 0x89d   :  { %v9264_v3 = vpop.f32.mrf.mxu1  ;;  %v9266_v55 = vpop.f32.mrf.mxu0 }
 0x89f   :  { %v7357_v49 = vpop.f32.mrf.mxu1  ;;  %v7362_v18 = vpop.f32.mrf.mxu0 }
 0x8a1   :  { %v9270_v59 = vpop.f32.mrf.mxu0  ;;  %v9272_v4 = vpop.f32.mrf.mxu1 }
 0x8a3   :  { %v7363_v27 = vpop.f32.mrf.mxu0  ;;  %v7368_v22 = vpop.f32.mrf.mxu1 }
 0x8a5   :  { %v9276_v52 = vpop.f32.mrf.mxu1  ;;  %v9278_v19 = vpop.f32.mrf.mxu0 }
 0x8a7   :  { %v7369_v25 = vpop.f32.mrf.mxu1  ;;  %v7374_v63 = vpop.f32.mrf.mxu0 }
 0x8a9   :  { %v9282_v15 = vpop.f32.mrf.mxu0  ;;  %v9284_v61 = vpop.f32.mrf.mxu1 }
 0x8aa   :  { %10686 = vst [vmem:[#allocation20_spill] sm:$0xff] %v9284_v61 }
 0x8ab   :  { %v7375_v32 = vpop.f32.mrf.mxu0  ;;  %v7380_v13 = vpop.f32.mrf.mxu1 }
 0x8ad   :  { %v9288_v38 = vpop.f32.mrf.mxu1  ;;  %v3404_v54 = vpop.f32.mrf.mxu0 }
 0x8ae   :  { %v9292_v24 = vmul.f32 0.35355338, %v3404_v54 }
 0x8af   :  { %v7381_v47 = vpop.f32.mrf.mxu1  ;;  %v7386_v1 = vpop.f32.mrf.mxu0 }
 0x8b0   :  { %v3784_v49 = vsel %vm831_vm3, %v9292_v24, -inf }
 0x8b1   :  { %3785 = vmax.xlane.f32.xlu0 %v3784_v49  ;;  %v3407_v18 = vpop.f32.mrf.mxu0  ;;  %v3455_v27 = vpop.f32.mrf.mxu1 }
 0x8b2   :  { %v9296_v22 = vmul.f32 0.35355338, %v3407_v18  ;;  %v9298_v25 = vmul.f32 0.35355338, %v3455_v27 }
 0x8b3   :  { %v7387_v63 = vpop.f32.mrf.mxu0  ;;  %v7392_v32 = vpop.f32.mrf.mxu1 }
 0x8b4   :  { %v3787_v13 = vsel %vm831_vm3, %v9296_v22, -inf  ;;  %v3790_v54 = vsel %vm831_vm3, %v9298_v25, -inf }
 0x8b5   :  { %3788 = vmax.xlane.f32.xlu1 %v3787_v13  ;;  %v3506_v47 = vpop.f32.mrf.mxu0  ;;  %3791 = vmax.xlane.f32.xlu0 %v3790_v54  ;;  %v3458_v1 = vpop.f32.mrf.mxu1 }
 0x8b6   :  { %v9304_v43 = vmul.f32 0.35355338, %v3506_v47  ;;  %v9306_v49 = vmul.f32 0.35355338, %v3458_v1 }
 0x8b7   :  { %v7393_v18 = vpop.f32.mrf.mxu1  ;;  %v7398_v5 = vpop.f32.mrf.mxu0 }
 0x8b8   :  { %v3796_v27 = vsel %vm831_vm3, %v9304_v43, -inf  ;;  %v3793_v63 = vsel %vm831_vm3, %v9306_v49, -inf }
 0x8b9   :  { %3797 = vmax.xlane.f32.xlu1 %v3796_v27  ;;  %v3509_v32 = vpop.f32.mrf.mxu0  ;;  %3794 = vmax.xlane.f32.xlu0 %v3793_v63  ;;  %v3557_v29 = vpop.f32.mrf.mxu1 }
 0x8ba   :  { %v9312_v13 = vmul.f32 0.35355338, %v3509_v32  ;;  %v9314_v54 = vmul.f32 0.35355338, %v3557_v29 }
 0x8bb   :  { %v7399_v47 = vpop.f32.mrf.mxu0  ;;  %v7404_v33 = vpop.f32.mrf.mxu1 }
 0x8bc   :  { %v3799_v1 = vsel %vm831_vm3, %v9312_v13, -inf  ;;  %v3802_v5 = vsel %vm831_vm3, %v9314_v54, -inf }
 0x8bd   :  { %v3608_v18 = vpop.f32.mrf.mxu0  ;;  %3800 = vmax.xlane.f32.xlu0 %v3799_v1  ;;  %3803 = vmax.xlane.f32.xlu1 %v3802_v5  ;;  %v3560_v10 = vpop.f32.mrf.mxu1 }
 0x8be   :  { %v9320_v27 = vmul.f32 0.35355338, %v3608_v18  ;;  %v9322_v63 = vmul.f32 0.35355338, %v3560_v10 }
 0x8bf   :  { %v7405_v32 = vpop.f32.mrf.mxu1  ;;  %v7410_v51 = vpop.f32.mrf.mxu0 }
 0x8c0   :  { %v3808_v29 = vsel %vm831_vm3, %v9320_v27, -inf  ;;  %v3805_v33 = vsel %vm831_vm3, %v9322_v63, -inf }
 0x8c1   :  { %v3611_v47 = vpop.f32.mrf.mxu0  ;;  %3809 = vmax.xlane.f32.xlu1 %v3808_v29  ;;  %3806 = vmax.xlane.f32.xlu0 %v3805_v33  ;;  %v3659_v9 = vpop.f32.mrf.mxu1 }
 0x8c2   :  { %v9328_v0 = vmul.f32 0.35355338, %v3611_v47  ;;  %v9330_v1 = vmul.f32 0.35355338, %v3659_v9 }
 0x8c3   :  { %v7411_v5 = vpop.f32.mrf.mxu0  ;;  %v7416_v18 = vpop.f32.mrf.mxu1 }
 0x8c4   :  { %v3811_v10 = vsel %vm831_vm3, %v9328_v0, -inf  ;;  %v3814_v51 = vsel %vm831_vm3, %v9330_v1, -inf }
 0x8c5   :  { %v3710_v32 = vpop.f32.mrf.mxu0  ;;  %3812 = vmax.xlane.f32.xlu0 %v3811_v10  ;;  %3815 = vmax.xlane.f32.xlu1 %v3814_v51  ;;  %v3662_v50 = vpop.f32.mrf.mxu1 }
 0x8c6   :  { %v9336_v12 = vmul.f32 0.35355338, %v3710_v32  ;;  %v9338_v29 = vmul.f32 0.35355338, %v3662_v50 }
 0x8c7   :  { %v7417_v33 = vpop.f32.mrf.mxu1  ;;  %v7422_v47 = vpop.f32.mrf.mxu0 }
 0x8c8   :  { %v3820_v9 = vsel %vm831_vm3, %v9336_v12, -inf  ;;  %v3817_v5 = vsel %vm831_vm3, %v9338_v29, -inf }
 0x8c9   :  { %v3713_v18 = vpop.f32.mrf.mxu0  ;;  %3821 = vmax.xlane.f32.xlu1 %v3820_v9  ;;  %3818 = vmax.xlane.f32.xlu0 %v3817_v5  ;;  %v3761_v23 = vpop.f32.mrf.mxu1 }
 0x8ca   :  { %v9344_v31 = vmul.f32 0.35355338, %v3713_v18  ;;  %v9346_v10 = vmul.f32 0.35355338, %v3761_v23 }
 0x8cb   :  { %v7423_v51 = vpop.f32.mrf.mxu0  ;;  %v7428_v32 = vpop.f32.mrf.mxu1 }
 0x8cc   :  { %v3823_v50 = vsel %vm831_vm3, %v9344_v31, -inf  ;;  %v3826_v33 = vsel %vm831_vm3, %v9346_v10, -inf }
 0x8cd   :  { %3824 = vmax.xlane.f32.xlu0 %v3823_v50  ;;  %3827 = vmax.xlane.f32.xlu1 %v3826_v33  ;;  %v3764_v47 = vpop.f32.mrf.mxu1 }
 0x8ce   :  { %v9352_v61 = vmul.f32 0.35355338, %v3764_v47 }
 0x8cf   :  { %v7429_v9 = vpop.f32.mrf.mxu1 }
 0x8d0   :  { %v3829_v5 = vsel %vm831_vm3, %v9352_v61, -inf }
 0x8d1   :  { %3830 = vmax.xlane.f32.xlu0 %v3829_v5 }
 0x8de   :  { %4062 = vrot.lane.b32.xlu1 %v8278_v36, %s8072_s27 }
 0x8e2   :  { %4109 = vrot.lane.b32.xlu1 %v8284_v40, %s8072_s27 }
 0x8e6   :  { %4203 = vrot.lane.b32.xlu1 %v8288_v41, %s8072_s27 }
 0x8e7   :  { %4015 = vrot.lane.b32.xlu0 %v8273_v30, %s8072_s27 }
 0x8eb   :  { %4156 = vrot.lane.b32.xlu0 %v8276_v35, %s8072_s27 }
 0x93a   :  { %v3786_v23 = vpop.xlane.xlu0 %3785 }
 0x93b   :  { %v3832_v18 = vsub.f32 %v9292_v24, %v3786_v23 }
 0x93d   :  { %v3848_v51 = vmul.f32 1.442695, %v3832_v18 }
 0x93e   :  { %v3792_v32 = vpop.xlane.xlu0 %3791  ;;  %v3789_v50 = vpop.xlane.xlu1 %3788 }
 0x93f   :  { %7899 = vpow2.f32 %v3848_v51  ;;  %v3834_v36 = vsub.f32 %v9298_v25, %v3792_v32  ;;  %v3833_v40 = vsub.f32 %v9296_v22, %v3789_v50 }
 0x941   :  { %v3852_v33 = vmul.f32 1.442695, %v3834_v36  ;;  %v3850_v47 = vmul.f32 1.442695, %v3833_v40 }
 0x942   :  { %v3795_v41 = vpop.xlane.xlu0 %3794  ;;  %v3798_v9 = vpop.xlane.xlu1 %3797 }
 0x943   :  { %7901 = vpow2.f32 %v3852_v33  ;;  %v3835_v30 = vsub.f32 %v9306_v49, %v3795_v41  ;;  %v3836_v35 = vsub.f32 %v9304_v43, %v3798_v9 }
 0x944   :  { %7903 = vpow2.f32 %v3850_v47 }
 0x945   :  { %v3854_v5 = vmul.f32 1.442695, %v3835_v30  ;;  %v3856_v24 = vmul.f32 1.442695, %v3836_v35 }
 0x946   :  { %v3801_v23 = vpop.xlane.xlu0 %3800  ;;  %v3804_v18 = vpop.xlane.xlu1 %3803 }
 0x947   :  { %7905 = vpow2.f32 %v3854_v5  ;;  %v3837_v51 = vsub.f32 %v9312_v13, %v3801_v23  ;;  %v3838_v25 = vsub.f32 %v9314_v54, %v3804_v18 }
 0x948   :  { %7907 = vpow2.f32 %v3856_v24 }
 0x949   :  { %v3858_v22 = vmul.f32 1.442695, %v3837_v51  ;;  %v3860_v32 = vmul.f32 1.442695, %v3838_v25 }
 0x94a   :  { %v3807_v50 = vpop.xlane.xlu0 %3806  ;;  %v3810_v36 = vpop.xlane.xlu1 %3809 }
 0x94b   :  { %7909 = vpow2.f32 %v3858_v22  ;;  %v3839_v49 = vsub.f32 %v9322_v63, %v3807_v50  ;;  %v3840_v43 = vsub.f32 %v9320_v27, %v3810_v36 }
 0x94c   :  { %v9375_v40 = vpop.eup %7899  ;;  %7911 = vpow2.f32 %v3860_v32 }
 0x94d   :  { %v3862_v33 = vmul.f32 1.442695, %v3839_v49  ;;  %v3864_v47 = vmul.f32 1.442695, %v3840_v43  ;;  %v3880_v13 = vsel %vm831_vm3, %v9375_v40, 0.0 }
 0x94e   :  { %v3813_v41 = vpop.xlane.xlu0 %3812  ;;  %3881 = vadd.xlane.f32.xlu1 %v3880_v13  ;;  %v3816_v54 = vpop.xlane.xlu1 %3815 }
 0x94f   :  { %7913 = vpow2.f32 %v3862_v33  ;;  %v3841_v9 = vsub.f32 %v9328_v0, %v3813_v41  ;;  %v3842_v30 = vsub.f32 %v9330_v1, %v3816_v54 }
 0x950   :  { %v9381_v35 = vpop.eup %7901  ;;  %7915 = vpow2.f32 %v3864_v47 }
 0x951   :  { %v9383_v27 = vpop.eup %7903  ;;  %v3866_v63 = vmul.f32 1.442695, %v3841_v9  ;;  %v3868_v5 = vmul.f32 1.442695, %v3842_v30  ;;  %v3886_v24 = vsel %vm831_vm3, %v9381_v35, 0.0 }
 0x952   :  { %v3819_v23 = vpop.xlane.xlu0 %3818  ;;  %3887 = vadd.xlane.f32.xlu1 %v3886_v24  ;;  %v3883_v18 = vsel %vm831_vm3, %v9383_v27, 0.0  ;;  %v3822_v51 = vpop.xlane.xlu1 %3821 }
 0x953   :  { %7917 = vpow2.f32 %v3866_v63  ;;  %v3843_v0 = vsub.f32 %v9338_v29, %v3819_v23  ;;  %3884 = vadd.xlane.f32.xlu0 %v3883_v18  ;;  %v3844_v1 = vsub.f32 %v9336_v12, %v3822_v51 }
 0x954   :  { %v9391_v25 = vpop.eup %7905  ;;  %7919 = vpow2.f32 %v3868_v5 }
 0x955   :  { %v9393_v22 = vpop.eup %7907  ;;  %v3870_v32 = vmul.f32 1.442695, %v3843_v0  ;;  %v3872_v50 = vmul.f32 1.442695, %v3844_v1  ;;  %v3889_v36 = vsel %vm831_vm3, %v9391_v25, 0.0 }
 0x956   :  { %v3825_v49 = vpop.xlane.xlu0 %3824  ;;  %v3892_v43 = vsel %vm831_vm3, %v9393_v22, 0.0  ;;  %v3828_v33 = vpop.xlane.xlu1 %3827 }
 0x957   :  { %7921 = vpow2.f32 %v3870_v32  ;;  %v3845_v29 = vsub.f32 %v9344_v31, %v3825_v49  ;;  %3890 = vadd.xlane.f32.xlu0 %v3889_v36  ;;  %3893 = vadd.xlane.f32.xlu1 %v3892_v43  ;;  %v3846_v12 = vsub.f32 %v9346_v10, %v3828_v33 }
 0x958   :  { %v9401_v47 = vpop.eup %7909  ;;  %7923 = vpow2.f32 %v3872_v50 }
 0x959   :  { %v9403_v13 = vpop.eup %7911  ;;  %v3874_v41 = vmul.f32 1.442695, %v3845_v29  ;;  %v3876_v54 = vmul.f32 1.442695, %v3846_v12  ;;  %v3895_v9 = vsel %vm831_vm3, %v9401_v47, 0.0 }
 0x95a   :  { %v3831_v30 = vpop.xlane.xlu0 %3830  ;;  %v3898_v63 = vsel %vm831_vm3, %v9403_v13, 0.0 }
 0x95b   :  { %7925 = vpow2.f32 %v3874_v41  ;;  %v3847_v31 = vsub.f32 %v9352_v61, %v3831_v30  ;;  %3896 = vadd.xlane.f32.xlu0 %v3895_v9  ;;  %3899 = vadd.xlane.f32.xlu1 %v3898_v63  ;;  %v10687_v30 = vpack.i.bf16 %v8931_v56, %v8929_v58  ;;  %v10688_v63 = vpack.i.bf16 %v9252_v34, %v9248_v28 }
 0x95c   :  { %v9410_v10 = vpop.eup %7913  ;;  %7927 = vpow2.f32 %v3876_v54  ;;  %v10691_v58 = vpack.i.bf16 %v9264_v3, %v9260_v16  ;;  %v10692_v56 = vpack.i.bf16 %v9246_v11, %v9244_v57 }
 0x95d   :  { %v9412_v5 = vpop.eup %7915  ;;  %v3878_v24 = vmul.f32 1.442695, %v3847_v31  ;;  %v3901_v23 = vsel %vm831_vm3, %v9410_v10, 0.0  ;;  %v10689_v31 = vpack.i.bf16 %v8943_v48, %v8939_v46  ;;  %v10696_v46 = vpack.i.bf16 %v8949_v53, %v8945_v17  ;;  %v4063_v48 = vpop.permute.xlu1 %4062 }
 0x95e   :  { %v4016_v18 = vpop.permute.xlu0 %4015  ;;  %v3904_v51 = vsel %vm831_vm3, %v9412_v5, 0.0 }
 0x95f   :  { %7929 = vpow2.f32 %v3878_v24  ;;  %3902 = vadd.xlane.f32.xlu0 %v3901_v23  ;;  %3905 = vadd.xlane.f32.xlu1 %v3904_v51 }
 0x960   :  { %v9418_v0 = vpop.eup %7917  ;;  %7437 = vmatpush3.bf16.msra.mxu1 %v4016_v18 }
 0x961   :  { %v9420_v61 = vpop.eup %7919  ;;  %v3907_v1 = vsel %vm831_vm3, %v9418_v0, 0.0  ;;  %7448 = vmatprep.subr.bf16.mxu1 %v10685_v60  ;;  %v4110_v57 = vpop.permute.xlu1 %4109 }
 0x962   :  { %v3910_v32 = vsel %vm831_vm3, %v9420_v61, 0.0 }
 0x963   :  { %3908 = vadd.xlane.f32.xlu0 %v3907_v1  ;;  %3911 = vadd.xlane.f32.xlu1 %v3910_v32 }
 0x964   :  { %v9427_v50 = vpop.eup %7921 }
 0x965   :  { %v9429_v36 = vpop.eup %7923  ;;  %v3913_v49 = vsel %vm831_vm3, %v9427_v50, 0.0  ;;  %v9491_v11 = vpop.permute.xlu1 %4203 }
 0x966   :  { %v3916_v43 = vsel %vm831_vm3, %v9429_v36, 0.0 }
 0x967   :  { %3914 = vadd.xlane.f32.xlu0 %v3913_v49  ;;  %3917 = vadd.xlane.f32.xlu1 %v3916_v43 }
 0x968   :  { %v9435_v33 = vpop.eup %7925 }
 0x969   :  { %v9437_v29 = vpop.eup %7927  ;;  %v3919_v12 = vsel %vm831_vm3, %v9435_v33, 0.0 }
 0x96a   :  { %v3922_v41 = vsel %vm831_vm3, %v9437_v29, 0.0 }
 0x96b   :  { %3920 = vadd.xlane.f32.xlu0 %v3919_v12  ;;  %3923 = vadd.xlane.f32.xlu1 %v3922_v41 }
 0x96c   :  { %v9443_v54 = vpop.eup %7929 }
 0x96d   :  { %v3925_v9 = vsel %vm831_vm3, %v9443_v54, 0.0 }
 0x96f   :  { %3926 = vadd.xlane.f32.xlu0 %v3925_v9 }
 0x97c   :  { %4297 = vrot.lane.b32.xlu1 %v8293_v42, %s8072_s27  ;;  %v10690_v42 = vpack.i.bf16 %v8925_v14, %v8923_v7  ;;  %v10694_v7 = vpack.i.bf16 %v8937_v62, %v8933_v26  ;;  %v10695_v14 = vpack.i.bf16 %v9258_v37, %v9254_v44 }
 0x980   :  { %7579 = vrot.lane.b32.xlu1 %v10687_v30, %s8073_s28 }
 0x984   :  { %7589 = vrot.lane.b32.xlu1 %v10688_v63, %s8074_s29 }
 0x985   :  { %4250 = vrot.lane.b32.xlu0 %v8282_v39, %s8072_s27  ;;  %v10693_v39 = vpack.i.bf16 %v8955_v2, %v8951_v21  ;;  %v4157_v2 = vpop.permute.xlu0 %4156 }
 0x988   :  { %7599 = vrot.lane.b32.xlu1 %v10689_v31, %s8073_s28 }
 0x989   :  { %7574 = vrot.lane.b32.xlu0 %v10690_v42, %s8073_s28 }
 0x98c   :  { %7609 = vrot.lane.b32.xlu1 %v10691_v58, %s8074_s29 }
 0x98d   :  { %7584 = vrot.lane.b32.xlu0 %v10692_v56, %s8074_s29 }
 0x990   :  { %7619 = vrot.lane.b32.xlu1 %v10693_v39, %s8073_s28 }
 0x991   :  { %7594 = vrot.lane.b32.xlu0 %v10694_v7, %s8073_s28 }
 0x995   :  { %7604 = vrot.lane.b32.xlu0 %v10695_v14, %s8074_s29 }
 0x999   :  { %7614 = vrot.lane.b32.xlu0 %v10696_v46, %s8073_s28 }
 0x9d7   :  { %v3882_v21 = vpop.xlane.xlu1 %3881 }
 0x9d8   :  { %7931 = vrcp.f32 %v3882_v21 }
 0x9db   :  { %v3888_v28 = vpop.xlane.xlu1 %3887 }
 0x9dc   :  { %v3885_v26 = vpop.xlane.xlu0 %3884 }
 0x9dd   :  { %7933 = vrcp.f32 %v3885_v26 }
 0x9de   :  { %7935 = vrcp.f32 %v3888_v28 }
 0x9e0   :  { %v3891_v62 = vpop.xlane.xlu0 %3890  ;;  %v3894_v34 = vpop.xlane.xlu1 %3893 }
 0x9e1   :  { %7937 = vrcp.f32 %v3891_v62 }
 0x9e2   :  { %7939 = vrcp.f32 %v3894_v34 }
 0x9e4   :  { %v3897_v44 = vpop.xlane.xlu0 %3896  ;;  %v3900_v37 = vpop.xlane.xlu1 %3899 }
 0x9e5   :  { %7941 = vrcp.f32 %v3897_v44  ;;  %v7932_v17 = vpop.eup %7931 }
 0x9e6   :  { %7943 = vrcp.f32 %v3900_v37  ;;  %v3944_v24 = vmul.f32 %v7932_v17, %v9375_v40 }
 0x9e8   :  { %v3903_v53 = vpop.xlane.xlu0 %3902  ;;  %v3906_v16 = vpop.xlane.xlu1 %3905 }
 0x9e9   :  { %7945 = vrcp.f32 %v3903_v53 }
 0x9ea   :  { %v7934_v3 = vpop.eup %7933  ;;  %7947 = vrcp.f32 %v3906_v16 }
 0x9eb   :  { %v3945_v23 = vmul.f32 %v7934_v3, %v9383_v27  ;;  %v7936_v18 = vpop.eup %7935  ;;  %v7695_v3 = vld [vmem:[%s10626_s2 + $0x8] sm:$0xff]  }
 0x9ec   :  { %v3909_v51 = vpop.xlane.xlu0 %3908  ;;  %v3912_v1 = vpop.xlane.xlu1 %3911  ;;  %v3946_v43 = vmul.f32 %v7936_v18, %v9381_v35 }
 0x9ed   :  { %v3960_v32 = vpack.c.bf16 %v3945_v23, %v3944_v24  ;;  %7949 = vrcp.f32 %v3909_v51 }
 0x9ee   :  { %v7938_v49 = vpop.eup %7937  ;;  %7951 = vrcp.f32 %v3912_v1 }
 0x9ef   :  { %v3947_v12 = vmul.f32 %v7938_v49, %v9391_v25  ;;  %7433 = vmatmul.mubr.msk.bf16.vlgmr.msra.gmra.mxu0 %vm831_vm3, %v3960_v32  ;;  %v7940_v41 = vpop.eup %7939 }
 0x9f0   :  { %7443 = vmatpush3.bf16.msra.mxu0 %v4063_v48  ;;  %v3915_v9 = vpop.xlane.xlu0 %3914  ;;  %v3918_v40 = vpop.xlane.xlu1 %3917  ;;  %7444 = vmatprep.mubr.msk.bf16.mxu0 %vm8061_vm1, %v10685_v60  ;;  %v3948_v63 = vmul.f32 %v7940_v41, %v9393_v22 }
 0x9f1   :  { %v3961_v27 = vpack.c.bf16 %v3947_v12, %v3946_v43  ;;  %7953 = vrcp.f32 %v3915_v9  ;;  %7454 = vmatprep.subr.bf16.mxu0 %v10685_v60  ;;  %v10697_v12 = vpack.i.bf16 %v9270_v59, %v9266_v55  ;;  %v10699_v59 = vpack.i.bf16 %v8961_v45, %v8957_v20 }
 0x9f2   :  { %v7942_v30 = vpop.eup %7941  ;;  %7955 = vrcp.f32 %v3918_v40  ;;  %v10701_v45 = vpack.i.bf16 %v9282_v15, %v9278_v19 }
 0x9f3   :  { %v3949_v35 = vmul.f32 %v7942_v30, %v9401_v47  ;;  %7439 = vmatmul.mubr.msk.bf16.vlgmr.msra.gmra.mxu1 %vm831_vm3, %v3961_v27  ;;  %v7944_v25 = vpop.eup %7943 }
 0x9f4   :  { %7449 = vmatpush3.bf16.msra.mxu1 %v4110_v57  ;;  %v3921_v31 = vpop.xlane.xlu0 %3920  ;;  %v3924_v42 = vpop.xlane.xlu1 %3923  ;;  %7450 = vmatprep.mubr.msk.bf16.mxu1 %vm8061_vm1, %v10685_v60  ;;  %v3950_v39 = vmul.f32 %v7944_v25, %v9403_v13 }
 0x9f5   :  { %v3962_v58 = vpack.c.bf16 %v3949_v35, %v3948_v63  ;;  %7957 = vrcp.f32 %v3921_v31  ;;  %7460 = vmatprep.subr.bf16.mxu1 %v10685_v60  ;;  %v10698_v63 = vpack.i.bf16 %v9276_v52, %v9272_v4  ;;  %v10700_v52 = vpack.i.bf16 %v8967_v8, %v8963_v6  ;;  %v10702_v8 = vld [vmem:[#allocation20_spill] sm:$0xff] }
 0x9f6   :  { %v7946_v56 = vpop.eup %7945  ;;  %7959 = vrcp.f32 %v3924_v42 }
 0x9f7   :  { %v3951_v22 = vmul.f32 %v7946_v56, %v9410_v10  ;;  %7445 = vmatmul.mubr.msk.bf16.vlgmr.msra.gmra.mxu0 %vm831_vm3, %v3962_v58  ;;  %v7948_v47 = vpop.eup %7947 }
 0x9f8   :  { %7455 = vmatpush3.bf16.msra.mxu0 %v4157_v2  ;;  %v3927_v7 = vpop.xlane.xlu0 %3926  ;;  %7456 = vmatprep.mubr.msk.bf16.mxu0 %vm8061_vm1, %v10685_v60  ;;  %v3952_v48 = vmul.f32 %v7948_v47, %v9412_v5  ;;  %v4298_v44 = vpop.permute.xlu1 %4297 }
 0x9f9   :  { %v3963_v14 = vpack.c.bf16 %v3951_v22, %v3950_v39  ;;  %7961 = vrcp.f32 %v3927_v7  ;;  %7466 = vmatprep.subr.bf16.mxu0 %v10685_v60 }
 0x9fa   :  { %v7950_v46 = vpop.eup %7949 }
 0x9fb   :  { %v3953_v13 = vmul.f32 %v7950_v46, %v9418_v0  ;;  %7451 = vmatmul.mubr.msk.bf16.vlgmr.msra.gmra.mxu1 %vm831_vm3, %v3963_v14  ;;  %v7952_v10 = vpop.eup %7951 }
 0x9fc   :  { %7461 = vmatpush3.bf16.msra.mxu1 %v9491_v11  ;;  %7462 = vmatprep.mubr.msk.bf16.mxu1 %vm8061_vm1, %v10685_v60  ;;  %v3954_v2 = vmul.f32 %v7952_v10, %v9420_v61  ;;  %v4251_v26 = vpop.permute.xlu0 %4250  ;;  %v7580_v15 = vpop.permute.xlu1 %7579 }
 0x9fd   :  { %v3964_v57 = vpack.c.bf16 %v3953_v13, %v3952_v48  ;;  %7472 = vmatprep.subr.bf16.mxu1 %v10685_v60 }
 0x9fe   :  { %v7954_v21 = vpop.eup %7953 }
 0x9ff   :  { %v3955_v28 = vmul.f32 %v7954_v21, %v9427_v50  ;;  %7457 = vmatmul.mubr.msk.bf16.vlgmr.msra.gmra.mxu0 %vm831_vm3, %v3964_v57  ;;  %v7956_v5 = vpop.eup %7955  ;;  %v10703_v21 = vpack.i.bf16 %v9288_v38, %v10702_v8 }
 0xa00   :  { %7467 = vmatpush3.bf16.msra.mxu0 %v4251_v26  ;;  %7468 = vmatprep.mubr.msk.bf16.mxu0 %vm8061_vm1, %v10685_v60  ;;  %v3956_v62 = vmul.f32 %v7956_v5, %v9429_v36  ;;  %v7575_v19 = vpop.permute.xlu0 %7574 }
 0xa01   :  { %v3965_v0 = vpack.c.bf16 %v3955_v28, %v3954_v2  ;;  %7478 = vmatprep.subr.bf16.mxu0 %v7695_v3  ;;  %v7576_v38 = vunpack.i.l.bf16 %v7575_v19 }
 0xa02   :  { %v7958_v11 = vpop.eup %7957 }
 0xa03   :  { %v3957_v34 = vmul.f32 %v7958_v11, %v9435_v33  ;;  %7463 = vmatmul.mubr.msk.bf16.vlgmr.msra.gmra.mxu1 %vm831_vm3, %v3965_v0  ;;  %v7960_v61 = vpop.eup %7959  ;;  %v7590_v0 = vpop.permute.xlu1 %7589 }
 0xa04   :  { %7473 = vmatpush3.bf16.msra.mxu1 %v4298_v44  ;;  %7474 = vmatprep.mubr.msk.bf16.mxu1 %vm8061_vm1, %v10685_v60  ;;  %v3958_v17 = vmul.f32 %v7960_v61, %v9437_v29  ;;  %v7696_v29 = vld [vmem:[%s10626_s2] sm:$0xff]   ;;  %v7585_v5 = vpop.permute.xlu0 %7584  ;;  %v7582_v44 = vunpack.i.h.bf16 %v7580_v15  ;;  %v7581_v61 = vunpack.i.l.bf16 %v7580_v15 }
 0xa05   :  { %v3966_v50 = vpack.c.bf16 %v3957_v34, %v3956_v62 }
 0xa06   :  { %v7962_v37 = vpop.eup %7961 }
 0xa07   :  { %v3959_v53 = vmul.f32 %v7962_v37, %v9443_v54  ;;  %7469 = vmatmul.mubr.msk.bf16.vlgmr.msra.gmra.mxu0 %vm831_vm3, %v3966_v50  ;;  %v7600_v62 = vpop.permute.xlu1 %7599  ;;  %v7577_v37 = vunpack.i.h.bf16 %v7575_v19 }
 0xa08   :  { %7479 = vmatpush3.bf16.msra.mxu0 %v7695_v3  ;;  %v7595_v11 = vpop.permute.xlu0 %7594 }
 0xa09   :  { %v3967_v16 = vpack.c.bf16 %v3959_v53, %v3958_v17  ;;  %7480 = vmatprep.subr.bf16.mxu0 %v7696_v29  ;;  %v7592_v17 = vunpack.i.h.bf16 %v7590_v0 }
 0xa0b   :  { %7475 = vmatmul.mubr.msk.bf16.vlgmr.msra.gmra.mxu1 %vm831_vm3, %v3967_v16  ;;  %v7610_v50 = vpop.permute.xlu1 %7609  ;;  %v10704_v16 = vld [vmem:[#allocation7_spill] sm:$0xff] }
 0xa0c   :  { %7481 = vmatpush3.bf16.msra.mxu0 %v7696_v29  ;;  %v7605_v34 = vpop.permute.xlu0 %7604  ;;  %v7587_v29 = vunpack.i.h.bf16 %v7585_v5 }
 0xa10   :  { %v9572_v53 = vpop.permute.xlu0 %7614 }
 0xa11   :  { %v7616_v15 = vunpack.i.l.bf16 %v9572_v53 }
 0xaaf   :  { %v4008_v36 = vpop.f32.mrf.mxu0 }
 0xab1   :  { %v7434_v33 = vpop.f32.mrf.mxu0 }
 0xab2   :  { %v10705_v33 = vld [vmem:[#allocation6_spill] sm:$0xff] }
 0xab3   :  { %v4011_v24 = vpop.f32.mrf.mxu0  ;;  %v4055_v23 = vpop.f32.mrf.mxu1  ;;  %v4538_v3 = vsel %vm417_vm2, %v10705_v33, %v7581_v61 }
 0xab4   :  { %v7623_v60 = vpack.i.bf16 %v4011_v24, %v4008_v36  ;;  %v4539_v36 = vsel %vm417_vm2, %v10704_v16, %v7582_v44  ;;  %v7591_v24 = vunpack.i.l.bf16 %v7590_v0 }
 0xab5   :  { %v7435_v18 = vpop.f32.mrf.mxu0  ;;  %v7440_v51 = vpop.f32.mrf.mxu1 }
 0xab6   :  { %7624 = vrot.lane.b32.xlu0 %v7623_v60, %s8075_s12  ;;  %v10707_v18 = vld [vmem:[#allocation4_spill] sm:$0xff] }
 0xab7   :  { %v4058_v54 = vpop.f32.mrf.mxu1  ;;  %v4102_v1 = vpop.f32.mrf.mxu0  ;;  %v4536_v51 = vsel %vm417_vm2, %v10707_v18, %v7576_v38  ;;  %v10713_v38 = vld [vmem:[#allocation14_spill] sm:$0xff] }
 0xab8   :  { %v7633_v32 = vpack.i.bf16 %v4058_v54, %v4055_v23  ;;  %v10706_v23 = vld [vmem:[#allocation5_spill] sm:$0xff]  ;;  %v7586_v54 = vunpack.i.l.bf16 %v7585_v5 }
 0xab9   :  { %v7441_v49 = vpop.f32.mrf.mxu1  ;;  %v7446_v43 = vpop.f32.mrf.mxu0  ;;  %v4537_v60 = vsel %vm417_vm2, %v10706_v23, %v7577_v37 }
 0xaba   :  { %7629 = vrot.lane.b32.xlu0 %v10697_v12, %s8074_s29  ;;  %7634 = vrot.lane.b32.xlu1 %v7633_v32, %s8075_s12  ;;  %v7602_v32 = vunpack.i.h.bf16 %v7600_v62  ;;  %v7601_v49 = vunpack.i.l.bf16 %v7600_v62  ;;  %v7597_v43 = vunpack.i.h.bf16 %v7595_v11  ;;  %v7620_v12 = vpop.permute.xlu1 %7619 }
 0xabb   :  { %v4105_v41 = vpop.f32.mrf.mxu0  ;;  %v4149_v9 = vpop.f32.mrf.mxu1 }
 0xabc   :  { %v7643_v40 = vpack.i.bf16 %v4105_v41, %v4102_v1  ;;  %v4555_v1 = vsel %vm831_vm3, %v4539_v36, %v7592_v17  ;;  %v7596_v41 = vunpack.i.l.bf16 %v7595_v11 }
 0xabd   :  { %v7447_v27 = vpop.f32.mrf.mxu0  ;;  %v7452_v30 = vpop.f32.mrf.mxu1 }
 0xabe   :  { %7639 = vrot.lane.b32.xlu1 %v10698_v63, %s8074_s29  ;;  %7644 = vrot.lane.b32.xlu0 %v7643_v40, %s8075_s12  ;;  %v7611_v40 = vunpack.i.l.bf16 %v7610_v50  ;;  %v4554_v30 = vsel %vm831_vm3, %v4538_v3, %v7591_v24  ;;  %v7606_v63 = vunpack.i.l.bf16 %v7605_v34  ;;  %v10714_v3 = vld [vmem:[#allocation13_spill] sm:$0xff]  ;;  %v10715_v24 = vld [vmem:[#allocation3_spill] sm:$0xff] }
 0xabf   :  { %v4152_v35 = vpop.f32.mrf.mxu1  ;;  %v4196_v25 = vpop.f32.mrf.mxu0 }
 0xac0   :  { %v7653_v31 = vpack.i.bf16 %v4152_v35, %v4149_v9  ;;  %v7612_v9 = vunpack.i.h.bf16 %v7610_v50 }
 0xac1   :  { %v7453_v42 = vpop.f32.mrf.mxu1  ;;  %v7458_v55 = vpop.f32.mrf.mxu0 }
 0xac2   :  { %7649 = vrot.lane.b32.xlu0 %v10699_v59, %s8073_s28  ;;  %7654 = vrot.lane.b32.xlu1 %v7653_v31, %s8075_s12  ;;  %v4552_v31 = vsel %vm831_vm3, %v4536_v51, %v7586_v54  ;;  %v4553_v42 = vsel %vm831_vm3, %v4537_v60, %v7587_v29  ;;  %v7607_v55 = vunpack.i.h.bf16 %v7605_v34  ;;  %v7622_v59 = vunpack.i.h.bf16 %v7620_v12  ;;  %v10716_v51 = vld [vmem:[#allocation12_spill] sm:$0xff] }
 0xac3   :  { %v4199_v58 = vpop.f32.mrf.mxu0  ;;  %v4243_v56 = vpop.f32.mrf.mxu1  ;;  %v4544_v29 = vsel %vm417_vm2, %v10716_v51, %v7616_v15 }
 0xac4   :  { %v7663_v39 = vpack.i.bf16 %v4199_v58, %v4196_v25  ;;  %v10708_v58 = vld [vmem:[#allocation11_spill] sm:$0xff] }
 0xac5   :  { %v7459_v22 = vpop.f32.mrf.mxu0  ;;  %v7464_v4 = vpop.f32.mrf.mxu1 }
 0xac6   :  { %7659 = vrot.lane.b32.xlu1 %v10700_v52, %s8073_s28  ;;  %7664 = vrot.lane.b32.xlu0 %v7663_v39, %s8075_s12  ;;  %v10709_v39 = vld [vmem:[#allocation10_spill] sm:$0xff]  ;;  %v10710_v4 = vld [vmem:[#allocation9_spill] sm:$0xff] }
 0xac7   :  { %v4246_v47 = vpop.f32.mrf.mxu1  ;;  %v4290_v7 = vpop.f32.mrf.mxu0  ;;  %v4542_v22 = vsel %vm417_vm2, %v10709_v39, %v7601_v49  ;;  %v4541_v52 = vsel %vm417_vm2, %v10710_v4, %v7597_v43 }
 0xac8   :  { %v7673_v14 = vpack.i.bf16 %v4246_v47, %v4243_v56  ;;  %v4543_v56 = vsel %vm417_vm2, %v10708_v58, %v7602_v32 }
 0xac9   :  { %v7465_v46 = vpop.f32.mrf.mxu1  ;;  %v7470_v20 = vpop.f32.mrf.mxu0 }
 0xaca   :  { %7669 = vrot.lane.b32.xlu0 %v10701_v45, %s8074_s29  ;;  %7674 = vrot.lane.b32.xlu1 %v7673_v14, %s8075_s12  ;;  %v4558_v46 = vsel %vm831_vm3, %v4542_v22, %v7611_v40  ;;  %v4559_v20 = vsel %vm831_vm3, %v4543_v56, %v7612_v9 }
 0xacb   :  { %v4293_v48 = vpop.f32.mrf.mxu0  ;;  %v4337_v13 = vpop.f32.mrf.mxu1 }
 0xacc   :  { %v7683_v10 = vpack.i.bf16 %v4293_v48, %v4290_v7  ;;  %v10711_v7 = vld [vmem:[#allocation8_spill] sm:$0xff] }
 0xacd   :  { %v7471_v57 = vpop.f32.mrf.mxu0  ;;  %v7476_v6 = vpop.f32.mrf.mxu1  ;;  %v4540_v14 = vsel %vm417_vm2, %v10711_v7, %v7596_v41 }
 0xace   :  { %7679 = vrot.lane.b32.xlu1 %v10703_v21, %s8074_s29  ;;  %7684 = vrot.lane.b32.xlu0 %v7683_v10, %s8075_s12  ;;  %v4556_v10 = vsel %vm831_vm3, %v4540_v14, %v7606_v63  ;;  %v7621_v57 = vunpack.i.l.bf16 %v7620_v12  ;;  %v4557_v21 = vsel %vm831_vm3, %v4541_v52, %v7607_v55 }
 0xacf   :  { %v4340_v2 = vpop.f32.mrf.mxu1 }
 0xad0   :  { %v7688_v28 = vpack.i.bf16 %v4340_v2, %v4337_v13  ;;  %v10712_v2 = vld [vmem:[#allocation15_spill] sm:$0xff]  ;;  %v4546_v17 = vsel %vm417_vm2, %v10713_v38, %v7621_v57 }
 0xad1   :  { %v7477_v26 = vpop.f32.mrf.mxu1 }
 0xad2   :  { %7689 = vrot.lane.b32.xlu1 %v7688_v28, %s8075_s12  ;;  %v9602_v28 = vsel %vm417_vm2, %v10712_v2, %v7622_v59  ;;  %v7617_v26 = vunpack.i.h.bf16 %v9572_v53 }
 0xad4   :  { %v4545_v53 = vsel %vm417_vm2, %v10714_v3, %v7617_v26 }
 0xb28   :  { %v7625_v27 = vpop.permute.xlu0 %7624 }
 0xb29   :  { %v7627_v35 = vunpack.i.h.bf16 %v7625_v27  ;;  %v7626_v25 = vunpack.i.l.bf16 %v7625_v27 }
 0xb2b   :  { %v4570_v47 = vsel %vm4568_vm4, %v4553_v42, %v7627_v35  ;;  %v4569_v45 = vsel %vm4568_vm4, %v4552_v31, %v7626_v25 }
 0xb2c   :  { %v7630_v48 = vpop.permute.xlu0 %7629  ;;  %v7635_v13 = vpop.permute.xlu1 %7634  ;;  %v6851_v19 = vpack.c.bf16 %v4570_v47, %v4570_v47  ;;  %v4585_v5 = vpack.c.bf16 %v4570_v47, %v4569_v45 }
 0xb2d   :  { %v7637_v6 = vunpack.i.h.bf16 %v7635_v13  ;;  %v7636_v8 = vunpack.i.l.bf16 %v7635_v13  ;;  %v7632_v62 = vunpack.i.h.bf16 %v7630_v48  ;;  %v7631_v34 = vunpack.i.l.bf16 %v7630_v48 }
 0xb2e   :  { %v4615_v23 = vrot.slane %v6851_v19, %v10715_v24  ;;  %v4608_v54 = vrot.slane %v4585_v5, %v10715_v24  ;;  %v10717_v5 = vld [vmem:[#allocation17_spill] sm:$0xff] }
 0xb2f   :  { %v4571_v0 = vsel %vm4568_vm4, %v4554_v30, %v7636_v8  ;;  %v4572_v11 = vsel %vm4568_vm4, %v4555_v1, %v7637_v6  ;;  %v4561_v49 = vsel %vm831_vm3, %v4545_v53, %v7632_v62  ;;  %v4560_v43 = vsel %vm831_vm3, %v4544_v29, %v7631_v34  ;;  %v10719_v53 = vld [vmem:[#allocation19_spill] sm:$0xff] }
 0xb30   :  { %v4586_v44 = vpack.c.bf16 %v4572_v11, %v4571_v0  ;;  %v6852_v61 = vpack.c.bf16 %v4572_v11, %v4572_v11  ;;  %v7645_v50 = vpop.permute.xlu0 %7644  ;;  %v7640_v37 = vpop.permute.xlu1 %7639  ;;  %v10718_v11 = vld [vmem:[#allocation16_spill] sm:$0xff] }
 0xb31   :  { %v7647_v16 = vunpack.i.h.bf16 %v7645_v50  ;;  %v7646_v36 = vunpack.i.l.bf16 %v7645_v50  ;;  %v7641_v33 = vunpack.i.l.bf16 %v7640_v37  ;;  %v7642_v63 = vunpack.i.h.bf16 %v7640_v37 }
 0xb32   :  { %v4625_v60 = vrot.slane %v4586_v44, %v10715_v24  ;;  %v4632_v18 = vrot.slane %v6852_v61, %v10715_v24 }
 0xb33   :  { %v4574_v1 = vsel %vm4568_vm4, %v4557_v21, %v7647_v16  ;;  %v4573_v32 = vsel %vm4568_vm4, %v4556_v10, %v7646_v36  ;;  %v4562_v35 = vsel %vm831_vm3, %v4546_v17, %v7641_v33  ;;  %v4563_v15 = vsel %vm831_vm3, %v9602_v28, %v7642_v63 }
 0xb34   :  { %v4765_v12 = vcombine.low %v4615_v23, %v4632_v18  ;;  %v6861_v41 = vcombine.high %v4615_v23, %v4632_v18  ;;  %v7650_v9 = vpop.permute.xlu0 %7649  ;;  %v7655_v40 = vpop.permute.xlu1 %7654  ;;  %v6853_v27 = vpack.c.bf16 %v4574_v1, %v4574_v1  ;;  %v4587_v30 = vpack.c.bf16 %v4574_v1, %v4573_v32  ;;  %v10720_v23 = vld [vmem:[#allocation18_spill] sm:$0xff] }
 0xb35   :  { %v4748_v25 = vcombine.low %v4608_v54, %v4625_v60  ;;  %v6860_v31 = vcombine.high %v4608_v54, %v4625_v60  ;;  %v7657_v42 = vunpack.i.h.bf16 %v7655_v40  ;;  %v7656_v55 = vunpack.i.l.bf16 %v7655_v40 }
 0xb36   :  { %v4773_v59 = vrot.slane %v4765_v12, %v10715_v24  ;;  %v4780_v58 = vrot.slane %v6861_v41, %v10715_v24  ;;  %v7652_v56 = vunpack.i.h.bf16 %v7650_v9  ;;  %v7651_v39 = vunpack.i.l.bf16 %v7650_v9 }
 0xb37   :  { %v4649_v22 = vrot.slane %v6853_v27, %v10715_v24  ;;  %v4642_v4 = vrot.slane %v4587_v30, %v10715_v24  ;;  %v4575_v52 = vsel %vm4568_vm4, %v4558_v46, %v7656_v55  ;;  %v4576_v47 = vsel %vm4568_vm4, %v4559_v20, %v7657_v42 }
 0xb38   :  { %v7665_v7 = vpop.permute.xlu0 %7664  ;;  %v7660_v14 = vpop.permute.xlu1 %7659  ;;  %v4588_v45 = vpack.c.bf16 %v4576_v47, %v4575_v52  ;;  %v6854_v48 = vpack.c.bf16 %v4576_v47, %v4576_v47  ;;  %v4756_v8 = vrot.slane %v4748_v25, %v10715_v24  ;;  %v4763_v21 = vrot.slane %v6860_v31, %v10715_v24 }
 0xb39   :  { %v7667_v13 = vunpack.i.h.bf16 %v7665_v7  ;;  %v7666_v10 = vunpack.i.l.bf16 %v7665_v7  ;;  %v7662_v57 = vunpack.i.h.bf16 %v7660_v14  ;;  %v7661_v6 = vunpack.i.l.bf16 %v7660_v14 }
 0xb3a   :  { %v4659_v2 = vrot.slane %v4588_v45, %v10715_v24  ;;  %v4666_v26 = vrot.slane %v6854_v48, %v10715_v24  ;;  %v4781_v19 = vcombine.low %v4773_v59, %v4780_v58  ;;  %v4549_v0 = vsel %vm417_vm2, %v10717_v5, %v7652_v56 }
 0xb3b   :  { %v4578_v46 = vsel %vm4568_vm4, %v4561_v49, %v7667_v13  ;;  %v4577_v20 = vsel %vm4568_vm4, %v4560_v43, %v7666_v10  ;;  %v4548_v62 = vsel %vm417_vm2, %v10718_v11, %v7651_v39  ;;  %v4764_v36 = vcombine.low %v4756_v8, %v4763_v21 }
 0xb3c   :  { %v7670_v34 = vpop.permute.xlu0 %7669  ;;  %v7675_v44 = vpop.permute.xlu1 %7674  ;;  %v4782_v61 = vcombine.low %v4642_v4, %v4659_v2  ;;  %v6862_v50 = vcombine.high %v4642_v4, %v4659_v2  ;;  %v4799_v37 = vcombine.low %v4649_v22, %v4666_v26  ;;  %v6863_v38 = vcombine.high %v4649_v22, %v4666_v26 }
 0xb3d   :  { %v6855_v17 = vpack.c.bf16 %v4578_v46, %v4578_v46  ;;  %v4589_v16 = vpack.c.bf16 %v4578_v46, %v4577_v20  ;;  %v7672_v33 = vunpack.i.h.bf16 %v7670_v34  ;;  %v4551_v28 = vsel %vm417_vm2, %v10719_v53, %v7662_v57  ;;  %7482 = vmatprep.mubr.msk.bf16.mxu0 %vm284_vm0, %v4764_v36 }
 0xb3e   :  { %v4807_v3 = vrot.slane %v4799_v37, %v10715_v24  ;;  %v4550_v60 = vsel %vm417_vm2, %v10720_v23, %v7661_v6  ;;  %v7677_v18 = vunpack.i.h.bf16 %v7675_v44  ;;  %v7671_v51 = vunpack.i.l.bf16 %v7670_v34  ;;  %7483 = vmatmul.mubr.msk.bf16.vlgmr.msra.gmra.mxu0 %vm284_vm0, %v4781_v19  ;;  %v9686_v23 = vld [vmem:[%s10627_s3] ss:$0 sm:$0xff] }
 0xb3f   :  { %v7676_v29 = vunpack.i.l.bf16 %v7675_v44  ;;  %v4790_v32 = vrot.slane %v4782_v61, %v10715_v24  ;;  %v4797_v49 = vrot.slane %v6862_v50, %v10715_v24  ;;  %v4814_v43 = vrot.slane %v6863_v38, %v10715_v24 }
 0xb40   :  { %v7685_v54 = vpop.permute.xlu0 %7684  ;;  %v7680_v1 = vpop.permute.xlu1 %7679  ;;  %v4580_v12 = vsel %vm4568_vm4, %v4563_v15, %v7677_v18  ;;  %v4565_v40 = vsel %vm831_vm3, %v4549_v0, %v7672_v33  ;;  %v4683_v25 = vrot.slane %v6855_v17, %v10715_v24  ;;  %v4676_v59 = vrot.slane %v4589_v16, %v10715_v24 }
 0xb41   :  { %v7687_v41 = vunpack.i.h.bf16 %v7685_v54  ;;  %v7686_v9 = vunpack.i.l.bf16 %v7685_v54  ;;  %v4579_v27 = vsel %vm4568_vm4, %v4562_v35, %v7676_v29  ;;  %v6856_v30 = vpack.c.bf16 %v4580_v12, %v4580_v12 }
 0xb42   :  { %v7682_v63 = vunpack.i.h.bf16 %v7680_v1  ;;  %v4590_v31 = vpack.c.bf16 %v4580_v12, %v4579_v27  ;;  %v4798_v55 = vcombine.low %v4790_v32, %v4797_v49  ;;  %v4564_v58 = vsel %vm831_vm3, %v4548_v62, %v7671_v51  ;;  %v8029_v27 = vld [vmem:[%s10625_s0] sm:$0xf] }
 0xb43   :  { %v4582_v42 = vsel %vm4568_vm4, %v4565_v40, %v7687_v41  ;;  %v4700_v56 = vrot.slane %v6856_v30, %v10715_v24  ;;  %v7681_v39 = vunpack.i.l.bf16 %v7680_v1  ;;  %v4581_v35 = vsel %vm4568_vm4, %v4564_v58, %v7686_v9  ;;  %v8028_v9 = vld [vmem:[%s10625_s0 + $0x14] sm:$0xf] }
 0xb44   :  { %v7690_v22 = vpop.permute.xlu1 %7689  ;;  %v4693_v4 = vrot.slane %v4590_v31, %v10715_v24  ;;  %7486 = vmatprep.mubr.msk.bf16.mxu0 %vm284_vm0, %v4798_v55  ;;  %v4815_v52 = vcombine.low %v4807_v3, %v4814_v43  ;;  %v6857_v45 = vpack.c.bf16 %v4582_v42, %v4582_v42  ;;  %v4567_v48 = vsel %vm831_vm3, %v4551_v28, %v7682_v63  ;;  %v8027_v43 = vld [vmem:[%s10625_s0 + $0x4] sm:$0xf]  ;;  %v8030_v55 = vld [vmem:[%s10625_s0 + $0x10] sm:$0xf] }
 0xb45   :  { %v7692_v47 = vunpack.i.h.bf16 %v7690_v22  ;;  %v4833_v7 = vcombine.low %v4683_v25, %v4700_v56  ;;  %v6865_v14 = vcombine.high %v4683_v25, %v4700_v56  ;;  %v7691_v57 = vunpack.i.l.bf16 %v7690_v22 }
 0xb46   :  { %v4816_v13 = vcombine.low %v4676_v59, %v4693_v4  ;;  %v6864_v10 = vcombine.high %v4676_v59, %v4693_v4  ;;  %v4591_v21 = vpack.c.bf16 %v4582_v42, %v4581_v35  ;;  %v4566_v2 = vsel %vm831_vm3, %v4550_v60, %v7681_v39  ;;  %7487 = vmatmul.mubr.msk.bf16.gmra.mxu0 %vm284_vm0, %v4815_v52  ;;  %v8031_v39 = vld [vmem:[%s10625_s0 + $0xc] sm:$0xf]  ;;  %v8032_v35 = vld [vmem:[%s10625_s0 + $0x8] sm:$0xf] }
 0xb47   :  { %v4584_v6 = vsel %vm4568_vm4, %v4567_v48, %v7692_v47  ;;  %v4841_v8 = vrot.slane %v4833_v7, %v10715_v24  ;;  %v4848_v46 = vrot.slane %v6865_v14, %v10715_v24  ;;  %v4583_v20 = vsel %vm4568_vm4, %v4566_v2, %v7691_v57  ;;  %v8033_v48 = vld [vmem:[%s10625_s0 + $0x1c] sm:$0xf] }
 0xb48   :  { %v6858_v26 = vpack.c.bf16 %v4584_v6, %v4584_v6  ;;  %v4824_v19 = vrot.slane %v4816_v13, %v10715_v24  ;;  %v4831_v15 = vrot.slane %v6864_v10, %v10715_v24  ;;  %v4592_v5 = vpack.c.bf16 %v4584_v6, %v4583_v20 }
 0xb49   :  { %v4717_v11 = vrot.slane %v6857_v45, %v10715_v24  ;;  %v4710_v34 = vrot.slane %v4591_v21, %v10715_v24  ;;  %v4849_v37 = vcombine.low %v4841_v8, %v4848_v46  ;;  %v8034_v21 = vld [vmem:[%s10625_s0 + $0x18] sm:$0xf] }
 0xb4a   :  { %v4734_v0 = vrot.slane %v6858_v26, %v10715_v24  ;;  %v4832_v62 = vcombine.low %v4824_v19, %v4831_v15  ;;  %v4727_v44 = vrot.slane %v4592_v5, %v10715_v24  ;;  %v8035_v26 = vld [vmem:[%s10625_s0 + $0x24] sm:$0xf]  ;;  %v8036_v19 = vld [vmem:[%s10625_s0 + $0x34] sm:$0xf]  ;;  %v8037_v5 = vld [vmem:[%s10625_s0 + $0x20] sm:$0xf] }
 0xb4c   :  { %v4867_v61 = vcombine.low %v4717_v11, %v4734_v0  ;;  %v6867_v50 = vcombine.high %v4717_v11, %v4734_v0  ;;  %7490 = vmatprep.mubr.msk.bf16.mxu0 %vm284_vm0, %v4832_v62  ;;  %v4850_v38 = vcombine.low %v4710_v34, %v4727_v44  ;;  %v6866_v17 = vcombine.high %v4710_v34, %v4727_v44 }
 0xb4e   :  { %v4858_v16 = vrot.slane %v4850_v38, %v10715_v24  ;;  %v4865_v36 = vrot.slane %v6866_v17, %v10715_v24  ;;  %v4875_v33 = vrot.slane %v4867_v61, %v10715_v24  ;;  %v4882_v3 = vrot.slane %v6867_v50, %v10715_v24  ;;  %7491 = vmatmul.mubr.msk.bf16.gmra.mxu0 %vm284_vm0, %v4849_v37  ;;  %v8038_v38 = vld [vmem:[%s10625_s0 + $0x30] sm:$0xf] }
 0xb50   :  { %v4866_v53 = vcombine.low %v4858_v16, %v4865_v36  ;;  %v4883_v28 = vcombine.low %v4875_v33, %v4882_v3  ;;  %v8039_v33 = vld [vmem:[%s10625_s0 + $0x2c] sm:$0xf] }
 0xb52   :  { %7494 = vmatprep.mubr.msk.bf16.mxu0 %vm284_vm0, %v4866_v53 }
 0xb56   :  { %7495 = vmatmul.mubr.msk.bf16.gmra.mxu0 %vm284_vm0, %v4883_v28  ;;  %v8040_v28 = vld [vmem:[%s10625_s0 + $0x28] sm:$0xf] }
 0xbfe   :  { %v7484_v60 = vpop.f32.mrf.mxu0 }
 0xbff   :  { %v4963_v18 = vadd.f32 %v7484_v60, %v9686_v23 }
 0xc00   :  { %v4954_v51 = vpop.f32.mrf.mxu0 }
 0xc01   :  { %v4955_v29 = vadd.f32 %v9686_v23, %v4954_v51  ;;  %v5035_v24 = vcombine.high %v4963_v18, %v4963_v18  ;;  %v9711_v59 = vadd.f32 %v8030_v55, %v4963_v18  ;;  %v8044_v55 = vld [vmem:[%s10625_s0 + $0x54] sm:$0xf] }
 0xc02   :  { %v7485_v54 = vpop.f32.mrf.mxu0 }
 0xc03   :  { %v5033_v1 = vcombine.high %v4955_v29, %v4955_v29  ;;  %v4966_v32 = vadd.f32 %v7485_v54, %v9686_v23  ;;  %v9700_v40 = vadd.f32 %v8028_v9, %v5035_v24  ;;  %v9705_v30 = vadd.f32 %v8029_v27, %v4955_v29  ;;  %v8041_v54 = vld [vmem:[%s10625_s0 + $0x3c] sm:$0xf]  ;;  %v8042_v27 = vld [vmem:[%s10625_s0 + $0x38] sm:$0xf] }
 0xc04   :  { %v4957_v49 = vpop.f32.mrf.mxu0 }
 0xc05   :  { %v9694_v12 = vadd.f32 %v8027_v43, %v5033_v1  ;;  %v4958_v41 = vadd.f32 %v9686_v23, %v4957_v49  ;;  %v5036_v25 = vcombine.high %v4966_v32, %v4966_v32  ;;  %v5155_v45 = vcombine.low %v9711_v59, %v9700_v40 }
 0xc06   :  { %v7488_v63 = vpop.f32.mrf.mxu0  ;;  %v9740_v2 = vadd.f32 %v8034_v21, %v4966_v32  ;;  %v8047_v21 = vld [vmem:[%s10625_s0 + $0x4c] sm:$0xf] }
 0xc07   :  { %v5034_v31 = vcombine.high %v4958_v41, %v4958_v41  ;;  %v4979_v42 = vadd.f32 %v7488_v63, %v9686_v23  ;;  %v5153_v56 = vcombine.low %v9705_v30, %v9694_v12  ;;  %v9724_v52 = vadd.f32 %v8032_v35, %v4958_v41 }
 0xc08   :  { %v4970_v58 = vpop.f32.mrf.mxu0  ;;  %v9732_v13 = vadd.f32 %v8033_v48, %v5036_v25  ;;  %v5191_v34 = vsel %vm284_vm0, %v5155_v45, 0.0  ;;  %v8043_v25 = vld [vmem:[%s10625_s0 + $0x44] sm:$0xf] }
 0xc09   :  { %v9718_v22 = vadd.f32 %v8031_v39, %v5034_v31  ;;  %v4971_v4 = vadd.f32 %v9686_v23, %v4970_v58  ;;  %v5039_v47 = vcombine.high %v4979_v42, %v4979_v42  ;;  %v5185_v14 = vsel %vm284_vm0, %v5153_v56, 0.0  ;;  %v8045_v56 = vld [vmem:[%s10625_s0 + $0x40] sm:$0xf] }
 0xc0a   :  { %v7489_v7 = vpop.f32.mrf.mxu0  ;;  %5186 = vadd.xlane.f32.xlu0 %v5185_v14  ;;  %v5156_v37 = vcombine.low %v9740_v2, %v9732_v13  ;;  %v9766_v17 = vadd.f32 %v8038_v38, %v4979_v42 }
 0xc0b   :  { %10721 = vst [vmem:[#allocation20_spill] sm:$0xff] %v9718_v22  ;;  %v5037_v10 = vcombine.high %v4971_v4, %v4971_v4  ;;  %v4982_v57 = vadd.f32 %v7489_v7, %v9686_v23  ;;  %v5154_v8 = vcombine.low %v9724_v52, %v9718_v22  ;;  %v9751_v15 = vadd.f32 %v8036_v19, %v5039_v47  ;;  %v8048_v19 = vld [vmem:[%s10625_s0 + $0x48] sm:$0xf] }
 0xc0c   :  { %v4973_v6 = vpop.f32.mrf.mxu0  ;;  %v9756_v0 = vadd.f32 %v8037_v5, %v4971_v4  ;;  %10725 = vst [vmem:[#allocation4_spill] sm:$0xff] %v9766_v17  ;;  %v5194_v43 = vsel %vm284_vm0, %v5156_v37, 0.0 }
 0xc0d   :  { %v9745_v46 = vadd.f32 %v8035_v26, %v5037_v10  ;;  %v4974_v20 = vadd.f32 %v9686_v23, %v4973_v6  ;;  %10723 = vst [vmem:[#allocation6_spill] sm:$0xff] %v9751_v15  ;;  %v5188_v62 = vsel %vm284_vm0, %v5154_v8, 0.0  ;;  %v5040_v44 = vcombine.high %v4982_v57, %v4982_v57  ;;  %v8046_v10 = vld [vmem:[%s10625_s0 + $0x50] sm:$0xf] }
 0xc0e   :  { %10724 = vst [vmem:[#allocation5_spill] sm:$0xff] %v9756_v0  ;;  %v7492_v11 = vpop.f32.mrf.mxu0  ;;  %5189 = vadd.xlane.f32.xlu1 %v5188_v62  ;;  %5192 = vadd.xlane.f32.xlu0 %v5191_v34  ;;  %v5159_v24 = vcombine.low %v9766_v17, %v9751_v15  ;;  %v9796_v63 = vadd.f32 %v8042_v27, %v4982_v57 }
 0xc0f   :  { %10722 = vst [vmem:[#allocation7_spill] sm:$0xff] %v9745_v46  ;;  %v5038_v61 = vcombine.high %v4974_v20, %v4974_v20  ;;  %v4995_v50 = vadd.f32 %v7492_v11, %v9686_v23  ;;  %v5157_v36 = vcombine.low %v9756_v0, %v9745_v46  ;;  %v9779_v60 = vadd.f32 %v8040_v28, %v4974_v20 }
 0xc10   :  { %v4986_v16 = vpop.f32.mrf.mxu0  ;;  %v9787_v1 = vadd.f32 %v8041_v54, %v5040_v44  ;;  %10729 = vst [vmem:[#allocation8_spill] sm:$0xff] %v9796_v63  ;;  %v5203_v35 = vsel %vm284_vm0, %v5159_v24, 0.0 }
 0xc11   :  { %v9773_v3 = vadd.f32 %v8039_v33, %v5038_v61  ;;  %v4987_v53 = vadd.f32 %v9686_v23, %v4986_v16  ;;  %10727 = vst [vmem:[#allocation10_spill] sm:$0xff] %v9779_v60  ;;  %v5043_v18 = vcombine.high %v4995_v50, %v4995_v50  ;;  %v5197_v29 = vsel %vm284_vm0, %v5157_v36, 0.0  ;;  %v8049_v61 = vld [vmem:[%s10625_s0 + $0x5c] sm:$0xf] }
 0xc12   :  { %v7493_v51 = vpop.f32.mrf.mxu0  ;;  %10728 = vst [vmem:[#allocation9_spill] sm:$0xff] %v9787_v1  ;;  %5198 = vadd.xlane.f32.xlu1 %v5197_v29  ;;  %5195 = vadd.xlane.f32.xlu0 %v5194_v43  ;;  %v5160_v48 = vcombine.low %v9796_v63, %v9787_v1  ;;  %v9822_v57 = vadd.f32 %v8046_v10, %v4995_v50  ;;  %v8052_v29 = vld [vmem:[%s10625_s0 + $0x64] sm:$0xf] }
 0xc13   :  { %10726 = vst [vmem:[#allocation11_spill] sm:$0xff] %v9773_v3  ;;  %v5041_v32 = vcombine.high %v4987_v53, %v4987_v53  ;;  %v4998_v49 = vadd.f32 %v7493_v51, %v9686_v23  ;;  %v5158_v9 = vcombine.low %v9779_v60, %v9773_v3  ;;  %v9807_v58 = vadd.f32 %v8044_v55, %v5043_v18  ;;  %v8051_v18 = vld [vmem:[%s10625_s0 + $0x60] sm:$0xf] }
 0xc14   :  { %v4989_v41 = vpop.f32.mrf.mxu0  ;;  %v9812_v39 = vadd.f32 %v8045_v56, %v4987_v53  ;;  %10733 = vst [vmem:[#allocation3_spill] sm:$0xff] %v9822_v57  ;;  %v5206_v16 = vsel %vm284_vm0, %v5160_v48, 0.0  ;;  %v8050_v53 = vld [vmem:[%s10625_s0 + $0x58] sm:$0xf]  ;;  %v8055_v56 = vld [vmem:[%s10625_s0 + $0x68] sm:$0xf] }
 0xc15   :  { %v9801_v31 = vadd.f32 %v8043_v25, %v5041_v32  ;;  %v4990_v42 = vadd.f32 %v9686_v23, %v4989_v41  ;;  %10731 = vst [vmem:[#allocation14_spill] sm:$0xff] %v9807_v58  ;;  %v5200_v47 = vsel %vm284_vm0, %v5158_v9, 0.0  ;;  %v5044_v7 = vcombine.high %v4998_v49, %v4998_v49  ;;  %v8053_v32 = vld [vmem:[%s10625_s0 + $0x74] sm:$0xf] }
 0xc16   :  { %10732 = vst [vmem:[#allocation13_spill] sm:$0xff] %v9812_v39  ;;  %v7496_v4 = vpop.f32.mrf.mxu0  ;;  %5204 = vadd.xlane.f32.xlu1 %v5203_v35  ;;  %5201 = vadd.xlane.f32.xlu0 %v5200_v47  ;;  %v5163_v44 = vcombine.low %v9822_v57, %v9807_v58  ;;  %v9852_v28 = vadd.f32 %v8050_v53, %v4998_v49  ;;  %v8056_v35 = vld [vmem:[%s10625_s0 + $0x6c] sm:$0xf] }
 0xc17   :  { %10730 = vst [vmem:[#allocation15_spill] sm:$0xff] %v9801_v31  ;;  %v5042_v14 = vcombine.high %v4990_v42, %v4990_v42  ;;  %v5011_v45 = vadd.f32 %v7496_v4, %v9686_v23  ;;  %v5161_v8 = vcombine.low %v9812_v39, %v9801_v31  ;;  %v9835_v5 = vadd.f32 %v8048_v19, %v4990_v42 }
 0xc18   :  { %v5002_v6 = vpop.f32.mrf.mxu0  ;;  %v9843_v50 = vadd.f32 %v8049_v61, %v5044_v7  ;;  %10737 = vst [vmem:[#allocation19_spill] sm:$0xff] %v9852_v28  ;;  %v5215_v43 = vsel %vm284_vm0, %v5163_v44, 0.0  ;;  %v8077_v61 = vmov 1985246804  }
 0xc19   :  { %v9829_v26 = vadd.f32 %v8047_v21, %v5042_v14  ;;  %v5003_v20 = vadd.f32 %v9686_v23, %v5002_v6  ;;  %10735 = vst [vmem:[#allocation17_spill] sm:$0xff] %v9835_v5  ;;  %v5047_v11 = vcombine.high %v5011_v45, %v5011_v45  ;;  %v5209_v34 = vsel %vm284_vm0, %v5161_v8, 0.0  ;;  %v8058_v8 = vld [vmem:[%s10625_s0 + $0x78] sm:$0xf] }
 0xc1a   :  { %v7497_v62 = vpop.f32.mrf.mxu0  ;;  %10736 = vst [vmem:[#allocation16_spill] sm:$0xff] %v9843_v50  ;;  %5210 = vadd.xlane.f32.xlu1 %v5209_v34  ;;  %5207 = vadd.xlane.f32.xlu0 %v5206_v16  ;;  %v5164_v42 = vcombine.low %v9852_v28, %v9843_v50  ;;  %v8076_v34 = vmov 839922192  }
 0xc1b   :  { %10734 = vst [vmem:[#allocation12_spill] sm:$0xff] %v9829_v26  ;;  %v5045_v37 = vcombine.high %v5003_v20, %v5003_v20  ;;  %v5014_v38 = vadd.f32 %v7497_v62, %v9686_v23  ;;  %v5162_v33 = vcombine.low %v9835_v5, %v9829_v26  ;;  %v9857_v51 = vadd.f32 %v8051_v18, %v5003_v20 }
 0xc1c   :  { %v5005_v36 = vpop.f32.mrf.mxu0  ;;  %v9868_v49 = vadd.f32 %v8053_v32, %v5047_v11  ;;  %v5218_v10 = vsel %vm284_vm0, %v5164_v42, 0.0  ;;  %v5267_v44 = vunpack.c.l.s4 %v8076_v34 }
 0xc1d   :  { %10738 = vst [vmem:[#allocation18_spill] sm:$0xff] %v9857_v51  ;;  %v9862_v24 = vadd.f32 %v8052_v29, %v5045_v37  ;;  %v5006_v54 = vadd.f32 %v9686_v23, %v5005_v36  ;;  %v5212_v41 = vsel %vm284_vm0, %v5162_v33, 0.0  ;;  %v5048_v9 = vcombine.high %v5014_v38, %v5014_v38  ;;  %v8054_v23 = vld [vmem:[%s10625_s0 + $0x70] sm:$0xf] }
 0xc1e   :  { %10740 = vst [vmem:[#allocation22_spill] sm:$0xff] %v9868_v49  ;;  %5216 = vadd.xlane.f32.xlu1 %v5215_v43  ;;  %v9879_v55 = vadd.f32 %v8054_v23, %v5011_v45  ;;  %5213 = vadd.xlane.f32.xlu0 %v5212_v41  ;;  %v8057_v45 = vld [vmem:[%s10625_s0 + $0x7c] sm:$0xf]  ;;  %v9905_v21 = vadd.f32 %v8058_v8, %v5014_v38  ;;  %v5274_v37 = vunpack.c.l.s4 %v8077_v61  ;;  %v5268_v16 = vunpack.c.0.s8 %v5267_v44  ;;  %v10746_v38 = vld [vmem:[#allocation2_spill] sm:$0xff] }
 0xc1f   :  { %10739 = vst [vmem:[#allocation21_spill] sm:$0xff] %v9862_v24  ;;  %v5046_v27 = vcombine.high %v5006_v54, %v5006_v54  ;;  %v5165_v25 = vcombine.low %v9857_v51, %v9862_v24  ;;  %v9884_v4 = vadd.f32 %v8055_v56, %v5006_v54  ;;  %v9897_v48 = vadd.f32 %v8057_v45, %v5048_v9 }
 0xc20   :  { %10741 = vst [vmem:[#allocation23_spill] sm:$0xff] %v9879_v55  ;;  %v5167_v14 = vcombine.low %v9879_v55, %v9868_v49  ;;  %10745 = vst [vmem:[#allocation27_spill] sm:$0xff] %v9905_v21  ;;  %v5275_v36 = vunpack.c.0.s8 %v5274_v37  ;;  %v9913_v33 = vsub.s32 %v5268_v16, %v10746_v38 }
 0xc21   :  { %10742 = vst [vmem:[#allocation24_spill] sm:$0xff] %v9884_v4  ;;  %v9889_v47 = vadd.f32 %v8056_v35, %v5046_v27  ;;  %v5221_v7 = vsel %vm284_vm0, %v5165_v25, 0.0  ;;  %10744 = vst [vmem:[#allocation26_spill] sm:$0xff] %v9897_v48  ;;  %v5168_v11 = vcombine.low %v9905_v21, %v9897_v48 }
 0xc22   :  { %5222 = vadd.xlane.f32.xlu1 %v5221_v7  ;;  %5219 = vadd.xlane.f32.xlu0 %v5218_v10  ;;  %v5227_v19 = vsel %vm284_vm0, %v5167_v14, 0.0  ;;  %v9916_v53 = vsub.s32 %v5275_v36, %v10746_v38 }
 0xc23   :  { %10743 = vst [vmem:[#allocation25_spill] sm:$0xff] %v9889_v47  ;;  %v5166_v6 = vcombine.low %v9884_v4, %v9889_v47  ;;  %v5230_v62 = vsel %vm284_vm0, %v5168_v11, 0.0 }
 0xc25   :  { %v5224_v20 = vsel %vm284_vm0, %v5166_v6, 0.0 }
 0xc26   :  { %5228 = vadd.xlane.f32.xlu1 %v5227_v19  ;;  %5225 = vadd.xlane.f32.xlu0 %v5224_v20 }
 0xc2a   :  { %5231 = vadd.xlane.f32.xlu0 %v5230_v62 }
 0xc93   :  { %v5187_v18 = vpop.xlane.xlu0 %5186 }
 0xc94   :  { %v5234_v29 = vmul.f32 0.03125, %v5187_v18 }
 0xc96   :  { %v5272_v54 = vrot.slane %v5234_v29, %v9913_v33  ;;  %v5279_v32 = vrot.slane %v5234_v29, %v9916_v53 }
 0xc97   :  { %v5190_v43 = vpop.xlane.xlu1 %5189  ;;  %v5193_v25 = vpop.xlane.xlu0 %5192 }
 0xc98   :  { %v9921_v41 = vsub.f32 %v9705_v30, %v5272_v54  ;;  %v9924_v9 = vsub.f32 %v9694_v12, %v5279_v32  ;;  %v5235_v27 = vmul.f32 0.03125, %v5190_v43  ;;  %v5236_v42 = vmul.f32 0.03125, %v5193_v25 }
 0xc9a   :  { %v5286_v23 = vrot.slane %v5235_v27, %v9913_v33  ;;  %v5293_v56 = vrot.slane %v5235_v27, %v9916_v53  ;;  %v5554_v35 = vmul.f32 %v9921_v41, %v9921_v41  ;;  %v5555_v7 = vmul.f32 %v9924_v9, %v9924_v9 }
 0xc9b   :  { %v5300_v14 = vrot.slane %v5236_v42, %v9913_v33  ;;  %v5307_v45 = vrot.slane %v5236_v42, %v9916_v53  ;;  %v5199_v10 = vpop.xlane.xlu1 %5198  ;;  %v5196_v19 = vpop.xlane.xlu0 %5195 }
 0xc9c   :  { %v9935_v6 = vsub.f32 %v9724_v52, %v5286_v23  ;;  %v9938_v8 = vsub.f32 %v9718_v22, %v5293_v56  ;;  %v5238_v20 = vmul.f32 0.03125, %v5199_v10  ;;  %v5618_v11 = vcombine.low %v5554_v35, %v5555_v7 }
 0xc9d   :  { %v9941_v62 = vsub.f32 %v9711_v59, %v5300_v14  ;;  %v9944_v34 = vsub.f32 %v9700_v40, %v5307_v45  ;;  %v5237_v44 = vmul.f32 0.03125, %v5196_v19 }
 0xc9e   :  { %v5328_v61 = vrot.slane %v5238_v20, %v9913_v33  ;;  %v5335_v37 = vrot.slane %v5238_v20, %v9916_v53  ;;  %v5650_v16 = vsel %vm284_vm0, %v5618_v11, 0.0  ;;  %v5556_v36 = vmul.f32 %v9935_v6, %v9935_v6 }
 0xc9f   :  { %v5314_v38 = vrot.slane %v5237_v44, %v9913_v33  ;;  %v5321_v18 = vrot.slane %v5237_v44, %v9916_v53  ;;  %v5205_v29 = vpop.xlane.xlu1 %5204  ;;  %5651 = vadd.xlane.f32.xlu1 %v5650_v16  ;;  %v5557_v54 = vmul.f32 %v9938_v8, %v9938_v8  ;;  %v5558_v32 = vmul.f32 %v9941_v62, %v9941_v62  ;;  %v5202_v42 = vpop.xlane.xlu0 %5201 }
 0xca0   :  { %v9958_v43 = vsub.f32 %v9756_v0, %v5328_v61  ;;  %v9961_v27 = vsub.f32 %v9745_v46, %v5335_v37  ;;  %v5240_v25 = vmul.f32 0.03125, %v5205_v29  ;;  %v5559_v23 = vmul.f32 %v9944_v34, %v9944_v34 }
 0xca1   :  { %v9966_v56 = vsub.f32 %v9740_v2, %v5314_v38  ;;  %v9969_v35 = vsub.f32 %v9732_v13, %v5321_v18  ;;  %v5239_v7 = vmul.f32 0.03125, %v5202_v42  ;;  %v5619_v14 = vcombine.low %v5556_v36, %v5557_v54 }
 0xca2   :  { %v5356_v45 = vrot.slane %v5240_v25, %v9913_v33  ;;  %v5363_v10 = vrot.slane %v5240_v25, %v9916_v53  ;;  %v5620_v20 = vcombine.low %v5558_v32, %v5559_v23  ;;  %v5562_v19 = vmul.f32 %v9958_v43, %v9958_v43 }
 0xca3   :  { %v5342_v11 = vrot.slane %v5239_v7, %v9913_v33  ;;  %v5349_v44 = vrot.slane %v5239_v7, %v9916_v53  ;;  %v5211_v61 = vpop.xlane.xlu1 %5210  ;;  %v5653_v37 = vsel %vm284_vm0, %v5619_v14, 0.0  ;;  %v5563_v16 = vmul.f32 %v9961_v27, %v9961_v27  ;;  %v5208_v54 = vpop.xlane.xlu0 %5207 }
 0xca4   :  { %v9981_v36 = vsub.f32 %v9766_v17, %v5356_v45  ;;  %v9984_v38 = vsub.f32 %v9751_v15, %v5363_v10  ;;  %v5242_v18 = vmul.f32 0.03125, %v5211_v61  ;;  %5654 = vadd.xlane.f32.xlu0 %v5653_v37  ;;  %v5656_v29 = vsel %vm284_vm0, %v5620_v20, 0.0 }
 0xca5   :  { %v9988_v32 = vsub.f32 %v9779_v60, %v5342_v11  ;;  %v9991_v25 = vsub.f32 %v9773_v3, %v5349_v44  ;;  %5657 = vadd.xlane.f32.xlu1 %v5656_v29  ;;  %v5241_v42 = vmul.f32 0.03125, %v5208_v54  ;;  %v5622_v23 = vcombine.low %v5562_v19, %v5563_v16 }
 0xca6   :  { %v5384_v7 = vrot.slane %v5242_v18, %v9913_v33  ;;  %v5391_v14 = vrot.slane %v5242_v18, %v9916_v53  ;;  %v5560_v45 = vmul.f32 %v9966_v56, %v9966_v56  ;;  %v5561_v10 = vmul.f32 %v9969_v35, %v9969_v35 }
 0xca7   :  { %v5370_v20 = vrot.slane %v5241_v42, %v9913_v33  ;;  %v5377_v11 = vrot.slane %v5241_v42, %v9916_v53  ;;  %v5217_v61 = vpop.xlane.xlu1 %5216  ;;  %v5662_v44 = vsel %vm284_vm0, %v5622_v23, 0.0  ;;  %v5566_v19 = vmul.f32 %v9981_v36, %v9981_v36  ;;  %v5214_v54 = vpop.xlane.xlu0 %5213 }
 0xca8   :  { %v10005_v37 = vsub.f32 %v9812_v39, %v5384_v7  ;;  %v10008_v16 = vsub.f32 %v9801_v31, %v5391_v14  ;;  %v5244_v18 = vmul.f32 0.03125, %v5217_v61  ;;  %v5621_v29 = vcombine.low %v5560_v45, %v5561_v10 }
 0xca9   :  { %v10011_v3 = vsub.f32 %v9796_v63, %v5370_v20  ;;  %v10014_v42 = vsub.f32 %v9787_v1, %v5377_v11  ;;  %5663 = vadd.xlane.f32.xlu1 %v5662_v44  ;;  %v5243_v23 = vmul.f32 0.03125, %v5214_v54  ;;  %v5567_v60 = vmul.f32 %v9984_v38, %v9984_v38 }
 0xcaa   :  { %v5412_v7 = vrot.slane %v5244_v18, %v9913_v33  ;;  %v5419_v39 = vrot.slane %v5244_v18, %v9916_v53  ;;  %v5659_v14 = vsel %vm284_vm0, %v5621_v29, 0.0  ;;  %v5564_v45 = vmul.f32 %v9988_v32, %v9988_v32 }
 0xcab   :  { %5660 = vadd.xlane.f32.xlu0 %v5659_v14  ;;  %v5398_v10 = vrot.slane %v5243_v23, %v9913_v33  ;;  %v5405_v20 = vrot.slane %v5243_v23, %v9916_v53  ;;  %v5223_v11 = vpop.xlane.xlu1 %5222  ;;  %v5624_v61 = vcombine.low %v5566_v19, %v5567_v60  ;;  %v5565_v44 = vmul.f32 %v9991_v25, %v9991_v25  ;;  %v5220_v31 = vpop.xlane.xlu0 %5219 }
 0xcac   :  { %v10028_v54 = vsub.f32 %v9822_v57, %v5412_v7  ;;  %v10031_v18 = vsub.f32 %v9807_v58, %v5419_v39  ;;  %v5246_v29 = vmul.f32 0.03125, %v5223_v11  ;;  %v5570_v14 = vmul.f32 %v10005_v37, %v10005_v37 }
 0xcad   :  { %v10036_v1 = vsub.f32 %v9835_v5, %v5398_v10  ;;  %v10039_v23 = vsub.f32 %v9829_v26, %v5405_v20  ;;  %v5668_v60 = vsel %vm284_vm0, %v5624_v61, 0.0  ;;  %v5623_v19 = vcombine.low %v5564_v45, %v5565_v44 }
 0xcae   :  { %v5440_v7 = vrot.slane %v5246_v29, %v9913_v33  ;;  %v5447_v57 = vrot.slane %v5246_v29, %v9916_v53  ;;  %5669 = vadd.xlane.f32.xlu1 %v5668_v60  ;;  %v5245_v39 = vmul.f32 0.03125, %v5220_v31  ;;  %v5571_v11 = vmul.f32 %v10008_v16, %v10008_v16 }
 0xcaf   :  { %v5665_v58 = vsel %vm284_vm0, %v5623_v19, 0.0  ;;  %v5229_v63 = vpop.xlane.xlu1 %5228  ;;  %v5568_v10 = vmul.f32 %v10011_v3, %v10011_v3  ;;  %v5569_v20 = vmul.f32 %v10014_v42, %v10014_v42  ;;  %v5574_v45 = vmul.f32 %v10028_v54, %v10028_v54  ;;  %v5226_v60 = vpop.xlane.xlu0 %5225 }
 0xcb0   :  { %v10054_v61 = vsub.f32 %v9857_v51, %v5440_v7  ;;  %v10057_v31 = vsub.f32 %v9862_v24, %v5447_v57  ;;  %5666 = vadd.xlane.f32.xlu0 %v5665_v58  ;;  %v5426_v44 = vrot.slane %v5245_v39, %v9913_v33  ;;  %v5433_v29 = vrot.slane %v5245_v39, %v9916_v53 }
 0xcb1   :  { %v5248_v19 = vmul.f32 0.03125, %v5229_v63  ;;  %v5626_v26 = vcombine.low %v5570_v14, %v5571_v11  ;;  %v5625_v5 = vcombine.low %v5568_v10, %v5569_v20  ;;  %v5247_v46 = vmul.f32 0.03125, %v5226_v60 }
 0xcb2   :  { %v10062_v0 = vsub.f32 %v9852_v28, %v5426_v44  ;;  %v10065_v15 = vsub.f32 %v9843_v50, %v5433_v29  ;;  %v5575_v57 = vmul.f32 %v10031_v18, %v10031_v18  ;;  %v5572_v58 = vmul.f32 %v10036_v1, %v10036_v1 }
 0xcb3   :  { %v5468_v7 = vrot.slane %v5248_v19, %v9913_v33  ;;  %v5475_v39 = vrot.slane %v5248_v19, %v9916_v53  ;;  %v5674_v63 = vsel %vm284_vm0, %v5626_v26, 0.0  ;;  %v5671_v14 = vsel %vm284_vm0, %v5625_v5, 0.0  ;;  %v5232_v44 = vpop.xlane.xlu0 %5231 }
 0xcb4   :  { %5675 = vadd.xlane.f32.xlu1 %v5674_v63  ;;  %5672 = vadd.xlane.f32.xlu0 %v5671_v14  ;;  %v5454_v11 = vrot.slane %v5247_v46, %v9913_v33  ;;  %v5461_v10 = vrot.slane %v5247_v46, %v9916_v53  ;;  %v5628_v20 = vcombine.low %v5574_v45, %v5575_v57  ;;  %v5249_v26 = vmul.f32 0.03125, %v5232_v44 }
 0xcb5   :  { %v10078_v29 = vsub.f32 %v9879_v55, %v5468_v7  ;;  %v10081_v60 = vsub.f32 %v9868_v49, %v5475_v39  ;;  %v5573_v19 = vmul.f32 %v10039_v23, %v10039_v23  ;;  %v5578_v45 = vmul.f32 %v10054_v61, %v10054_v61 }
 0xcb6   :  { %v10086_v5 = vsub.f32 %v9884_v4, %v5454_v11  ;;  %v10089_v63 = vsub.f32 %v9889_v47, %v5461_v10  ;;  %v5680_v46 = vsel %vm284_vm0, %v5628_v20, 0.0  ;;  %v5482_v7 = vrot.slane %v5249_v26, %v9913_v33 }
 0xcb7   :  { %v5627_v57 = vcombine.low %v5572_v58, %v5573_v19  ;;  %v5489_v39 = vrot.slane %v5249_v26, %v9916_v53  ;;  %v5579_v14 = vmul.f32 %v10057_v31, %v10057_v31  ;;  %v5576_v11 = vmul.f32 %v10062_v0, %v10062_v0 }
 0xcb8   :  { %5681 = vadd.xlane.f32.xlu1 %v5680_v46  ;;  %v5577_v10 = vmul.f32 %v10065_v15, %v10065_v15  ;;  %v5582_v20 = vmul.f32 %v10078_v29, %v10078_v29  ;;  %v5583_v58 = vmul.f32 %v10081_v60, %v10081_v60  ;;  %v10108_v19 = vsub.f32 %v9905_v21, %v5482_v7 }
 0xcb9   :  { %v5677_v44 = vsel %vm284_vm0, %v5627_v57, 0.0  ;;  %v10111_v26 = vsub.f32 %v9897_v48, %v5489_v39  ;;  %v5630_v46 = vcombine.low %v5578_v45, %v5579_v14  ;;  %v5580_v24 = vmul.f32 %v10086_v5, %v10086_v5 }
 0xcba   :  { %5678 = vadd.xlane.f32.xlu0 %v5677_v44  ;;  %v5629_v47 = vcombine.low %v5576_v11, %v5577_v10  ;;  %v5632_v4 = vcombine.low %v5582_v20, %v5583_v58  ;;  %v5581_v51 = vmul.f32 %v10089_v63, %v10089_v63  ;;  %v5584_v57 = vmul.f32 %v10108_v19, %v10108_v19  ;;  %v7697_v58 = vld [vmem:[%s10628_s6 + $0x8] sm:$0xff]  }
 0xcbb   :  { %v5686_v49 = vsel %vm284_vm0, %v5630_v46, 0.0  ;;  %v5585_v7 = vmul.f32 %v10111_v26, %v10111_v26  ;;  %7498 = vmatprep.subr.bf16.mxu1 %v7697_v58 }
 0xcbc   :  { %5687 = vadd.xlane.f32.xlu1 %v5686_v49  ;;  %v5683_v45 = vsel %vm284_vm0, %v5629_v47, 0.0  ;;  %v5631_v39 = vcombine.low %v5580_v24, %v5581_v51  ;;  %v5692_v14 = vsel %vm284_vm0, %v5632_v4, 0.0  ;;  %7499 = vmatpush3.bf16.msra.mxu1 %v7697_v58  ;;  %v7698_v51 = vld [vmem:[%s10628_s6] sm:$0xff]  }
 0xcbd   :  { %v5633_v10 = vcombine.low %v5584_v57, %v5585_v7  ;;  %7500 = vmatprep.subr.bf16.mxu1 %v7698_v51 }
 0xcbe   :  { %5684 = vadd.xlane.f32.xlu0 %v5683_v45  ;;  %v5689_v11 = vsel %vm284_vm0, %v5631_v39, 0.0 }
 0xcbf   :  { %v5695_v20 = vsel %vm284_vm0, %v5633_v10, 0.0 }
 0xcc0   :  { %5693 = vadd.xlane.f32.xlu1 %v5692_v14  ;;  %7501 = vmatpush3.bf16.msra.mxu1 %v7698_v51 }
 0xcc2   :  { %5690 = vadd.xlane.f32.xlu0 %v5689_v11 }
 0xcc6   :  { %5696 = vadd.xlane.f32.xlu0 %v5695_v20 }
 0xd28   :  { %v5652_v24 = vpop.xlane.xlu1 %5651 }
 0xd29   :  { %v5698_v49 = vmul.f32 0.03125, %v5652_v24  ;;  %v10135_v24 = vld [vmem:[%s10629_s4] ss:$0 sm:$0xff] }
 0xd2b   :  { %v5714_v4 = vadd.f32 1e-05, %v5698_v49 }
 0xd2d   :  { %7963 = vrsqrt.f32 %v5714_v4  ;;  %v5655_v47 = vpop.xlane.xlu0 %5654 }
 0xd2e   :  { %v5658_v44 = vpop.xlane.xlu1 %5657  ;;  %v5699_v46 = vmul.f32 0.03125, %v5655_v47 }
 0xd2f   :  { %v5700_v57 = vmul.f32 0.03125, %v5658_v44 }
 0xd30   :  { %v5715_v7 = vadd.f32 1e-05, %v5699_v46 }
 0xd31   :  { %v5716_v45 = vadd.f32 1e-05, %v5700_v57  ;;  %v10140_v57 = vld [vmem:[%s10630_s5] ss:$0 sm:$0xff] }
 0xd32   :  { %7965 = vrsqrt.f32 %v5715_v7  ;;  %v5664_v39 = vpop.xlane.xlu1 %5663 }
 0xd33   :  { %7967 = vrsqrt.f32 %v5716_v45  ;;  %v5702_v14 = vmul.f32 0.03125, %v5664_v39  ;;  %v10146_v39 = vcombine.high %v10135_v24, %v10135_v24 }
 0xd34   :  { %v5661_v11 = vpop.xlane.xlu0 %5660 }
 0xd35   :  { %v5718_v10 = vadd.f32 1e-05, %v5702_v14  ;;  %v5701_v20 = vmul.f32 0.03125, %v5661_v11 }
 0xd37   :  { %7969 = vrsqrt.f32 %v5718_v10  ;;  %v5717_v58 = vadd.f32 1e-05, %v5701_v20  ;;  %v5670_v51 = vpop.xlane.xlu1 %5669 }
 0xd38   :  { %v5704_v49 = vmul.f32 0.03125, %v5670_v51  ;;  %v10152_v51 = vcombine.high %v10140_v57, %v10140_v57 }
 0xd39   :  { %7971 = vrsqrt.f32 %v5717_v58  ;;  %v5667_v4 = vpop.xlane.xlu0 %5666 }
 0xd3a   :  { %v7964_v47 = vpop.eup %7963  ;;  %v5720_v44 = vadd.f32 1e-05, %v5704_v49  ;;  %v5703_v46 = vmul.f32 0.03125, %v5667_v4 }
 0xd3b   :  { %v5768_v7 = vrot.slane %v7964_v47, %v9913_v33  ;;  %v5775_v45 = vrot.slane %v7964_v47, %v9916_v53 }
 0xd3c   :  { %7973 = vrsqrt.f32 %v5720_v44  ;;  %v5719_v14 = vadd.f32 1e-05, %v5703_v46 }
 0xd3d   :  { %v5676_v11 = vpop.xlane.xlu1 %5675  ;;  %v5673_v10 = vpop.xlane.xlu0 %5672  ;;  %v6018_v20 = vmul.f32 %v5768_v7, %v9921_v41  ;;  %v6019_v58 = vmul.f32 %v5775_v45, %v9924_v9 }
 0xd3e   :  { %7975 = vrsqrt.f32 %v5719_v14  ;;  %v5706_v49 = vmul.f32 0.03125, %v5676_v11  ;;  %v5705_v4 = vmul.f32 0.03125, %v5673_v10 }
 0xd3f   :  { %v7966_v47 = vpop.eup %7965  ;;  %v6058_v48 = vmul.f32 %v10135_v24, %v6018_v20  ;;  %v6059_v21 = vmul.f32 %v10146_v39, %v6019_v58 }
 0xd40   :  { %v7968_v44 = vpop.eup %7967  ;;  %v5782_v46 = vrot.slane %v7966_v47, %v9913_v33  ;;  %v5789_v55 = vrot.slane %v7966_v47, %v9916_v53  ;;  %v5722_v41 = vadd.f32 1e-05, %v5706_v49  ;;  %v5721_v7 = vadd.f32 1e-05, %v5705_v4 }
 0xd41   :  { %v5796_v9 = vrot.slane %v7968_v44, %v9913_v33  ;;  %v5803_v45 = vrot.slane %v7968_v44, %v9916_v53  ;;  %v5682_v50 = vpop.xlane.xlu1 %5681  ;;  %v6098_v14 = vadd.f32 %v10140_v57, %v6058_v48  ;;  %v6099_v11 = vadd.f32 %v10152_v51, %v6059_v21 }
 0xd42   :  { %7977 = vrsqrt.f32 %v5722_v41  ;;  %v5708_v10 = vmul.f32 0.03125, %v5682_v50  ;;  %v6020_v20 = vmul.f32 %v5782_v46, %v9935_v6  ;;  %v6021_v58 = vmul.f32 %v5789_v55, %v9938_v8 }
 0xd43   :  { %v6022_v28 = vmul.f32 %v5796_v9, %v9941_v62  ;;  %v6023_v49 = vmul.f32 %v5803_v45, %v9944_v34  ;;  %7979 = vrsqrt.f32 %v5721_v7  ;;  %v5679_v4 = vpop.xlane.xlu0 %5678  ;;  %v6162_v47 = vcombine.low %v6098_v14, %v6099_v11 }
 0xd44   :  { %v7970_v17 = vpop.eup %7969  ;;  %v5724_v44 = vadd.f32 1e-05, %v5708_v10  ;;  %v5707_v22 = vmul.f32 0.03125, %v5679_v4  ;;  %v6060_v48 = vmul.f32 %v10135_v24, %v6020_v20  ;;  %v6061_v21 = vmul.f32 %v10146_v39, %v6021_v58 }
 0xd45   :  { %v6062_v50 = vmul.f32 %v10135_v24, %v6022_v28  ;;  %v6063_v6 = vmul.f32 %v10146_v39, %v6023_v49  ;;  %v5824_v55 = vrot.slane %v7970_v17, %v9913_v33  ;;  %v5831_v8 = vrot.slane %v7970_v17, %v9916_v53  ;;  %v5688_v62 = vpop.xlane.xlu1 %5687 }
 0xd46   :  { %v7972_v34 = vpop.eup %7971  ;;  %7981 = vrsqrt.f32 %v5724_v44  ;;  %v5723_v46 = vadd.f32 1e-05, %v5707_v22  ;;  %v5710_v41 = vmul.f32 0.03125, %v5688_v62  ;;  %v6100_v7 = vadd.f32 %v10140_v57, %v6060_v48 }
 0xd47   :  { %v5810_v9 = vrot.slane %v7972_v34, %v9913_v33  ;;  %v5817_v45 = vrot.slane %v7972_v34, %v9916_v53  ;;  %v5685_v14 = vpop.xlane.xlu0 %5684  ;;  %v6101_v28 = vadd.f32 %v10152_v51, %v6061_v21  ;;  %v6102_v11 = vadd.f32 %v10140_v57, %v6062_v50 }
 0xd48   :  { %7983 = vrsqrt.f32 %v5723_v46  ;;  %v5726_v10 = vadd.f32 1e-05, %v5710_v41  ;;  %v5709_v20 = vmul.f32 0.03125, %v5685_v14  ;;  %v6103_v17 = vadd.f32 %v10152_v51, %v6063_v6 }
 0xd49   :  { %v7974_v58 = vpop.eup %7973  ;;  %v6024_v22 = vmul.f32 %v5810_v9, %v9966_v56  ;;  %v6025_v49 = vmul.f32 %v5817_v45, %v9969_v35  ;;  %v5694_v4 = vpop.xlane.xlu1 %5693  ;;  %v6163_v44 = vcombine.low %v6100_v7, %v6101_v28  ;;  %v6026_v48 = vmul.f32 %v5824_v55, %v9958_v43 }
 0xd4a   :  { %v5852_v62 = vrot.slane %v7974_v58, %v9913_v33  ;;  %v5859_v21 = vrot.slane %v7974_v58, %v9916_v53  ;;  %7985 = vrsqrt.f32 %v5726_v10  ;;  %v5725_v50 = vadd.f32 1e-05, %v5709_v20 }
 0xd4b   :  { %v7976_v34 = vpop.eup %7975  ;;  %v6064_v46 = vmul.f32 %v10135_v24, %v6024_v22  ;;  %v6065_v6 = vmul.f32 %v10146_v39, %v6025_v49  ;;  %v5712_v41 = vmul.f32 0.03125, %v5694_v4  ;;  %v5691_v14 = vpop.xlane.xlu0 %5690  ;;  %v6194_v56 = vpack.c.bf16 %v6163_v44, %v6162_v47 }
 0xd4c   :  { %v6030_v35 = vmul.f32 %v5852_v62, %v9981_v36  ;;  %v6031_v7 = vmul.f32 %v5859_v21, %v9984_v38  ;;  %v5838_v43 = vrot.slane %v7976_v34, %v9913_v33  ;;  %v5845_v55 = vrot.slane %v7976_v34, %v9916_v53 }
 0xd4d   :  { %7987 = vrsqrt.f32 %v5725_v50  ;;  %v5728_v9 = vadd.f32 1e-05, %v5712_v41  ;;  %v5711_v45 = vmul.f32 0.03125, %v5691_v14  ;;  %7502 = vmatprep.mubr.msk.bf16.mxu1 %vm284_vm0, %v6194_v56  ;;  %v6104_v28 = vadd.f32 %v10140_v57, %v6064_v46 }
 0xd4e   :  { %v6105_v10 = vadd.f32 %v10152_v51, %v6065_v6  ;;  %v6164_v20 = vcombine.low %v6102_v11, %v6103_v17  ;;  %v6027_v47 = vmul.f32 %v5831_v8, %v9961_v27  ;;  %v6028_v36 = vmul.f32 %v5838_v43, %v9988_v32 }
 0xd4f   :  { %v7978_v58 = vpop.eup %7977  ;;  %7989 = vrsqrt.f32 %v5728_v9  ;;  %v5727_v38 = vadd.f32 1e-05, %v5711_v45  ;;  %v5697_v22 = vpop.xlane.xlu0 %5696  ;;  %v6029_v49 = vmul.f32 %v5845_v55, %v9991_v25  ;;  %v6066_v4 = vmul.f32 %v10135_v24, %v6026_v48 }
 0xd50   :  { %v7980_v44 = vpop.eup %7979  ;;  %v5880_v62 = vrot.slane %v7978_v58, %v9913_v33  ;;  %v5887_v21 = vrot.slane %v7978_v58, %v9916_v53  ;;  %v5713_v50 = vmul.f32 0.03125, %v5697_v22  ;;  %v6165_v34 = vcombine.low %v6104_v28, %v6105_v10 }
 0xd51   :  { %v5866_v11 = vrot.slane %v7980_v44, %v9913_v33  ;;  %v5873_v27 = vrot.slane %v7980_v44, %v9916_v53  ;;  %7991 = vrsqrt.f32 %v5727_v38  ;;  %v6067_v32 = vmul.f32 %v10146_v39, %v6027_v47 }
 0xd52   :  { %v5729_v8 = vadd.f32 1e-05, %v5713_v50  ;;  %v6195_v17 = vpack.c.bf16 %v6165_v34, %v6164_v20  ;;  %v6068_v25 = vmul.f32 %v10135_v24, %v6028_v36  ;;  %v6069_v48 = vmul.f32 %v10146_v39, %v6029_v49 }
 0xd53   :  { %v7982_v46 = vpop.eup %7981  ;;  %v6032_v6 = vmul.f32 %v5866_v11, %v10011_v3  ;;  %v6033_v41 = vmul.f32 %v5873_v27, %v10014_v42  ;;  %v6106_v14 = vadd.f32 %v10140_v57, %v6066_v4  ;;  %v6107_v56 = vadd.f32 %v10152_v51, %v6067_v32 }
 0xd54   :  { %v5908_v43 = vrot.slane %v7982_v46, %v9913_v33  ;;  %v5915_v55 = vrot.slane %v7982_v46, %v9916_v53  ;;  %7993 = vrsqrt.f32 %v5729_v8  ;;  %7503 = vmatmul.mubr.msk.bf16.vlgmr.msra.gmra.mxu1 %vm284_vm0, %v6195_v17  ;;  %v6108_v9 = vadd.f32 %v10140_v57, %v6068_v25 }
 0xd55   :  { %v7984_v45 = vpop.eup %7983  ;;  %v6109_v28 = vadd.f32 %v10152_v51, %v6069_v48  ;;  %v6166_v10 = vcombine.low %v6106_v14, %v6107_v56  ;;  %v6070_v3 = vmul.f32 %v10135_v24, %v6030_v35  ;;  %v6071_v42 = vmul.f32 %v10146_v39, %v6031_v7 }
 0xd56   :  { %v6038_v20 = vmul.f32 %v5908_v43, %v10028_v54  ;;  %v6039_v47 = vmul.f32 %v5915_v55, %v10031_v18  ;;  %v5894_v36 = vrot.slane %v7984_v45, %v9913_v33  ;;  %v5901_v58 = vrot.slane %v7984_v45, %v9916_v53 }
 0xd57   :  { %v7986_v38 = vpop.eup %7985  ;;  %v6167_v22 = vcombine.low %v6108_v9, %v6109_v28  ;;  %v6072_v49 = vmul.f32 %v10135_v24, %v6032_v6  ;;  %v6073_v4 = vmul.f32 %v10146_v39, %v6033_v41  ;;  %v6110_v44 = vadd.f32 %v10140_v57, %v6070_v3 }
 0xd58   :  { %v5936_v35 = vrot.slane %v7986_v38, %v9913_v33  ;;  %v5943_v7 = vrot.slane %v7986_v38, %v9916_v53  ;;  %v6111_v54 = vadd.f32 %v10152_v51, %v6071_v42  ;;  %v6034_v18 = vmul.f32 %v5880_v62, %v10005_v37 }
 0xd59   :  { %v6196_v50 = vpack.c.bf16 %v6167_v22, %v6166_v10  ;;  %v6112_v34 = vadd.f32 %v10140_v57, %v6072_v49  ;;  %v6113_v11 = vadd.f32 %v10152_v51, %v6073_v4  ;;  %v6035_v27 = vmul.f32 %v5887_v21, %v10008_v16 }
 0xd5a   :  { %v7988_v32 = vpop.eup %7987  ;;  %v6168_v8 = vcombine.low %v6110_v44, %v6111_v54  ;;  %v6036_v17 = vmul.f32 %v5894_v36, %v10036_v1  ;;  %v6037_v25 = vmul.f32 %v5901_v58, %v10039_v23  ;;  %v6074_v48 = vmul.f32 %v10135_v24, %v6034_v18 }
 0xd5b   :  { %v5922_v46 = vrot.slane %v7988_v32, %v9913_v33  ;;  %v5929_v6 = vrot.slane %v7988_v32, %v9916_v53  ;;  %7506 = vmatprep.mubr.msk.bf16.mxu1 %vm284_vm0, %v6196_v50  ;;  %v6169_v37 = vcombine.low %v6112_v34, %v6113_v11  ;;  %v6075_v62 = vmul.f32 %v10146_v39, %v6035_v27 }
 0xd5c   :  { %v7990_v41 = vpop.eup %7989  ;;  %v6076_v16 = vmul.f32 %v10135_v24, %v6036_v17  ;;  %v6077_v21 = vmul.f32 %v10146_v39, %v6037_v25  ;;  %v6114_v1 = vadd.f32 %v10140_v57, %v6074_v48  ;;  %v6078_v23 = vmul.f32 %v10135_v24, %v6038_v20 }
 0xd5d   :  { %v6040_v14 = vmul.f32 %v5922_v46, %v10062_v0  ;;  %v6041_v56 = vmul.f32 %v5929_v6, %v10065_v15  ;;  %v5964_v43 = vrot.slane %v7990_v41, %v9913_v33  ;;  %v5971_v55 = vrot.slane %v7990_v41, %v9916_v53 }
 0xd5e   :  { %v7992_v9 = vpop.eup %7991  ;;  %v6197_v45 = vpack.c.bf16 %v6169_v37, %v6168_v8  ;;  %v6115_v28 = vadd.f32 %v10152_v51, %v6075_v62  ;;  %v6116_v10 = vadd.f32 %v10140_v57, %v6076_v16  ;;  %v6117_v3 = vadd.f32 %v10152_v51, %v6077_v21 }
 0xd5f   :  { %v6046_v42 = vmul.f32 %v5964_v43, %v10078_v29  ;;  %v6047_v20 = vmul.f32 %v5971_v55, %v10081_v60  ;;  %v5950_v0 = vrot.slane %v7992_v9, %v9913_v33  ;;  %v5957_v15 = vrot.slane %v7992_v9, %v9916_v53  ;;  %v7702_v55 = vld [vmem:[%s10631_s8 + $0x20] sm:$0xff]   ;;  %v7703_v9 = vld [vmem:[%s10631_s8 + $0x18] sm:$0xff]  }
 0xd60   :  { %7507 = vmatmul.mubr.msk.bf16.gmra.mxu1 %vm284_vm0, %v6197_v45  ;;  %v6170_v36 = vcombine.low %v6114_v1, %v6115_v28  ;;  %v6171_v58 = vcombine.low %v6116_v10, %v6117_v3  ;;  %v6079_v38 = vmul.f32 %v10146_v39, %v6039_v47  ;;  %v6080_v22 = vmul.f32 %v10135_v24, %v6040_v14  ;;  %v7704_v45 = vld [vmem:[%s10631_s8 + $0x10] sm:$0xff]   ;;  %v7705_v28 = vld [vmem:[%s10631_s8 + $0x8] sm:$0xff]   ;;  %v7706_v10 = vld [vmem:[%s10631_s8] sm:$0xff]  }
 0xd61   :  { %v7994_v49 = vpop.eup %7993  ;;  %v6081_v4 = vmul.f32 %v10146_v39, %v6041_v56  ;;  %v6118_v44 = vadd.f32 %v10140_v57, %v6078_v23  ;;  %v6042_v29 = vmul.f32 %v5936_v35, %v10054_v61  ;;  %v6043_v60 = vmul.f32 %v5943_v7, %v10057_v31  ;;  %v10313_v3 = vld [vmem:[%s10632_s7] ss:$0 sm:$0xff] }
 0xd62   :  { %v5978_v54 = vrot.slane %v7994_v49, %v9913_v33  ;;  %v5985_v18 = vrot.slane %v7994_v49, %v9916_v53  ;;  %v6198_v50 = vpack.c.bf16 %v6171_v58, %v6170_v36  ;;  %v6119_v34 = vadd.f32 %v10152_v51, %v6079_v38 }
 0xd63   :  { %v6120_v47 = vadd.f32 %v10140_v57, %v6080_v22  ;;  %v6121_v11 = vadd.f32 %v10152_v51, %v6081_v4  ;;  %v6044_v27 = vmul.f32 %v5950_v0, %v10086_v5  ;;  %v6045_v32 = vmul.f32 %v5957_v15, %v10089_v63 }
 0xd64   :  { %v6048_v8 = vmul.f32 %v5978_v54, %v10108_v19  ;;  %v6049_v61 = vmul.f32 %v5985_v18, %v10111_v26  ;;  %7510 = vmatprep.mubr.msk.bf16.mxu1 %vm284_vm0, %v6198_v50  ;;  %v6172_v33 = vcombine.low %v6118_v44, %v6119_v34  ;;  %v6082_v53 = vmul.f32 %v10135_v24, %v6042_v29 }
 0xd65   :  { %v6173_v31 = vcombine.low %v6120_v47, %v6121_v11  ;;  %v6083_v35 = vmul.f32 %v10146_v39, %v6043_v60  ;;  %v6084_v7 = vmul.f32 %v10135_v24, %v6044_v27  ;;  %v6085_v17 = vmul.f32 %v10146_v39, %v6045_v32 }
 0xd66   :  { %v6122_v5 = vadd.f32 %v10140_v57, %v6082_v53  ;;  %v6086_v63 = vmul.f32 %v10135_v24, %v6046_v42  ;;  %v6087_v19 = vmul.f32 %v10146_v39, %v6047_v20  ;;  %v6088_v26 = vmul.f32 %v10135_v24, %v6048_v8 }
 0xd67   :  { %v6199_v25 = vpack.c.bf16 %v6173_v31, %v6172_v33  ;;  %v6123_v48 = vadd.f32 %v10152_v51, %v6083_v35  ;;  %v6124_v46 = vadd.f32 %v10140_v57, %v6084_v7  ;;  %v6125_v6 = vadd.f32 %v10152_v51, %v6085_v17 }
 0xd68   :  { %v6089_v37 = vmul.f32 %v10146_v39, %v6049_v61  ;;  %v6126_v62 = vadd.f32 %v10140_v57, %v6086_v63  ;;  %v6127_v41 = vadd.f32 %v10152_v51, %v6087_v19  ;;  %v6128_v16 = vadd.f32 %v10140_v57, %v6088_v26  ;;  %v7699_v39 = vld [vmem:[%s10631_s8 + $0x38] sm:$0xff]   ;;  %v7700_v57 = vld [vmem:[%s10631_s8 + $0x30] sm:$0xff]  }
 0xd69   :  { %7511 = vmatmul.mubr.msk.bf16.gmra.mxu1 %vm284_vm0, %v6199_v25  ;;  %v6174_v21 = vcombine.low %v6122_v5, %v6123_v48  ;;  %v6175_v1 = vcombine.low %v6124_v46, %v6125_v6  ;;  %7518 = vmatprep.subr.bf16.mxu0 %v7699_v39 }
 0xd6a   :  { %v6129_v24 = vadd.f32 %v10152_v51, %v6089_v37  ;;  %v6176_v14 = vcombine.low %v6126_v62, %v6127_v41  ;;  %7519 = vmatpush3.bf16.msra.mxu0 %v7699_v39  ;;  %v7701_v51 = vld [vmem:[%s10631_s8 + $0x28] sm:$0xff]  }
 0xd6b   :  { %v6200_v23 = vpack.c.bf16 %v6175_v1, %v6174_v21  ;;  %7520 = vmatprep.subr.bf16.mxu0 %v7700_v57 }
 0xd6c   :  { %v6177_v56 = vcombine.low %v6128_v16, %v6129_v24 }
 0xd6d   :  { %7514 = vmatprep.mubr.msk.bf16.mxu1 %vm284_vm0, %v6200_v23 }
 0xd6e   :  { %v6201_v43 = vpack.c.bf16 %v6177_v56, %v6176_v14  ;;  %7521 = vmatpush3.bf16.msra.mxu0 %v7700_v57 }
 0xd6f   :  { %7522 = vmatprep.subr.bf16.mxu0 %v7701_v51 }
 0xd71   :  { %7515 = vmatmul.mubr.msk.bf16.gmra.mxu1 %vm284_vm0, %v6201_v43 }
 0xd72   :  { %7523 = vmatpush3.bf16.msra.mxu0 %v7701_v51 }
 0xd73   :  { %7524 = vmatprep.subr.bf16.mxu0 %v7702_v55 }
 0xd76   :  { %7525 = vmatpush3.bf16.msra.mxu0 %v7702_v55 }
 0xd77   :  { %7526 = vmatprep.subr.bf16.mxu0 %v7703_v9 }
 0xd7a   :  { %7527 = vmatpush3.bf16.msra.mxu0 %v7703_v9 }
 0xd7b   :  { %7528 = vmatprep.subr.bf16.mxu0 %v7704_v45 }
 0xd7e   :  { %7529 = vmatpush3.bf16.msra.mxu0 %v7704_v45 }
 0xd7f   :  { %7530 = vmatprep.subr.bf16.mxu0 %v7705_v28 }
 0xd82   :  { %7531 = vmatpush3.bf16.msra.mxu0 %v7705_v28 }
 0xd83   :  { %7532 = vmatprep.subr.bf16.mxu0 %v7706_v10 }
 0xd86   :  { %7533 = vmatpush3.bf16.msra.mxu0 %v7706_v10 }
 0xe14   :  { %v7504_v42 = vpop.f32.mrf.mxu1 }
 0xe15   :  { %v10316_v20 = vadd.f32 %v7504_v42, %v10313_v3 }
 0xe16   :  { %v6278_v0 = vpop.f32.mrf.mxu1 }
 0xe17   :  { %v6343_v15 = vmul.f32 %v10316_v20, %v10316_v20  ;;  %v10321_v36 = vadd.f32 %v10313_v3, %v6278_v0 }
 0xe18   :  { %v7505_v58 = vpop.f32.mrf.mxu1 }
 0xe19   :  { %v6359_v38 = vmul.f32 %v6343_v15, %v10316_v20  ;;  %v6341_v22 = vmul.f32 %v10321_v36, %v10321_v36  ;;  %v10327_v49 = vadd.f32 %v7505_v58, %v10313_v3 }
 0xe1a   :  { %v6281_v4 = vpop.f32.mrf.mxu1 }
 0xe1b   :  { %v6375_v44 = vmul.f32 0.044715, %v6359_v38  ;;  %v6357_v29 = vmul.f32 %v6341_v22, %v10321_v36  ;;  %v6344_v60 = vmul.f32 %v10327_v49, %v10327_v49  ;;  %v10333_v54 = vadd.f32 %v10313_v3, %v6281_v4 }
 0xe1d   :  { %v6391_v18 = vadd.f32 %v6375_v44, %v10316_v20  ;;  %v6373_v50 = vmul.f32 0.044715, %v6357_v29  ;;  %v6360_v34 = vmul.f32 %v6344_v60, %v10327_v49  ;;  %v6342_v47 = vmul.f32 %v10333_v54, %v10333_v54 }
 0xe1f   :  { %v6407_v11 = vmul.f32 0.7978846, %v6391_v18  ;;  %v6389_v27 = vadd.f32 %v6373_v50, %v10321_v36  ;;  %v6376_v32 = vmul.f32 0.044715, %v6360_v34  ;;  %v6358_v8 = vmul.f32 %v6342_v47, %v10333_v54 }
 0xe20   :  { %v7508_v61 = vpop.f32.mrf.mxu1 }
 0xe21   :  { %7995 = vtanh.f32 %v6407_v11  ;;  %v6405_v33 = vmul.f32 0.7978846, %v6389_v27  ;;  %v6392_v53 = vadd.f32 %v6376_v32, %v10327_v49  ;;  %v6374_v31 = vmul.f32 0.044715, %v6358_v8 }
 0xe22   :  { %v10343_v35 = vadd.f32 %v7508_v61, %v10313_v3  ;;  %v6294_v7 = vpop.f32.mrf.mxu1 }
 0xe23   :  { %v6408_v17 = vmul.f32 0.7978846, %v6392_v53  ;;  %v6390_v5 = vadd.f32 %v6374_v31, %v10333_v54  ;;  %v10347_v63 = vadd.f32 %v10313_v3, %v6294_v7  ;;  %7997 = vtanh.f32 %v6405_v33 }
 0xe24   :  { %v6347_v19 = vmul.f32 %v10343_v35, %v10343_v35  ;;  %v7509_v26 = vpop.f32.mrf.mxu1 }
 0xe25   :  { %7999 = vtanh.f32 %v6408_v17  ;;  %v6406_v25 = vmul.f32 0.7978846, %v6390_v5  ;;  %v6345_v48 = vmul.f32 %v10347_v63, %v10347_v63  ;;  %v10354_v46 = vadd.f32 %v7509_v26, %v10313_v3 }
 0xe26   :  { %v6363_v6 = vmul.f32 %v6347_v19, %v10343_v35  ;;  %v6297_v37 = vpop.f32.mrf.mxu1 }
 0xe27   :  { %8001 = vtanh.f32 %v6406_v25  ;;  %v6361_v62 = vmul.f32 %v6345_v48, %v10347_v63  ;;  %v6348_v41 = vmul.f32 %v10354_v46, %v10354_v46  ;;  %v10361_v16 = vadd.f32 %v10313_v3, %v6297_v37 }
 0xe28   :  { %v6379_v21 = vmul.f32 0.044715, %v6363_v6 }
 0xe29   :  { %v6377_v1 = vmul.f32 0.044715, %v6361_v62  ;;  %v6364_v24 = vmul.f32 %v6348_v41, %v10354_v46  ;;  %v6346_v23 = vmul.f32 %v10361_v16, %v10361_v16  ;;  %v7512_v14 = vpop.f32.mrf.mxu1 }
 0xe2a   :  { %v6395_v56 = vadd.f32 %v6379_v21, %v10343_v35  ;;  %v10368_v43 = vadd.f32 %v7512_v14, %v10313_v3 }
 0xe2b   :  { %v6393_v39 = vadd.f32 %v6377_v1, %v10347_v63  ;;  %v6380_v57 = vmul.f32 0.044715, %v6364_v24  ;;  %v6362_v51 = vmul.f32 %v6346_v23, %v10361_v16  ;;  %v6310_v55 = vpop.f32.mrf.mxu1 }
 0xe2c   :  { %v6411_v9 = vmul.f32 0.7978846, %v6395_v56  ;;  %v6351_v45 = vmul.f32 %v10368_v43, %v10368_v43  ;;  %v10375_v28 = vadd.f32 %v10313_v3, %v6310_v55 }
 0xe2d   :  { %v6409_v10 = vmul.f32 0.7978846, %v6393_v39  ;;  %v6396_v42 = vadd.f32 %v6380_v57, %v10354_v46  ;;  %v6378_v0 = vmul.f32 0.044715, %v6362_v51  ;;  %v7513_v15 = vpop.f32.mrf.mxu1 }
 0xe2e   :  { %v7996_v58 = vpop.eup %7995  ;;  %8003 = vtanh.f32 %v6411_v9  ;;  %v6367_v38 = vmul.f32 %v6351_v45, %v10368_v43  ;;  %v6349_v22 = vmul.f32 %v10375_v28, %v10375_v28  ;;  %v10382_v4 = vadd.f32 %v7513_v15, %v10313_v3 }
 0xe2f   :  { %v6439_v44 = vadd.f32 1.0, %v7996_v58  ;;  %8005 = vtanh.f32 %v6409_v10  ;;  %v6412_v29 = vmul.f32 0.7978846, %v6396_v42  ;;  %v6394_v60 = vadd.f32 %v6378_v0, %v10361_v16  ;;  %v6313_v18 = vpop.f32.mrf.mxu1 }
 0xe30   :  { %v6383_v50 = vmul.f32 0.044715, %v6367_v38  ;;  %v6365_v34 = vmul.f32 %v6349_v22, %v10375_v28  ;;  %v6352_v47 = vmul.f32 %v10382_v4, %v10382_v4  ;;  %v10389_v11 = vadd.f32 %v10313_v3, %v6313_v18  ;;  %v7998_v27 = vpop.eup %7997 }
 0xe31   :  { %8007 = vtanh.f32 %v6412_v29  ;;  %v6410_v32 = vmul.f32 0.7978846, %v6394_v60  ;;  %v7516_v8 = vpop.f32.mrf.mxu1  ;;  %v6455_v17 = vmul.f32 0.5, %v6439_v44  ;;  %v6437_v23 = vadd.f32 1.0, %v7998_v27 }
 0xe32   :  { %v8000_v61 = vpop.eup %7999  ;;  %v6399_v33 = vadd.f32 %v6383_v50, %v10368_v43  ;;  %v6381_v53 = vmul.f32 0.044715, %v6365_v34  ;;  %v6368_v31 = vmul.f32 %v6352_v47, %v10382_v4  ;;  %v6350_v7 = vmul.f32 %v10389_v11, %v10389_v11 }
 0xe33   :  { %v6440_v5 = vadd.f32 1.0, %v8000_v61  ;;  %8009 = vtanh.f32 %v6410_v32  ;;  %v10396_v19 = vadd.f32 %v7516_v8, %v10313_v3  ;;  %v6326_v26 = vpop.f32.mrf.mxu1  ;;  %v6453_v29 = vmul.f32 0.5, %v6437_v23 }
 0xe34   :  { %v8002_v25 = vpop.eup %8001  ;;  %v6415_v48 = vmul.f32 0.7978846, %v6399_v33  ;;  %v6397_v6 = vadd.f32 %v6381_v53, %v10375_v28  ;;  %v6384_v37 = vmul.f32 0.044715, %v6368_v31  ;;  %v6366_v62 = vmul.f32 %v6350_v7, %v10389_v11 }
 0xe35   :  { %v6456_v41 = vmul.f32 0.5, %v6440_v5  ;;  %v6355_v21 = vmul.f32 %v10396_v19, %v10396_v19  ;;  %v10403_v1 = vadd.f32 %v10313_v3, %v6326_v26  ;;  %v7517_v24 = vpop.f32.mrf.mxu1  ;;  %v6438_v57 = vadd.f32 1.0, %v8002_v25 }
 0xe36   :  { %v6413_v14 = vmul.f32 0.7978846, %v6397_v6  ;;  %v6400_v56 = vadd.f32 %v6384_v37, %v10382_v4  ;;  %v6382_v39 = vmul.f32 0.044715, %v6366_v62  ;;  %8011 = vtanh.f32 %v6415_v48 }
 0xe37   :  { %v6371_v51 = vmul.f32 %v6355_v21, %v10396_v19  ;;  %v6353_v55 = vmul.f32 %v10403_v1, %v10403_v1  ;;  %v10410_v9 = vadd.f32 %v7517_v24, %v10313_v3  ;;  %v6329_v45 = vpop.f32.mrf.mxu1  ;;  %v6471_v27 = vmul.f32 %v6455_v17, %v10316_v20 }
 0xe38   :  { %8013 = vtanh.f32 %v6413_v14  ;;  %v6416_v10 = vmul.f32 0.7978846, %v6400_v56  ;;  %v6398_v42 = vadd.f32 %v6382_v39, %v10389_v11  ;;  %v10414_v0 = vadd.f32 %v10313_v3, %v6329_v45 }
 0xe39   :  { %v6387_v15 = vmul.f32 0.044715, %v6371_v51  ;;  %v6369_v58 = vmul.f32 %v6353_v55, %v10403_v1  ;;  %v6356_v38 = vmul.f32 %v10410_v9, %v10410_v9  ;;  %v6454_v3 = vmul.f32 0.5, %v6438_v57 }
 0xe3a   :  { %8015 = vtanh.f32 %v6416_v10  ;;  %v6414_v22 = vmul.f32 0.7978846, %v6398_v42  ;;  %v6354_v44 = vmul.f32 %v10414_v0, %v10414_v0  ;;  %v6472_v32 = vmul.f32 %v6456_v41, %v10327_v49 }
 0xe3b   :  { %v8004_v60 = vpop.eup %8003  ;;  %v6403_v18 = vadd.f32 %v6387_v15, %v10396_v19  ;;  %v6385_v50 = vmul.f32 0.044715, %v6369_v58  ;;  %v6372_v34 = vmul.f32 %v6356_v38, %v10410_v9  ;;  %v6470_v31 = vmul.f32 %v6454_v3, %v10333_v54 }
 0xe3c   :  { %v8006_v47 = vpop.eup %8005  ;;  %8017 = vtanh.f32 %v6414_v22  ;;  %v6370_v8 = vmul.f32 %v6354_v44, %v10414_v0  ;;  %v6443_v5 = vadd.f32 1.0, %v8004_v60  ;;  %v6469_v25 = vmul.f32 %v6453_v29, %v10321_v36 }
 0xe3d   :  { %v6419_v61 = vmul.f32 0.7978846, %v6403_v18  ;;  %v6401_v33 = vadd.f32 %v6385_v50, %v10403_v1  ;;  %v6388_v53 = vmul.f32 0.044715, %v6372_v34  ;;  %v6441_v48 = vadd.f32 1.0, %v8006_v47 }
 0xe3e   :  { %v8008_v7 = vpop.eup %8007  ;;  %v6386_v26 = vmul.f32 0.044715, %v6370_v8  ;;  %v6486_v37 = vpack.c.bf16 %v6472_v32, %v6471_v27  ;;  %v6485_v41 = vpack.c.bf16 %v6470_v31, %v6469_v25  ;;  %v6459_v56 = vmul.f32 0.5, %v6443_v5 }
 0xe3f   :  { %v6444_v6 = vadd.f32 1.0, %v8008_v7  ;;  %8019 = vtanh.f32 %v6419_v61  ;;  %v6417_v20 = vmul.f32 0.7978846, %v6401_v33  ;;  %v6404_v49 = vadd.f32 %v6388_v53, %v10410_v9 }
 0xe40   :  { %v8010_v17 = vpop.eup %8009  ;;  %v6402_v62 = vadd.f32 %v6386_v26, %v10414_v0  ;;  %v6457_v21 = vmul.f32 0.5, %v6441_v48  ;;  %7534 = vmatprep.mubr.bf16.mxu0 %v6485_v41  ;;  %v6475_v15 = vmul.f32 %v6459_v56, %v10343_v35 }
 0xe41   :  { %v6460_v24 = vmul.f32 0.5, %v6444_v6  ;;  %8021 = vtanh.f32 %v6417_v20  ;;  %v6420_v54 = vmul.f32 0.7978846, %v6404_v49  ;;  %v6442_v23 = vadd.f32 1.0, %v8010_v17  ;;  %7535 = vmatmul.mubr.bf16.vlgmr.msra.gmra.mxu0 %v6486_v37  ;;  %v10446_v17 = vld [vmem:[%s10633_s9] ss:$0 sm:$0xff] }
 0xe42   :  { %v6418_v14 = vmul.f32 0.7978846, %v6402_v62  ;;  %v6473_v55 = vmul.f32 %v6457_v21, %v10347_v63 }
 0xe43   :  { %8023 = vtanh.f32 %v6420_v54  ;;  %v6458_v36 = vmul.f32 0.5, %v6442_v23  ;;  %v8012_v39 = vpop.eup %8011  ;;  %v6476_v51 = vmul.f32 %v6460_v24, %v10354_v46 }
 0xe44   :  { %8025 = vtanh.f32 %v6418_v14  ;;  %v6447_v58 = vadd.f32 1.0, %v8012_v39 }
 0xe45   :  { %v8014_v57 = vpop.eup %8013  ;;  %v6474_v45 = vmul.f32 %v6458_v36, %v10361_v16  ;;  %v6488_v29 = vpack.c.bf16 %v6476_v51, %v6475_v15 }
 0xe46   :  { %v6445_v10 = vadd.f32 1.0, %v8014_v57  ;;  %v6463_v34 = vmul.f32 0.5, %v6447_v58  ;;  %v10749_v58 = vld [vmem:[#allocation6_spill] sm:$0xff] }
 0xe47   :  { %v8016_v42 = vpop.eup %8015  ;;  %v6487_v38 = vpack.c.bf16 %v6474_v45, %v6473_v55  ;;  %v10747_v55 = vld [vmem:[#allocation20_spill] sm:$0xff] }
 0xe48   :  { %v6448_v22 = vadd.f32 1.0, %v8016_v42  ;;  %v6461_v50 = vmul.f32 0.5, %v6445_v10  ;;  %v6479_v27 = vmul.f32 %v6463_v34, %v10368_v43  ;;  %v10748_v10 = vld [vmem:[#allocation4_spill] sm:$0xff] }
 0xe49   :  { %v8018_v44 = vpop.eup %8017  ;;  %7538 = vmatprep.mubr.bf16.mxu0 %v6487_v38 }
 0xe4a   :  { %v6464_v60 = vmul.f32 0.5, %v6448_v22  ;;  %v6446_v18 = vadd.f32 1.0, %v8018_v44  ;;  %7539 = vmatmul.mubr.bf16.gmra.mxu0 %v6488_v29  ;;  %v6477_v47 = vmul.f32 %v6461_v50, %v10375_v28  ;;  %v10750_v44 = vld [vmem:[#allocation5_spill] sm:$0xff]  ;;  %v10751_v50 = vld [vmem:[#allocation7_spill] sm:$0xff] }
 0xe4c   :  { %v8020_v46 = vpop.eup %8019  ;;  %v6462_v3 = vmul.f32 0.5, %v6446_v18  ;;  %v6480_v63 = vmul.f32 %v6464_v60, %v10382_v4 }
 0xe4d   :  { %v6451_v32 = vadd.f32 1.0, %v8020_v46 }
 0xe4e   :  { %v8022_v16 = vpop.eup %8021  ;;  %v6478_v35 = vmul.f32 %v6462_v3, %v10389_v11  ;;  %v6490_v7 = vpack.c.bf16 %v6480_v63, %v6479_v27  ;;  %v10752_v3 = vld [vmem:[#allocation8_spill] sm:$0xff] }
 0xe4f   :  { %v6449_v8 = vadd.f32 1.0, %v8022_v16  ;;  %v6467_v25 = vmul.f32 0.5, %v6451_v32 }
 0xe50   :  { %v8024_v61 = vpop.eup %8023  ;;  %v6489_v33 = vpack.c.bf16 %v6478_v35, %v6477_v47  ;;  %v10753_v35 = vld [vmem:[#allocation9_spill] sm:$0xff] }
 0xe51   :  { %v8026_v53 = vpop.eup %8025  ;;  %v6452_v31 = vadd.f32 1.0, %v8024_v61  ;;  %v6465_v26 = vmul.f32 0.5, %v6449_v8  ;;  %v6483_v6 = vmul.f32 %v6467_v25, %v10396_v19  ;;  %v10754_v8 = vld [vmem:[#allocation10_spill] sm:$0xff] }
 0xe52   :  { %7542 = vmatprep.mubr.bf16.mxu0 %v6489_v33  ;;  %v6450_v5 = vadd.f32 1.0, %v8026_v53 }
 0xe53   :  { %v6468_v48 = vmul.f32 0.5, %v6452_v31  ;;  %7543 = vmatmul.mubr.bf16.gmra.mxu0 %v6490_v7  ;;  %v6481_v11 = vmul.f32 %v6465_v26, %v10403_v1  ;;  %v10755_v31 = vld [vmem:[#allocation11_spill] sm:$0xff] }
 0xe54   :  { %v6466_v4 = vmul.f32 0.5, %v6450_v5  ;;  %v10756_v26 = vld [vmem:[#allocation3_spill] sm:$0xff] }
 0xe55   :  { %v6484_v28 = vmul.f32 %v6468_v48, %v10410_v9 }
 0xe56   :  { %v6482_v43 = vmul.f32 %v6466_v4, %v10414_v0 }
 0xe57   :  { %v6492_v49 = vpack.c.bf16 %v6484_v28, %v6483_v6  ;;  %v10757_v28 = vld [vmem:[#allocation14_spill] sm:$0xff]  ;;  %v10758_v6 = vld [vmem:[#allocation13_spill] sm:$0xff] }
 0xe58   :  { %v6491_v20 = vpack.c.bf16 %v6482_v43, %v6481_v11 }
 0xe5a   :  { %7546 = vmatprep.mubr.bf16.mxu0 %v6491_v20 }
 0xe5b   :  { %7547 = vmatmul.mubr.bf16.gmra.mxu0 %v6492_v49 }
 0xf01   :  { %v7536_v37 = vpop.f32.mrf.mxu0 }
 0xf02   :  { %v6590_v62 = vadd.f32 %v7536_v37, %v10446_v17 }
 0xf03   :  { %v6581_v9 = vpop.f32.mrf.mxu0 }
 0xf04   :  { %v6662_v41 = vcombine.high %v6590_v62, %v6590_v62  ;;  %v6696_v1 = vadd.f32 %v6590_v62, %v9711_v59  ;;  %v6582_v0 = vadd.f32 %v10446_v17, %v6581_v9  ;;  %v10759_v62 = vld [vmem:[#allocation15_spill] sm:$0xff] }
 0xf05   :  { %v7537_v19 = vpop.f32.mrf.mxu0 }
 0xf06   :  { %v6697_v21 = vadd.f32 %v6662_v41, %v9700_v40  ;;  %6729 = vst.msk [vmem:[%s10634_s10 + $0x10] sm:$0xf] %vm6724_vm5, %v6696_v1  ;;  %v6660_v24 = vcombine.high %v6582_v0, %v6582_v0  ;;  %v6692_v54 = vadd.f32 %v6582_v0, %v9705_v30  ;;  %v6593_v23 = vadd.f32 %v7537_v19, %v10446_v17  ;;  %v10760_v1 = vld [vmem:[#allocation19_spill] sm:$0xff] }
 0xf07   :  { %v6584_v14 = vpop.f32.mrf.mxu0 }
 0xf08   :  { %6730 = vst.msk [vmem:[%s10634_s10 + $0x14] sm:$0xf] %vm6724_vm5, %v6697_v21  ;;  %v6693_v59 = vadd.f32 %v6660_v24, %v9694_v12  ;;  %6725 = vst.msk [vmem:[%s10634_s10] sm:$0xf] %vm6724_vm5, %v6692_v54  ;;  %v6663_v40 = vcombine.high %v6593_v23, %v6593_v23  ;;  %v6698_v56 = vadd.f32 %v6593_v23, %v9740_v2  ;;  %v10761_v24 = vld [vmem:[#allocation16_spill] sm:$0xff] }
 0xf09   :  { %v6585_v30 = vadd.f32 %v10446_v17, %v6584_v14  ;;  %v10762_v14 = vld [vmem:[#allocation17_spill] sm:$0xff] }
 0xf0a   :  { %v7540_v36 = vpop.f32.mrf.mxu0  ;;  %6726 = vst.msk [vmem:[%s10634_s10 + $0x4] sm:$0xf] %vm6724_vm5, %v6693_v59  ;;  %v6699_v39 = vadd.f32 %v6663_v40, %v9732_v13  ;;  %6731 = vst.msk [vmem:[%s10634_s10 + $0x18] sm:$0xf] %vm6724_vm5, %v6698_v56 }
 0xf0b   :  { %v6661_v12 = vcombine.high %v6585_v30, %v6585_v30  ;;  %v6694_v57 = vadd.f32 %v6585_v30, %v9724_v52  ;;  %v6606_v2 = vadd.f32 %v7540_v36, %v10446_v17  ;;  %v10763_v30 = vld [vmem:[#allocation12_spill] sm:$0xff] }
 0xf0c   :  { %v6597_v51 = vpop.f32.mrf.mxu0  ;;  %6732 = vst.msk [vmem:[%s10634_s10 + $0x1c] sm:$0xf] %vm6724_vm5, %v6699_v39 }
 0xf0d   :  { %v6695_v45 = vadd.f32 %v6661_v12, %v10747_v55  ;;  %6727 = vst.msk [vmem:[%s10634_s10 + $0x8] sm:$0xf] %vm6724_vm5, %v6694_v57  ;;  %v6666_v13 = vcombine.high %v6606_v2, %v6606_v2  ;;  %v6704_v42 = vadd.f32 %v6606_v2, %v10748_v10  ;;  %v6598_v52 = vadd.f32 %v10446_v17, %v6597_v51  ;;  %v10764_v12 = vld [vmem:[#allocation23_spill] sm:$0xff]  ;;  %v10765_v55 = vld [vmem:[#allocation22_spill] sm:$0xff] }
 0xf0e   :  { %v7541_v15 = vpop.f32.mrf.mxu0  ;;  %v10766_v10 = vld [vmem:[#allocation18_spill] sm:$0xff] }
 0xf0f   :  { %6728 = vst.msk [vmem:[%s10634_s10 + $0xc] sm:$0xf] %vm6724_vm5, %v6695_v45  ;;  %v6705_v38 = vadd.f32 %v6666_v13, %v10749_v58  ;;  %6737 = vst.msk [vmem:[%s10634_s10 + $0x30] sm:$0xf] %vm6724_vm5, %v6704_v42  ;;  %v6664_v22 = vcombine.high %v6598_v52, %v6598_v52  ;;  %v6700_v29 = vadd.f32 %v6598_v52, %v10750_v44  ;;  %v10767_v58 = vld [vmem:[#allocation21_spill] sm:$0xff]  ;;  %v10768_v44 = vld [vmem:[#allocation27_spill] sm:$0xff] }
 0xf10   :  { %v6609_v60 = vadd.f32 %v7541_v15, %v10446_v17  ;;  %v6600_v18 = vpop.f32.mrf.mxu0 }
 0xf11   :  { %6738 = vst.msk [vmem:[%s10634_s10 + $0x34] sm:$0xf] %vm6724_vm5, %v6705_v38  ;;  %v6701_v34 = vadd.f32 %v6664_v22, %v10751_v50  ;;  %6733 = vst.msk [vmem:[%s10634_s10 + $0x20] sm:$0xf] %vm6724_vm5, %v6700_v29  ;;  %v6601_v16 = vadd.f32 %v10446_v17, %v6600_v18  ;;  %v10769_v18 = vld [vmem:[#allocation26_spill] sm:$0xff] }
 0xf12   :  { %v6667_v46 = vcombine.high %v6609_v60, %v6609_v60  ;;  %v6706_v63 = vadd.f32 %v6609_v60, %v10752_v3 }
 0xf13   :  { %v7544_v47 = vpop.f32.mrf.mxu0  ;;  %6734 = vst.msk [vmem:[%s10634_s10 + $0x24] sm:$0xf] %vm6724_vm5, %v6701_v34  ;;  %v6665_v32 = vcombine.high %v6601_v16, %v6601_v16  ;;  %v6702_v61 = vadd.f32 %v6601_v16, %v10754_v8 }
 0xf14   :  { %v6707_v27 = vadd.f32 %v6667_v46, %v10753_v35  ;;  %6739 = vst.msk [vmem:[%s10634_s10 + $0x38] sm:$0xf] %vm6724_vm5, %v6706_v63  ;;  %v6622_v33 = vadd.f32 %v7544_v47, %v10446_v17  ;;  %v10770_v46 = vld [vmem:[#allocation24_spill] sm:$0xff] }
 0xf15   :  { %v6613_v53 = vpop.f32.mrf.mxu0  ;;  %v6703_v7 = vadd.f32 %v6665_v32, %v10755_v31  ;;  %6735 = vst.msk [vmem:[%s10634_s10 + $0x28] sm:$0xf] %vm6724_vm5, %v6702_v61 }
 0xf16   :  { %6740 = vst.msk [vmem:[%s10634_s10 + $0x3c] sm:$0xf] %vm6724_vm5, %v6707_v27  ;;  %v6670_v5 = vcombine.high %v6622_v33, %v6622_v33  ;;  %v6712_v25 = vadd.f32 %v6622_v33, %v10756_v26  ;;  %v6614_v48 = vadd.f32 %v10446_v17, %v6613_v53 }
 0xf17   :  { %v7545_v4 = vpop.f32.mrf.mxu0  ;;  %6736 = vst.msk [vmem:[%s10634_s10 + $0x2c] sm:$0xf] %vm6724_vm5, %v6703_v7 }
 0xf18   :  { %v6713_v11 = vadd.f32 %v6670_v5, %v10757_v28  ;;  %6745 = vst.msk [vmem:[%s10634_s10 + $0x50] sm:$0xf] %vm6724_vm5, %v6712_v25  ;;  %v6668_v43 = vcombine.high %v6614_v48, %v6614_v48  ;;  %v6708_v20 = vadd.f32 %v6614_v48, %v10758_v6  ;;  %v6625_v49 = vadd.f32 %v7545_v4, %v10446_v17 }
 0xf19   :  { %v6616_v37 = vpop.f32.mrf.mxu0 }
 0xf1a   :  { %6746 = vst.msk [vmem:[%s10634_s10 + $0x54] sm:$0xf] %vm6724_vm5, %v6713_v11  ;;  %v6709_v9 = vadd.f32 %v6668_v43, %v10759_v62  ;;  %6741 = vst.msk [vmem:[%s10634_s10 + $0x40] sm:$0xf] %vm6724_vm5, %v6708_v20  ;;  %v6671_v41 = vcombine.high %v6625_v49, %v6625_v49  ;;  %v6714_v0 = vadd.f32 %v6625_v49, %v10760_v1 }
 0xf1b   :  { %v6617_v19 = vadd.f32 %v10446_v17, %v6616_v37  ;;  %v7548_v21 = vpop.f32.mrf.mxu0 }
 0xf1c   :  { %6742 = vst.msk [vmem:[%s10634_s10 + $0x44] sm:$0xf] %vm6724_vm5, %v6709_v9  ;;  %v6715_v54 = vadd.f32 %v6671_v41, %v10761_v24  ;;  %6747 = vst.msk [vmem:[%s10634_s10 + $0x58] sm:$0xf] %vm6724_vm5, %v6714_v0  ;;  %v6638_v40 = vadd.f32 %v7548_v21, %v10446_v17 }
 0xf1d   :  { %v6669_v23 = vcombine.high %v6617_v19, %v6617_v19  ;;  %v6710_v59 = vadd.f32 %v6617_v19, %v10762_v14  ;;  %v6629_v56 = vpop.f32.mrf.mxu0 }
 0xf1e   :  { %6748 = vst.msk [vmem:[%s10634_s10 + $0x5c] sm:$0xf] %vm6724_vm5, %v6715_v54  ;;  %v6674_v39 = vcombine.high %v6638_v40, %v6638_v40  ;;  %v6720_v57 = vadd.f32 %v6638_v40, %v10764_v12  ;;  %v6630_v2 = vadd.f32 %v10446_v17, %v6629_v56 }
 0xf1f   :  { %v6711_v36 = vadd.f32 %v6669_v23, %v10763_v30  ;;  %6743 = vst.msk [vmem:[%s10634_s10 + $0x48] sm:$0xf] %vm6724_vm5, %v6710_v59  ;;  %v7549_v51 = vpop.f32.mrf.mxu0 }
 0xf20   :  { %v6721_v45 = vadd.f32 %v6674_v39, %v10765_v55  ;;  %6753 = vst.msk [vmem:[%s10634_s10 + $0x70] sm:$0xf] %vm6724_vm5, %v6720_v57  ;;  %v6672_v13 = vcombine.high %v6630_v2, %v6630_v2  ;;  %v6716_v42 = vadd.f32 %v6630_v2, %v10766_v10  ;;  %v6641_v52 = vadd.f32 %v7549_v51, %v10446_v17 }
 0xf21   :  { %6744 = vst.msk [vmem:[%s10634_s10 + $0x4c] sm:$0xf] %vm6724_vm5, %v6711_v36  ;;  %v6632_v15 = vpop.f32.mrf.mxu0 }
 0xf22   :  { %6754 = vst.msk [vmem:[%s10634_s10 + $0x74] sm:$0xf] %vm6724_vm5, %v6721_v45  ;;  %v6717_v38 = vadd.f32 %v6672_v13, %v10767_v58  ;;  %6749 = vst.msk [vmem:[%s10634_s10 + $0x60] sm:$0xf] %vm6724_vm5, %v6716_v42  ;;  %v6675_v22 = vcombine.high %v6641_v52, %v6641_v52  ;;  %v6722_v29 = vadd.f32 %v6641_v52, %v10768_v44 }
 0xf23   :  { %v6633_v60 = vadd.f32 %v10446_v17, %v6632_v15  ;;  %v10771_v17 = vld [vmem:[#allocation25_spill] sm:$0xff] }
 0xf24   :  { %6750 = vst.msk [vmem:[%s10634_s10 + $0x64] sm:$0xf] %vm6724_vm5, %v6717_v38  ;;  %v6723_v50 = vadd.f32 %v6675_v22, %v10769_v18  ;;  %6755 = vst.msk [vmem:[%s10634_s10 + $0x78] sm:$0xf] %vm6724_vm5, %v6722_v29 }
 0xf25   :  { %v6673_v34 = vcombine.high %v6633_v60, %v6633_v60  ;;  %v6718_v3 = vadd.f32 %v6633_v60, %v10770_v46 }
 0xf26   :  { %6756 = vst.msk [vmem:[%s10634_s10 + $0x7c] sm:$0xf] %vm6724_vm5, %v6723_v50 }
 0xf27   :  { %v6719_v63 = vadd.f32 %v6673_v34, %v10771_v17  ;;  %6751 = vst.msk [vmem:[%s10634_s10 + $0x68] sm:$0xf] %vm6724_vm5, %v6718_v3 }
 0xf29   :  { %6752 = vst.msk [vmem:[%s10634_s10 + $0x6c] sm:$0xf] %vm6724_vm5, %v6719_v63 }

</bundles_post_ra>
